<compile_context>
chip_gen: v5e
topology: v5e:2x2
jax: 0.10.0
libtpu: 0.0.40
codegen_flags: <defaults>
</compile_context>

<pallas_src>
import functools

import jax
import jax.numpy as jnp
from jax.experimental import pallas as pl
from jax.experimental.pallas import tpu as pltpu

HIDDEN = 100          # logical LSTM hidden size
INPUT = 50            # logical LSTM input feature size
IN_P = 128            # input padded to one full 128-lane block
OUT_DIM = 128         # final Linear output size
HP = 128              # hidden padded to one full 128-lane block per gate
G = 4 * HP            # padded gate width (i, f, g, o each own 128 lanes)


def _sigmoid(x):
    # One EUP push (tanh) per gate instead of exp + exact divide:
    #   sigmoid(x) = 0.5 * tanh(0.5 * x) + 0.5
    return 0.5 * jnp.tanh(0.5 * x) + 0.5


def _lstm_linear_kernel(x_ref,            # (S*BP, IN_P)   bf16, time-major, batch-padded
                        h0_ref, c0_ref,   # (2, BP, HP)    f32, zero-padded initial state
                        wih0_ref,         # (IN_P, G)      bf16
                        whh0_ref,         # (HP, G)        bf16
                        b0_ref,           # (1, G)         f32  (bih0 + bhh0, padded)
                        w1_ref,           # (2*HP, G)      bf16 [W_ih1 ; W_hh1] stacked
                        b1_ref,           # (1, G)         f32  (bih1 + bhh1, padded)
                        wlin_ref,         # (HP, OUT_DIM)  bf16
                        blin_ref,         # (1, OUT_DIM)   f32
                        out_ref,          # (BP, OUT_DIM)  f32
                        gx_ref,           # VMEM scratch: (S*BP, G) f32
                        z_ref,            # VMEM scratch: (BP, 2*HP) f32 slab [h0_t ; h1_{t-1}]
                        *, seq_len, bp):
    # ---- prologue: hoist the layer-0 input projection out of the recurrence.
    # One well-shaped bf16 GEMM (f32 accumulate) + single bias add.
    gx_ref[...] = (jnp.dot(x_ref[...], wih0_ref[...],
                           preferred_element_type=jnp.float32)
                   + b0_ref[...])

    # Hoist the per-step bias broadcast out of the loop (JAX does not CSE
    # broadcast_in_dim).
    b1b = jnp.broadcast_to(b1_ref[...], (bp, G))

    def gates_to_hc(gates, c_prev):
        # Lane-aligned 128-wide gate slices, PyTorch gate order (i, f, g, o).
        i = _sigmoid(gates[:, 0 * HP:1 * HP])
        f = _sigmoid(gates[:, 1 * HP:2 * HP])
        g = jnp.tanh(gates[:, 2 * HP:3 * HP])
        o = _sigmoid(gates[:, 3 * HP:4 * HP])
        c_new = f * c_prev + i * g
        h_new = o * jnp.tanh(c_new)
        return h_new, c_new

    h0 = h0_ref[0]
    c0 = c0_ref[0]
    h1 = h0_ref[1]
    c1 = c0_ref[1]

    # Persistent layer-1 input slab: [:, :HP] <- h0_t, [:, HP:] <- h1_{t-1}.
    # Replaces the per-step concatenate while keeping the fused K=256 matmul.
    z_ref[:, HP:2 * HP] = h1

    # Fully unrolled recurrence (seq_len is small and static) so the scheduler
    # can interleave layer-0 of step t+1 with layer-1 of step t.
    for t in range(seq_len):
        # ---- layer 0: only the recurrent matmul remains on the serial chain.
        gates0 = (gx_ref[t * bp:(t + 1) * bp, :]
                  + jnp.dot(h0.astype(jnp.bfloat16), whh0_ref[...],
                            preferred_element_type=jnp.float32))
        h0, c0 = gates_to_hc(gates0, c0)

        # ---- layer 1: fused [h0_t ; h1_{t-1}] @ [W_ih ; W_hh] via slab.
        z_ref[:, 0:HP] = h0
        gates1 = (jnp.dot(z_ref[...].astype(jnp.bfloat16), w1_ref[...],
                          preferred_element_type=jnp.float32)
                  + b1b)
        h1, c1 = gates_to_hc(gates1, c1)
        z_ref[:, HP:2 * HP] = h1

    # ---- epilogue: Linear(100 -> 128) on the last timestep of layer 1.
    out_ref[...] = (jnp.dot(h1.astype(jnp.bfloat16), wlin_ref[...],
                            preferred_element_type=jnp.float32)
                    + blin_ref[...])


def _pad_gate_cols(w):
    """(K, 4*HIDDEN) -> (K, 4*HP): each gate's 100 columns -> its own 128-lane block."""
    k = w.shape[0]
    out = jnp.zeros((k, G), w.dtype)
    for g in range(4):
        out = out.at[:, g * HP:g * HP + HIDDEN].set(
            w[:, g * HIDDEN:(g + 1) * HIDDEN])
    return out


def _pad_rows(w, k_to):
    return jnp.pad(w, ((0, k_to - w.shape[0]), (0, 0)))


def siamese_net_forward(description, h0, c0, params):
    """description: (B, S, 50) float32.  Returns (B, 128, 1) like the PyTorch module.

    To amortize launch/DMA cost, stack both Siamese branches (or several
    requests) along the batch axis and make a single call.
    """
    B, S, I = description.shape
    assert I == INPUT
    BP = max(8, ((B + 7) // 8) * 8)     # pad batch to a full sublane tile

    (wih0, whh0, bih0, bhh0,
     wih1, whh1, bih1, bhh1,
     wlin, blin) = params

    f32 = jnp.float32
    bf16 = jnp.bfloat16

    # --- lane-aligned, zero-padded weights; matmul operands cast to bf16. ---
    wih0_p = _pad_rows(_pad_gate_cols(wih0.T.astype(f32)), IN_P).astype(bf16)  # (128, 512)
    whh0_p = _pad_gate_cols(_pad_rows(whh0.T.astype(f32), HP)).astype(bf16)    # (128, 512)
    b0_p = _pad_gate_cols((bih0 + bhh0).astype(f32).reshape(1, -1))            # (1, 512) f32
    wih1_p = _pad_gate_cols(_pad_rows(wih1.T.astype(f32), HP))
    whh1_p = _pad_gate_cols(_pad_rows(whh1.T.astype(f32), HP))
    w1_p = jnp.concatenate([wih1_p, whh1_p], axis=0).astype(bf16)              # (256, 512)
    b1_p = _pad_gate_cols((bih1 + bhh1).astype(f32).reshape(1, -1))            # (1, 512) f32
    wlin_p = _pad_rows(wlin.T.astype(f32), HP).astype(bf16)                    # (128, 128)
    blin_r = blin.astype(f32).reshape(1, OUT_DIM)                              # (1, 128)

    # --- time-major, batch- and feature-padded input, flattened, bf16. ---
    x_tm = jnp.transpose(description, (1, 0, 2)).astype(f32)        # (S, B, 50)
    x_tm = jnp.pad(x_tm, ((0, 0), (0, BP - B), (0, IN_P - INPUT)))  # (S, BP, 128)
    x_flat = x_tm.reshape(S * BP, IN_P).astype(bf16)

    # --- zero-padded initial states (padded lanes stay exactly zero). ---
    h0_p = jnp.pad(h0.astype(f32), ((0, 0), (0, BP - B), (0, HP - HIDDEN)))
    c0_p = jnp.pad(c0.astype(f32), ((0, 0), (0, BP - B), (0, HP - HIDDEN)))

    vmem = pl.BlockSpec(memory_space=pltpu.MemorySpace.VMEM)
    kernel = functools.partial(_lstm_linear_kernel, seq_len=S, bp=BP)
    out = pl.pallas_call(
        kernel,
        out_shape=jax.ShapeDtypeStruct((BP, OUT_DIM), jnp.float32),
        in_specs=[vmem] * 10,
        out_specs=vmem,
        scratch_shapes=[pltpu.VMEM((S * BP, G), jnp.float32),
                        pltpu.VMEM((BP, 2 * HP), jnp.float32)],
    )(x_flat, h0_p, c0_p, wih0_p, whh0_p, b0_p, w1_p, b1_p, wlin_p, blin_r)

    return out[:B].reshape(B, OUT_DIM, 1)


def init_params(key):
    ks = jax.random.split(key, 10)
    scale = 1.0 / jnp.sqrt(HIDDEN)
    wih0 = jax.random.uniform(ks[0], (4 * HIDDEN, INPUT), jnp.float32, -scale, scale)
    whh0 = jax.random.uniform(ks[1], (4 * HIDDEN, HIDDEN), jnp.float32, -scale, scale)
    bih0 = jax.random.uniform(ks[2], (4 * HIDDEN,), jnp.float32, -scale, scale)
    bhh0 = jax.random.uniform(ks[3], (4 * HIDDEN,), jnp.float32, -scale, scale)
    wih1 = jax.random.uniform(ks[4], (4 * HIDDEN, HIDDEN), jnp.float32, -scale, scale)
    whh1 = jax.random.uniform(ks[5], (4 * HIDDEN, HIDDEN), jnp.float32, -scale, scale)
    bih1 = jax.random.uniform(ks[6], (4 * HIDDEN,), jnp.float32, -scale, scale)
    bhh1 = jax.random.uniform(ks[7], (4 * HIDDEN,), jnp.float32, -scale, scale)
    wlin = jax.random.uniform(ks[8], (OUT_DIM, HIDDEN), jnp.float32, -scale, scale)
    blin = jax.random.uniform(ks[9], (OUT_DIM,), jnp.float32, -scale, scale)
    return (wih0, whh0, bih0, bhh0, wih1, whh1, bih1, bhh1, wlin, blin)


if __name__ == "__main__":
    key = jax.random.PRNGKey(0)
    k_desc, k_h, k_c, k_params = jax.random.split(key, 4)

    batch_size = 2
    seq_len = 8

    # x[1] in the PyTorch module: the "description" sequence, (B, S, 50).
    description = jax.random.normal(k_desc, (batch_size, seq_len, INPUT), jnp.float32)
    # self.hidden = (randn(2, B, 100), randn(2, B, 100))
    h0 = jax.random.normal(k_h, (2, batch_size, HIDDEN), jnp.float32)
    c0 = jax.random.normal(k_c, (2, batch_size, HIDDEN), jnp.float32)

    params = init_params(k_params)

    fwd = jax.jit(siamese_net_forward)
    out = fwd(description, h0, c0, params)
    out = jax.block_until_ready(out)

    assert out.shape == (batch_size, OUT_DIM, 1), out.shape
    assert jnp.all(jnp.isfinite(out))
    print("KERNEL_OK")
</pallas_src>

<mosaic_0001>
module attributes {stable_mosaic.version = 11 : i64} {
  func.func @_lstm_linear_kernel(%arg0: memref<64x128xbf16, #tpu.memory_space<vmem>>, %arg1: memref<2x8x128xf32, #tpu.memory_space<vmem>>, %arg2: memref<2x8x128xf32, #tpu.memory_space<vmem>>, %arg3: memref<128x512xbf16, #tpu.memory_space<vmem>>, %arg4: memref<128x512xbf16, #tpu.memory_space<vmem>>, %arg5: memref<1x512xf32, #tpu.memory_space<vmem>>, %arg6: memref<256x512xbf16, #tpu.memory_space<vmem>>, %arg7: memref<1x512xf32, #tpu.memory_space<vmem>>, %arg8: memref<128x128xbf16, #tpu.memory_space<vmem>>, %arg9: memref<1x128xf32, #tpu.memory_space<vmem>>, %arg10: memref<8x128xf32, #tpu.memory_space<vmem>>, %arg11: memref<64x512xf32, #tpu.memory_space<vmem>>, %arg12: memref<8x256xf32, #tpu.memory_space<vmem>>) attributes {dimension_semantics = [], scalar_prefetch = 0 : i64, scratch_operands = 2 : i64, tpu.core_type = #tpu.core_type<tc>} {
    %c0 = arith.constant 0 : index
    %c0_0 = arith.constant 0 : index
    %0 = vector.load %arg0[%c0, %c0_0] : memref<64x128xbf16, #tpu.memory_space<vmem>>, vector<64x128xbf16>
    %c0_1 = arith.constant 0 : index
    %c0_2 = arith.constant 0 : index
    %1 = vector.load %arg3[%c0_1, %c0_2] : memref<128x512xbf16, #tpu.memory_space<vmem>>, vector<128x512xbf16>
    %cst = arith.constant dense<0.000000e+00> : vector<64x512xf32>
    %2 = tpu.matmul %0, %1, %cst {dimension_numbers = #tpu.dot_dimension_numbers<[1], [0], [0], [1], [0, 0, 1, 1], [], []>} : vector<64x128xbf16>, vector<128x512xbf16>, vector<64x512xf32> -> vector<64x512xf32>
    %c0_3 = arith.constant 0 : index
    %c0_4 = arith.constant 0 : index
    %3 = vector.load %arg5[%c0_3, %c0_4] : memref<1x512xf32, #tpu.memory_space<vmem>>, vector<1x512xf32>
    %4 = vector.broadcast %3 : vector<1x512xf32> to vector<64x512xf32>
    %5 = arith.addf %2, %4 : vector<64x512xf32>
    %c0_5 = arith.constant 0 : index
    %c0_6 = arith.constant 0 : index
    %6 = vector.load %arg11[%c0_5, %c0_6] : memref<64x512xf32, #tpu.memory_space<vmem>>, vector<64x512xf32>
    tpu.vector_store %arg11[%c0_5, %c0_6], %5 {strides = array<i32>} : memref<64x512xf32, #tpu.memory_space<vmem>>, vector<64x512xf32>,
    %c0_7 = arith.constant 0 : index
    %c0_8 = arith.constant 0 : index
    %7 = vector.load %arg7[%c0_7, %c0_8] : memref<1x512xf32, #tpu.memory_space<vmem>>, vector<1x512xf32>
    %8 = vector.shape_cast %7 : vector<1x512xf32> to vector<1x512xf32>
    %9 = vector.broadcast %8 : vector<1x512xf32> to vector<8x512xf32>
    %c0_9 = arith.constant 0 : index
    %c0_10 = arith.constant 0 : index
    %c0_11 = arith.constant 0 : index
    %10 = vector.load %arg1[%c0_9, %c0_10, %c0_11] : memref<2x8x128xf32, #tpu.memory_space<vmem>>, vector<1x8x128xf32>
    %11 = vector.shape_cast %10 : vector<1x8x128xf32> to vector<8x128xf32>
    %c0_12 = arith.constant 0 : index
    %c0_13 = arith.constant 0 : index
    %c0_14 = arith.constant 0 : index
    %12 = vector.load %arg2[%c0_12, %c0_13, %c0_14] : memref<2x8x128xf32, #tpu.memory_space<vmem>>, vector<1x8x128xf32>
    %13 = vector.shape_cast %12 : vector<1x8x128xf32> to vector<8x128xf32>
    %c1 = arith.constant 1 : index
    %c0_15 = arith.constant 0 : index
    %c0_16 = arith.constant 0 : index
    %14 = vector.load %arg1[%c1, %c0_15, %c0_16] : memref<2x8x128xf32, #tpu.memory_space<vmem>>, vector<1x8x128xf32>
    %15 = vector.shape_cast %14 : vector<1x8x128xf32> to vector<8x128xf32>
    %c1_17 = arith.constant 1 : index
    %c0_18 = arith.constant 0 : index
    %c0_19 = arith.constant 0 : index
    %16 = vector.load %arg2[%c1_17, %c0_18, %c0_19] : memref<2x8x128xf32, #tpu.memory_space<vmem>>, vector<1x8x128xf32>
    %17 = vector.shape_cast %16 : vector<1x8x128xf32> to vector<8x128xf32>
    %c0_20 = arith.constant 0 : index
    %c128 = arith.constant 128 : index
    %18 = vector.load %arg12[%c0_20, %c128] : memref<8x256xf32, #tpu.memory_space<vmem>>, vector<8x128xf32>
    tpu.vector_store %arg12[%c0_20, %c128], %15 {strides = array<i32>} : memref<8x256xf32, #tpu.memory_space<vmem>>, vector<8x128xf32>,
    %c0_21 = arith.constant 0 : index
    %c0_22 = arith.constant 0 : index
    %19 = vector.load %arg11[%c0_21, %c0_22] : memref<64x512xf32, #tpu.memory_space<vmem>>, vector<8x512xf32>
    %20 = arith.truncf %11 : vector<8x128xf32> to vector<8x128xbf16>
    %c0_23 = arith.constant 0 : index
    %c0_24 = arith.constant 0 : index
    %21 = vector.load %arg4[%c0_23, %c0_24] : memref<128x512xbf16, #tpu.memory_space<vmem>>, vector<128x512xbf16>
    %cst_25 = arith.constant dense<0.000000e+00> : vector<8x512xf32>
    %22 = tpu.matmul %20, %21, %cst_25 {dimension_numbers = #tpu.dot_dimension_numbers<[1], [0], [0], [1], [0, 0, 1, 1], [], []>} : vector<8x128xbf16>, vector<128x512xbf16>, vector<8x512xf32> -> vector<8x512xf32>
    %23 = arith.addf %19, %22 : vector<8x512xf32>
    %24 = vector.extract_strided_slice %23 {offsets = [0, 0], sizes = [8, 128], strides = [1, 1]} : vector<8x512xf32> to vector<8x128xf32>
    %cst_26 = arith.constant 5.000000e-01 : f32
    %25 = vector.broadcast %cst_26 : f32 to vector<8x128xf32>
    %26 = arith.mulf %25, %24 : vector<8x128xf32>
    %27 = math.tanh %26 : vector<8x128xf32>
    %cst_27 = arith.constant 5.000000e-01 : f32
    %28 = vector.broadcast %cst_27 : f32 to vector<8x128xf32>
    %29 = arith.mulf %28, %27 : vector<8x128xf32>
    %cst_28 = arith.constant 5.000000e-01 : f32
    %30 = vector.broadcast %cst_28 : f32 to vector<8x128xf32>
    %31 = arith.addf %29, %30 : vector<8x128xf32>
    %32 = vector.extract_strided_slice %23 {offsets = [0, 128], sizes = [8, 128], strides = [1, 1]} : vector<8x512xf32> to vector<8x128xf32>
    %cst_29 = arith.constant 5.000000e-01 : f32
    %33 = vector.broadcast %cst_29 : f32 to vector<8x128xf32>
    %34 = arith.mulf %33, %32 : vector<8x128xf32>
    %35 = math.tanh %34 : vector<8x128xf32>
    %cst_30 = arith.constant 5.000000e-01 : f32
    %36 = vector.broadcast %cst_30 : f32 to vector<8x128xf32>
    %37 = arith.mulf %36, %35 : vector<8x128xf32>
    %cst_31 = arith.constant 5.000000e-01 : f32
    %38 = vector.broadcast %cst_31 : f32 to vector<8x128xf32>
    %39 = arith.addf %37, %38 : vector<8x128xf32>
    %40 = vector.extract_strided_slice %23 {offsets = [0, 256], sizes = [8, 128], strides = [1, 1]} : vector<8x512xf32> to vector<8x128xf32>
    %41 = math.tanh %40 : vector<8x128xf32>
    %42 = vector.extract_strided_slice %23 {offsets = [0, 384], sizes = [8, 128], strides = [1, 1]} : vector<8x512xf32> to vector<8x128xf32>
    %cst_32 = arith.constant 5.000000e-01 : f32
    %43 = vector.broadcast %cst_32 : f32 to vector<8x128xf32>
    %44 = arith.mulf %43, %42 : vector<8x128xf32>
    %45 = math.tanh %44 : vector<8x128xf32>
    %cst_33 = arith.constant 5.000000e-01 : f32
    %46 = vector.broadcast %cst_33 : f32 to vector<8x128xf32>
    %47 = arith.mulf %46, %45 : vector<8x128xf32>
    %cst_34 = arith.constant 5.000000e-01 : f32
    %48 = vector.broadcast %cst_34 : f32 to vector<8x128xf32>
    %49 = arith.addf %47, %48 : vector<8x128xf32>
    %50 = arith.mulf %39, %13 : vector<8x128xf32>
    %51 = arith.mulf %31, %41 : vector<8x128xf32>
    %52 = arith.addf %50, %51 : vector<8x128xf32>
    %53 = math.tanh %52 : vector<8x128xf32>
    %54 = arith.mulf %49, %53 : vector<8x128xf32>
    %c0_35 = arith.constant 0 : index
    %c0_36 = arith.constant 0 : index
    %55 = vector.load %arg12[%c0_35, %c0_36] : memref<8x256xf32, #tpu.memory_space<vmem>>, vector<8x128xf32>
    tpu.vector_store %arg12[%c0_35, %c0_36], %54 {strides = array<i32>} : memref<8x256xf32, #tpu.memory_space<vmem>>, vector<8x128xf32>,
    %c0_37 = arith.constant 0 : index
    %c0_38 = arith.constant 0 : index
    %56 = vector.load %arg12[%c0_37, %c0_38] : memref<8x256xf32, #tpu.memory_space<vmem>>, vector<8x256xf32>
    %57 = arith.truncf %56 : vector<8x256xf32> to vector<8x256xbf16>
    %c0_39 = arith.constant 0 : index
    %c0_40 = arith.constant 0 : index
    %58 = vector.load %arg6[%c0_39, %c0_40] : memref<256x512xbf16, #tpu.memory_space<vmem>>, vector<256x512xbf16>
    %cst_41 = arith.constant dense<0.000000e+00> : vector<8x512xf32>
    %59 = tpu.matmul %57, %58, %cst_41 {dimension_numbers = #tpu.dot_dimension_numbers<[1], [0], [0], [1], [0, 0, 1, 1], [], []>} : vector<8x256xbf16>, vector<256x512xbf16>, vector<8x512xf32> -> vector<8x512xf32>
    %60 = arith.addf %59, %9 : vector<8x512xf32>
    %61 = vector.extract_strided_slice %60 {offsets = [0, 0], sizes = [8, 128], strides = [1, 1]} : vector<8x512xf32> to vector<8x128xf32>
    %cst_42 = arith.constant 5.000000e-01 : f32
    %62 = vector.broadcast %cst_42 : f32 to vector<8x128xf32>
    %63 = arith.mulf %62, %61 : vector<8x128xf32>
    %64 = math.tanh %63 : vector<8x128xf32>
    %cst_43 = arith.constant 5.000000e-01 : f32
    %65 = vector.broadcast %cst_43 : f32 to vector<8x128xf32>
    %66 = arith.mulf %65, %64 : vector<8x128xf32>
    %cst_44 = arith.constant 5.000000e-01 : f32
    %67 = vector.broadcast %cst_44 : f32 to vector<8x128xf32>
    %68 = arith.addf %66, %67 : vector<8x128xf32>
    %69 = vector.extract_strided_slice %60 {offsets = [0, 128], sizes = [8, 128], strides = [1, 1]} : vector<8x512xf32> to vector<8x128xf32>
    %cst_45 = arith.constant 5.000000e-01 : f32
    %70 = vector.broadcast %cst_45 : f32 to vector<8x128xf32>
    %71 = arith.mulf %70, %69 : vector<8x128xf32>
    %72 = math.tanh %71 : vector<8x128xf32>
    %cst_46 = arith.constant 5.000000e-01 : f32
    %73 = vector.broadcast %cst_46 : f32 to vector<8x128xf32>
    %74 = arith.mulf %73, %72 : vector<8x128xf32>
    %cst_47 = arith.constant 5.000000e-01 : f32
    %75 = vector.broadcast %cst_47 : f32 to vector<8x128xf32>
    %76 = arith.addf %74, %75 : vector<8x128xf32>
    %77 = vector.extract_strided_slice %60 {offsets = [0, 256], sizes = [8, 128], strides = [1, 1]} : vector<8x512xf32> to vector<8x128xf32>
    %78 = math.tanh %77 : vector<8x128xf32>
    %79 = vector.extract_strided_slice %60 {offsets = [0, 384], sizes = [8, 128], strides = [1, 1]} : vector<8x512xf32> to vector<8x128xf32>
    %cst_48 = arith.constant 5.000000e-01 : f32
    %80 = vector.broadcast %cst_48 : f32 to vector<8x128xf32>
    %81 = arith.mulf %80, %79 : vector<8x128xf32>
    %82 = math.tanh %81 : vector<8x128xf32>
    %cst_49 = arith.constant 5.000000e-01 : f32
    %83 = vector.broadcast %cst_49 : f32 to vector<8x128xf32>
    %84 = arith.mulf %83, %82 : vector<8x128xf32>
    %cst_50 = arith.constant 5.000000e-01 : f32
    %85 = vector.broadcast %cst_50 : f32 to vector<8x128xf32>
    %86 = arith.addf %84, %85 : vector<8x128xf32>
    %87 = arith.mulf %76, %17 : vector<8x128xf32>
    %88 = arith.mulf %68, %78 : vector<8x128xf32>
    %89 = arith.addf %87, %88 : vector<8x128xf32>
    %90 = math.tanh %89 : vector<8x128xf32>
    %91 = arith.mulf %86, %90 : vector<8x128xf32>
    %c0_51 = arith.constant 0 : index
    %c128_52 = arith.constant 128 : index
    %92 = vector.load %arg12[%c0_51, %c128_52] : memref<8x256xf32, #tpu.memory_space<vmem>>, vector<8x128xf32>
    tpu.vector_store %arg12[%c0_51, %c128_52], %91 {strides = array<i32>} : memref<8x256xf32, #tpu.memory_space<vmem>>, vector<8x128xf32>,
    %c8 = arith.constant 8 : index
    %c0_53 = arith.constant 0 : index
    %93 = vector.load %arg11[%c8, %c0_53] : memref<64x512xf32, #tpu.memory_space<vmem>>, vector<8x512xf32>
    %94 = arith.truncf %54 : vector<8x128xf32> to vector<8x128xbf16>
    %c0_54 = arith.constant 0 : index
    %c0_55 = arith.constant 0 : index
    %95 = vector.load %arg4[%c0_54, %c0_55] : memref<128x512xbf16, #tpu.memory_space<vmem>>, vector<128x512xbf16>
    %cst_56 = arith.constant dense<0.000000e+00> : vector<8x512xf32>
    %96 = tpu.matmul %94, %95, %cst_56 {dimension_numbers = #tpu.dot_dimension_numbers<[1], [0], [0], [1], [0, 0, 1, 1], [], []>} : vector<8x128xbf16>, vector<128x512xbf16>, vector<8x512xf32> -> vector<8x512xf32>
    %97 = arith.addf %93, %96 : vector<8x512xf32>
    %98 = vector.extract_strided_slice %97 {offsets = [0, 0], sizes = [8, 128], strides = [1, 1]} : vector<8x512xf32> to vector<8x128xf32>
    %cst_57 = arith.constant 5.000000e-01 : f32
    %99 = vector.broadcast %cst_57 : f32 to vector<8x128xf32>
    %100 = arith.mulf %99, %98 : vector<8x128xf32>
    %101 = math.tanh %100 : vector<8x128xf32>
    %cst_58 = arith.constant 5.000000e-01 : f32
    %102 = vector.broadcast %cst_58 : f32 to vector<8x128xf32>
    %103 = arith.mulf %102, %101 : vector<8x128xf32>
    %cst_59 = arith.constant 5.000000e-01 : f32
    %104 = vector.broadcast %cst_59 : f32 to vector<8x128xf32>
    %105 = arith.addf %103, %104 : vector<8x128xf32>
    %106 = vector.extract_strided_slice %97 {offsets = [0, 128], sizes = [8, 128], strides = [1, 1]} : vector<8x512xf32> to vector<8x128xf32>
    %cst_60 = arith.constant 5.000000e-01 : f32
    %107 = vector.broadcast %cst_60 : f32 to vector<8x128xf32>
    %108 = arith.mulf %107, %106 : vector<8x128xf32>
    %109 = math.tanh %108 : vector<8x128xf32>
    %cst_61 = arith.constant 5.000000e-01 : f32
    %110 = vector.broadcast %cst_61 : f32 to vector<8x128xf32>
    %111 = arith.mulf %110, %109 : vector<8x128xf32>
    %cst_62 = arith.constant 5.000000e-01 : f32
    %112 = vector.broadcast %cst_62 : f32 to vector<8x128xf32>
    %113 = arith.addf %111, %112 : vector<8x128xf32>
    %114 = vector.extract_strided_slice %97 {offsets = [0, 256], sizes = [8, 128], strides = [1, 1]} : vector<8x512xf32> to vector<8x128xf32>
    %115 = math.tanh %114 : vector<8x128xf32>
    %116 = vector.extract_strided_slice %97 {offsets = [0, 384], sizes = [8, 128], strides = [1, 1]} : vector<8x512xf32> to vector<8x128xf32>
    %cst_63 = arith.constant 5.000000e-01 : f32
    %117 = vector.broadcast %cst_63 : f32 to vector<8x128xf32>
    %118 = arith.mulf %117, %116 : vector<8x128xf32>
    %119 = math.tanh %118 : vector<8x128xf32>
    %cst_64 = arith.constant 5.000000e-01 : f32
    %120 = vector.broadcast %cst_64 : f32 to vector<8x128xf32>
    %121 = arith.mulf %120, %119 : vector<8x128xf32>
    %cst_65 = arith.constant 5.000000e-01 : f32
    %122 = vector.broadcast %cst_65 : f32 to vector<8x128xf32>
    %123 = arith.addf %121, %122 : vector<8x128xf32>
    %124 = arith.mulf %113, %52 : vector<8x128xf32>
    %125 = arith.mulf %105, %115 : vector<8x128xf32>
    %126 = arith.addf %124, %125 : vector<8x128xf32>
    %127 = math.tanh %126 : vector<8x128xf32>
    %128 = arith.mulf %123, %127 : vector<8x128xf32>
    %c0_66 = arith.constant 0 : index
    %c0_67 = arith.constant 0 : index
    %129 = vector.load %arg12[%c0_66, %c0_67] : memref<8x256xf32, #tpu.memory_space<vmem>>, vector<8x128xf32>
    tpu.vector_store %arg12[%c0_66, %c0_67], %128 {strides = array<i32>} : memref<8x256xf32, #tpu.memory_space<vmem>>, vector<8x128xf32>,
    %c0_68 = arith.constant 0 : index
    %c0_69 = arith.constant 0 : index
    %130 = vector.load %arg12[%c0_68, %c0_69] : memref<8x256xf32, #tpu.memory_space<vmem>>, vector<8x256xf32>
    %131 = arith.truncf %130 : vector<8x256xf32> to vector<8x256xbf16>
    %c0_70 = arith.constant 0 : index
    %c0_71 = arith.constant 0 : index
    %132 = vector.load %arg6[%c0_70, %c0_71] : memref<256x512xbf16, #tpu.memory_space<vmem>>, vector<256x512xbf16>
    %cst_72 = arith.constant dense<0.000000e+00> : vector<8x512xf32>
    %133 = tpu.matmul %131, %132, %cst_72 {dimension_numbers = #tpu.dot_dimension_numbers<[1], [0], [0], [1], [0, 0, 1, 1], [], []>} : vector<8x256xbf16>, vector<256x512xbf16>, vector<8x512xf32> -> vector<8x512xf32>
    %134 = arith.addf %133, %9 : vector<8x512xf32>
    %135 = vector.extract_strided_slice %134 {offsets = [0, 0], sizes = [8, 128], strides = [1, 1]} : vector<8x512xf32> to vector<8x128xf32>
    %cst_73 = arith.constant 5.000000e-01 : f32
    %136 = vector.broadcast %cst_73 : f32 to vector<8x128xf32>
    %137 = arith.mulf %136, %135 : vector<8x128xf32>
    %138 = math.tanh %137 : vector<8x128xf32>
    %cst_74 = arith.constant 5.000000e-01 : f32
    %139 = vector.broadcast %cst_74 : f32 to vector<8x128xf32>
    %140 = arith.mulf %139, %138 : vector<8x128xf32>
    %cst_75 = arith.constant 5.000000e-01 : f32
    %141 = vector.broadcast %cst_75 : f32 to vector<8x128xf32>
    %142 = arith.addf %140, %141 : vector<8x128xf32>
    %143 = vector.extract_strided_slice %134 {offsets = [0, 128], sizes = [8, 128], strides = [1, 1]} : vector<8x512xf32> to vector<8x128xf32>
    %cst_76 = arith.constant 5.000000e-01 : f32
    %144 = vector.broadcast %cst_76 : f32 to vector<8x128xf32>
    %145 = arith.mulf %144, %143 : vector<8x128xf32>
    %146 = math.tanh %145 : vector<8x128xf32>
    %cst_77 = arith.constant 5.000000e-01 : f32
    %147 = vector.broadcast %cst_77 : f32 to vector<8x128xf32>
    %148 = arith.mulf %147, %146 : vector<8x128xf32>
    %cst_78 = arith.constant 5.000000e-01 : f32
    %149 = vector.broadcast %cst_78 : f32 to vector<8x128xf32>
    %150 = arith.addf %148, %149 : vector<8x128xf32>
    %151 = vector.extract_strided_slice %134 {offsets = [0, 256], sizes = [8, 128], strides = [1, 1]} : vector<8x512xf32> to vector<8x128xf32>
    %152 = math.tanh %151 : vector<8x128xf32>
    %153 = vector.extract_strided_slice %134 {offsets = [0, 384], sizes = [8, 128], strides = [1, 1]} : vector<8x512xf32> to vector<8x128xf32>
    %cst_79 = arith.constant 5.000000e-01 : f32
    %154 = vector.broadcast %cst_79 : f32 to vector<8x128xf32>
    %155 = arith.mulf %154, %153 : vector<8x128xf32>
    %156 = math.tanh %155 : vector<8x128xf32>
    %cst_80 = arith.constant 5.000000e-01 : f32
    %157 = vector.broadcast %cst_80 : f32 to vector<8x128xf32>
    %158 = arith.mulf %157, %156 : vector<8x128xf32>
    %cst_81 = arith.constant 5.000000e-01 : f32
    %159 = vector.broadcast %cst_81 : f32 to vector<8x128xf32>
    %160 = arith.addf %158, %159 : vector<8x128xf32>
    %161 = arith.mulf %150, %89 : vector<8x128xf32>
    %162 = arith.mulf %142, %152 : vector<8x128xf32>
    %163 = arith.addf %161, %162 : vector<8x128xf32>
    %164 = math.tanh %163 : vector<8x128xf32>
    %165 = arith.mulf %160, %164 : vector<8x128xf32>
    %c0_82 = arith.constant 0 : index
    %c128_83 = arith.constant 128 : index
    %166 = vector.load %arg12[%c0_82, %c128_83] : memref<8x256xf32, #tpu.memory_space<vmem>>, vector<8x128xf32>
    tpu.vector_store %arg12[%c0_82, %c128_83], %165 {strides = array<i32>} : memref<8x256xf32, #tpu.memory_space<vmem>>, vector<8x128xf32>,
    %c16 = arith.constant 16 : index
    %c0_84 = arith.constant 0 : index
    %167 = vector.load %arg11[%c16, %c0_84] : memref<64x512xf32, #tpu.memory_space<vmem>>, vector<8x512xf32>
    %168 = arith.truncf %128 : vector<8x128xf32> to vector<8x128xbf16>
    %c0_85 = arith.constant 0 : index
    %c0_86 = arith.constant 0 : index
    %169 = vector.load %arg4[%c0_85, %c0_86] : memref<128x512xbf16, #tpu.memory_space<vmem>>, vector<128x512xbf16>
    %cst_87 = arith.constant dense<0.000000e+00> : vector<8x512xf32>
    %170 = tpu.matmul %168, %169, %cst_87 {dimension_numbers = #tpu.dot_dimension_numbers<[1], [0], [0], [1], [0, 0, 1, 1], [], []>} : vector<8x128xbf16>, vector<128x512xbf16>, vector<8x512xf32> -> vector<8x512xf32>
    %171 = arith.addf %167, %170 : vector<8x512xf32>
    %172 = vector.extract_strided_slice %171 {offsets = [0, 0], sizes = [8, 128], strides = [1, 1]} : vector<8x512xf32> to vector<8x128xf32>
    %cst_88 = arith.constant 5.000000e-01 : f32
    %173 = vector.broadcast %cst_88 : f32 to vector<8x128xf32>
    %174 = arith.mulf %173, %172 : vector<8x128xf32>
    %175 = math.tanh %174 : vector<8x128xf32>
    %cst_89 = arith.constant 5.000000e-01 : f32
    %176 = vector.broadcast %cst_89 : f32 to vector<8x128xf32>
    %177 = arith.mulf %176, %175 : vector<8x128xf32>
    %cst_90 = arith.constant 5.000000e-01 : f32
    %178 = vector.broadcast %cst_90 : f32 to vector<8x128xf32>
    %179 = arith.addf %177, %178 : vector<8x128xf32>
    %180 = vector.extract_strided_slice %171 {offsets = [0, 128], sizes = [8, 128], strides = [1, 1]} : vector<8x512xf32> to vector<8x128xf32>
    %cst_91 = arith.constant 5.000000e-01 : f32
    %181 = vector.broadcast %cst_91 : f32 to vector<8x128xf32>
    %182 = arith.mulf %181, %180 : vector<8x128xf32>
    %183 = math.tanh %182 : vector<8x128xf32>
    %cst_92 = arith.constant 5.000000e-01 : f32
    %184 = vector.broadcast %cst_92 : f32 to vector<8x128xf32>
    %185 = arith.mulf %184, %183 : vector<8x128xf32>
    %cst_93 = arith.constant 5.000000e-01 : f32
    %186 = vector.broadcast %cst_93 : f32 to vector<8x128xf32>
    %187 = arith.addf %185, %186 : vector<8x128xf32>
    %188 = vector.extract_strided_slice %171 {offsets = [0, 256], sizes = [8, 128], strides = [1, 1]} : vector<8x512xf32> to vector<8x128xf32>
    %189 = math.tanh %188 : vector<8x128xf32>
    %190 = vector.extract_strided_slice %171 {offsets = [0, 384], sizes = [8, 128], strides = [1, 1]} : vector<8x512xf32> to vector<8x128xf32>
    %cst_94 = arith.constant 5.000000e-01 : f32
    %191 = vector.broadcast %cst_94 : f32 to vector<8x128xf32>
    %192 = arith.mulf %191, %190 : vector<8x128xf32>
    %193 = math.tanh %192 : vector<8x128xf32>
    %cst_95 = arith.constant 5.000000e-01 : f32
    %194 = vector.broadcast %cst_95 : f32 to vector<8x128xf32>
    %195 = arith.mulf %194, %193 : vector<8x128xf32>
    %cst_96 = arith.constant 5.000000e-01 : f32
    %196 = vector.broadcast %cst_96 : f32 to vector<8x128xf32>
    %197 = arith.addf %195, %196 : vector<8x128xf32>
    %198 = arith.mulf %187, %126 : vector<8x128xf32>
    %199 = arith.mulf %179, %189 : vector<8x128xf32>
    %200 = arith.addf %198, %199 : vector<8x128xf32>
    %201 = math.tanh %200 : vector<8x128xf32>
    %202 = arith.mulf %197, %201 : vector<8x128xf32>
    %c0_97 = arith.constant 0 : index
    %c0_98 = arith.constant 0 : index
    %203 = vector.load %arg12[%c0_97, %c0_98] : memref<8x256xf32, #tpu.memory_space<vmem>>, vector<8x128xf32>
    tpu.vector_store %arg12[%c0_97, %c0_98], %202 {strides = array<i32>} : memref<8x256xf32, #tpu.memory_space<vmem>>, vector<8x128xf32>,
    %c0_99 = arith.constant 0 : index
    %c0_100 = arith.constant 0 : index
    %204 = vector.load %arg12[%c0_99, %c0_100] : memref<8x256xf32, #tpu.memory_space<vmem>>, vector<8x256xf32>
    %205 = arith.truncf %204 : vector<8x256xf32> to vector<8x256xbf16>
    %c0_101 = arith.constant 0 : index
    %c0_102 = arith.constant 0 : index
    %206 = vector.load %arg6[%c0_101, %c0_102] : memref<256x512xbf16, #tpu.memory_space<vmem>>, vector<256x512xbf16>
    %cst_103 = arith.constant dense<0.000000e+00> : vector<8x512xf32>
    %207 = tpu.matmul %205, %206, %cst_103 {dimension_numbers = #tpu.dot_dimension_numbers<[1], [0], [0], [1], [0, 0, 1, 1], [], []>} : vector<8x256xbf16>, vector<256x512xbf16>, vector<8x512xf32> -> vector<8x512xf32>
    %208 = arith.addf %207, %9 : vector<8x512xf32>
    %209 = vector.extract_strided_slice %208 {offsets = [0, 0], sizes = [8, 128], strides = [1, 1]} : vector<8x512xf32> to vector<8x128xf32>
    %cst_104 = arith.constant 5.000000e-01 : f32
    %210 = vector.broadcast %cst_104 : f32 to vector<8x128xf32>
    %211 = arith.mulf %210, %209 : vector<8x128xf32>
    %212 = math.tanh %211 : vector<8x128xf32>
    %cst_105 = arith.constant 5.000000e-01 : f32
    %213 = vector.broadcast %cst_105 : f32 to vector<8x128xf32>
    %214 = arith.mulf %213, %212 : vector<8x128xf32>
    %cst_106 = arith.constant 5.000000e-01 : f32
    %215 = vector.broadcast %cst_106 : f32 to vector<8x128xf32>
    %216 = arith.addf %214, %215 : vector<8x128xf32>
    %217 = vector.extract_strided_slice %208 {offsets = [0, 128], sizes = [8, 128], strides = [1, 1]} : vector<8x512xf32> to vector<8x128xf32>
    %cst_107 = arith.constant 5.000000e-01 : f32
    %218 = vector.broadcast %cst_107 : f32 to vector<8x128xf32>
    %219 = arith.mulf %218, %217 : vector<8x128xf32>
    %220 = math.tanh %219 : vector<8x128xf32>
    %cst_108 = arith.constant 5.000000e-01 : f32
    %221 = vector.broadcast %cst_108 : f32 to vector<8x128xf32>
    %222 = arith.mulf %221, %220 : vector<8x128xf32>
    %cst_109 = arith.constant 5.000000e-01 : f32
    %223 = vector.broadcast %cst_109 : f32 to vector<8x128xf32>
    %224 = arith.addf %222, %223 : vector<8x128xf32>
    %225 = vector.extract_strided_slice %208 {offsets = [0, 256], sizes = [8, 128], strides = [1, 1]} : vector<8x512xf32> to vector<8x128xf32>
    %226 = math.tanh %225 : vector<8x128xf32>
    %227 = vector.extract_strided_slice %208 {offsets = [0, 384], sizes = [8, 128], strides = [1, 1]} : vector<8x512xf32> to vector<8x128xf32>
    %cst_110 = arith.constant 5.000000e-01 : f32
    %228 = vector.broadcast %cst_110 : f32 to vector<8x128xf32>
    %229 = arith.mulf %228, %227 : vector<8x128xf32>
    %230 = math.tanh %229 : vector<8x128xf32>
    %cst_111 = arith.constant 5.000000e-01 : f32
    %231 = vector.broadcast %cst_111 : f32 to vector<8x128xf32>
    %232 = arith.mulf %231, %230 : vector<8x128xf32>
    %cst_112 = arith.constant 5.000000e-01 : f32
    %233 = vector.broadcast %cst_112 : f32 to vector<8x128xf32>
    %234 = arith.addf %232, %233 : vector<8x128xf32>
    %235 = arith.mulf %224, %163 : vector<8x128xf32>
    %236 = arith.mulf %216, %226 : vector<8x128xf32>
    %237 = arith.addf %235, %236 : vector<8x128xf32>
    %238 = math.tanh %237 : vector<8x128xf32>
    %239 = arith.mulf %234, %238 : vector<8x128xf32>
    %c0_113 = arith.constant 0 : index
    %c128_114 = arith.constant 128 : index
    %240 = vector.load %arg12[%c0_113, %c128_114] : memref<8x256xf32, #tpu.memory_space<vmem>>, vector<8x128xf32>
    tpu.vector_store %arg12[%c0_113, %c128_114], %239 {strides = array<i32>} : memref<8x256xf32, #tpu.memory_space<vmem>>, vector<8x128xf32>,
    %c24 = arith.constant 24 : index
    %c0_115 = arith.constant 0 : index
    %241 = vector.load %arg11[%c24, %c0_115] : memref<64x512xf32, #tpu.memory_space<vmem>>, vector<8x512xf32>
    %242 = arith.truncf %202 : vector<8x128xf32> to vector<8x128xbf16>
    %c0_116 = arith.constant 0 : index
    %c0_117 = arith.constant 0 : index
    %243 = vector.load %arg4[%c0_116, %c0_117] : memref<128x512xbf16, #tpu.memory_space<vmem>>, vector<128x512xbf16>
    %cst_118 = arith.constant dense<0.000000e+00> : vector<8x512xf32>
    %244 = tpu.matmul %242, %243, %cst_118 {dimension_numbers = #tpu.dot_dimension_numbers<[1], [0], [0], [1], [0, 0, 1, 1], [], []>} : vector<8x128xbf16>, vector<128x512xbf16>, vector<8x512xf32> -> vector<8x512xf32>
    %245 = arith.addf %241, %244 : vector<8x512xf32>
    %246 = vector.extract_strided_slice %245 {offsets = [0, 0], sizes = [8, 128], strides = [1, 1]} : vector<8x512xf32> to vector<8x128xf32>
    %cst_119 = arith.constant 5.000000e-01 : f32
    %247 = vector.broadcast %cst_119 : f32 to vector<8x128xf32>
    %248 = arith.mulf %247, %246 : vector<8x128xf32>
    %249 = math.tanh %248 : vector<8x128xf32>
    %cst_120 = arith.constant 5.000000e-01 : f32
    %250 = vector.broadcast %cst_120 : f32 to vector<8x128xf32>
    %251 = arith.mulf %250, %249 : vector<8x128xf32>
    %cst_121 = arith.constant 5.000000e-01 : f32
    %252 = vector.broadcast %cst_121 : f32 to vector<8x128xf32>
    %253 = arith.addf %251, %252 : vector<8x128xf32>
    %254 = vector.extract_strided_slice %245 {offsets = [0, 128], sizes = [8, 128], strides = [1, 1]} : vector<8x512xf32> to vector<8x128xf32>
    %cst_122 = arith.constant 5.000000e-01 : f32
    %255 = vector.broadcast %cst_122 : f32 to vector<8x128xf32>
    %256 = arith.mulf %255, %254 : vector<8x128xf32>
    %257 = math.tanh %256 : vector<8x128xf32>
    %cst_123 = arith.constant 5.000000e-01 : f32
    %258 = vector.broadcast %cst_123 : f32 to vector<8x128xf32>
    %259 = arith.mulf %258, %257 : vector<8x128xf32>
    %cst_124 = arith.constant 5.000000e-01 : f32
    %260 = vector.broadcast %cst_124 : f32 to vector<8x128xf32>
    %261 = arith.addf %259, %260 : vector<8x128xf32>
    %262 = vector.extract_strided_slice %245 {offsets = [0, 256], sizes = [8, 128], strides = [1, 1]} : vector<8x512xf32> to vector<8x128xf32>
    %263 = math.tanh %262 : vector<8x128xf32>
    %264 = vector.extract_strided_slice %245 {offsets = [0, 384], sizes = [8, 128], strides = [1, 1]} : vector<8x512xf32> to vector<8x128xf32>
    %cst_125 = arith.constant 5.000000e-01 : f32
    %265 = vector.broadcast %cst_125 : f32 to vector<8x128xf32>
    %266 = arith.mulf %265, %264 : vector<8x128xf32>
    %267 = math.tanh %266 : vector<8x128xf32>
    %cst_126 = arith.constant 5.000000e-01 : f32
    %268 = vector.broadcast %cst_126 : f32 to vector<8x128xf32>
    %269 = arith.mulf %268, %267 : vector<8x128xf32>
    %cst_127 = arith.constant 5.000000e-01 : f32
    %270 = vector.broadcast %cst_127 : f32 to vector<8x128xf32>
    %271 = arith.addf %269, %270 : vector<8x128xf32>
    %272 = arith.mulf %261, %200 : vector<8x128xf32>
    %273 = arith.mulf %253, %263 : vector<8x128xf32>
    %274 = arith.addf %272, %273 : vector<8x128xf32>
    %275 = math.tanh %274 : vector<8x128xf32>
    %276 = arith.mulf %271, %275 : vector<8x128xf32>
    %c0_128 = arith.constant 0 : index
    %c0_129 = arith.constant 0 : index
    %277 = vector.load %arg12[%c0_128, %c0_129] : memref<8x256xf32, #tpu.memory_space<vmem>>, vector<8x128xf32>
    tpu.vector_store %arg12[%c0_128, %c0_129], %276 {strides = array<i32>} : memref<8x256xf32, #tpu.memory_space<vmem>>, vector<8x128xf32>,
    %c0_130 = arith.constant 0 : index
    %c0_131 = arith.constant 0 : index
    %278 = vector.load %arg12[%c0_130, %c0_131] : memref<8x256xf32, #tpu.memory_space<vmem>>, vector<8x256xf32>
    %279 = arith.truncf %278 : vector<8x256xf32> to vector<8x256xbf16>
    %c0_132 = arith.constant 0 : index
    %c0_133 = arith.constant 0 : index
    %280 = vector.load %arg6[%c0_132, %c0_133] : memref<256x512xbf16, #tpu.memory_space<vmem>>, vector<256x512xbf16>
    %cst_134 = arith.constant dense<0.000000e+00> : vector<8x512xf32>
    %281 = tpu.matmul %279, %280, %cst_134 {dimension_numbers = #tpu.dot_dimension_numbers<[1], [0], [0], [1], [0, 0, 1, 1], [], []>} : vector<8x256xbf16>, vector<256x512xbf16>, vector<8x512xf32> -> vector<8x512xf32>
    %282 = arith.addf %281, %9 : vector<8x512xf32>
    %283 = vector.extract_strided_slice %282 {offsets = [0, 0], sizes = [8, 128], strides = [1, 1]} : vector<8x512xf32> to vector<8x128xf32>
    %cst_135 = arith.constant 5.000000e-01 : f32
    %284 = vector.broadcast %cst_135 : f32 to vector<8x128xf32>
    %285 = arith.mulf %284, %283 : vector<8x128xf32>
    %286 = math.tanh %285 : vector<8x128xf32>
    %cst_136 = arith.constant 5.000000e-01 : f32
    %287 = vector.broadcast %cst_136 : f32 to vector<8x128xf32>
    %288 = arith.mulf %287, %286 : vector<8x128xf32>
    %cst_137 = arith.constant 5.000000e-01 : f32
    %289 = vector.broadcast %cst_137 : f32 to vector<8x128xf32>
    %290 = arith.addf %288, %289 : vector<8x128xf32>
    %291 = vector.extract_strided_slice %282 {offsets = [0, 128], sizes = [8, 128], strides = [1, 1]} : vector<8x512xf32> to vector<8x128xf32>
    %cst_138 = arith.constant 5.000000e-01 : f32
    %292 = vector.broadcast %cst_138 : f32 to vector<8x128xf32>
    %293 = arith.mulf %292, %291 : vector<8x128xf32>
    %294 = math.tanh %293 : vector<8x128xf32>
    %cst_139 = arith.constant 5.000000e-01 : f32
    %295 = vector.broadcast %cst_139 : f32 to vector<8x128xf32>
    %296 = arith.mulf %295, %294 : vector<8x128xf32>
    %cst_140 = arith.constant 5.000000e-01 : f32
    %297 = vector.broadcast %cst_140 : f32 to vector<8x128xf32>
    %298 = arith.addf %296, %297 : vector<8x128xf32>
    %299 = vector.extract_strided_slice %282 {offsets = [0, 256], sizes = [8, 128], strides = [1, 1]} : vector<8x512xf32> to vector<8x128xf32>
    %300 = math.tanh %299 : vector<8x128xf32>
    %301 = vector.extract_strided_slice %282 {offsets = [0, 384], sizes = [8, 128], strides = [1, 1]} : vector<8x512xf32> to vector<8x128xf32>
    %cst_141 = arith.constant 5.000000e-01 : f32
    %302 = vector.broadcast %cst_141 : f32 to vector<8x128xf32>
    %303 = arith.mulf %302, %301 : vector<8x128xf32>
    %304 = math.tanh %303 : vector<8x128xf32>
    %cst_142 = arith.constant 5.000000e-01 : f32
    %305 = vector.broadcast %cst_142 : f32 to vector<8x128xf32>
    %306 = arith.mulf %305, %304 : vector<8x128xf32>
    %cst_143 = arith.constant 5.000000e-01 : f32
    %307 = vector.broadcast %cst_143 : f32 to vector<8x128xf32>
    %308 = arith.addf %306, %307 : vector<8x128xf32>
    %309 = arith.mulf %298, %237 : vector<8x128xf32>
    %310 = arith.mulf %290, %300 : vector<8x128xf32>
    %311 = arith.addf %309, %310 : vector<8x128xf32>
    %312 = math.tanh %311 : vector<8x128xf32>
    %313 = arith.mulf %308, %312 : vector<8x128xf32>
    %c0_144 = arith.constant 0 : index
    %c128_145 = arith.constant 128 : index
    %314 = vector.load %arg12[%c0_144, %c128_145] : memref<8x256xf32, #tpu.memory_space<vmem>>, vector<8x128xf32>
    tpu.vector_store %arg12[%c0_144, %c128_145], %313 {strides = array<i32>} : memref<8x256xf32, #tpu.memory_space<vmem>>, vector<8x128xf32>,
    %c32 = arith.constant 32 : index
    %c0_146 = arith.constant 0 : index
    %315 = vector.load %arg11[%c32, %c0_146] : memref<64x512xf32, #tpu.memory_space<vmem>>, vector<8x512xf32>
    %316 = arith.truncf %276 : vector<8x128xf32> to vector<8x128xbf16>
    %c0_147 = arith.constant 0 : index
    %c0_148 = arith.constant 0 : index
    %317 = vector.load %arg4[%c0_147, %c0_148] : memref<128x512xbf16, #tpu.memory_space<vmem>>, vector<128x512xbf16>
    %cst_149 = arith.constant dense<0.000000e+00> : vector<8x512xf32>
    %318 = tpu.matmul %316, %317, %cst_149 {dimension_numbers = #tpu.dot_dimension_numbers<[1], [0], [0], [1], [0, 0, 1, 1], [], []>} : vector<8x128xbf16>, vector<128x512xbf16>, vector<8x512xf32> -> vector<8x512xf32>
    %319 = arith.addf %315, %318 : vector<8x512xf32>
    %320 = vector.extract_strided_slice %319 {offsets = [0, 0], sizes = [8, 128], strides = [1, 1]} : vector<8x512xf32> to vector<8x128xf32>
    %cst_150 = arith.constant 5.000000e-01 : f32
    %321 = vector.broadcast %cst_150 : f32 to vector<8x128xf32>
    %322 = arith.mulf %321, %320 : vector<8x128xf32>
    %323 = math.tanh %322 : vector<8x128xf32>
    %cst_151 = arith.constant 5.000000e-01 : f32
    %324 = vector.broadcast %cst_151 : f32 to vector<8x128xf32>
    %325 = arith.mulf %324, %323 : vector<8x128xf32>
    %cst_152 = arith.constant 5.000000e-01 : f32
    %326 = vector.broadcast %cst_152 : f32 to vector<8x128xf32>
    %327 = arith.addf %325, %326 : vector<8x128xf32>
    %328 = vector.extract_strided_slice %319 {offsets = [0, 128], sizes = [8, 128], strides = [1, 1]} : vector<8x512xf32> to vector<8x128xf32>
    %cst_153 = arith.constant 5.000000e-01 : f32
    %329 = vector.broadcast %cst_153 : f32 to vector<8x128xf32>
    %330 = arith.mulf %329, %328 : vector<8x128xf32>
    %331 = math.tanh %330 : vector<8x128xf32>
    %cst_154 = arith.constant 5.000000e-01 : f32
    %332 = vector.broadcast %cst_154 : f32 to vector<8x128xf32>
    %333 = arith.mulf %332, %331 : vector<8x128xf32>
    %cst_155 = arith.constant 5.000000e-01 : f32
    %334 = vector.broadcast %cst_155 : f32 to vector<8x128xf32>
    %335 = arith.addf %333, %334 : vector<8x128xf32>
    %336 = vector.extract_strided_slice %319 {offsets = [0, 256], sizes = [8, 128], strides = [1, 1]} : vector<8x512xf32> to vector<8x128xf32>
    %337 = math.tanh %336 : vector<8x128xf32>
    %338 = vector.extract_strided_slice %319 {offsets = [0, 384], sizes = [8, 128], strides = [1, 1]} : vector<8x512xf32> to vector<8x128xf32>
    %cst_156 = arith.constant 5.000000e-01 : f32
    %339 = vector.broadcast %cst_156 : f32 to vector<8x128xf32>
    %340 = arith.mulf %339, %338 : vector<8x128xf32>
    %341 = math.tanh %340 : vector<8x128xf32>
    %cst_157 = arith.constant 5.000000e-01 : f32
    %342 = vector.broadcast %cst_157 : f32 to vector<8x128xf32>
    %343 = arith.mulf %342, %341 : vector<8x128xf32>
    %cst_158 = arith.constant 5.000000e-01 : f32
    %344 = vector.broadcast %cst_158 : f32 to vector<8x128xf32>
    %345 = arith.addf %343, %344 : vector<8x128xf32>
    %346 = arith.mulf %335, %274 : vector<8x128xf32>
    %347 = arith.mulf %327, %337 : vector<8x128xf32>
    %348 = arith.addf %346, %347 : vector<8x128xf32>
    %349 = math.tanh %348 : vector<8x128xf32>
    %350 = arith.mulf %345, %349 : vector<8x128xf32>
    %c0_159 = arith.constant 0 : index
    %c0_160 = arith.constant 0 : index
    %351 = vector.load %arg12[%c0_159, %c0_160] : memref<8x256xf32, #tpu.memory_space<vmem>>, vector<8x128xf32>
    tpu.vector_store %arg12[%c0_159, %c0_160], %350 {strides = array<i32>} : memref<8x256xf32, #tpu.memory_space<vmem>>, vector<8x128xf32>,
    %c0_161 = arith.constant 0 : index
    %c0_162 = arith.constant 0 : index
    %352 = vector.load %arg12[%c0_161, %c0_162] : memref<8x256xf32, #tpu.memory_space<vmem>>, vector<8x256xf32>
    %353 = arith.truncf %352 : vector<8x256xf32> to vector<8x256xbf16>
    %c0_163 = arith.constant 0 : index
    %c0_164 = arith.constant 0 : index
    %354 = vector.load %arg6[%c0_163, %c0_164] : memref<256x512xbf16, #tpu.memory_space<vmem>>, vector<256x512xbf16>
    %cst_165 = arith.constant dense<0.000000e+00> : vector<8x512xf32>
    %355 = tpu.matmul %353, %354, %cst_165 {dimension_numbers = #tpu.dot_dimension_numbers<[1], [0], [0], [1], [0, 0, 1, 1], [], []>} : vector<8x256xbf16>, vector<256x512xbf16>, vector<8x512xf32> -> vector<8x512xf32>
    %356 = arith.addf %355, %9 : vector<8x512xf32>
    %357 = vector.extract_strided_slice %356 {offsets = [0, 0], sizes = [8, 128], strides = [1, 1]} : vector<8x512xf32> to vector<8x128xf32>
    %cst_166 = arith.constant 5.000000e-01 : f32
    %358 = vector.broadcast %cst_166 : f32 to vector<8x128xf32>
    %359 = arith.mulf %358, %357 : vector<8x128xf32>
    %360 = math.tanh %359 : vector<8x128xf32>
    %cst_167 = arith.constant 5.000000e-01 : f32
    %361 = vector.broadcast %cst_167 : f32 to vector<8x128xf32>
    %362 = arith.mulf %361, %360 : vector<8x128xf32>
    %cst_168 = arith.constant 5.000000e-01 : f32
    %363 = vector.broadcast %cst_168 : f32 to vector<8x128xf32>
    %364 = arith.addf %362, %363 : vector<8x128xf32>
    %365 = vector.extract_strided_slice %356 {offsets = [0, 128], sizes = [8, 128], strides = [1, 1]} : vector<8x512xf32> to vector<8x128xf32>
    %cst_169 = arith.constant 5.000000e-01 : f32
    %366 = vector.broadcast %cst_169 : f32 to vector<8x128xf32>
    %367 = arith.mulf %366, %365 : vector<8x128xf32>
    %368 = math.tanh %367 : vector<8x128xf32>
    %cst_170 = arith.constant 5.000000e-01 : f32
    %369 = vector.broadcast %cst_170 : f32 to vector<8x128xf32>
    %370 = arith.mulf %369, %368 : vector<8x128xf32>
    %cst_171 = arith.constant 5.000000e-01 : f32
    %371 = vector.broadcast %cst_171 : f32 to vector<8x128xf32>
    %372 = arith.addf %370, %371 : vector<8x128xf32>
    %373 = vector.extract_strided_slice %356 {offsets = [0, 256], sizes = [8, 128], strides = [1, 1]} : vector<8x512xf32> to vector<8x128xf32>
    %374 = math.tanh %373 : vector<8x128xf32>
    %375 = vector.extract_strided_slice %356 {offsets = [0, 384], sizes = [8, 128], strides = [1, 1]} : vector<8x512xf32> to vector<8x128xf32>
    %cst_172 = arith.constant 5.000000e-01 : f32
    %376 = vector.broadcast %cst_172 : f32 to vector<8x128xf32>
    %377 = arith.mulf %376, %375 : vector<8x128xf32>
    %378 = math.tanh %377 : vector<8x128xf32>
    %cst_173 = arith.constant 5.000000e-01 : f32
    %379 = vector.broadcast %cst_173 : f32 to vector<8x128xf32>
    %380 = arith.mulf %379, %378 : vector<8x128xf32>
    %cst_174 = arith.constant 5.000000e-01 : f32
    %381 = vector.broadcast %cst_174 : f32 to vector<8x128xf32>
    %382 = arith.addf %380, %381 : vector<8x128xf32>
    %383 = arith.mulf %372, %311 : vector<8x128xf32>
    %384 = arith.mulf %364, %374 : vector<8x128xf32>
    %385 = arith.addf %383, %384 : vector<8x128xf32>
    %386 = math.tanh %385 : vector<8x128xf32>
    %387 = arith.mulf %382, %386 : vector<8x128xf32>
    %c0_175 = arith.constant 0 : index
    %c128_176 = arith.constant 128 : index
    %388 = vector.load %arg12[%c0_175, %c128_176] : memref<8x256xf32, #tpu.memory_space<vmem>>, vector<8x128xf32>
    tpu.vector_store %arg12[%c0_175, %c128_176], %387 {strides = array<i32>} : memref<8x256xf32, #tpu.memory_space<vmem>>, vector<8x128xf32>,
    %c40 = arith.constant 40 : index
    %c0_177 = arith.constant 0 : index
    %389 = vector.load %arg11[%c40, %c0_177] : memref<64x512xf32, #tpu.memory_space<vmem>>, vector<8x512xf32>
    %390 = arith.truncf %350 : vector<8x128xf32> to vector<8x128xbf16>
    %c0_178 = arith.constant 0 : index
    %c0_179 = arith.constant 0 : index
    %391 = vector.load %arg4[%c0_178, %c0_179] : memref<128x512xbf16, #tpu.memory_space<vmem>>, vector<128x512xbf16>
    %cst_180 = arith.constant dense<0.000000e+00> : vector<8x512xf32>
    %392 = tpu.matmul %390, %391, %cst_180 {dimension_numbers = #tpu.dot_dimension_numbers<[1], [0], [0], [1], [0, 0, 1, 1], [], []>} : vector<8x128xbf16>, vector<128x512xbf16>, vector<8x512xf32> -> vector<8x512xf32>
    %393 = arith.addf %389, %392 : vector<8x512xf32>
    %394 = vector.extract_strided_slice %393 {offsets = [0, 0], sizes = [8, 128], strides = [1, 1]} : vector<8x512xf32> to vector<8x128xf32>
    %cst_181 = arith.constant 5.000000e-01 : f32
    %395 = vector.broadcast %cst_181 : f32 to vector<8x128xf32>
    %396 = arith.mulf %395, %394 : vector<8x128xf32>
    %397 = math.tanh %396 : vector<8x128xf32>
    %cst_182 = arith.constant 5.000000e-01 : f32
    %398 = vector.broadcast %cst_182 : f32 to vector<8x128xf32>
    %399 = arith.mulf %398, %397 : vector<8x128xf32>
    %cst_183 = arith.constant 5.000000e-01 : f32
    %400 = vector.broadcast %cst_183 : f32 to vector<8x128xf32>
    %401 = arith.addf %399, %400 : vector<8x128xf32>
    %402 = vector.extract_strided_slice %393 {offsets = [0, 128], sizes = [8, 128], strides = [1, 1]} : vector<8x512xf32> to vector<8x128xf32>
    %cst_184 = arith.constant 5.000000e-01 : f32
    %403 = vector.broadcast %cst_184 : f32 to vector<8x128xf32>
    %404 = arith.mulf %403, %402 : vector<8x128xf32>
    %405 = math.tanh %404 : vector<8x128xf32>
    %cst_185 = arith.constant 5.000000e-01 : f32
    %406 = vector.broadcast %cst_185 : f32 to vector<8x128xf32>
    %407 = arith.mulf %406, %405 : vector<8x128xf32>
    %cst_186 = arith.constant 5.000000e-01 : f32
    %408 = vector.broadcast %cst_186 : f32 to vector<8x128xf32>
    %409 = arith.addf %407, %408 : vector<8x128xf32>
    %410 = vector.extract_strided_slice %393 {offsets = [0, 256], sizes = [8, 128], strides = [1, 1]} : vector<8x512xf32> to vector<8x128xf32>
    %411 = math.tanh %410 : vector<8x128xf32>
    %412 = vector.extract_strided_slice %393 {offsets = [0, 384], sizes = [8, 128], strides = [1, 1]} : vector<8x512xf32> to vector<8x128xf32>
    %cst_187 = arith.constant 5.000000e-01 : f32
    %413 = vector.broadcast %cst_187 : f32 to vector<8x128xf32>
    %414 = arith.mulf %413, %412 : vector<8x128xf32>
    %415 = math.tanh %414 : vector<8x128xf32>
    %cst_188 = arith.constant 5.000000e-01 : f32
    %416 = vector.broadcast %cst_188 : f32 to vector<8x128xf32>
    %417 = arith.mulf %416, %415 : vector<8x128xf32>
    %cst_189 = arith.constant 5.000000e-01 : f32
    %418 = vector.broadcast %cst_189 : f32 to vector<8x128xf32>
    %419 = arith.addf %417, %418 : vector<8x128xf32>
    %420 = arith.mulf %409, %348 : vector<8x128xf32>
    %421 = arith.mulf %401, %411 : vector<8x128xf32>
    %422 = arith.addf %420, %421 : vector<8x128xf32>
    %423 = math.tanh %422 : vector<8x128xf32>
    %424 = arith.mulf %419, %423 : vector<8x128xf32>
    %c0_190 = arith.constant 0 : index
    %c0_191 = arith.constant 0 : index
    %425 = vector.load %arg12[%c0_190, %c0_191] : memref<8x256xf32, #tpu.memory_space<vmem>>, vector<8x128xf32>
    tpu.vector_store %arg12[%c0_190, %c0_191], %424 {strides = array<i32>} : memref<8x256xf32, #tpu.memory_space<vmem>>, vector<8x128xf32>,
    %c0_192 = arith.constant 0 : index
    %c0_193 = arith.constant 0 : index
    %426 = vector.load %arg12[%c0_192, %c0_193] : memref<8x256xf32, #tpu.memory_space<vmem>>, vector<8x256xf32>
    %427 = arith.truncf %426 : vector<8x256xf32> to vector<8x256xbf16>
    %c0_194 = arith.constant 0 : index
    %c0_195 = arith.constant 0 : index
    %428 = vector.load %arg6[%c0_194, %c0_195] : memref<256x512xbf16, #tpu.memory_space<vmem>>, vector<256x512xbf16>
    %cst_196 = arith.constant dense<0.000000e+00> : vector<8x512xf32>
    %429 = tpu.matmul %427, %428, %cst_196 {dimension_numbers = #tpu.dot_dimension_numbers<[1], [0], [0], [1], [0, 0, 1, 1], [], []>} : vector<8x256xbf16>, vector<256x512xbf16>, vector<8x512xf32> -> vector<8x512xf32>
    %430 = arith.addf %429, %9 : vector<8x512xf32>
    %431 = vector.extract_strided_slice %430 {offsets = [0, 0], sizes = [8, 128], strides = [1, 1]} : vector<8x512xf32> to vector<8x128xf32>
    %cst_197 = arith.constant 5.000000e-01 : f32
    %432 = vector.broadcast %cst_197 : f32 to vector<8x128xf32>
    %433 = arith.mulf %432, %431 : vector<8x128xf32>
    %434 = math.tanh %433 : vector<8x128xf32>
    %cst_198 = arith.constant 5.000000e-01 : f32
    %435 = vector.broadcast %cst_198 : f32 to vector<8x128xf32>
    %436 = arith.mulf %435, %434 : vector<8x128xf32>
    %cst_199 = arith.constant 5.000000e-01 : f32
    %437 = vector.broadcast %cst_199 : f32 to vector<8x128xf32>
    %438 = arith.addf %436, %437 : vector<8x128xf32>
    %439 = vector.extract_strided_slice %430 {offsets = [0, 128], sizes = [8, 128], strides = [1, 1]} : vector<8x512xf32> to vector<8x128xf32>
    %cst_200 = arith.constant 5.000000e-01 : f32
    %440 = vector.broadcast %cst_200 : f32 to vector<8x128xf32>
    %441 = arith.mulf %440, %439 : vector<8x128xf32>
    %442 = math.tanh %441 : vector<8x128xf32>
    %cst_201 = arith.constant 5.000000e-01 : f32
    %443 = vector.broadcast %cst_201 : f32 to vector<8x128xf32>
    %444 = arith.mulf %443, %442 : vector<8x128xf32>
    %cst_202 = arith.constant 5.000000e-01 : f32
    %445 = vector.broadcast %cst_202 : f32 to vector<8x128xf32>
    %446 = arith.addf %444, %445 : vector<8x128xf32>
    %447 = vector.extract_strided_slice %430 {offsets = [0, 256], sizes = [8, 128], strides = [1, 1]} : vector<8x512xf32> to vector<8x128xf32>
    %448 = math.tanh %447 : vector<8x128xf32>
    %449 = vector.extract_strided_slice %430 {offsets = [0, 384], sizes = [8, 128], strides = [1, 1]} : vector<8x512xf32> to vector<8x128xf32>
    %cst_203 = arith.constant 5.000000e-01 : f32
    %450 = vector.broadcast %cst_203 : f32 to vector<8x128xf32>
    %451 = arith.mulf %450, %449 : vector<8x128xf32>
    %452 = math.tanh %451 : vector<8x128xf32>
    %cst_204 = arith.constant 5.000000e-01 : f32
    %453 = vector.broadcast %cst_204 : f32 to vector<8x128xf32>
    %454 = arith.mulf %453, %452 : vector<8x128xf32>
    %cst_205 = arith.constant 5.000000e-01 : f32
    %455 = vector.broadcast %cst_205 : f32 to vector<8x128xf32>
    %456 = arith.addf %454, %455 : vector<8x128xf32>
    %457 = arith.mulf %446, %385 : vector<8x128xf32>
    %458 = arith.mulf %438, %448 : vector<8x128xf32>
    %459 = arith.addf %457, %458 : vector<8x128xf32>
    %460 = math.tanh %459 : vector<8x128xf32>
    %461 = arith.mulf %456, %460 : vector<8x128xf32>
    %c0_206 = arith.constant 0 : index
    %c128_207 = arith.constant 128 : index
    %462 = vector.load %arg12[%c0_206, %c128_207] : memref<8x256xf32, #tpu.memory_space<vmem>>, vector<8x128xf32>
    tpu.vector_store %arg12[%c0_206, %c128_207], %461 {strides = array<i32>} : memref<8x256xf32, #tpu.memory_space<vmem>>, vector<8x128xf32>,
    %c48 = arith.constant 48 : index
    %c0_208 = arith.constant 0 : index
    %463 = vector.load %arg11[%c48, %c0_208] : memref<64x512xf32, #tpu.memory_space<vmem>>, vector<8x512xf32>
    %464 = arith.truncf %424 : vector<8x128xf32> to vector<8x128xbf16>
    %c0_209 = arith.constant 0 : index
    %c0_210 = arith.constant 0 : index
    %465 = vector.load %arg4[%c0_209, %c0_210] : memref<128x512xbf16, #tpu.memory_space<vmem>>, vector<128x512xbf16>
    %cst_211 = arith.constant dense<0.000000e+00> : vector<8x512xf32>
    %466 = tpu.matmul %464, %465, %cst_211 {dimension_numbers = #tpu.dot_dimension_numbers<[1], [0], [0], [1], [0, 0, 1, 1], [], []>} : vector<8x128xbf16>, vector<128x512xbf16>, vector<8x512xf32> -> vector<8x512xf32>
    %467 = arith.addf %463, %466 : vector<8x512xf32>
    %468 = vector.extract_strided_slice %467 {offsets = [0, 0], sizes = [8, 128], strides = [1, 1]} : vector<8x512xf32> to vector<8x128xf32>
    %cst_212 = arith.constant 5.000000e-01 : f32
    %469 = vector.broadcast %cst_212 : f32 to vector<8x128xf32>
    %470 = arith.mulf %469, %468 : vector<8x128xf32>
    %471 = math.tanh %470 : vector<8x128xf32>
    %cst_213 = arith.constant 5.000000e-01 : f32
    %472 = vector.broadcast %cst_213 : f32 to vector<8x128xf32>
    %473 = arith.mulf %472, %471 : vector<8x128xf32>
    %cst_214 = arith.constant 5.000000e-01 : f32
    %474 = vector.broadcast %cst_214 : f32 to vector<8x128xf32>
    %475 = arith.addf %473, %474 : vector<8x128xf32>
    %476 = vector.extract_strided_slice %467 {offsets = [0, 128], sizes = [8, 128], strides = [1, 1]} : vector<8x512xf32> to vector<8x128xf32>
    %cst_215 = arith.constant 5.000000e-01 : f32
    %477 = vector.broadcast %cst_215 : f32 to vector<8x128xf32>
    %478 = arith.mulf %477, %476 : vector<8x128xf32>
    %479 = math.tanh %478 : vector<8x128xf32>
    %cst_216 = arith.constant 5.000000e-01 : f32
    %480 = vector.broadcast %cst_216 : f32 to vector<8x128xf32>
    %481 = arith.mulf %480, %479 : vector<8x128xf32>
    %cst_217 = arith.constant 5.000000e-01 : f32
    %482 = vector.broadcast %cst_217 : f32 to vector<8x128xf32>
    %483 = arith.addf %481, %482 : vector<8x128xf32>
    %484 = vector.extract_strided_slice %467 {offsets = [0, 256], sizes = [8, 128], strides = [1, 1]} : vector<8x512xf32> to vector<8x128xf32>
    %485 = math.tanh %484 : vector<8x128xf32>
    %486 = vector.extract_strided_slice %467 {offsets = [0, 384], sizes = [8, 128], strides = [1, 1]} : vector<8x512xf32> to vector<8x128xf32>
    %cst_218 = arith.constant 5.000000e-01 : f32
    %487 = vector.broadcast %cst_218 : f32 to vector<8x128xf32>
    %488 = arith.mulf %487, %486 : vector<8x128xf32>
    %489 = math.tanh %488 : vector<8x128xf32>
    %cst_219 = arith.constant 5.000000e-01 : f32
    %490 = vector.broadcast %cst_219 : f32 to vector<8x128xf32>
    %491 = arith.mulf %490, %489 : vector<8x128xf32>
    %cst_220 = arith.constant 5.000000e-01 : f32
    %492 = vector.broadcast %cst_220 : f32 to vector<8x128xf32>
    %493 = arith.addf %491, %492 : vector<8x128xf32>
    %494 = arith.mulf %483, %422 : vector<8x128xf32>
    %495 = arith.mulf %475, %485 : vector<8x128xf32>
    %496 = arith.addf %494, %495 : vector<8x128xf32>
    %497 = math.tanh %496 : vector<8x128xf32>
    %498 = arith.mulf %493, %497 : vector<8x128xf32>
    %c0_221 = arith.constant 0 : index
    %c0_222 = arith.constant 0 : index
    %499 = vector.load %arg12[%c0_221, %c0_222] : memref<8x256xf32, #tpu.memory_space<vmem>>, vector<8x128xf32>
    tpu.vector_store %arg12[%c0_221, %c0_222], %498 {strides = array<i32>} : memref<8x256xf32, #tpu.memory_space<vmem>>, vector<8x128xf32>,
    %c0_223 = arith.constant 0 : index
    %c0_224 = arith.constant 0 : index
    %500 = vector.load %arg12[%c0_223, %c0_224] : memref<8x256xf32, #tpu.memory_space<vmem>>, vector<8x256xf32>
    %501 = arith.truncf %500 : vector<8x256xf32> to vector<8x256xbf16>
    %c0_225 = arith.constant 0 : index
    %c0_226 = arith.constant 0 : index
    %502 = vector.load %arg6[%c0_225, %c0_226] : memref<256x512xbf16, #tpu.memory_space<vmem>>, vector<256x512xbf16>
    %cst_227 = arith.constant dense<0.000000e+00> : vector<8x512xf32>
    %503 = tpu.matmul %501, %502, %cst_227 {dimension_numbers = #tpu.dot_dimension_numbers<[1], [0], [0], [1], [0, 0, 1, 1], [], []>} : vector<8x256xbf16>, vector<256x512xbf16>, vector<8x512xf32> -> vector<8x512xf32>
    %504 = arith.addf %503, %9 : vector<8x512xf32>
    %505 = vector.extract_strided_slice %504 {offsets = [0, 0], sizes = [8, 128], strides = [1, 1]} : vector<8x512xf32> to vector<8x128xf32>
    %cst_228 = arith.constant 5.000000e-01 : f32
    %506 = vector.broadcast %cst_228 : f32 to vector<8x128xf32>
    %507 = arith.mulf %506, %505 : vector<8x128xf32>
    %508 = math.tanh %507 : vector<8x128xf32>
    %cst_229 = arith.constant 5.000000e-01 : f32
    %509 = vector.broadcast %cst_229 : f32 to vector<8x128xf32>
    %510 = arith.mulf %509, %508 : vector<8x128xf32>
    %cst_230 = arith.constant 5.000000e-01 : f32
    %511 = vector.broadcast %cst_230 : f32 to vector<8x128xf32>
    %512 = arith.addf %510, %511 : vector<8x128xf32>
    %513 = vector.extract_strided_slice %504 {offsets = [0, 128], sizes = [8, 128], strides = [1, 1]} : vector<8x512xf32> to vector<8x128xf32>
    %cst_231 = arith.constant 5.000000e-01 : f32
    %514 = vector.broadcast %cst_231 : f32 to vector<8x128xf32>
    %515 = arith.mulf %514, %513 : vector<8x128xf32>
    %516 = math.tanh %515 : vector<8x128xf32>
    %cst_232 = arith.constant 5.000000e-01 : f32
    %517 = vector.broadcast %cst_232 : f32 to vector<8x128xf32>
    %518 = arith.mulf %517, %516 : vector<8x128xf32>
    %cst_233 = arith.constant 5.000000e-01 : f32
    %519 = vector.broadcast %cst_233 : f32 to vector<8x128xf32>
    %520 = arith.addf %518, %519 : vector<8x128xf32>
    %521 = vector.extract_strided_slice %504 {offsets = [0, 256], sizes = [8, 128], strides = [1, 1]} : vector<8x512xf32> to vector<8x128xf32>
    %522 = math.tanh %521 : vector<8x128xf32>
    %523 = vector.extract_strided_slice %504 {offsets = [0, 384], sizes = [8, 128], strides = [1, 1]} : vector<8x512xf32> to vector<8x128xf32>
    %cst_234 = arith.constant 5.000000e-01 : f32
    %524 = vector.broadcast %cst_234 : f32 to vector<8x128xf32>
    %525 = arith.mulf %524, %523 : vector<8x128xf32>
    %526 = math.tanh %525 : vector<8x128xf32>
    %cst_235 = arith.constant 5.000000e-01 : f32
    %527 = vector.broadcast %cst_235 : f32 to vector<8x128xf32>
    %528 = arith.mulf %527, %526 : vector<8x128xf32>
    %cst_236 = arith.constant 5.000000e-01 : f32
    %529 = vector.broadcast %cst_236 : f32 to vector<8x128xf32>
    %530 = arith.addf %528, %529 : vector<8x128xf32>
    %531 = arith.mulf %520, %459 : vector<8x128xf32>
    %532 = arith.mulf %512, %522 : vector<8x128xf32>
    %533 = arith.addf %531, %532 : vector<8x128xf32>
    %534 = math.tanh %533 : vector<8x128xf32>
    %535 = arith.mulf %530, %534 : vector<8x128xf32>
    %c0_237 = arith.constant 0 : index
    %c128_238 = arith.constant 128 : index
    %536 = vector.load %arg12[%c0_237, %c128_238] : memref<8x256xf32, #tpu.memory_space<vmem>>, vector<8x128xf32>
    tpu.vector_store %arg12[%c0_237, %c128_238], %535 {strides = array<i32>} : memref<8x256xf32, #tpu.memory_space<vmem>>, vector<8x128xf32>,
    %c56 = arith.constant 56 : index
    %c0_239 = arith.constant 0 : index
    %537 = vector.load %arg11[%c56, %c0_239] : memref<64x512xf32, #tpu.memory_space<vmem>>, vector<8x512xf32>
    %538 = arith.truncf %498 : vector<8x128xf32> to vector<8x128xbf16>
    %c0_240 = arith.constant 0 : index
    %c0_241 = arith.constant 0 : index
    %539 = vector.load %arg4[%c0_240, %c0_241] : memref<128x512xbf16, #tpu.memory_space<vmem>>, vector<128x512xbf16>
    %cst_242 = arith.constant dense<0.000000e+00> : vector<8x512xf32>
    %540 = tpu.matmul %538, %539, %cst_242 {dimension_numbers = #tpu.dot_dimension_numbers<[1], [0], [0], [1], [0, 0, 1, 1], [], []>} : vector<8x128xbf16>, vector<128x512xbf16>, vector<8x512xf32> -> vector<8x512xf32>
    %541 = arith.addf %537, %540 : vector<8x512xf32>
    %542 = vector.extract_strided_slice %541 {offsets = [0, 0], sizes = [8, 128], strides = [1, 1]} : vector<8x512xf32> to vector<8x128xf32>
    %cst_243 = arith.constant 5.000000e-01 : f32
    %543 = vector.broadcast %cst_243 : f32 to vector<8x128xf32>
    %544 = arith.mulf %543, %542 : vector<8x128xf32>
    %545 = math.tanh %544 : vector<8x128xf32>
    %cst_244 = arith.constant 5.000000e-01 : f32
    %546 = vector.broadcast %cst_244 : f32 to vector<8x128xf32>
    %547 = arith.mulf %546, %545 : vector<8x128xf32>
    %cst_245 = arith.constant 5.000000e-01 : f32
    %548 = vector.broadcast %cst_245 : f32 to vector<8x128xf32>
    %549 = arith.addf %547, %548 : vector<8x128xf32>
    %550 = vector.extract_strided_slice %541 {offsets = [0, 128], sizes = [8, 128], strides = [1, 1]} : vector<8x512xf32> to vector<8x128xf32>
    %cst_246 = arith.constant 5.000000e-01 : f32
    %551 = vector.broadcast %cst_246 : f32 to vector<8x128xf32>
    %552 = arith.mulf %551, %550 : vector<8x128xf32>
    %553 = math.tanh %552 : vector<8x128xf32>
    %cst_247 = arith.constant 5.000000e-01 : f32
    %554 = vector.broadcast %cst_247 : f32 to vector<8x128xf32>
    %555 = arith.mulf %554, %553 : vector<8x128xf32>
    %cst_248 = arith.constant 5.000000e-01 : f32
    %556 = vector.broadcast %cst_248 : f32 to vector<8x128xf32>
    %557 = arith.addf %555, %556 : vector<8x128xf32>
    %558 = vector.extract_strided_slice %541 {offsets = [0, 256], sizes = [8, 128], strides = [1, 1]} : vector<8x512xf32> to vector<8x128xf32>
    %559 = math.tanh %558 : vector<8x128xf32>
    %560 = vector.extract_strided_slice %541 {offsets = [0, 384], sizes = [8, 128], strides = [1, 1]} : vector<8x512xf32> to vector<8x128xf32>
    %cst_249 = arith.constant 5.000000e-01 : f32
    %561 = vector.broadcast %cst_249 : f32 to vector<8x128xf32>
    %562 = arith.mulf %561, %560 : vector<8x128xf32>
    %563 = math.tanh %562 : vector<8x128xf32>
    %cst_250 = arith.constant 5.000000e-01 : f32
    %564 = vector.broadcast %cst_250 : f32 to vector<8x128xf32>
    %565 = arith.mulf %564, %563 : vector<8x128xf32>
    %cst_251 = arith.constant 5.000000e-01 : f32
    %566 = vector.broadcast %cst_251 : f32 to vector<8x128xf32>
    %567 = arith.addf %565, %566 : vector<8x128xf32>
    %568 = arith.mulf %557, %496 : vector<8x128xf32>
    %569 = arith.mulf %549, %559 : vector<8x128xf32>
    %570 = arith.addf %568, %569 : vector<8x128xf32>
    %571 = math.tanh %570 : vector<8x128xf32>
    %572 = arith.mulf %567, %571 : vector<8x128xf32>
    %c0_252 = arith.constant 0 : index
    %c0_253 = arith.constant 0 : index
    %573 = vector.load %arg12[%c0_252, %c0_253] : memref<8x256xf32, #tpu.memory_space<vmem>>, vector<8x128xf32>
    tpu.vector_store %arg12[%c0_252, %c0_253], %572 {strides = array<i32>} : memref<8x256xf32, #tpu.memory_space<vmem>>, vector<8x128xf32>,
    %c0_254 = arith.constant 0 : index
    %c0_255 = arith.constant 0 : index
    %574 = vector.load %arg12[%c0_254, %c0_255] : memref<8x256xf32, #tpu.memory_space<vmem>>, vector<8x256xf32>
    %575 = arith.truncf %574 : vector<8x256xf32> to vector<8x256xbf16>
    %c0_256 = arith.constant 0 : index
    %c0_257 = arith.constant 0 : index
    %576 = vector.load %arg6[%c0_256, %c0_257] : memref<256x512xbf16, #tpu.memory_space<vmem>>, vector<256x512xbf16>
    %cst_258 = arith.constant dense<0.000000e+00> : vector<8x512xf32>
    %577 = tpu.matmul %575, %576, %cst_258 {dimension_numbers = #tpu.dot_dimension_numbers<[1], [0], [0], [1], [0, 0, 1, 1], [], []>} : vector<8x256xbf16>, vector<256x512xbf16>, vector<8x512xf32> -> vector<8x512xf32>
    %578 = arith.addf %577, %9 : vector<8x512xf32>
    %579 = vector.extract_strided_slice %578 {offsets = [0, 0], sizes = [8, 128], strides = [1, 1]} : vector<8x512xf32> to vector<8x128xf32>
    %cst_259 = arith.constant 5.000000e-01 : f32
    %580 = vector.broadcast %cst_259 : f32 to vector<8x128xf32>
    %581 = arith.mulf %580, %579 : vector<8x128xf32>
    %582 = math.tanh %581 : vector<8x128xf32>
    %cst_260 = arith.constant 5.000000e-01 : f32
    %583 = vector.broadcast %cst_260 : f32 to vector<8x128xf32>
    %584 = arith.mulf %583, %582 : vector<8x128xf32>
    %cst_261 = arith.constant 5.000000e-01 : f32
    %585 = vector.broadcast %cst_261 : f32 to vector<8x128xf32>
    %586 = arith.addf %584, %585 : vector<8x128xf32>
    %587 = vector.extract_strided_slice %578 {offsets = [0, 128], sizes = [8, 128], strides = [1, 1]} : vector<8x512xf32> to vector<8x128xf32>
    %cst_262 = arith.constant 5.000000e-01 : f32
    %588 = vector.broadcast %cst_262 : f32 to vector<8x128xf32>
    %589 = arith.mulf %588, %587 : vector<8x128xf32>
    %590 = math.tanh %589 : vector<8x128xf32>
    %cst_263 = arith.constant 5.000000e-01 : f32
    %591 = vector.broadcast %cst_263 : f32 to vector<8x128xf32>
    %592 = arith.mulf %591, %590 : vector<8x128xf32>
    %cst_264 = arith.constant 5.000000e-01 : f32
    %593 = vector.broadcast %cst_264 : f32 to vector<8x128xf32>
    %594 = arith.addf %592, %593 : vector<8x128xf32>
    %595 = vector.extract_strided_slice %578 {offsets = [0, 256], sizes = [8, 128], strides = [1, 1]} : vector<8x512xf32> to vector<8x128xf32>
    %596 = math.tanh %595 : vector<8x128xf32>
    %597 = vector.extract_strided_slice %578 {offsets = [0, 384], sizes = [8, 128], strides = [1, 1]} : vector<8x512xf32> to vector<8x128xf32>
    %cst_265 = arith.constant 5.000000e-01 : f32
    %598 = vector.broadcast %cst_265 : f32 to vector<8x128xf32>
    %599 = arith.mulf %598, %597 : vector<8x128xf32>
    %600 = math.tanh %599 : vector<8x128xf32>
    %cst_266 = arith.constant 5.000000e-01 : f32
    %601 = vector.broadcast %cst_266 : f32 to vector<8x128xf32>
    %602 = arith.mulf %601, %600 : vector<8x128xf32>
    %cst_267 = arith.constant 5.000000e-01 : f32
    %603 = vector.broadcast %cst_267 : f32 to vector<8x128xf32>
    %604 = arith.addf %602, %603 : vector<8x128xf32>
    %605 = arith.mulf %594, %533 : vector<8x128xf32>
    %606 = arith.mulf %586, %596 : vector<8x128xf32>
    %607 = arith.addf %605, %606 : vector<8x128xf32>
    %608 = math.tanh %607 : vector<8x128xf32>
    %609 = arith.mulf %604, %608 : vector<8x128xf32>
    %c0_268 = arith.constant 0 : index
    %c128_269 = arith.constant 128 : index
    %610 = vector.load %arg12[%c0_268, %c128_269] : memref<8x256xf32, #tpu.memory_space<vmem>>, vector<8x128xf32>
    tpu.vector_store %arg12[%c0_268, %c128_269], %609 {strides = array<i32>} : memref<8x256xf32, #tpu.memory_space<vmem>>, vector<8x128xf32>,
    %611 = arith.truncf %609 : vector<8x128xf32> to vector<8x128xbf16>
    %c0_270 = arith.constant 0 : index
    %c0_271 = arith.constant 0 : index
    %612 = vector.load %arg8[%c0_270, %c0_271] : memref<128x128xbf16, #tpu.memory_space<vmem>>, vector<128x128xbf16>
    %cst_272 = arith.constant dense<0.000000e+00> : vector<8x128xf32>
    %613 = tpu.matmul %611, %612, %cst_272 {dimension_numbers = #tpu.dot_dimension_numbers<[1], [0], [0], [1], [0, 0, 1, 1], [], []>} : vector<8x128xbf16>, vector<128x128xbf16>, vector<8x128xf32> -> vector<8x128xf32>
    %c0_273 = arith.constant 0 : index
    %c0_274 = arith.constant 0 : index
    %614 = vector.load %arg9[%c0_273, %c0_274] : memref<1x128xf32, #tpu.memory_space<vmem>>, vector<1x128xf32>
    %615 = vector.broadcast %614 : vector<1x128xf32> to vector<8x128xf32>
    %616 = arith.addf %613, %615 : vector<8x128xf32>
    %c0_275 = arith.constant 0 : index
    %c0_276 = arith.constant 0 : index
    %617 = vector.load %arg10[%c0_275, %c0_276] : memref<8x128xf32, #tpu.memory_space<vmem>>, vector<8x128xf32>
    tpu.vector_store %arg10[%c0_275, %c0_276], %616 {strides = array<i32>} : memref<8x128xf32, #tpu.memory_space<vmem>>, vector<8x128xf32>,
    return
  }
}

</mosaic_0001>

<bundles_post_ra>
// kernel: siamese_net_forward.1
= control target key start
LH: loop header
LB: loop body
LE: loop exit
PB: predicated region body
PF: predicated region fallthrough
CT: control target
= control target key end

     0   :  { %s16333_s3 = inlined_call_operand.vmem [shape: bf16[128,512], index: 3, kind: input, shape index: {}]   ;;  %s16334_s4 = inlined_call_operand.vmem [shape: bf16[128,512], index: 4, kind: input, shape index: {}]   ;;  %s16335_s0 = inlined_call_operand.vmem [shape: bf16[64,128], index: 0, kind: input, shape index: {}]   ;;  %s16336_s1 = inlined_call_operand.vmem [shape: f32[2,8,128], index: 1, kind: input, shape index: {}]   ;;  %s16337_s6 = inlined_call_operand.vmem [shape: bf16[256,512], index: 6, kind: input, shape index: {}]   ;;  %s16338_s5 = inlined_call_operand.vmem [shape: f32[1,512], index: 5, kind: input, shape index: {}]   ;;  %s16339_s2 = inlined_call_operand.vmem [shape: f32[2,8,128], index: 2, kind: input, shape index: {}]   ;;  %s16340_s7 = inlined_call_operand.vmem [shape: f32[1,512], index: 7, kind: input, shape index: {}]   ;;  %s16341_s9 = inlined_call_operand.vmem [shape: f32[1,128], index: 9, kind: input, shape index: {}]   ;;  %s16342_s8 = inlined_call_operand.vmem [shape: bf16[128,128], index: 8, kind: input, shape index: {}]   ;;  %s16343_s10 = inlined_call_operand.vmem [shape: f32[8,128], index: 10, kind: output, shape index: {}]  }
   0x1   :  { %v6915_v0 = vld [vmem:[%s16333_s3 + $0xe0] sm:$0xf]  ;;  %v10069_v1 = vld [vmem:[%s16333_s3 + $0xec] sm:$0xf0]  ;;  %v10067_v2 = vld [vmem:[%s16333_s3 + $0xe4] sm:$0xf] }
   0x2   :  { %v6916_v3 = vor.u32 %v10069_v1, %v6915_v0  ;;  %v6917_v4 = vld [vmem:[%s16333_s3 + $0xf0] sm:$0xf0]  ;;  %v6923_v5 = vld [vmem:[%s16333_s3 + $0xe8] sm:$0xf]  ;;  %v10070_v6 = vld [vmem:[%s16333_s3 + $0xf4] sm:$0xf0] }
   0x3   :  { %v6920_v7 = vor.u32 %v10067_v2, %v6917_v4  ;;  %v6924_v8 = vor.u32 %v10070_v6, %v6923_v5  ;;  %v10068_v9 = vld [vmem:[%s16333_s3 + $0xec] sm:$0xf]  ;;  %v6925_v10 = vld [vmem:[%s16333_s3 + $0xf8] sm:$0xf0]  ;;  %v6899_v11 = vld [vmem:[%s16333_s3 + $0xc0] sm:$0xf] }
   0x4   :  { %269 = vmatpush.bf16.msra.mxu0 %v6916_v3  ;;  %v6928_v12 = vor.u32 %v10068_v9, %v6925_v10  ;;  %v10065_v13 = vld [vmem:[%s16333_s3 + $0xcc] sm:$0xf0]  ;;  %v10063_v14 = vld [vmem:[%s16333_s3 + $0xc4] sm:$0xf]  ;;  %v6901_v15 = vld [vmem:[%s16333_s3 + $0xd0] sm:$0xf0] }
   0x5   :  { %298 = vmatpush.bf16.msra.mxu1 %v6920_v7  ;;  %327 = vmatpush.bf16.msra.mxu2 %v6924_v8  ;;  %v6900_v16 = vor.u32 %v10065_v13, %v6899_v11  ;;  %v6904_v17 = vor.u32 %v10063_v14, %v6901_v15  ;;  %v6907_v18 = vld [vmem:[%s16333_s3 + $0xc8] sm:$0xf]  ;;  %v10066_v19 = vld [vmem:[%s16333_s3 + $0xd4] sm:$0xf0]  ;;  %v10064_v20 = vld [vmem:[%s16333_s3 + $0xcc] sm:$0xf] }
   0x6   :  { %356 = vmatpush.bf16.msra.mxu3 %v6928_v12  ;;  %v6908_v21 = vor.u32 %v10066_v19, %v6907_v18  ;;  %v6909_v22 = vld [vmem:[%s16333_s3 + $0xd8] sm:$0xf0]  ;;  %v6883_v23 = vld [vmem:[%s16333_s3 + $0xa0] sm:$0xf]  ;;  %v10061_v24 = vld [vmem:[%s16333_s3 + $0xac] sm:$0xf0] }
   0x7   :  { %v6912_v25 = vor.u32 %v10064_v20, %v6909_v22  ;;  %v10059_v26 = vld [vmem:[%s16333_s3 + $0xa4] sm:$0xf]  ;;  %v6885_v27 = vld [vmem:[%s16333_s3 + $0xb0] sm:$0xf0]  ;;  %v6891_v28 = vld [vmem:[%s16333_s3 + $0xa8] sm:$0xf]  ;;  %v6884_v29 = vor.u32 %v10061_v24, %v6883_v23 }
   0x8   :  { %270 = vmatpush.bf16.msra.mxu0 %v6900_v16  ;;  %v10062_v30 = vld [vmem:[%s16333_s3 + $0xb4] sm:$0xf0]  ;;  %v10060_v31 = vld [vmem:[%s16333_s3 + $0xac] sm:$0xf]  ;;  %v6893_v32 = vld [vmem:[%s16333_s3 + $0xb8] sm:$0xf0]  ;;  %v6888_v33 = vor.u32 %v10059_v26, %v6885_v27 }
   0x9   :  { %299 = vmatpush.bf16.msra.mxu1 %v6904_v17  ;;  %328 = vmatpush.bf16.msra.mxu2 %v6908_v21  ;;  %v6892_v34 = vor.u32 %v10062_v30, %v6891_v28  ;;  %v6867_v35 = vld [vmem:[%s16333_s3 + $0x80] sm:$0xf]  ;;  %v10057_v36 = vld [vmem:[%s16333_s3 + $0x8c] sm:$0xf0]  ;;  %v10055_v37 = vld [vmem:[%s16333_s3 + $0x84] sm:$0xf]  ;;  %v6896_v38 = vor.u32 %v10060_v31, %v6893_v32 }
   0xa   :  { %357 = vmatpush.bf16.msra.mxu3 %v6912_v25  ;;  %v6869_v39 = vld [vmem:[%s16333_s3 + $0x90] sm:$0xf0]  ;;  %v6875_v40 = vld [vmem:[%s16333_s3 + $0x88] sm:$0xf]  ;;  %v10058_v41 = vld [vmem:[%s16333_s3 + $0x94] sm:$0xf0]  ;;  %v6868_v44 = vor.u32 %v10057_v36, %v6867_v35 }
   0xb   :  { %v10056_v42 = vld [vmem:[%s16333_s3 + $0x8c] sm:$0xf]  ;;  %v6877_v43 = vld [vmem:[%s16333_s3 + $0x98] sm:$0xf0]  ;;  %v6872_v45 = vor.u32 %v10055_v37, %v6869_v39  ;;  %v6876_v46 = vor.u32 %v10058_v41, %v6875_v40  ;;  %v6851_v47 = vld [vmem:[%s16333_s3 + $0x60] sm:$0xf] }
   0xc   :  { %271 = vmatpush.bf16.msra.mxu0 %v6884_v29  ;;  %v10053_v48 = vld [vmem:[%s16333_s3 + $0x6c] sm:$0xf0]  ;;  %v10051_v49 = vld [vmem:[%s16333_s3 + $0x64] sm:$0xf]  ;;  %v6880_v50 = vor.u32 %v10056_v42, %v6877_v43  ;;  %v6853_v51 = vld [vmem:[%s16333_s3 + $0x70] sm:$0xf0] }
   0xd   :  { %300 = vmatpush.bf16.msra.mxu1 %v6888_v33  ;;  %329 = vmatpush.bf16.msra.mxu2 %v6892_v34  ;;  %v6859_v52 = vld [vmem:[%s16333_s3 + $0x68] sm:$0xf]  ;;  %v10054_v53 = vld [vmem:[%s16333_s3 + $0x74] sm:$0xf0]  ;;  %v10052_v54 = vld [vmem:[%s16333_s3 + $0x6c] sm:$0xf]  ;;  %v6852_v56 = vor.u32 %v10053_v48, %v6851_v47  ;;  %v6856_v57 = vor.u32 %v10051_v49, %v6853_v51 }
   0xe   :  { %358 = vmatpush.bf16.msra.mxu3 %v6896_v38  ;;  %v6861_v55 = vld [vmem:[%s16333_s3 + $0x78] sm:$0xf0]  ;;  %v6860_v58 = vor.u32 %v10054_v53, %v6859_v52  ;;  %v6835_v59 = vld [vmem:[%s16333_s3 + $0x40] sm:$0xf]  ;;  %v10049_v60 = vld [vmem:[%s16333_s3 + $0x4c] sm:$0xf0] }
   0xf   :  { %v10047_v61 = vld [vmem:[%s16333_s3 + $0x44] sm:$0xf]  ;;  %v6864_v62 = vor.u32 %v10052_v54, %v6861_v55  ;;  %v6837_v63 = vld [vmem:[%s16333_s3 + $0x50] sm:$0xf0]  ;;  %v6843_v0 = vld [vmem:[%s16333_s3 + $0x48] sm:$0xf]  ;;  %v6836_v4 = vor.u32 %v10049_v60, %v6835_v59 }
  0x10   :  { %272 = vmatpush.bf16.msra.mxu0 %v6868_v44  ;;  %v10050_v1 = vld [vmem:[%s16333_s3 + $0x54] sm:$0xf0]  ;;  %v10048_v2 = vld [vmem:[%s16333_s3 + $0x4c] sm:$0xf]  ;;  %v6845_v3 = vld [vmem:[%s16333_s3 + $0x58] sm:$0xf0]  ;;  %v6840_v5 = vor.u32 %v10047_v61, %v6837_v63 }
  0x11   :  { %301 = vmatpush.bf16.msra.mxu1 %v6872_v45  ;;  %330 = vmatpush.bf16.msra.mxu2 %v6876_v46  ;;  %v6844_v6 = vor.u32 %v10050_v1, %v6843_v0  ;;  %v6819_v7 = vld [vmem:[%s16333_s3 + $0x20] sm:$0xf]  ;;  %v10045_v8 = vld [vmem:[%s16333_s3 + $0x2c] sm:$0xf0]  ;;  %v10043_v9 = vld [vmem:[%s16333_s3 + $0x24] sm:$0xf]  ;;  %v6848_v10 = vor.u32 %v10048_v2, %v6845_v3 }
  0x12   :  { %359 = vmatpush.bf16.msra.mxu3 %v6880_v50  ;;  %v6821_v11 = vld [vmem:[%s16333_s3 + $0x30] sm:$0xf0]  ;;  %v6827_v12 = vld [vmem:[%s16333_s3 + $0x28] sm:$0xf]  ;;  %v10046_v13 = vld [vmem:[%s16333_s3 + $0x34] sm:$0xf0]  ;;  %v6820_v16 = vor.u32 %v10045_v8, %v6819_v7 }
  0x13   :  { %v10044_v14 = vld [vmem:[%s16333_s3 + $0x2c] sm:$0xf]  ;;  %v6829_v15 = vld [vmem:[%s16333_s3 + $0x38] sm:$0xf0]  ;;  %v6803_v17 = vld [vmem:[%s16333_s3] sm:$0xf]  ;;  %v6824_v18 = vor.u32 %v10043_v9, %v6821_v11  ;;  %v6828_v19 = vor.u32 %v10046_v13, %v6827_v12 }
  0x14   :  { %273 = vmatpush.bf16.msra.mxu0 %v6852_v56  ;;  %v10041_v20 = vld [vmem:[%s16333_s3 + $0xc] sm:$0xf0]  ;;  %v10039_v21 = vld [vmem:[%s16333_s3 + $0x4] sm:$0xf]  ;;  %v6805_v22 = vld [vmem:[%s16333_s3 + $0x10] sm:$0xf0]  ;;  %v6832_v23 = vor.u32 %v10044_v14, %v6829_v15 }
  0x15   :  { %302 = vmatpush.bf16.msra.mxu1 %v6856_v57  ;;  %331 = vmatpush.bf16.msra.mxu2 %v6860_v58  ;;  %v6811_v24 = vld [vmem:[%s16333_s3 + $0x8] sm:$0xf]  ;;  %v10042_v25 = vld [vmem:[%s16333_s3 + $0x14] sm:$0xf0]  ;;  %v10040_v26 = vld [vmem:[%s16333_s3 + $0xc] sm:$0xf]  ;;  %v6804_v30 = vor.u32 %v10041_v20, %v6803_v17  ;;  %v6808_v33 = vor.u32 %v10039_v21, %v6805_v22 }
  0x16   :  { %360 = vmatpush.bf16.msra.mxu3 %v6864_v62  ;;  %v6813_v27 = vld [vmem:[%s16333_s3 + $0x18] sm:$0xf0]  ;;  %v7045_v28 = vld [vmem:[%s16334_s4 + $0xe0] sm:$0xf]  ;;  %v10101_v29 = vld [vmem:[%s16334_s4 + $0xec] sm:$0xf0]  ;;  %v6812_v34 = vor.u32 %v10042_v25, %v6811_v24 }
  0x17   :  { %v10099_v31 = vld [vmem:[%s16334_s4 + $0xe4] sm:$0xf]  ;;  %v7047_v32 = vld [vmem:[%s16334_s4 + $0xf0] sm:$0xf0]  ;;  %v6816_v36 = vor.u32 %v10040_v26, %v6813_v27  ;;  %v7046_v37 = vor.u32 %v10101_v29, %v7045_v28  ;;  %v7053_v38 = vld [vmem:[%s16334_s4 + $0xe8] sm:$0xf] }
  0x18   :  { %274 = vmatpush.bf16.msra.mxu0 %v6836_v4  ;;  %v10035_v35 = vld [vmem:[%s16335_s0] sm:$0xff]  ;;  %v10102_v39 = vld [vmem:[%s16334_s4 + $0xf4] sm:$0xf0]  ;;  %v10100_v40 = vld [vmem:[%s16334_s4 + $0xec] sm:$0xf]  ;;  %v7050_v41 = vor.u32 %v10099_v31, %v7047_v32 }
  0x19   :  { %303 = vmatpush.bf16.msra.mxu1 %v6840_v5  ;;  %332 = vmatpush.bf16.msra.mxu2 %v6844_v6  ;;  %v7055_v42 = vld [vmem:[%s16334_s4 + $0xf8] sm:$0xf0]  ;;  %v7029_v43 = vld [vmem:[%s16334_s4 + $0xc0] sm:$0xf]  ;;  %v10097_v44 = vld [vmem:[%s16334_s4 + $0xcc] sm:$0xf0]  ;;  %v7054_v47 = vor.u32 %v10102_v39, %v7053_v38 }
  0x1a   :  { %361 = vmatpush.bf16.msra.mxu3 %v6848_v10  ;;  %v10095_v45 = vld [vmem:[%s16334_s4 + $0xc4] sm:$0xf]  ;;  %v7031_v46 = vld [vmem:[%s16334_s4 + $0xd0] sm:$0xf0]  ;;  %v7058_v48 = vor.u32 %v10100_v40, %v7055_v42  ;;  %v7030_v49 = vor.u32 %v10097_v44, %v7029_v43  ;;  %v7037_v50 = vld [vmem:[%s16334_s4 + $0xc8] sm:$0xf] }
  0x1b   :  { %v10098_v51 = vld [vmem:[%s16334_s4 + $0xd4] sm:$0xf0]  ;;  %v10096_v52 = vld [vmem:[%s16334_s4 + $0xcc] sm:$0xf]  ;;  %v7034_v53 = vor.u32 %v10095_v45, %v7031_v46  ;;  %v7039_v54 = vld [vmem:[%s16334_s4 + $0xd8] sm:$0xf0] }
  0x1c   :  { %275 = vmatpush.bf16.msra.mxu0 %v6820_v16  ;;  %v7013_v55 = vld [vmem:[%s16334_s4 + $0xa0] sm:$0xf]  ;;  %v10093_v56 = vld [vmem:[%s16334_s4 + $0xac] sm:$0xf0]  ;;  %v10091_v57 = vld [vmem:[%s16334_s4 + $0xa4] sm:$0xf]  ;;  %v7038_v59 = vor.u32 %v10098_v51, %v7037_v50  ;;  %v7042_v60 = vor.u32 %v10096_v52, %v7039_v54 }
  0x1d   :  { %304 = vmatpush.bf16.msra.mxu1 %v6824_v18  ;;  %333 = vmatpush.bf16.msra.mxu2 %v6828_v19  ;;  %v7015_v58 = vld [vmem:[%s16334_s4 + $0xb0] sm:$0xf0]  ;;  %v7014_v61 = vor.u32 %v10093_v56, %v7013_v55  ;;  %v7021_v62 = vld [vmem:[%s16334_s4 + $0xa8] sm:$0xf]  ;;  %v10094_v63 = vld [vmem:[%s16334_s4 + $0xb4] sm:$0xf0] }
  0x1e   :  { %362 = vmatpush.bf16.msra.mxu3 %v6832_v23  ;;  %v10092_v0 = vld [vmem:[%s16334_s4 + $0xac] sm:$0xf]  ;;  %v7018_v1 = vor.u32 %v10091_v57, %v7015_v58  ;;  %v7023_v2 = vld [vmem:[%s16334_s4 + $0xb8] sm:$0xf0]  ;;  %v6997_v3 = vld [vmem:[%s16334_s4 + $0x80] sm:$0xf]  ;;  %v7022_v7 = vor.u32 %v10094_v63, %v7021_v62 }
  0x1f   :  { %v10089_v4 = vld [vmem:[%s16334_s4 + $0x8c] sm:$0xf0]  ;;  %v10087_v5 = vld [vmem:[%s16334_s4 + $0x84] sm:$0xf]  ;;  %v6999_v6 = vld [vmem:[%s16334_s4 + $0x90] sm:$0xf0]  ;;  %v7026_v8 = vor.u32 %v10092_v0, %v7023_v2 }
  0x20   :  { %276 = vmatpush.bf16.msra.mxu0 %v6804_v30  ;;  %v6998_v9 = vor.u32 %v10089_v4, %v6997_v3  ;;  %v7005_v10 = vld [vmem:[%s16334_s4 + $0x88] sm:$0xf]  ;;  %v10090_v11 = vld [vmem:[%s16334_s4 + $0x94] sm:$0xf0]  ;;  %v10088_v12 = vld [vmem:[%s16334_s4 + $0x8c] sm:$0xf]  ;;  %v7002_v13 = vor.u32 %v10087_v5, %v6999_v6 }
  0x21   :  { %305 = vmatpush.bf16.msra.mxu1 %v6808_v33  ;;  %334 = vmatpush.bf16.msra.mxu2 %v6812_v34  ;;  %v7007_v14 = vld [vmem:[%s16334_s4 + $0x98] sm:$0xf0]  ;;  %v6981_v15 = vld [vmem:[%s16334_s4 + $0x60] sm:$0xf]  ;;  %v10085_v16 = vld [vmem:[%s16334_s4 + $0x6c] sm:$0xf0]  ;;  %v7006_v20 = vor.u32 %v10090_v11, %v7005_v10 }
  0x22   :  { %363 = vmatpush.bf16.msra.mxu3 %v6816_v36  ;;  %v10083_v17 = vld [vmem:[%s16334_s4 + $0x64] sm:$0xf]  ;;  %v6983_v18 = vld [vmem:[%s16334_s4 + $0x70] sm:$0xf0]  ;;  %v10036_v19 = vld [vmem:[%s16335_s0 + $0x8] sm:$0xff]  ;;  %v7010_v21 = vor.u32 %v10088_v12, %v7007_v14  ;;  %v6982_v22 = vor.u32 %v10085_v16, %v6981_v15 }
  0x23   :  { %277 = vmatmul.bf16.vlgmr.msra.gmra.mxu0 %v10035_v35  ;;  %v6989_v23 = vld [vmem:[%s16334_s4 + $0x68] sm:$0xf]  ;;  %v10086_v24 = vld [vmem:[%s16334_s4 + $0x74] sm:$0xf0]  ;;  %v10084_v25 = vld [vmem:[%s16334_s4 + $0x6c] sm:$0xf]  ;;  %v6986_v26 = vor.u32 %v10083_v17, %v6983_v18 }
  0x24   :  { %631 = vmatpush.bf16.msrb.mxu0 %v7046_v37  ;;  %306 = vmatmul.bf16.vlgmr.msra.gmra.mxu1 %v10035_v35  ;;  %v6991_v27 = vld [vmem:[%s16334_s4 + $0x78] sm:$0xf0]  ;;  %v6965_v28 = vld [vmem:[%s16334_s4 + $0x40] sm:$0xf]  ;;  %v10081_v29 = vld [vmem:[%s16334_s4 + $0x4c] sm:$0xf0]  ;;  %v6990_v32 = vor.u32 %v10086_v24, %v6989_v23 }
  0x25   :  { %644 = vmatpush.bf16.msrb.mxu1 %v7050_v41  ;;  %335 = vmatmul.bf16.vlgmr.msra.gmra.mxu2 %v10035_v35  ;;  %v10079_v30 = vld [vmem:[%s16334_s4 + $0x44] sm:$0xf]  ;;  %v6967_v31 = vld [vmem:[%s16334_s4 + $0x50] sm:$0xf0]  ;;  %v6994_v33 = vor.u32 %v10084_v25, %v6991_v27  ;;  %v6966_v34 = vor.u32 %v10081_v29, %v6965_v28  ;;  %v10082_v36 = vld [vmem:[%s16334_s4 + $0x54] sm:$0xf0] }
  0x26   :  { %364 = vmatmul.bf16.vlgmr.msra.gmra.mxu3 %v10035_v35  ;;  %657 = vmatpush.bf16.msrb.mxu2 %v7054_v47  ;;  %v6973_v35 = vld [vmem:[%s16334_s4 + $0x48] sm:$0xf]  ;;  %v6970_v37 = vor.u32 %v10079_v30, %v6967_v31  ;;  %v10080_v38 = vld [vmem:[%s16334_s4 + $0x4c] sm:$0xf]  ;;  %v6975_v39 = vld [vmem:[%s16334_s4 + $0x58] sm:$0xf0] }
  0x27   :  { %670 = vmatpush.bf16.msrb.mxu3 %v7058_v48  ;;  %v6974_v40 = vor.u32 %v10082_v36, %v6973_v35  ;;  %v6949_v41 = vld [vmem:[%s16334_s4 + $0x20] sm:$0xf]  ;;  %v10077_v42 = vld [vmem:[%s16334_s4 + $0x2c] sm:$0xf0]  ;;  %v10075_v43 = vld [vmem:[%s16334_s4 + $0x24] sm:$0xf]  ;;  %v6978_v44 = vor.u32 %v10080_v38, %v6975_v39 }
  0x28   :  { %632 = vmatpush.bf16.msrb.mxu0 %v7030_v49  ;;  %v6950_v45 = vor.u32 %v10077_v42, %v6949_v41  ;;  %v6951_v46 = vld [vmem:[%s16334_s4 + $0x30] sm:$0xf0]  ;;  %v6957_v47 = vld [vmem:[%s16334_s4 + $0x28] sm:$0xf]  ;;  %v10078_v48 = vld [vmem:[%s16334_s4 + $0x34] sm:$0xf0] }
  0x29   :  { %645 = vmatpush.bf16.msrb.mxu1 %v7034_v53  ;;  %v6954_v49 = vor.u32 %v10075_v43, %v6951_v46  ;;  %v10076_v50 = vld [vmem:[%s16334_s4 + $0x2c] sm:$0xf]  ;;  %v6959_v51 = vld [vmem:[%s16334_s4 + $0x38] sm:$0xf0]  ;;  %v6933_v52 = vld [vmem:[%s16334_s4] sm:$0xf]  ;;  %v6958_v56 = vor.u32 %v10078_v48, %v6957_v47 }
  0x2a   :  { %658 = vmatpush.bf16.msrb.mxu2 %v7038_v59  ;;  %v10073_v53 = vld [vmem:[%s16334_s4 + $0xc] sm:$0xf0]  ;;  %v10071_v54 = vld [vmem:[%s16334_s4 + $0x4] sm:$0xf]  ;;  %v6935_v55 = vld [vmem:[%s16334_s4 + $0x10] sm:$0xf0]  ;;  %v6962_v57 = vor.u32 %v10076_v50, %v6959_v51 }
  0x2b   :  { %671 = vmatpush.bf16.msrb.mxu3 %v7042_v60  ;;  %v6934_v58 = vor.u32 %v10073_v53, %v6933_v52  ;;  %v6941_v59 = vld [vmem:[%s16334_s4 + $0x8] sm:$0xf]  ;;  %v10074_v60 = vld [vmem:[%s16334_s4 + $0x14] sm:$0xf0]  ;;  %v10072_v62 = vld [vmem:[%s16334_s4 + $0xc] sm:$0xf] }
  0x2c   :  { %633 = vmatpush.bf16.msrb.mxu0 %v7014_v61  ;;  %v6938_v61 = vor.u32 %v10071_v54, %v6935_v55  ;;  %v6943_v63 = vld [vmem:[%s16334_s4 + $0x18] sm:$0xf0]  ;;  %v6942_v0 = vor.u32 %v10074_v60, %v6941_v59  ;;  %v10037_v2 = vld [vmem:[%s16335_s0 + $0x10] sm:$0xff]  ;;  %v427_v4 = vld [vmem:[%s16336_s1] sm:$0xff] }
  0x2d   :  { %646 = vmatpush.bf16.msrb.mxu1 %v7018_v1  ;;  %v6946_v1 = vor.u32 %v10072_v62, %v6943_v63  ;;  %v10038_v3 = vld [vmem:[%s16335_s0 + $0x18] sm:$0xff]  ;;  %v438_v5 = vpack.c.bf16 %v427_v4, %v427_v4  ;;  %v7301_v6 = vld [vmem:[%s16337_s6 + $0x1e0] sm:$0xf]  ;;  %v7303_v10 = vld [vmem:[%s16337_s6 + $0x1f0] sm:$0xf0] }
  0x2e   :  { %659 = vmatpush.bf16.msrb.mxu2 %v7022_v7  ;;  %v10165_v7 = vld [vmem:[%s16337_s6 + $0x1ec] sm:$0xf0]  ;;  %v7285_v12 = vld [vmem:[%s16337_s6 + $0x1c0] sm:$0xf]  ;;  %v10159_v14 = vld [vmem:[%s16337_s6 + $0x1c4] sm:$0xf] }
  0x2f   :  { %672 = vmatpush.bf16.msrb.mxu3 %v7026_v8  ;;  %v10163_v8 = vld [vmem:[%s16337_s6 + $0x1e4] sm:$0xf]  ;;  %v7287_v16 = vld [vmem:[%s16337_s6 + $0x1d0] sm:$0xf0]  ;;  %v7269_v18 = vld [vmem:[%s16337_s6 + $0x1a0] sm:$0xf] }
  0x30   :  { %634 = vmatpush.bf16.msrb.mxu0 %v6998_v9  ;;  %v7302_v9 = vor.u32 %v10165_v7, %v7301_v6  ;;  %v7306_v11 = vor.u32 %v10163_v8, %v7303_v10  ;;  %v7290_v17 = vor.u32 %v10159_v14, %v7287_v16  ;;  %v7253_v24 = vld [vmem:[%s16337_s6 + $0x180] sm:$0xf]  ;;  %v10153_v25 = vld [vmem:[%s16337_s6 + $0x18c] sm:$0xf0]  ;;  %v7255_v28 = vld [vmem:[%s16337_s6 + $0x190] sm:$0xf0] }
  0x31   :  { %647 = vmatpush.bf16.msrb.mxu1 %v7002_v13  ;;  %v10161_v13 = vld [vmem:[%s16337_s6 + $0x1cc] sm:$0xf0]  ;;  %v7254_v27 = vor.u32 %v10153_v25, %v7253_v24  ;;  %v7237_v30 = vld [vmem:[%s16337_s6 + $0x160] sm:$0xf]  ;;  %v10143_v38 = vld [vmem:[%s16337_s6 + $0x144] sm:$0xf] }
  0x32   :  { %660 = vmatpush.bf16.msrb.mxu2 %v7006_v20  ;;  %v7286_v15 = vor.u32 %v10161_v13, %v7285_v12  ;;  %v10155_v20 = vld [vmem:[%s16337_s6 + $0x1a4] sm:$0xf]  ;;  %v10149_v31 = vld [vmem:[%s16337_s6 + $0x16c] sm:$0xf0]  ;;  %v7221_v36 = vld [vmem:[%s16337_s6 + $0x140] sm:$0xf] }
  0x33   :  { %673 = vmatpush.bf16.msrb.mxu3 %v7010_v21  ;;  %282 = vmatmul.bf16.gmra.mxu0 %v10036_v19  ;;  %v7205_v42 = vld [vmem:[%s16337_s6 + $0x120] sm:$0xf]  ;;  %v10141_v43 = vld [vmem:[%s16337_s6 + $0x12c] sm:$0xf0]  ;;  %v7207_v46 = vld [vmem:[%s16337_s6 + $0x130] sm:$0xf0] }
  0x34   :  { %635 = vmatpush.bf16.msrb.mxu0 %v6982_v22  ;;  %311 = vmatmul.bf16.gmra.mxu1 %v10036_v19  ;;  %v7271_v22 = vld [vmem:[%s16337_s6 + $0x1b0] sm:$0xf0]  ;;  %v7189_v50 = vld [vmem:[%s16337_s6 + $0x100] sm:$0xf]  ;;  %v10137_v51 = vld [vmem:[%s16337_s6 + $0x10c] sm:$0xf0] }
  0x35   :  { %648 = vmatpush.bf16.msrb.mxu1 %v6986_v26  ;;  %340 = vmatmul.bf16.gmra.mxu2 %v10036_v19  ;;  %v7274_v23 = vor.u32 %v10155_v20, %v7271_v22  ;;  %v10151_v26 = vld [vmem:[%s16337_s6 + $0x184] sm:$0xf]  ;;  %v7190_v53 = vor.u32 %v10137_v51, %v7189_v50  ;;  %v7191_v54 = vld [vmem:[%s16337_s6 + $0x110] sm:$0xf0]  ;;  %v7309_v55 = vld [vmem:[%s16337_s6 + $0x1e8] sm:$0xf] }
  0x36   :  { %369 = vmatmul.bf16.gmra.mxu3 %v10036_v19  ;;  %661 = vmatpush.bf16.msrb.mxu2 %v6990_v32  ;;  %v10157_v19 = vld [vmem:[%s16337_s6 + $0x1ac] sm:$0xf0]  ;;  %v7258_v29 = vor.u32 %v10151_v26, %v7255_v28  ;;  %v10147_v32 = vld [vmem:[%s16337_s6 + $0x164] sm:$0xf]  ;;  %v10164_v59 = vld [vmem:[%s16337_s6 + $0x1ec] sm:$0xf] }
  0x37   :  { %674 = vmatpush.bf16.msrb.mxu3 %v6994_v33  ;;  %v7270_v21 = vor.u32 %v10157_v19, %v7269_v18  ;;  %v7238_v33 = vor.u32 %v10149_v31, %v7237_v30  ;;  %v10135_v52 = vld [vmem:[%s16337_s6 + $0x104] sm:$0xf]  ;;  %v7311_v60 = vld [vmem:[%s16337_s6 + $0x1f8] sm:$0xf0]  ;;  %v7173_v62 = vld [vmem:[%s16337_s6 + $0xe0] sm:$0xf] }
  0x38   :  { %636 = vmatpush.bf16.msrb.mxu0 %v6966_v34  ;;  %v7239_v34 = vld [vmem:[%s16337_s6 + $0x170] sm:$0xf0]  ;;  %v10133_v63 = vld [vmem:[%s16337_s6 + $0xec] sm:$0xf0]  ;;  %v10162_v4 = vld [vmem:[%s16337_s6 + $0x1d4] sm:$0xf0] }
  0x39   :  { %649 = vmatpush.bf16.msrb.mxu1 %v6970_v37  ;;  %v7242_v35 = vor.u32 %v10147_v32, %v7239_v34  ;;  %v10145_v37 = vld [vmem:[%s16337_s6 + $0x14c] sm:$0xf0]  ;;  %v10160_v8 = vld [vmem:[%s16337_s6 + $0x1cc] sm:$0xf]  ;;  %v7157_v14 = vld [vmem:[%s16337_s6 + $0xc0] sm:$0xf] }
  0x3a   :  { %662 = vmatpush.bf16.msrb.mxu2 %v6974_v40  ;;  %v7222_v39 = vor.u32 %v10145_v37, %v7221_v36  ;;  %v7223_v40 = vld [vmem:[%s16337_s6 + $0x150] sm:$0xf0]  ;;  %v10127_v16 = vld [vmem:[%s16337_s6 + $0xc4] sm:$0xf]  ;;  %v7277_v19 = vld [vmem:[%s16337_s6 + $0x1a8] sm:$0xf] }
  0x3b   :  { %675 = vmatpush.bf16.msrb.mxu3 %v6978_v44  ;;  %v7226_v41 = vor.u32 %v10143_v38, %v7223_v40  ;;  %v10139_v44 = vld [vmem:[%s16337_s6 + $0x124] sm:$0xf]  ;;  %v7159_v18 = vld [vmem:[%s16337_s6 + $0xd0] sm:$0xf0]  ;;  %v10158_v20 = vld [vmem:[%s16337_s6 + $0x1b4] sm:$0xf0] }
  0x3c   :  { %637 = vmatpush.bf16.msrb.mxu0 %v6950_v45  ;;  %v7206_v45 = vor.u32 %v10141_v43, %v7205_v42  ;;  %v7210_v47 = vor.u32 %v10139_v44, %v7207_v46  ;;  %v7278_v22 = vor.u32 %v10158_v20, %v7277_v19  ;;  %v7279_v24 = vld [vmem:[%s16337_s6 + $0x1b8] sm:$0xf0]  ;;  %v75_v25 = vld [vmem:[%s16338_s5] sm:$0xf]  ;;  %v10125_v28 = vld [vmem:[%s16337_s6 + $0xac] sm:$0xf0] }
  0x3d   :  { %650 = vmatpush.bf16.msrb.mxu1 %v6954_v49  ;;  %v7143_v31 = vld [vmem:[%s16337_s6 + $0xb0] sm:$0xf0]  ;;  %v7261_v32 = vld [vmem:[%s16337_s6 + $0x188] sm:$0xf]  ;;  %v11651_v34 = vperm.slane %v75_v25, 0  ;;  %v11661_v40 = vperm.slane %v75_v25, 1 }
  0x3e   :  { %663 = vmatpush.bf16.msrb.mxu2 %v6958_v56  ;;  %v10166_v56 = vld [vmem:[%s16337_s6 + $0x1f4] sm:$0xf0]  ;;  %v10152_v38 = vld [vmem:[%s16337_s6 + $0x18c] sm:$0xf]  ;;  %v7125_v46 = vld [vmem:[%s16337_s6 + $0x80] sm:$0xf] }
  0x3f   :  { %676 = vmatpush.bf16.msrb.mxu3 %v6962_v57  ;;  %v7194_v57 = vor.u32 %v10135_v52, %v7191_v54  ;;  %v10119_v50 = vld [vmem:[%s16337_s6 + $0x84] sm:$0xf]  ;;  %v7245_v54 = vld [vmem:[%s16337_s6 + $0x168] sm:$0xf] }
  0x40   :  { %638 = vmatpush.bf16.msrb.mxu0 %v6934_v58  ;;  %v7310_v58 = vor.u32 %v10166_v56, %v7309_v55  ;;  %v10150_v55 = vld [vmem:[%s16337_s6 + $0x174] sm:$0xf0] }
  0x41   :  { %651 = vmatpush.bf16.msrb.mxu1 %v6938_v61  ;;  %v7314_v61 = vor.u32 %v10164_v59, %v7311_v60  ;;  %v7247_v59 = vld [vmem:[%s16337_s6 + $0x178] sm:$0xf0]  ;;  %v11695_v60 = vperm.slane %v75_v25, 2 }
  0x42   :  { %664 = vmatpush.bf16.msrb.mxu2 %v6942_v0  ;;  %v10131_v0 = vld [vmem:[%s16337_s6 + $0xe4] sm:$0xf] }
  0x43   :  { %677 = vmatpush.bf16.msrb.mxu3 %v6946_v1  ;;  %287 = vmatmul.bf16.gmra.mxu0 %v10037_v2  ;;  %v7174_v1 = vor.u32 %v10133_v63, %v7173_v62  ;;  %v7109_v62 = vld [vmem:[%s16337_s6 + $0x60] sm:$0xf]  ;;  %v10117_v63 = vld [vmem:[%s16337_s6 + $0x6c] sm:$0xf0] }
  0x44   :  { %316 = vmatmul.bf16.gmra.mxu1 %v10037_v2 }
  0x45   :  { %345 = vmatmul.bf16.gmra.mxu2 %v10037_v2  ;;  %1107 = vmatpush.bf16.msra.mxu1 %v7302_v9  ;;  %v7295_v9 = vld [vmem:[%s16337_s6 + $0x1d8] sm:$0xf0] }
  0x46   :  { %374 = vmatmul.bf16.gmra.mxu3 %v10037_v2  ;;  %v7175_v2 = vld [vmem:[%s16337_s6 + $0xf0] sm:$0xf0]  ;;  %1094 = vmatpush.bf16.msra.mxu0 %v7174_v1  ;;  %v7298_v12 = vor.u32 %v10160_v8, %v7295_v9  ;;  %v7110_v1 = vor.u32 %v10117_v63, %v7109_v62 }
  0x47   :  { %1133 = vmatpush.bf16.msra.mxu3 %v7306_v11  ;;  %v7178_v6 = vor.u32 %v10131_v0, %v7175_v2  ;;  %v10115_v0 = vld [vmem:[%s16337_s6 + $0x64] sm:$0xf]  ;;  %v7111_v2 = vld [vmem:[%s16337_s6 + $0x70] sm:$0xf0] }
  0x48   :  { %v7114_v8 = vor.u32 %v10115_v0, %v7111_v2  ;;  %v7061_v2 = vld [vmem:[%s16337_s6] sm:$0xf] }
  0x49   :  { %1108 = vmatpush.bf16.msra.mxu1 %v7286_v15  ;;  %1120 = vmatpush.bf16.msra.mxu2 %v7178_v6  ;;  %v10129_v15 = vld [vmem:[%s16337_s6 + $0xcc] sm:$0xf0]  ;;  %v11715_v6 = vperm.slane %v75_v25, 3  ;;  %v7095_v25 = vld [vmem:[%s16337_s6 + $0x50] sm:$0xf0] }
  0x4b   :  { %1134 = vmatpush.bf16.msra.mxu3 %v7290_v17  ;;  %v7158_v17 = vor.u32 %v10129_v15, %v7157_v14  ;;  %v7231_v14 = vld [vmem:[%s16337_s6 + $0x158] sm:$0xf0] }
  0x4d   :  { %1109 = vmatpush.bf16.msra.mxu1 %v7270_v21  ;;  %v7162_v21 = vor.u32 %v10127_v16, %v7159_v18  ;;  %1095 = vmatpush.bf16.msra.mxu0 %v7158_v17 }
  0x4f   :  { %1135 = vmatpush.bf16.msra.mxu3 %v7274_v23  ;;  %v10156_v23 = vld [vmem:[%s16337_s6 + $0x1ac] sm:$0xf]  ;;  %1121 = vmatpush.bf16.msra.mxu2 %v7162_v21  ;;  %v7093_v21 = vld [vmem:[%s16337_s6 + $0x40] sm:$0xf] }
  0x50   :  { %v7282_v26 = vor.u32 %v10156_v23, %v7279_v24  ;;  %v10111_v23 = vld [vmem:[%s16337_s6 + $0x44] sm:$0xf] }
  0x51   :  { %1110 = vmatpush.bf16.msra.mxu1 %v7254_v27  ;;  %v7141_v27 = vld [vmem:[%s16337_s6 + $0xa0] sm:$0xf] }
  0x52   :  { %v7142_v30 = vor.u32 %v10125_v28, %v7141_v27  ;;  %v10142_v27 = vld [vmem:[%s16337_s6 + $0x134] sm:$0xf0]  ;;  %v7098_v28 = vor.u32 %v10111_v23, %v7095_v25  ;;  %v10191_v25 = vld [vmem:[%s16334_s4 + $0xc4] sm:$0xf] }
  0x53   :  { %292 = vmatmul.bf16.gmra.mxu0 %v10038_v3  ;;  %1136 = vmatpush.bf16.msra.mxu3 %v7258_v29  ;;  %v10123_v29 = vld [vmem:[%s16337_s6 + $0xa4] sm:$0xf] }
  0x54   :  { %321 = vmatmul.bf16.gmra.mxu1 %v10038_v3  ;;  %v7146_v36 = vor.u32 %v10123_v29, %v7143_v31  ;;  %1096 = vmatpush.bf16.msra.mxu0 %v7142_v30  ;;  %v10140_v30 = vld [vmem:[%s16337_s6 + $0x12c] sm:$0xf]  ;;  %v7215_v31 = vld [vmem:[%s16337_s6 + $0x138] sm:$0xf0] }
  0x55   :  { %350 = vmatmul.bf16.gmra.mxu2 %v10038_v3  ;;  %1111 = vmatpush.bf16.msra.mxu1 %v7238_v33  ;;  %v10154_v33 = vld [vmem:[%s16337_s6 + $0x194] sm:$0xf0] }
  0x56   :  { %379 = vmatmul.bf16.gmra.mxu3 %v10038_v3  ;;  %v7293_v3 = vld [vmem:[%s16337_s6 + $0x1c8] sm:$0xf]  ;;  %v7262_v37 = vor.u32 %v10154_v33, %v7261_v32  ;;  %1122 = vmatpush.bf16.msra.mxu2 %v7146_v36  ;;  %v7218_v32 = vor.u32 %v10140_v30, %v7215_v31  ;;  %v7077_v33 = vld [vmem:[%s16337_s6 + $0x20] sm:$0xf]  ;;  %v10109_v36 = vld [vmem:[%s16337_s6 + $0x2c] sm:$0xf0] }
  0x57   :  { %1137 = vmatpush.bf16.msra.mxu3 %v7242_v35  ;;  %v7294_v7 = vor.u32 %v10162_v4, %v7293_v3  ;;  %v7229_v3 = vld [vmem:[%s16337_s6 + $0x148] sm:$0xf]  ;;  %v10146_v4 = vld [vmem:[%s16337_s6 + $0x154] sm:$0xf0] }
  0x58   :  { %v7230_v9 = vor.u32 %v10146_v4, %v7229_v3  ;;  %v10105_v3 = vld [vmem:[%s16337_s6 + $0xc] sm:$0xf0]  ;;  %v7165_v31 = vld [vmem:[%s16337_s6 + $0xc8] sm:$0xf] }
  0x59   :  { %1112 = vmatpush.bf16.msra.mxu1 %v7222_v39  ;;  %v7263_v39 = vld [vmem:[%s16337_s6 + $0x198] sm:$0xf0] }
  0x5a   :  { %v7266_v43 = vor.u32 %v10152_v38, %v7263_v39  ;;  %v7078_v38 = vor.u32 %v10109_v36, %v7077_v33  ;;  %v7079_v39 = vld [vmem:[%s16337_s6 + $0x30] sm:$0xf0]  ;;  %v10128_v33 = vld [vmem:[%s16337_s6 + $0xcc] sm:$0xf] }
  0x5b   :  { %1138 = vmatpush.bf16.msra.mxu3 %v7226_v41 }
  0x5d   :  { %1113 = vmatpush.bf16.msra.mxu1 %v7206_v45 }
  0x5f   :  { %1139 = vmatpush.bf16.msra.mxu3 %v7210_v47  ;;  %v10121_v47 = vld [vmem:[%s16337_s6 + $0x8c] sm:$0xf0] }
  0x60   :  { %v7126_v52 = vor.u32 %v10121_v47, %v7125_v46 }
  0x61   :  { %1114 = vmatpush.bf16.msra.mxu1 %v7190_v53  ;;  %v7127_v53 = vld [vmem:[%s16337_s6 + $0x90] sm:$0xf0] }
  0x62   :  { %v7130_v56 = vor.u32 %v10119_v50, %v7127_v53  ;;  %1097 = vmatpush.bf16.msra.mxu0 %v7126_v52  ;;  %v10138_v50 = vld [vmem:[%s16337_s6 + $0x114] sm:$0xf0]  ;;  %v10136_v52 = vld [vmem:[%s16337_s6 + $0x10c] sm:$0xf]  ;;  %v7199_v53 = vld [vmem:[%s16337_s6 + $0x118] sm:$0xf0] }
  0x63   :  { %639 = vmatmul.bf16.vlgmr.msrb.gmra.mxu0 %v438_v5  ;;  %1140 = vmatpush.bf16.msra.mxu3 %v7194_v57  ;;  %v7246_v57 = vor.u32 %v10150_v55, %v7245_v54 }
  0x64   :  { %652 = vmatmul.bf16.vlgmr.msrb.gmra.mxu1 %v438_v5  ;;  %1123 = vmatpush.bf16.msra.mxu2 %v7130_v56 }
  0x65   :  { %665 = vmatmul.bf16.vlgmr.msrb.gmra.mxu2 %v438_v5  ;;  %1159 = vmatpush.bf16.msrb.mxu1 %v7310_v58  ;;  %v10148_v58 = vld [vmem:[%s16337_s6 + $0x16c] sm:$0xf] }
  0x66   :  { %678 = vmatmul.bf16.vlgmr.msrb.gmra.mxu3 %v438_v5  ;;  %1098 = vmatpush.bf16.msra.mxu0 %v7110_v1  ;;  %v7439_v1 = vld [vmem:[%s16334_s4 + $0xf8] sm:$0xf0] }
  0x67   :  { %1185 = vmatpush.bf16.msrb.mxu3 %v7314_v61  ;;  %v7250_v61 = vor.u32 %v10148_v58, %v7247_v59  ;;  %v10195_v58 = vld [vmem:[%s16334_s4 + $0xe4] sm:$0xf]  ;;  %v7431_v59 = vld [vmem:[%s16334_s4 + $0xf0] sm:$0xf0] }
  0x68   :  { %1124 = vmatpush.bf16.msra.mxu2 %v7114_v8  ;;  %v7434_v0 = vor.u32 %v10195_v58, %v7431_v59  ;;  %v7062_v8 = vor.u32 %v10105_v3, %v7061_v2  ;;  %v7151_v2 = vld [vmem:[%s16337_s6 + $0xb8] sm:$0xf0]  ;;  %v10183_v3 = vld [vmem:[%s16334_s4 + $0x84] sm:$0xf] }
  0x69   :  { %1160 = vmatpush.bf16.msrb.mxu1 %v7294_v7 }
  0x6b   :  { %1186 = vmatpush.bf16.msrb.mxu3 %v7298_v12  ;;  %v10144_v12 = vld [vmem:[%s16337_s6 + $0x14c] sm:$0xf] }
  0x6c   :  { %v7234_v18 = vor.u32 %v10144_v12, %v7231_v14  ;;  %1125 = vmatpush.bf16.msra.mxu2 %v7098_v28  ;;  %v7063_v12 = vld [vmem:[%s16337_s6 + $0x10] sm:$0xf0]  ;;  %v7181_v14 = vld [vmem:[%s16337_s6 + $0xe8] sm:$0xf] }
  0x6d   :  { %1161 = vmatpush.bf16.msrb.mxu1 %v7278_v22  ;;  %v10113_v22 = vld [vmem:[%s16337_s6 + $0x4c] sm:$0xf0] }
  0x6e   :  { %v7094_v24 = vor.u32 %v10113_v22, %v7093_v21  ;;  %v10132_v21 = vld [vmem:[%s16337_s6 + $0xec] sm:$0xf]  ;;  %v7183_v22 = vld [vmem:[%s16337_s6 + $0xf8] sm:$0xf0] }
  0x6f   :  { %1187 = vmatpush.bf16.msrb.mxu3 %v7282_v26  ;;  %v7213_v26 = vld [vmem:[%s16337_s6 + $0x128] sm:$0xf] }
  0x70   :  { %v7214_v29 = vor.u32 %v10142_v27, %v7213_v26  ;;  %1099 = vmatpush.bf16.msra.mxu0 %v7094_v24  ;;  %v7186_v24 = vor.u32 %v10132_v21, %v7183_v22  ;;  %v7415_v26 = vld [vmem:[%s16334_s4 + $0xd0] sm:$0xf0]  ;;  %v10192_v27 = vld [vmem:[%s16334_s4 + $0xcc] sm:$0xf]  ;;  %v10122_v21 = vld [vmem:[%s16337_s6 + $0x94] sm:$0xf0] }
  0x71   :  { %1162 = vmatpush.bf16.msrb.mxu1 %v7262_v37  ;;  %v10107_v37 = vld [vmem:[%s16337_s6 + $0x24] sm:$0xf]  ;;  %v7418_v28 = vor.u32 %v10191_v25, %v7415_v26  ;;  %v7135_v25 = vld [vmem:[%s16337_s6 + $0x98] sm:$0xf0] }
  0x72   :  { %v7082_v46 = vor.u32 %v10107_v37, %v7079_v39  ;;  %v10187_v39 = vld [vmem:[%s16334_s4 + $0xa4] sm:$0xf] }
  0x73   :  { %1188 = vmatpush.bf16.msrb.mxu3 %v7266_v43  ;;  %v7197_v43 = vld [vmem:[%s16337_s6 + $0x108] sm:$0xf]  ;;  %v10179_v26 = vld [vmem:[%s16334_s4 + $0x64] sm:$0xf] }
  0x74   :  { %1100 = vmatpush.bf16.msra.mxu0 %v7078_v38  ;;  %v7198_v56 = vor.u32 %v10138_v50, %v7197_v43  ;;  %1126 = vmatpush.bf16.msra.mxu2 %v7082_v46  ;;  %v7167_v38 = vld [vmem:[%s16337_s6 + $0xd8] sm:$0xf0] }
  0x75   :  { %1163 = vmatpush.bf16.msrb.mxu1 %v7246_v57  ;;  %v7202_v57 = vor.u32 %v10136_v52, %v7199_v53  ;;  %v7170_v52 = vor.u32 %v10128_v33, %v7167_v38 }
  0x77   :  { %1189 = vmatpush.bf16.msrb.mxu3 %v7250_v61  ;;  %v10196_v61 = vld [vmem:[%s16334_s4 + $0xec] sm:$0xf] }
  0x78   :  { %1101 = vmatpush.bf16.msra.mxu0 %v7062_v8 }
  0x79   :  { %1164 = vmatpush.bf16.msrb.mxu1 %v7230_v9  ;;  %v10103_v9 = vld [vmem:[%s16337_s6 + $0x4] sm:$0xf] }
  0x7b   :  { %1190 = vmatpush.bf16.msrb.mxu3 %v7234_v18  ;;  %v10134_v18 = vld [vmem:[%s16337_s6 + $0xf4] sm:$0xf0] }
  0x7c   :  { %v7182_v23 = vor.u32 %v10134_v18, %v7181_v14  ;;  %v7391_v14 = vld [vmem:[%s16334_s4 + $0x98] sm:$0xf0]  ;;  %v7133_v18 = vld [vmem:[%s16337_s6 + $0x88] sm:$0xf] }
  0x7d   :  { %1165 = vmatpush.bf16.msrb.mxu1 %v7214_v29  ;;  %v7423_v29 = vld [vmem:[%s16334_s4 + $0xd8] sm:$0xf0] }
  0x7e   :  { %1146 = vmatpush.bf16.msrb.mxu0 %v7182_v23  ;;  %v7426_v30 = vor.u32 %v10192_v27, %v7423_v29  ;;  %v7134_v23 = vor.u32 %v10122_v21, %v7133_v18 }
  0x7f   :  { %1191 = vmatpush.bf16.msrb.mxu3 %v7218_v32  ;;  %v10130_v32 = vld [vmem:[%s16337_s6 + $0xd4] sm:$0xf0] }
  0x80   :  { %v7166_v37 = vor.u32 %v10130_v32, %v7165_v31  ;;  %v10180_v31 = vld [vmem:[%s16334_s4 + $0x6c] sm:$0xf]  ;;  %v7375_v32 = vld [vmem:[%s16334_s4 + $0x78] sm:$0xf0] }
  0x81   :  { %1166 = vmatpush.bf16.msrb.mxu1 %v7198_v56  ;;  %v7407_v56 = vld [vmem:[%s16334_s4 + $0xb8] sm:$0xf0]  ;;  %v7378_v38 = vor.u32 %v10180_v31, %v7375_v32  ;;  %v7085_v32 = vld [vmem:[%s16337_s6 + $0x28] sm:$0xf] }
  0x82   :  { %1147 = vmatpush.bf16.msrb.mxu0 %v7166_v37 }
  0x83   :  { %1192 = vmatpush.bf16.msrb.mxu3 %v7202_v57 }
  0xa0   :  { %v11546_v48 = vpop.f32.mrf.mxu0 }
  0xa1   :  { %v11548_v49 = vpop.f32.mrf.mxu1 }
  0xa8   :  { %v11592_v5 = vpop.f32.mrf.mxu2  ;;  %v11602_v11 = vpop.f32.mrf.mxu0 }
  0xa9   :  { %v11600_v10 = vpop.f32.mrf.mxu3  ;;  %v11604_v13 = vpop.f32.mrf.mxu1 }
  0xb0   :  { %v11653_v35 = vpop.f32.mrf.mxu2  ;;  %v283_v42 = vpop.f32.mrf.mxu0 }
  0xb1   :  { %v11663_v41 = vpop.f32.mrf.mxu3  ;;  %v11666_v44 = vadd.f32 %v283_v42, %v11651_v34  ;;  %v312_v45 = vpop.f32.mrf.mxu1  ;;  %v6929_v42 = vld [vmem:[%s16336_s1 + $0x8] sm:$0xff] }
  0xb2   :  { %v11678_v51 = vadd.f32 %v312_v45, %v11661_v40  ;;  %v11777_v47 = vpack.c.bf16 %v6929_v42, %v6929_v42  ;;  %v7399_v42 = vld [vmem:[%s16334_s4 + $0xb0] sm:$0xf0] }
  0xb3   :  { %v7402_v53 = vor.u32 %v10187_v39, %v7399_v42  ;;  %v7117_v42 = vld [vmem:[%s16337_s6 + $0x68] sm:$0xf] }
  0xb4   :  { %1115 = vmatmul.bf16.vlgmr.msra.gmra.mxu1 %v11777_v47  ;;  %1141 = vmatmul.bf16.vlgmr.msra.gmra.mxu3 %v11777_v47 }
  0xb5   :  { %1427 = vmatpush.bf16.msra.mxu1 %v7434_v0  ;;  %v10124_v0 = vld [vmem:[%s16337_s6 + $0xac] sm:$0xf] }
  0xb6   :  { %v7154_v8 = vor.u32 %v10124_v0, %v7151_v2  ;;  %v7359_v0 = vld [vmem:[%s16334_s4 + $0x58] sm:$0xf0]  ;;  %v7101_v2 = vld [vmem:[%s16337_s6 + $0x48] sm:$0xf] }
  0xb8   :  { %v341_v7 = vpop.f32.mrf.mxu2  ;;  %v11726_v17 = vpop.f32.mrf.mxu0 }
  0xb9   :  { %v11724_v15 = vadd.f32 %v341_v7, %v11695_v60  ;;  %v370_v16 = vpop.f32.mrf.mxu3  ;;  %v11731_v20 = vpop.f32.mrf.mxu1  ;;  %v7442_v7 = vor.u32 %v10196_v61, %v7439_v1  ;;  %1428 = vmatpush.bf16.msra.mxu1 %v7418_v28  ;;  %v7149_v61 = vld [vmem:[%s16337_s6 + $0xa8] sm:$0xf] }
  0xba   :  { %v11729_v19 = vadd.f32 %v370_v16, %v11715_v6  ;;  %v7066_v16 = vor.u32 %v10103_v9, %v7063_v12  ;;  %v10184_v12 = vld [vmem:[%s16334_s4 + $0x8c] sm:$0xf] }
  0xbb   :  { %1453 = vmatpush.bf16.msra.mxu3 %v7442_v7  ;;  %v7383_v7 = vld [vmem:[%s16334_s4 + $0x90] sm:$0xf0] }
  0xbc   :  { %1127 = vmatpush.bf16.msra.mxu2 %v7066_v16  ;;  %v7386_v9 = vor.u32 %v10183_v3, %v7383_v7  ;;  %v7394_v16 = vor.u32 %v10184_v12, %v7391_v14  ;;  %v10114_v3 = vld [vmem:[%s16337_s6 + $0x54] sm:$0xf0]  ;;  %v10112_v7 = vld [vmem:[%s16337_s6 + $0x4c] sm:$0xf]  ;;  %v7103_v12 = vld [vmem:[%s16337_s6 + $0x58] sm:$0xf0] }
  0xbd   :  { %1429 = vmatpush.bf16.msra.mxu1 %v7402_v53  ;;  %v10171_v14 = vld [vmem:[%s16334_s4 + $0x24] sm:$0xf] }
  0xbf   :  { %1454 = vmatpush.bf16.msra.mxu3 %v7426_v30  ;;  %v7367_v30 = vld [vmem:[%s16334_s4 + $0x70] sm:$0xf0] }
  0xc0   :  { %v11775_v45 = vpop.f32.mrf.mxu2  ;;  %v288_v55 = vpop.f32.mrf.mxu0  ;;  %1172 = vmatpush.bf16.msrb.mxu2 %v7186_v24  ;;  %v10120_v24 = vld [vmem:[%s16337_s6 + $0x8c] sm:$0xf]  ;;  %v7370_v37 = vor.u32 %v10179_v26, %v7367_v30 }
  0xc1   :  { %v11788_v54 = vpop.f32.mrf.mxu3  ;;  %v11800_v62 = vadd.f32 %v288_v55, %v11651_v34  ;;  %v317_v63 = vpop.f32.mrf.mxu1  ;;  %v10188_v55 = vld [vmem:[%s16334_s4 + $0xac] sm:$0xf]  ;;  %1430 = vmatpush.bf16.msra.mxu1 %v7386_v9  ;;  %v7138_v29 = vor.u32 %v10120_v24, %v7135_v25  ;;  %v7102_v9 = vor.u32 %v10114_v3, %v7101_v2  ;;  %v7106_v24 = vor.u32 %v10112_v7, %v7103_v12  ;;  %v7071_v7 = vld [vmem:[%s16337_s6 + $0x18] sm:$0xf0] }
  0xc2   :  { %v11813_v4 = vadd.f32 %v317_v63, %v11661_v40  ;;  %v7410_v59 = vor.u32 %v10188_v55, %v7407_v56  ;;  %v10126_v63 = vld [vmem:[%s16337_s6 + $0xb4] sm:$0xf0]  ;;  %v7119_v55 = vld [vmem:[%s16337_s6 + $0x78] sm:$0xf0]  ;;  %v10175_v56 = vld [vmem:[%s16334_s4 + $0x44] sm:$0xf] }
  0xc3   :  { %v7150_v1 = vor.u32 %v10126_v63, %v7149_v61  ;;  %v10172_v26 = vld [vmem:[%s16334_s4 + $0x2c] sm:$0xf] }
  0xc4   :  { %1173 = vmatpush.bf16.msrb.mxu2 %v7170_v52  ;;  %1455 = vmatpush.bf16.msra.mxu3 %v7410_v59  ;;  %v10116_v52 = vld [vmem:[%s16337_s6 + $0x6c] sm:$0xf]  ;;  %v7351_v59 = vld [vmem:[%s16334_s4 + $0x50] sm:$0xf0] }
  0xc5   :  { %1148 = vmatpush.bf16.msrb.mxu0 %v7150_v1  ;;  %1167 = vmatmul.bf16.vlgmr.msrb.gmra.mxu1 %v11777_v47  ;;  %v7122_v61 = vor.u32 %v10116_v52, %v7119_v55  ;;  %v7354_v63 = vor.u32 %v10175_v56, %v7351_v59  ;;  %v7319_v52 = vld [vmem:[%s16334_s4 + $0x10] sm:$0xf0]  ;;  %v10168_v56 = vld [vmem:[%s16334_s4 + $0xc] sm:$0xf]  ;;  %v7327_v59 = vld [vmem:[%s16334_s4 + $0x18] sm:$0xf0] }
  0xc6   :  { %1193 = vmatmul.bf16.vlgmr.msrb.gmra.mxu3 %v11777_v47  ;;  %1431 = vmatpush.bf16.msra.mxu1 %v7370_v37  ;;  %v10176_v47 = vld [vmem:[%s16334_s4 + $0x4c] sm:$0xf] }
  0xc7   :  { %v7362_v1 = vor.u32 %v10176_v47, %v7359_v0  ;;  %v10108_v37 = vld [vmem:[%s16337_s6 + $0x2c] sm:$0xf]  ;;  %v10106_v47 = vld [vmem:[%s16337_s6 + $0x14] sm:$0xf0] }
  0xc8   :  { %v346_v36 = vpop.f32.mrf.mxu2  ;;  %v11867_v50 = vpop.f32.mrf.mxu0  ;;  %1174 = vmatpush.bf16.msrb.mxu2 %v7154_v8  ;;  %1456 = vmatpush.bf16.msra.mxu3 %v7394_v16  ;;  %v7335_v16 = vld [vmem:[%s16334_s4 + $0x30] sm:$0xf0]  ;;  %v10104_v0 = vld [vmem:[%s16337_s6 + $0xc] sm:$0xf] }
  0xc9   :  { %v11865_v43 = vadd.f32 %v346_v36, %v11695_v60  ;;  %v375_v46 = vpop.f32.mrf.mxu3  ;;  %v11878_v58 = vpop.f32.mrf.mxu1  ;;  %1149 = vmatpush.bf16.msrb.mxu0 %v7134_v23  ;;  %v7338_v25 = vor.u32 %v10171_v14, %v7335_v16  ;;  %v7074_v14 = vor.u32 %v10104_v0, %v7071_v7 }
  0xca   :  { %v11876_v57 = vadd.f32 %v375_v46, %v11715_v6  ;;  %v10118_v46 = vld [vmem:[%s16337_s6 + $0x74] sm:$0xf0]  ;;  %1432 = vmatpush.bf16.msra.mxu1 %v7354_v63  ;;  %v7069_v63 = vld [vmem:[%s16337_s6 + $0x8] sm:$0xf] }
  0xcb   :  { %v7118_v53 = vor.u32 %v10118_v46, %v7117_v42  ;;  %v7087_v42 = vld [vmem:[%s16337_s6 + $0x38] sm:$0xf0]  ;;  %v10167_v46 = vld [vmem:[%s16334_s4 + $0x4] sm:$0xf]  ;;  %v7070_v3 = vor.u32 %v10106_v47, %v7069_v63 }
  0xcc   :  { %1175 = vmatpush.bf16.msrb.mxu2 %v7138_v29  ;;  %1457 = vmatpush.bf16.msra.mxu3 %v7378_v38  ;;  %v7322_v55 = vor.u32 %v10167_v46, %v7319_v52 }
  0xcd   :  { %1150 = vmatpush.bf16.msrb.mxu0 %v7118_v53  ;;  %v7090_v53 = vor.u32 %v10108_v37, %v7087_v42 }
  0xce   :  { %1433 = vmatpush.bf16.msra.mxu1 %v7338_v25 }
  0xd0   :  { %v11910_v22 = vpop.f32.mrf.mxu2  ;;  %v293_v28 = vpop.f32.mrf.mxu0  ;;  %1176 = vmatpush.bf16.msrb.mxu2 %v7122_v61  ;;  %1458 = vmatpush.bf16.msra.mxu3 %v7362_v1  ;;  %v7330_v61 = vor.u32 %v10168_v56, %v7327_v59  ;;  %v279_v1 = vadd.f32 %v11546_v48, %v11651_v34 }
  0xd1   :  { %v11921_v27 = vpop.f32.mrf.mxu3  ;;  %v11933_v33 = vadd.f32 %v293_v28, %v11651_v34  ;;  %v322_v36 = vpop.f32.mrf.mxu1  ;;  %v7343_v28 = vld [vmem:[%s16334_s4 + $0x38] sm:$0xf0]  ;;  %1151 = vmatpush.bf16.msrb.mxu0 %v7102_v9 }
  0xd2   :  { %v11937_v39 = vadd.f32 %v322_v36, %v11661_v40  ;;  %v7346_v31 = vor.u32 %v10172_v26, %v7343_v28  ;;  %v10110_v36 = vld [vmem:[%s16337_s6 + $0x34] sm:$0xf0]  ;;  %1434 = vmatpush.bf16.msra.mxu1 %v7322_v55  ;;  %v337_v26 = vadd.f32 %v11592_v5, %v11695_v60  ;;  %v428_v5 = vld [vmem:[%s16339_s2] sm:$0xff] }
  0xd3   :  { %v7086_v38 = vor.u32 %v10110_v36, %v7085_v32 }
  0xd4   :  { %1177 = vmatpush.bf16.msrb.mxu2 %v7106_v24  ;;  %1459 = vmatpush.bf16.msra.mxu3 %v7346_v31 }
  0xd5   :  { %1152 = vmatpush.bf16.msrb.mxu0 %v7086_v38 }
  0xd8   :  { %v351_v8 = vpop.f32.mrf.mxu2  ;;  %v11985_v23 = vpop.f32.mrf.mxu0  ;;  %1178 = vmatpush.bf16.msrb.mxu2 %v7090_v53  ;;  %1460 = vmatpush.bf16.msra.mxu3 %v7330_v61 }
  0xd9   :  { %v11983_v18 = vadd.f32 %v351_v8, %v11695_v60  ;;  %v380_v21 = vpop.f32.mrf.mxu3  ;;  %v11996_v30 = vpop.f32.mrf.mxu1  ;;  %v308_v8 = vadd.f32 %v11548_v49, %v11661_v40  ;;  %1153 = vmatpush.bf16.msrb.mxu0 %v7070_v3  ;;  %v366_v49 = vadd.f32 %v11600_v10, %v11715_v6 }
  0xda   :  { %v11994_v29 = vadd.f32 %v380_v21, %v11715_v6 }
  0xdc   :  { %1179 = vmatpush.bf16.msrb.mxu2 %v7074_v14 }
  0xe0   :  { %v12033_v2 = vpop.f32.mrf.mxu2  ;;  %v640_v12 = vpop.f32.mrf.mxu0 }
  0xe1   :  { %v12040_v9 = vpop.f32.mrf.mxu3  ;;  %v683_v16 = vadd.f32 %v640_v12, %v279_v1  ;;  %v653_v21 = vpop.f32.mrf.mxu1  ;;  %v7429_v12 = vld [vmem:[%s16334_s4 + $0xe0] sm:$0xf] }
  0xe2   :  { %v684_v24 = vadd.f32 %v653_v21, %v308_v8  ;;  %v7437_v21 = vld [vmem:[%s16334_s4 + $0xe8] sm:$0xf] }
  0xe3   :  { %v687_v48 = vmul.f32 0.5, %v683_v16  ;;  %v10197_v16 = vld [vmem:[%s16334_s4 + $0xec] sm:$0xf0] }
  0xe4   :  { %v691_v25 = vmul.f32 0.5, %v684_v24  ;;  %v10198_v24 = vld [vmem:[%s16334_s4 + $0xf4] sm:$0xf0] }
  0xe5   :  { %10848 = vtanh.f32 %v687_v48 }
  0xe6   :  { %10850 = vtanh.f32 %v691_v25 }
  0xe8   :  { %v666_v28 = vpop.f32.mrf.mxu2  ;;  %v642_v36 = vpop.f32.mrf.mxu0 }
  0xe9   :  { %v685_v31 = vadd.f32 %v666_v28, %v337_v26  ;;  %v679_v32 = vpop.f32.mrf.mxu3  ;;  %v655_v38 = vpop.f32.mrf.mxu1  ;;  %v7430_v26 = vor.u32 %v10197_v16, %v7429_v12  ;;  %v7413_v28 = vld [vmem:[%s16334_s4 + $0xc0] sm:$0xf]  ;;  %v10194_v36 = vld [vmem:[%s16334_s4 + $0xd4] sm:$0xf0] }
  0xea   :  { %v686_v37 = vadd.f32 %v679_v32, %v366_v49  ;;  %v7438_v49 = vor.u32 %v10198_v24, %v7437_v21  ;;  %v7421_v32 = vld [vmem:[%s16334_s4 + $0xc8] sm:$0xf]  ;;  %v7349_v16 = vld [vmem:[%s16334_s4 + $0x40] sm:$0xf]  ;;  %v10177_v21 = vld [vmem:[%s16334_s4 + $0x4c] sm:$0xf0] }
  0xeb   :  { %10852 = vtanh.f32 %v685_v31  ;;  %v10849_v42 = vpop.eup %10848  ;;  %v10193_v31 = vld [vmem:[%s16334_s4 + $0xcc] sm:$0xf0]  ;;  %v7422_v38 = vor.u32 %v10194_v36, %v7421_v32  ;;  %v7357_v24 = vld [vmem:[%s16334_s4 + $0x48] sm:$0xf]  ;;  %v10174_v36 = vld [vmem:[%s16334_s4 + $0x34] sm:$0xf0] }
  0xec   :  { %v696_v46 = vmul.f32 0.5, %v686_v37  ;;  %v10851_v52 = vpop.eup %10850  ;;  %v689_v53 = vmul.f32 0.5, %v10849_v42  ;;  %v7414_v37 = vor.u32 %v10193_v31, %v7413_v28  ;;  %v7397_v42 = vld [vmem:[%s16334_s4 + $0xa0] sm:$0xf]  ;;  %v10173_v31 = vld [vmem:[%s16334_s4 + $0x2c] sm:$0xf0] }
  0xed   :  { %v693_v55 = vmul.f32 0.5, %v10851_v52  ;;  %v7405_v52 = vld [vmem:[%s16334_s4 + $0xa8] sm:$0xf]  ;;  %v7333_v28 = vld [vmem:[%s16334_s4 + $0x20] sm:$0xf] }
  0xee   :  { %10854 = vtanh.f32 %v696_v46  ;;  %v690_v56 = vadd.f32 0.5, %v689_v53  ;;  %v10189_v46 = vld [vmem:[%s16334_s4 + $0xac] sm:$0xf0]  ;;  %v10190_v53 = vld [vmem:[%s16334_s4 + $0xb4] sm:$0xf0] }
  0xef   :  { %v694_v59 = vadd.f32 0.5, %v693_v55  ;;  %v7398_v55 = vor.u32 %v10189_v46, %v7397_v42  ;;  %v7341_v32 = vld [vmem:[%s16334_s4 + $0x28] sm:$0xf]  ;;  %v7317_v42 = vld [vmem:[%s16334_s4] sm:$0xf] }
  0xf0   :  { %v668_v10 = vpop.f32.mrf.mxu2  ;;  %v10169_v46 = vld [vmem:[%s16334_s4 + $0xc] sm:$0xf0] }
  0xf1   :  { %v10853_v61 = vpop.eup %10852  ;;  %v681_v63 = vpop.f32.mrf.mxu3  ;;  %v700_v47 = vmul.f32 %v694_v59, %v428_v5  ;;  %v7381_v5 = vld [vmem:[%s16334_s4 + $0x80] sm:$0xf]  ;;  %v10185_v59 = vld [vmem:[%s16334_s4 + $0x8c] sm:$0xf0]  ;;  %v7389_v10 = vld [vmem:[%s16334_s4 + $0x88] sm:$0xf] }
  0xf2   :  { %v701_v0 = vmul.f32 %v10853_v61, %v690_v56  ;;  %v7406_v56 = vor.u32 %v10190_v53, %v7405_v52  ;;  %v10186_v61 = vld [vmem:[%s16334_s4 + $0x94] sm:$0xf0]  ;;  %v7382_v63 = vor.u32 %v10185_v59, %v7381_v5  ;;  %v7325_v52 = vld [vmem:[%s16334_s4 + $0x8] sm:$0xf]  ;;  %v7685_v5 = vld [vmem:[%s16337_s6 + $0x1e0] sm:$0xf] }
  0xf3   :  { %v10170_v53 = vld [vmem:[%s16334_s4 + $0x14] sm:$0xf0]  ;;  %v10261_v59 = vld [vmem:[%s16337_s6 + $0x1ec] sm:$0xf0] }
  0xf4   :  { %v10855_v1 = vpop.eup %10854  ;;  %v12049_v3 = vadd.f32 %v701_v0, %v700_v47  ;;  %v7390_v47 = vor.u32 %v10186_v61, %v7389_v10  ;;  %v7365_v0 = vld [vmem:[%s16334_s4 + $0x60] sm:$0xf]  ;;  %v10259_v10 = vld [vmem:[%s16337_s6 + $0x1e4] sm:$0xf]  ;;  %v7686_v61 = vor.u32 %v10261_v59, %v7685_v5 }
  0xf5   :  { %v698_v7 = vmul.f32 0.5, %v10855_v1  ;;  %v10181_v1 = vld [vmem:[%s16334_s4 + $0x6c] sm:$0xf0]  ;;  %v7621_v59 = vld [vmem:[%s16337_s6 + $0x160] sm:$0xf] }
  0xf6   :  { %10856 = vtanh.f32 %v12049_v3  ;;  %v7366_v12 = vor.u32 %v10181_v1, %v7365_v0  ;;  %1890 = vmatpush.bf16.msrb.mxu1 %v7686_v61  ;;  %v10257_v0 = vld [vmem:[%s16337_s6 + $0x1cc] sm:$0xf0]  ;;  %v10255_v1 = vld [vmem:[%s16337_s6 + $0x1c4] sm:$0xf] }
  0xf7   :  { %v699_v8 = vadd.f32 0.5, %v698_v7  ;;  %v7373_v7 = vld [vmem:[%s16334_s4 + $0x68] sm:$0xf]  ;;  %v10243_v61 = vld [vmem:[%s16337_s6 + $0x164] sm:$0xf] }
  0xfc   :  { %v10857_v14 = vpop.eup %10856 }
  0xfd   :  { %v704_v48 = vmul.f32 %v10857_v14, %v699_v8  ;;  %v10182_v8 = vld [vmem:[%s16334_s4 + $0x74] sm:$0xf0] }
  0xfe   :  { %v7374_v14 = vor.u32 %v10182_v8, %v7373_v7  ;;  %v7671_v8 = vld [vmem:[%s16337_s6 + $0x1d0] sm:$0xf0] }
  0xff   :  { %v12064_v25 = vpack.c.bf16 %v704_v48, %v704_v48  ;;  %v10178_v48 = vld [vmem:[%s16334_s4 + $0x54] sm:$0xf0] }
 0x101   :  { %1102 = vmatmul.bf16.vlgmr.msra.gmra.mxu0 %v12064_v25  ;;  %1128 = vmatmul.bf16.vlgmr.msra.gmra.mxu2 %v12064_v25 }
 0x102   :  { %1435 = vmatmul.bf16.vlgmr.msra.gmra.mxu1 %v12064_v25  ;;  %1461 = vmatmul.bf16.vlgmr.msra.gmra.mxu3 %v12064_v25 }
 0x103   :  { %1414 = vmatpush.bf16.msra.mxu0 %v7430_v26  ;;  %1440 = vmatpush.bf16.msra.mxu2 %v7438_v49  ;;  %v7350_v26 = vor.u32 %v10177_v21, %v7349_v16  ;;  %v7358_v49 = vor.u32 %v10178_v48, %v7357_v24  ;;  %v7674_v16 = vor.u32 %v10255_v1, %v7671_v8  ;;  %v10251_v21 = vld [vmem:[%s16337_s6 + $0x1a4] sm:$0xf]  ;;  %v7655_v24 = vld [vmem:[%s16337_s6 + $0x1b0] sm:$0xf0]  ;;  %v10229_v1 = vld [vmem:[%s16337_s6 + $0xec] sm:$0xf0] }
 0x107   :  { %1415 = vmatpush.bf16.msra.mxu0 %v7414_v37  ;;  %1441 = vmatpush.bf16.msra.mxu2 %v7422_v38  ;;  %v7334_v37 = vor.u32 %v10173_v31, %v7333_v28  ;;  %v7342_v38 = vor.u32 %v10174_v36, %v7341_v32  ;;  %v7637_v28 = vld [vmem:[%s16337_s6 + $0x180] sm:$0xf]  ;;  %v10249_v31 = vld [vmem:[%s16337_s6 + $0x18c] sm:$0xf0]  ;;  %v10247_v32 = vld [vmem:[%s16337_s6 + $0x184] sm:$0xf] }
 0x108   :  { %v7638_v36 = vor.u32 %v10249_v31, %v7637_v28  ;;  %v7541_v31 = vld [vmem:[%s16337_s6 + $0xc0] sm:$0xf] }
 0x10b   :  { %1416 = vmatpush.bf16.msra.mxu0 %v7398_v55  ;;  %1442 = vmatpush.bf16.msra.mxu2 %v7406_v56  ;;  %v7318_v55 = vor.u32 %v10169_v46, %v7317_v42  ;;  %v7326_v56 = vor.u32 %v10170_v53, %v7325_v52 }
 0x10f   :  { %1417 = vmatpush.bf16.msra.mxu0 %v7382_v63  ;;  %1443 = vmatpush.bf16.msra.mxu2 %v7390_v47  ;;  %v7687_v63 = vld [vmem:[%s16337_s6 + $0x1f0] sm:$0xf0] }
 0x110   :  { %v7690_v47 = vor.u32 %v10259_v10, %v7687_v63  ;;  %v10245_v10 = vld [vmem:[%s16337_s6 + $0x16c] sm:$0xf0] }
 0x111   :  { %1154 = vmatmul.bf16.vlgmr.msrb.gmra.mxu0 %v12064_v25  ;;  %1180 = vmatmul.bf16.vlgmr.msrb.gmra.mxu2 %v12064_v25  ;;  %v7622_v63 = vor.u32 %v10245_v10, %v7621_v59  ;;  %v10235_v59 = vld [vmem:[%s16337_s6 + $0x124] sm:$0xf]  ;;  %v7591_v10 = vld [vmem:[%s16337_s6 + $0x130] sm:$0xf0] }
 0x112   :  { %1916 = vmatpush.bf16.msrb.mxu3 %v7690_v47  ;;  %v7623_v47 = vld [vmem:[%s16337_s6 + $0x170] sm:$0xf0] }
 0x113   :  { %1418 = vmatpush.bf16.msra.mxu0 %v7366_v12  ;;  %1444 = vmatpush.bf16.msra.mxu2 %v7374_v14  ;;  %v7653_v12 = vld [vmem:[%s16337_s6 + $0x1a0] sm:$0xf]  ;;  %v10253_v14 = vld [vmem:[%s16337_s6 + $0x1ac] sm:$0xf0] }
 0x114   :  { %v7654_v48 = vor.u32 %v10253_v14, %v7653_v12  ;;  %v7559_v12 = vld [vmem:[%s16337_s6 + $0xf0] sm:$0xf0]  ;;  %v7605_v14 = vld [vmem:[%s16337_s6 + $0x140] sm:$0xf] }
 0x116   :  { %1917 = vmatpush.bf16.msrb.mxu3 %v7674_v16  ;;  %v10241_v16 = vld [vmem:[%s16337_s6 + $0x14c] sm:$0xf0] }
 0x117   :  { %1419 = vmatpush.bf16.msra.mxu0 %v7350_v26  ;;  %1445 = vmatpush.bf16.msra.mxu2 %v7358_v49  ;;  %v7658_v26 = vor.u32 %v10251_v21, %v7655_v24  ;;  %v7606_v24 = vor.u32 %v10241_v16, %v7605_v14  ;;  %v10231_v16 = vld [vmem:[%s16337_s6 + $0x104] sm:$0xf] }
 0x11a   :  { %1918 = vmatpush.bf16.msrb.mxu3 %v7658_v26  ;;  %v7607_v26 = vld [vmem:[%s16337_s6 + $0x150] sm:$0xf0] }
 0x11b   :  { %1420 = vmatpush.bf16.msra.mxu0 %v7334_v37  ;;  %1446 = vmatpush.bf16.msra.mxu2 %v7342_v38  ;;  %v7639_v37 = vld [vmem:[%s16337_s6 + $0x190] sm:$0xf0] }
 0x11c   :  { %v7642_v38 = vor.u32 %v10247_v32, %v7639_v37  ;;  %v10225_v32 = vld [vmem:[%s16337_s6 + $0xcc] sm:$0xf0] }
 0x11d   :  { %v7542_v37 = vor.u32 %v10225_v32, %v7541_v31  ;;  %v7695_v31 = vld [vmem:[%s16337_s6 + $0x1f8] sm:$0xf0] }
 0x11e   :  { %1919 = vmatpush.bf16.msrb.mxu3 %v7642_v38  ;;  %v7543_v38 = vld [vmem:[%s16337_s6 + $0xd0] sm:$0xf0] }
 0x11f   :  { %1421 = vmatpush.bf16.msra.mxu0 %v7318_v55  ;;  %1447 = vmatpush.bf16.msra.mxu2 %v7326_v56 }
 0x122   :  { %1422 = vmatmul.bf16.vlgmr.msra.gmra.mxu0 %v12064_v25  ;;  %1448 = vmatmul.bf16.vlgmr.msra.gmra.mxu2 %v12064_v25  ;;  %v7669_v25 = vld [vmem:[%s16337_s6 + $0x1c0] sm:$0xf] }
 0x123   :  { %v7670_v7 = vor.u32 %v10257_v0, %v7669_v25  ;;  %v7626_v25 = vor.u32 %v10243_v61, %v7623_v47  ;;  %v7557_v0 = vld [vmem:[%s16337_s6 + $0xe0] sm:$0xf]  ;;  %v7594_v61 = vor.u32 %v10235_v59, %v7591_v10  ;;  %v10221_v47 = vld [vmem:[%s16337_s6 + $0xac] sm:$0xf0]  ;;  %v7677_v59 = vld [vmem:[%s16337_s6 + $0x1c8] sm:$0xf] }
 0x124   :  { %v7558_v8 = vor.u32 %v10229_v1, %v7557_v0  ;;  %v7527_v1 = vld [vmem:[%s16337_s6 + $0xb0] sm:$0xf0]  ;;  %v10258_v10 = vld [vmem:[%s16337_s6 + $0x1d4] sm:$0xf0] }
 0x125   :  { %1891 = vmatpush.bf16.msrb.mxu1 %v7670_v7  ;;  %v10227_v7 = vld [vmem:[%s16337_s6 + $0xe4] sm:$0xf]  ;;  %1920 = vmatpush.bf16.msrb.mxu3 %v7626_v25 }
 0x126   :  { %v7562_v21 = vor.u32 %v10227_v7, %v7559_v12  ;;  %1877 = vmatpush.bf16.msrb.mxu0 %v7558_v8  ;;  %v10219_v25 = vld [vmem:[%s16337_s6 + $0xa4] sm:$0xf]  ;;  %v7573_v7 = vld [vmem:[%s16337_s6 + $0x100] sm:$0xf]  ;;  %v10233_v8 = vld [vmem:[%s16337_s6 + $0x10c] sm:$0xf0] }
 0x127   :  { %v7530_v12 = vor.u32 %v10219_v25, %v7527_v1  ;;  %v7574_v14 = vor.u32 %v10233_v8, %v7573_v7  ;;  %v10213_v1 = vld [vmem:[%s16337_s6 + $0x6c] sm:$0xf0]  ;;  %v10211_v7 = vld [vmem:[%s16337_s6 + $0x64] sm:$0xf] }
 0x128   :  { %1903 = vmatpush.bf16.msrb.mxu2 %v7562_v21  ;;  %v7575_v21 = vld [vmem:[%s16337_s6 + $0x110] sm:$0xf0] }
 0x129   :  { %1892 = vmatpush.bf16.msrb.mxu1 %v7654_v48  ;;  %v10239_v48 = vld [vmem:[%s16337_s6 + $0x144] sm:$0xf] }
 0x12a   :  { %v7610_v28 = vor.u32 %v10239_v48, %v7607_v26  ;;  %1878 = vmatpush.bf16.msrb.mxu0 %v7542_v37  ;;  %v7578_v48 = vor.u32 %v10231_v16, %v7575_v21  ;;  %v10262_v26 = vld [vmem:[%s16337_s6 + $0x1f4] sm:$0xf0]  ;;  %v7509_v37 = vld [vmem:[%s16337_s6 + $0x80] sm:$0xf]  ;;  %v7661_v16 = vld [vmem:[%s16337_s6 + $0x1a8] sm:$0xf] }
 0x12b   :  { %v10254_v21 = vld [vmem:[%s16337_s6 + $0x1b4] sm:$0xf0] }
 0x12c   :  { %1921 = vmatpush.bf16.msrb.mxu3 %v7610_v28  ;;  %v10260_v28 = vld [vmem:[%s16337_s6 + $0x1ec] sm:$0xf] }
 0x12d   :  { %1893 = vmatpush.bf16.msrb.mxu1 %v7638_v36  ;;  %v10223_v36 = vld [vmem:[%s16337_s6 + $0xc4] sm:$0xf] }
 0x130   :  { %1922 = vmatpush.bf16.msrb.mxu3 %v7594_v61  ;;  %v10256_v61 = vld [vmem:[%s16337_s6 + $0x1cc] sm:$0xf] }
 0x131   :  { %v12194_v49 = vpop.f32.mrf.mxu1  ;;  %1894 = vmatpush.bf16.msrb.mxu1 %v7622_v63  ;;  %v7525_v63 = vld [vmem:[%s16337_s6 + $0xa0] sm:$0xf] }
 0x132   :  { %v7526_v0 = vor.u32 %v10221_v47, %v7525_v63  ;;  %v7678_v63 = vor.u32 %v10258_v10, %v7677_v59  ;;  %v7679_v47 = vld [vmem:[%s16337_s6 + $0x1d8] sm:$0xf0]  ;;  %v10248_v59 = vld [vmem:[%s16337_s6 + $0x18c] sm:$0xf] }
 0x133   :  { %v7682_v25 = vor.u32 %v10256_v61, %v7679_v47  ;;  %v7647_v61 = vld [vmem:[%s16337_s6 + $0x198] sm:$0xf0]  ;;  %v7461_v47 = vld [vmem:[%s16337_s6 + $0x20] sm:$0xf] }
 0x134   :  { %1879 = vmatpush.bf16.msrb.mxu0 %v7526_v0  ;;  %1923 = vmatpush.bf16.msrb.mxu3 %v7578_v48  ;;  %v7493_v0 = vld [vmem:[%s16337_s6 + $0x60] sm:$0xf]  ;;  %v10252_v48 = vld [vmem:[%s16337_s6 + $0x1ac] sm:$0xf] }
 0x135   :  { %1895 = vmatpush.bf16.msrb.mxu1 %v7606_v24  ;;  %v7693_v24 = vld [vmem:[%s16337_s6 + $0x1e8] sm:$0xf]  ;;  %v7494_v8 = vor.u32 %v10213_v1, %v7493_v0  ;;  %v10203_v0 = vld [vmem:[%s16337_s6 + $0x24] sm:$0xf] }
 0x136   :  { %v7694_v32 = vor.u32 %v10262_v26, %v7693_v24  ;;  %v7662_v24 = vor.u32 %v10254_v21, %v7661_v16  ;;  %v7663_v26 = vld [vmem:[%s16337_s6 + $0x1b8] sm:$0xf0]  ;;  %v10246_v16 = vld [vmem:[%s16337_s6 + $0x174] sm:$0xf0]  ;;  %v10244_v21 = vld [vmem:[%s16337_s6 + $0x16c] sm:$0xf] }
 0x137   :  { %v12208_v42 = vpop.f32.mrf.mxu3 }
 0x139   :  { %v1118_v46 = vpop.f32.mrf.mxu1 }
 0x13a   :  { %v7589_v46 = vld [vmem:[%s16337_s6 + $0x120] sm:$0xf] }
 0x13f   :  { %v1144_v52 = vpop.f32.mrf.mxu3 }
 0x140   :  { %v10237_v52 = vld [vmem:[%s16337_s6 + $0x12c] sm:$0xf0] }
 0x142   :  { %v12210_v53 = vpop.f32.mrf.mxu1 }
 0x149   :  { %v12212_v55 = vpop.f32.mrf.mxu3 }
 0x14a   :  { %v1170_v56 = vpop.f32.mrf.mxu1 }
 0x14b   :  { %v7546_v56 = vor.u32 %v10223_v36, %v7543_v38  ;;  %v7698_v36 = vor.u32 %v10260_v28, %v7695_v31  ;;  %v10217_v38 = vld [vmem:[%s16337_s6 + $0x8c] sm:$0xf0]  ;;  %v7666_v28 = vor.u32 %v10252_v48, %v7663_v26  ;;  %v7477_v31 = vld [vmem:[%s16337_s6 + $0x40] sm:$0xf]  ;;  %v7631_v26 = vld [vmem:[%s16337_s6 + $0x178] sm:$0xf0] }
 0x14d   :  { %1904 = vmatpush.bf16.msrb.mxu2 %v7546_v56  ;;  %v7511_v56 = vld [vmem:[%s16337_s6 + $0x90] sm:$0xf0]  ;;  %1968 = vmatpush.bf16.msra.mxu3 %v7698_v36  ;;  %v10207_v36 = vld [vmem:[%s16337_s6 + $0x44] sm:$0xf] }
 0x151   :  { %v1196_v5 = vpop.f32.mrf.mxu3  ;;  %1905 = vmatpush.bf16.msrb.mxu2 %v7530_v12  ;;  %v7495_v12 = vld [vmem:[%s16337_s6 + $0x70] sm:$0xf0]  ;;  %1969 = vmatpush.bf16.msra.mxu3 %v7682_v25  ;;  %v10205_v25 = vld [vmem:[%s16337_s6 + $0x2c] sm:$0xf0] }
 0x152   :  { %v7590_v5 = vor.u32 %v10237_v52, %v7589_v46  ;;  %v7510_v46 = vor.u32 %v10217_v38, %v7509_v37  ;;  %v10215_v52 = vld [vmem:[%s16337_s6 + $0x84] sm:$0xf]  ;;  %v12370_v37 = vld [vmem:[%s16340_s7] sm:$0xf] }
 0x153   :  { %v12397_v1 = vperm.slane %v12370_v37, 0 }
 0x154   :  { %1896 = vmatpush.bf16.msrb.mxu1 %v7590_v5  ;;  %v7514_v5 = vor.u32 %v10215_v52, %v7511_v56  ;;  %1880 = vmatpush.bf16.msrb.mxu0 %v7510_v46  ;;  %v7479_v46 = vld [vmem:[%s16337_s6 + $0x50] sm:$0xf0]  ;;  %v7645_v56 = vld [vmem:[%s16337_s6 + $0x188] sm:$0xf] }
 0x155   :  { %1970 = vmatpush.bf16.msra.mxu3 %v7666_v28  ;;  %v7482_v52 = vor.u32 %v10207_v36, %v7479_v46  ;;  %v10201_v36 = vld [vmem:[%s16337_s6 + $0xc] sm:$0xf0] }
 0x156   :  { %1906 = vmatpush.bf16.msrb.mxu2 %v7514_v5  ;;  %v10250_v5 = vld [vmem:[%s16337_s6 + $0x194] sm:$0xf0] }
 0x157   :  { %v7646_v10 = vor.u32 %v10250_v5, %v7645_v56  ;;  %v7447_v5 = vld [vmem:[%s16337_s6 + $0x10] sm:$0xf0] }
 0x158   :  { %1897 = vmatpush.bf16.msrb.mxu1 %v7574_v14  ;;  %v7498_v14 = vor.u32 %v10211_v7, %v7495_v12  ;;  %1881 = vmatpush.bf16.msrb.mxu0 %v7494_v8  ;;  %v7462_v7 = vor.u32 %v10205_v25, %v7461_v47  ;;  %v7463_v8 = vld [vmem:[%s16337_s6 + $0x30] sm:$0xf0]  ;;  %v10228_v47 = vld [vmem:[%s16337_s6 + $0xec] sm:$0xf]  ;;  %v7567_v25 = vld [vmem:[%s16337_s6 + $0xf8] sm:$0xf0] }
 0x159   :  { %v7466_v12 = vor.u32 %v10203_v0, %v7463_v8  ;;  %v7613_v0 = vld [vmem:[%s16337_s6 + $0x148] sm:$0xf]  ;;  %v10242_v8 = vld [vmem:[%s16337_s6 + $0x154] sm:$0xf0] }
 0x15a   :  { %1907 = vmatpush.bf16.msrb.mxu2 %v7498_v14  ;;  %v7629_v14 = vld [vmem:[%s16337_s6 + $0x168] sm:$0xf] }
 0x15b   :  { %v7630_v48 = vor.u32 %v10246_v16, %v7629_v14  ;;  %v7615_v14 = vld [vmem:[%s16337_s6 + $0x158] sm:$0xf0] }
 0x15c   :  { %1942 = vmatpush.bf16.msra.mxu1 %v7694_v32  ;;  %v10209_v32 = vld [vmem:[%s16337_s6 + $0x4c] sm:$0xf0] }
 0x15d   :  { %v7478_v38 = vor.u32 %v10209_v32, %v7477_v31  ;;  %v7634_v31 = vor.u32 %v10244_v21, %v7631_v26  ;;  %v7445_v32 = vld [vmem:[%s16337_s6] sm:$0xf]  ;;  %v7614_v21 = vor.u32 %v10242_v8, %v7613_v0  ;;  %v7549_v26 = vld [vmem:[%s16337_s6 + $0xc8] sm:$0xf] }
 0x15e   :  { %1908 = vmatpush.bf16.msrb.mxu2 %v7482_v52  ;;  %v7446_v56 = vor.u32 %v10201_v36, %v7445_v32  ;;  %v7551_v36 = vld [vmem:[%s16337_s6 + $0xd8] sm:$0xf0] }
 0x15f   :  { %1882 = vmatpush.bf16.msrb.mxu0 %v7478_v38  ;;  %v10199_v38 = vld [vmem:[%s16337_s6 + $0x4] sm:$0xf] }
 0x160   :  { %1943 = vmatpush.bf16.msra.mxu1 %v7678_v63  ;;  %v7650_v63 = vor.u32 %v10248_v59, %v7647_v61  ;;  %v7565_v59 = vld [vmem:[%s16337_s6 + $0xe8] sm:$0xf]  ;;  %v7450_v61 = vor.u32 %v10199_v38, %v7447_v5 }
 0x161   :  { %v7597_v38 = vld [vmem:[%s16337_s6 + $0x128] sm:$0xf] }
 0x162   :  { %1971 = vmatpush.bf16.msra.mxu3 %v7650_v63  ;;  %1909 = vmatpush.bf16.msrb.mxu2 %v7466_v12  ;;  %v10240_v12 = vld [vmem:[%s16337_s6 + $0x14c] sm:$0xf] }
 0x163   :  { %1883 = vmatpush.bf16.msrb.mxu0 %v7462_v7  ;;  %v7570_v7 = vor.u32 %v10228_v47, %v7567_v25 }
 0x164   :  { %1944 = vmatpush.bf16.msra.mxu1 %v7662_v24  ;;  %v12412_v24 = vperm.slane %v12370_v37, 1 }
 0x166   :  { %1972 = vmatpush.bf16.msra.mxu3 %v7634_v31  ;;  %1910 = vmatpush.bf16.msrb.mxu2 %v7450_v61  ;;  %v7599_v61 = vld [vmem:[%s16337_s6 + $0x138] sm:$0xf0] }
 0x167   :  { %1884 = vmatpush.bf16.msrb.mxu0 %v7446_v56 }
 0x168   :  { %1945 = vmatpush.bf16.msra.mxu1 %v7646_v10  ;;  %v10230_v10 = vld [vmem:[%s16337_s6 + $0xf4] sm:$0xf0] }
 0x169   :  { %v7566_v63 = vor.u32 %v10230_v10, %v7565_v59  ;;  %v10238_v59 = vld [vmem:[%s16337_s6 + $0x134] sm:$0xf0]  ;;  %v10236_v10 = vld [vmem:[%s16337_s6 + $0x12c] sm:$0xf] }
 0x16a   :  { %1955 = vmatpush.bf16.msra.mxu2 %v7570_v7  ;;  %v7598_v25 = vor.u32 %v10238_v59, %v7597_v38  ;;  %v7602_v0 = vor.u32 %v10236_v10, %v7599_v61  ;;  %v12510_v38 = vperm.slane %v12370_v37, 2  ;;  %v7517_v59 = vld [vmem:[%s16337_s6 + $0x88] sm:$0xf]  ;;  %v10218_v10 = vld [vmem:[%s16337_s6 + $0x94] sm:$0xf0] }
 0x16b   :  { %1929 = vmatpush.bf16.msra.mxu0 %v7566_v63 }
 0x16c   :  { %1946 = vmatpush.bf16.msra.mxu1 %v7630_v48  ;;  %v7618_v48 = vor.u32 %v10240_v12, %v7615_v14  ;;  %v7533_v12 = vld [vmem:[%s16337_s6 + $0xa8] sm:$0xf]  ;;  %v10222_v14 = vld [vmem:[%s16337_s6 + $0xb4] sm:$0xf0] }
 0x16e   :  { %1973 = vmatpush.bf16.msra.mxu3 %v7618_v48  ;;  %v7581_v48 = vld [vmem:[%s16337_s6 + $0x108] sm:$0xf] }
 0x170   :  { %1947 = vmatpush.bf16.msra.mxu1 %v7614_v21  ;;  %v7534_v21 = vor.u32 %v10222_v14, %v7533_v12  ;;  %v7501_v12 = vld [vmem:[%s16337_s6 + $0x68] sm:$0xf] }
 0x172   :  { %1974 = vmatpush.bf16.msra.mxu3 %v7602_v0 }
 0x174   :  { %1948 = vmatpush.bf16.msra.mxu1 %v7598_v25  ;;  %v7519_v25 = vld [vmem:[%s16337_s6 + $0x98] sm:$0xf0] }
 0x17e   :  { %v1103_v28 = vpop.f32.mrf.mxu0 }
 0x17f   :  { %v1104_v46 = vadd.f32 %v1103_v28, %v12397_v1  ;;  %v12427_v52 = vpop.f32.mrf.mxu1  ;;  %v10226_v28 = vld [vmem:[%s16337_s6 + $0xd4] sm:$0xf0] }
 0x180   :  { %v7550_v32 = vor.u32 %v10226_v28, %v7549_v26 }
 0x181   :  { %v1117_v16 = vadd.f32 %v12194_v49, %v1104_v46  ;;  %v10224_v49 = vld [vmem:[%s16337_s6 + $0xcc] sm:$0xf] }
 0x182   :  { %v7554_v5 = vor.u32 %v10224_v49, %v7551_v36  ;;  %1930 = vmatpush.bf16.msra.mxu0 %v7550_v32  ;;  %v10232_v32 = vld [vmem:[%s16337_s6 + $0x10c] sm:$0xf]  ;;  %v7583_v36 = vld [vmem:[%s16337_s6 + $0x118] sm:$0xf0] }
 0x183   :  { %v1198_v63 = vmul.f32 0.5, %v1117_v16  ;;  %v10220_v16 = vld [vmem:[%s16337_s6 + $0xac] sm:$0xf] }
 0x184   :  { %v1129_v31 = vpop.f32.mrf.mxu2  ;;  %1956 = vmatpush.bf16.msra.mxu2 %v7554_v5 }
 0x185   :  { %v1130_v46 = vadd.f32 %v1129_v31, %v12412_v24  ;;  %v12473_v56 = vpop.f32.mrf.mxu3  ;;  %v10234_v31 = vld [vmem:[%s16337_s6 + $0x114] sm:$0xf0]  ;;  %10858 = vtanh.f32 %v1198_v63  ;;  %v7518_v63 = vor.u32 %v10218_v10, %v7517_v59  ;;  %v10208_v10 = vld [vmem:[%s16337_s6 + $0x4c] sm:$0xf] }
 0x186   :  { %v1105_v47 = vpop.f32.mrf.mxu0  ;;  %1931 = vmatpush.bf16.msra.mxu0 %v7534_v21  ;;  %v7582_v49 = vor.u32 %v10234_v31, %v7581_v48  ;;  %v10212_v21 = vld [vmem:[%s16337_s6 + $0x6c] sm:$0xf] }
 0x187   :  { %v1143_v7 = vadd.f32 %v12208_v42, %v1130_v46  ;;  %v1438_v8 = vpop.f32.mrf.mxu1  ;;  %v7535_v42 = vld [vmem:[%s16337_s6 + $0xb8] sm:$0xf0]  ;;  %v7586_v46 = vor.u32 %v10232_v32, %v7583_v36  ;;  %v10216_v47 = vld [vmem:[%s16337_s6 + $0x8c] sm:$0xf]  ;;  %v310_v36 = vadd.f32 %v11604_v13, %v11661_v40 }
 0x188   :  { %v7538_v28 = vor.u32 %v10220_v16, %v7535_v42  ;;  %1949 = vmatpush.bf16.msra.mxu1 %v7582_v49  ;;  %v10214_v16 = vld [vmem:[%s16337_s6 + $0x74] sm:$0xf0]  ;;  %v7503_v42 = vld [vmem:[%s16337_s6 + $0x78] sm:$0xf0] }
 0x189   :  { %v1202_v26 = vmul.f32 0.5, %v1143_v7  ;;  %1975 = vmatpush.bf16.msra.mxu3 %v7586_v46  ;;  %v7522_v7 = vor.u32 %v10216_v47, %v7519_v25  ;;  %v7502_v31 = vor.u32 %v10214_v16, %v7501_v12  ;;  %v7506_v32 = vor.u32 %v10212_v21, %v7503_v42  ;;  %v7485_v46 = vld [vmem:[%s16337_s6 + $0x48] sm:$0xf]  ;;  %v7487_v13 = vld [vmem:[%s16337_s6 + $0x58] sm:$0xf0] }
 0x18a   :  { %1957 = vmatpush.bf16.msra.mxu2 %v7538_v28  ;;  %1932 = vmatpush.bf16.msra.mxu0 %v7518_v63  ;;  %v12539_v28 = vperm.slane %v12370_v37, 3  ;;  %v7490_v47 = vor.u32 %v10208_v10, %v7487_v13  ;;  %v6930_v25 = vld [vmem:[%s16339_s2 + $0x8] sm:$0xff]  ;;  %v7455_v10 = vld [vmem:[%s16337_s6 + $0x18] sm:$0xf0] }
 0x18b   :  { %10860 = vtanh.f32 %v1202_v26  ;;  %v10859_v14 = vpop.eup %10858  ;;  %v7469_v12 = vld [vmem:[%s16337_s6 + $0x28] sm:$0xf] }
 0x18c   :  { %v1131_v5 = vpop.f32.mrf.mxu2 }
 0x18d   :  { %v1464_v61 = vpop.f32.mrf.mxu3  ;;  %v10210_v5 = vld [vmem:[%s16337_s6 + $0x54] sm:$0xf0] }
 0x18e   :  { %v1155_v0 = vpop.f32.mrf.mxu0  ;;  %1958 = vmatpush.bf16.msra.mxu2 %v7522_v7  ;;  %1933 = vmatpush.bf16.msra.mxu0 %v7502_v31  ;;  %v7486_v37 = vor.u32 %v10210_v5, %v7485_v46  ;;  %v1467_v61 = vadd.f32 %v12427_v52, %v310_v36  ;;  %v10206_v52 = vld [vmem:[%s16337_s6 + $0x34] sm:$0xf0]  ;;  %v7453_v36 = vld [vmem:[%s16337_s6 + $0x8] sm:$0xf]  ;;  %v10200_v5 = vld [vmem:[%s16337_s6 + $0xc] sm:$0xf] }
 0x18f   :  { %v1156_v8 = vadd.f32 %v1155_v0, %v12510_v38  ;;  %v7470_v21 = vor.u32 %v10206_v52, %v7469_v12  ;;  %v10202_v46 = vld [vmem:[%s16337_s6 + $0x14] sm:$0xf0]  ;;  %v7458_v13 = vor.u32 %v10200_v5, %v7455_v10  ;;  %v7807_v10 = vld [vmem:[%s16334_s4 + $0xd8] sm:$0xf0] }
 0x191   :  { %v10861_v48 = vpop.eup %10860  ;;  %v1169_v26 = vadd.f32 %v12210_v53, %v1156_v8  ;;  %v1200_v53 = vmul.f32 0.5, %v10859_v14  ;;  %v10204_v14 = vld [vmem:[%s16337_s6 + $0x2c] sm:$0xf] }
 0x192   :  { %v1204_v49 = vmul.f32 0.5, %v10861_v48  ;;  %1959 = vmatpush.bf16.msra.mxu2 %v7506_v32  ;;  %1934 = vmatpush.bf16.msra.mxu0 %v7486_v37  ;;  %v1474_v48 = vmul.f32 0.5, %v1467_v61  ;;  %v7454_v37 = vor.u32 %v10202_v46, %v7453_v36  ;;  %v281_v61 = vadd.f32 %v11602_v11, %v11651_v34  ;;  %v7815_v11 = vld [vmem:[%s16334_s4 + $0xf0] sm:$0xf0] }
 0x193   :  { %10862 = vtanh.f32 %v1169_v26  ;;  %v1201_v16 = vadd.f32 0.5, %v1200_v53 }
 0x194   :  { %v1181_v59 = vpop.f32.mrf.mxu2  ;;  %v1205_v0 = vadd.f32 0.5, %v1204_v49 }
 0x195   :  { %v1182_v63 = vadd.f32 %v1181_v59, %v12539_v28 }
 0x196   :  { %v1157_v7 = vpop.f32.mrf.mxu0  ;;  %1960 = vmatpush.bf16.msra.mxu2 %v7490_v47  ;;  %v1211_v32 = vmul.f32 %v6930_v25, %v1205_v0  ;;  %1935 = vmatpush.bf16.msra.mxu0 %v7470_v21  ;;  %v368_v47 = vadd.f32 %v11663_v41, %v11715_v6  ;;  %v339_v41 = vadd.f32 %v11653_v35, %v11695_v60  ;;  %v10287_v35 = vld [vmem:[%s16334_s4 + $0xc4] sm:$0xf] }
 0x197   :  { %v1195_v8 = vadd.f32 %v12212_v55, %v1182_v63  ;;  %v7471_v55 = vld [vmem:[%s16337_s6 + $0x38] sm:$0xf0] }
 0x198   :  { %v7474_v31 = vor.u32 %v10204_v14, %v7471_v55  ;;  %v1469_v7 = vadd.f32 %v12473_v56, %v368_v47  ;;  %v10291_v14 = vld [vmem:[%s16334_s4 + $0xe4] sm:$0xf]  ;;  %v10292_v56 = vld [vmem:[%s16334_s4 + $0xec] sm:$0xf]  ;;  %v7823_v55 = vld [vmem:[%s16334_s4 + $0xf8] sm:$0xf0] }
 0x199   :  { %v10863_v42 = vpop.eup %10862  ;;  %v1207_v26 = vmul.f32 0.5, %v1195_v8  ;;  %v7818_v36 = vor.u32 %v10291_v14, %v7815_v11  ;;  %v7826_v46 = vor.u32 %v10292_v56, %v7823_v55  ;;  %v10279_v55 = vld [vmem:[%s16334_s4 + $0x84] sm:$0xf] }
 0x19a   :  { %v1212_v49 = vmul.f32 %v10863_v42, %v1201_v16  ;;  %1961 = vmatpush.bf16.msra.mxu2 %v7474_v31  ;;  %1936 = vmatpush.bf16.msra.mxu0 %v7454_v37  ;;  %v10288_v37 = vld [vmem:[%s16334_s4 + $0xcc] sm:$0xf] }
 0x19b   :  { %10864 = vtanh.f32 %v1207_v26  ;;  %v1479_v26 = vmul.f32 0.5, %v1469_v7  ;;  %v7783_v7 = vld [vmem:[%s16334_s4 + $0xb0] sm:$0xf0] }
 0x19c   :  { %v12582_v53 = vadd.f32 %v1212_v49, %v1211_v32  ;;  %v1183_v59 = vpop.f32.mrf.mxu2  ;;  %10866 = vtanh.f32 %v1474_v48 }
 0x19d   :  { %v7799_v59 = vld [vmem:[%s16334_s4 + $0xd0] sm:$0xf0] }
 0x19e   :  { %10868 = vtanh.f32 %v12582_v53  ;;  %1962 = vmatpush.bf16.msra.mxu2 %v7458_v13  ;;  %v7802_v47 = vor.u32 %v10287_v35, %v7799_v59  ;;  %v7751_v35 = vld [vmem:[%s16334_s4 + $0x70] sm:$0xf0]  ;;  %v10276_v59 = vld [vmem:[%s16334_s4 + $0x6c] sm:$0xf] }
 0x19f   :  { %v1423_v63 = vpop.f32.mrf.mxu0 }
 0x1a0   :  { %v1466_v25 = vadd.f32 %v1423_v63, %v281_v61 }
 0x1a1   :  { %v10865_v0 = vpop.eup %10864 }
 0x1a2   :  { %v1209_v8 = vmul.f32 0.5, %v10865_v0  ;;  %v1470_v12 = vmul.f32 0.5, %v1466_v25  ;;  %v10867_v52 = vpop.eup %10866  ;;  %v7810_v25 = vor.u32 %v10288_v37, %v7807_v10  ;;  %v10283_v0 = vld [vmem:[%s16334_s4 + $0xa4] sm:$0xf]  ;;  %v7759_v37 = vld [vmem:[%s16334_s4 + $0x78] sm:$0xf0] }
 0x1a3   :  { %v1476_v48 = vmul.f32 0.5, %v10867_v52 }
 0x1a4   :  { %v10869_v16 = vpop.eup %10868  ;;  %v1210_v21 = vadd.f32 0.5, %v1209_v8  ;;  %10870 = vtanh.f32 %v1470_v12  ;;  %v10284_v8 = vld [vmem:[%s16334_s4 + $0xac] sm:$0xf]  ;;  %v7791_v12 = vld [vmem:[%s16334_s4 + $0xb8] sm:$0xf0] }
 0x1a5   :  { %v1449_v42 = vpop.f32.mrf.mxu2  ;;  %v1477_v61 = vadd.f32 0.5, %v1476_v48  ;;  %v7794_v56 = vor.u32 %v10284_v8, %v7791_v12  ;;  %v7767_v48 = vld [vmem:[%s16334_s4 + $0x90] sm:$0xf0] }
 0x1a6   :  { %v1215_v31 = vmul.f32 %v10869_v16, %v1210_v21  ;;  %v1468_v32 = vadd.f32 %v1449_v42, %v339_v41  ;;  %v7786_v21 = vor.u32 %v10283_v0, %v7783_v7  ;;  %v10294_v0 = vld [vmem:[%s16334_s4 + $0xf4] sm:$0xf0]  ;;  %v10271_v7 = vld [vmem:[%s16334_s4 + $0x44] sm:$0xf]  ;;  %v7735_v12 = vld [vmem:[%s16334_s4 + $0x50] sm:$0xf0] }
 0x1a7   :  { %v1425_v49 = vpop.f32.mrf.mxu0  ;;  %v1483_v16 = vmul.f32 %v1477_v61, %v12049_v3  ;;  %v7775_v3 = vld [vmem:[%s16334_s4 + $0x98] sm:$0xf0]  ;;  %v7762_v61 = vor.u32 %v10276_v59, %v7759_v37  ;;  %v7781_v59 = vld [vmem:[%s16334_s4 + $0xa0] sm:$0xf]  ;;  %v10285_v37 = vld [vmem:[%s16334_s4 + $0xac] sm:$0xf0] }
 0x1a8   :  { %10872 = vtanh.f32 %v1468_v32  ;;  %v1492_v5 = vpack.c.bf16 %v1215_v31, %v1215_v31  ;;  %v7770_v49 = vor.u32 %v10279_v55, %v7767_v48 }
 0x1a9   :  { %10874 = vtanh.f32 %v1479_v26  ;;  %v10280_v26 = vld [vmem:[%s16334_s4 + $0x8c] sm:$0xf] }
 0x1aa   :  { %v10871_v13 = vpop.eup %10870  ;;  %1898 = vmatmul.bf16.vlgmr.msrb.gmra.mxu1 %v1492_v5  ;;  %1924 = vmatmul.bf16.vlgmr.msrb.gmra.mxu3 %v1492_v5 }
 0x1ab   :  { %v1472_v63 = vmul.f32 0.5, %v10871_v13  ;;  %2210 = vmatpush.bf16.msrb.mxu1 %v7818_v36  ;;  %2236 = vmatpush.bf16.msrb.mxu3 %v7826_v46  ;;  %v7778_v36 = vor.u32 %v10280_v26, %v7775_v3  ;;  %v10275_v46 = vld [vmem:[%s16334_s4 + $0x64] sm:$0xf]  ;;  %v10290_v26 = vld [vmem:[%s16334_s4 + $0xd4] sm:$0xf0] }
 0x1ac   :  { %v7754_v13 = vor.u32 %v10275_v46, %v7751_v35  ;;  %v10267_v3 = vld [vmem:[%s16334_s4 + $0x24] sm:$0xf] }
 0x1ad   :  { %v1473_v52 = vadd.f32 0.5, %v1472_v63  ;;  %v1451_v14 = vpop.f32.mrf.mxu2  ;;  %v7813_v63 = vld [vmem:[%s16334_s4 + $0xe0] sm:$0xf] }
 0x1ae   :  { %v10873_v11 = vpop.eup %10872  ;;  %v7743_v14 = vld [vmem:[%s16334_s4 + $0x58] sm:$0xf0] }
 0x1af   :  { %v1484_v41 = vmul.f32 %v10873_v11, %v1473_v52  ;;  %2211 = vmatpush.bf16.msrb.mxu1 %v7802_v47  ;;  %2237 = vmatpush.bf16.msrb.mxu3 %v7810_v25  ;;  %v10875_v42 = vpop.eup %10874  ;;  %v10293_v47 = vld [vmem:[%s16334_s4 + $0xec] sm:$0xf0]  ;;  %v7821_v25 = vld [vmem:[%s16334_s4 + $0xe8] sm:$0xf]  ;;  %v10272_v52 = vld [vmem:[%s16334_s4 + $0x4c] sm:$0xf] }
 0x1b0   :  { %v1481_v32 = vmul.f32 0.5, %v10875_v42  ;;  %v7738_v42 = vor.u32 %v10271_v7, %v7735_v12  ;;  %v7746_v48 = vor.u32 %v10272_v52, %v7743_v14  ;;  %v7711_v7 = vld [vmem:[%s16334_s4 + $0x18] sm:$0xf0] }
 0x1b1   :  { %v12644_v31 = vadd.f32 %v1484_v41, %v1483_v16  ;;  %v7814_v16 = vor.u32 %v10293_v47, %v7813_v63  ;;  %v7822_v41 = vor.u32 %v10294_v0, %v7821_v25  ;;  %v10286_v63 = vld [vmem:[%s16334_s4 + $0xb4] sm:$0xf0]  ;;  %v10263_v47 = vld [vmem:[%s16334_s4 + $0x4] sm:$0xf]  ;;  %v7703_v25 = vld [vmem:[%s16334_s4 + $0x10] sm:$0xf0] }
 0x1b2   :  { %v1482_v10 = vadd.f32 0.5, %v1481_v32  ;;  %v7719_v32 = vld [vmem:[%s16334_s4 + $0x30] sm:$0xf0]  ;;  %v10264_v0 = vld [vmem:[%s16334_s4 + $0xc] sm:$0xf]  ;;  %v7706_v52 = vor.u32 %v10263_v47, %v7703_v25 }
 0x1b3   :  { %10876 = vtanh.f32 %v12644_v31  ;;  %2212 = vmatpush.bf16.msrb.mxu1 %v7786_v21  ;;  %2238 = vmatpush.bf16.msrb.mxu3 %v7794_v56  ;;  %v7797_v21 = vld [vmem:[%s16334_s4 + $0xc0] sm:$0xf]  ;;  %v10289_v56 = vld [vmem:[%s16334_s4 + $0xcc] sm:$0xf0]  ;;  %v7714_v14 = vor.u32 %v10264_v0, %v7711_v7  ;;  %v10270_v47 = vld [vmem:[%s16334_s4 + $0x34] sm:$0xf0] }
 0x1b4   :  { %v7798_v46 = vor.u32 %v10289_v56, %v7797_v21  ;;  %v10282_v21 = vld [vmem:[%s16334_s4 + $0x94] sm:$0xf0]  ;;  %v7701_v7 = vld [vmem:[%s16334_s4] sm:$0xf] }
 0x1b7   :  { %2213 = vmatpush.bf16.msrb.mxu1 %v7770_v49  ;;  %2239 = vmatpush.bf16.msrb.mxu3 %v7778_v36  ;;  %v10268_v49 = vld [vmem:[%s16334_s4 + $0x2c] sm:$0xf]  ;;  %v7727_v36 = vld [vmem:[%s16334_s4 + $0x38] sm:$0xf0] }
 0x1b9   :  { %v10877_v8 = vpop.eup %10876 }
 0x1ba   :  { %v1487_v11 = vmul.f32 %v10877_v8, %v1482_v10  ;;  %1950 = vmatmul.bf16.vlgmr.msra.gmra.mxu1 %v1492_v5  ;;  %1976 = vmatmul.bf16.vlgmr.msra.gmra.mxu3 %v1492_v5  ;;  %v7805_v5 = vld [vmem:[%s16334_s4 + $0xc8] sm:$0xf]  ;;  %v7722_v10 = vor.u32 %v10267_v3, %v7719_v32  ;;  %v7782_v8 = vor.u32 %v10285_v37, %v7781_v59  ;;  %v10278_v3 = vld [vmem:[%s16334_s4 + $0x74] sm:$0xf0] }
 0x1bb   :  { %2214 = vmatpush.bf16.msrb.mxu1 %v7754_v13  ;;  %2240 = vmatpush.bf16.msrb.mxu3 %v7762_v61  ;;  %v7806_v35 = vor.u32 %v10290_v26, %v7805_v5  ;;  %v7730_v13 = vor.u32 %v10268_v49, %v7727_v36  ;;  %v7789_v61 = vld [vmem:[%s16334_s4 + $0xa8] sm:$0xf]  ;;  %v10277_v5 = vld [vmem:[%s16334_s4 + $0x6c] sm:$0xf0]  ;;  %v7733_v36 = vld [vmem:[%s16334_s4 + $0x40] sm:$0xf] }
 0x1bc   :  { %v12689_v55 = vpack.c.bf16 %v1487_v11, %v1487_v11  ;;  %v7790_v12 = vor.u32 %v10286_v63, %v7789_v61  ;;  %v7765_v11 = vld [vmem:[%s16334_s4 + $0x80] sm:$0xf]  ;;  %v7757_v26 = vld [vmem:[%s16334_s4 + $0x68] sm:$0xf]  ;;  %v10274_v59 = vld [vmem:[%s16334_s4 + $0x54] sm:$0xf0] }
 0x1bd   :  { %v7758_v49 = vor.u32 %v10278_v3, %v7757_v26  ;;  %v10269_v61 = vld [vmem:[%s16334_s4 + $0x2c] sm:$0xf0]  ;;  %v7725_v63 = vld [vmem:[%s16334_s4 + $0x28] sm:$0xf]  ;;  %v10351_v26 = vld [vmem:[%s16337_s6 + $0x1c4] sm:$0xf] }
 0x1be   :  { %1885 = vmatmul.bf16.vlgmr.msrb.gmra.mxu0 %v12689_v55  ;;  %1911 = vmatmul.bf16.vlgmr.msrb.gmra.mxu2 %v12689_v55  ;;  %v7726_v0 = vor.u32 %v10270_v47, %v7725_v63  ;;  %v10343_v63 = vld [vmem:[%s16337_s6 + $0x184] sm:$0xf] }
 0x1bf   :  { %2197 = vmatpush.bf16.msrb.mxu0 %v7814_v16  ;;  %2223 = vmatpush.bf16.msrb.mxu2 %v7822_v41  ;;  %v10281_v16 = vld [vmem:[%s16334_s4 + $0x8c] sm:$0xf0]  ;;  %v7773_v41 = vld [vmem:[%s16334_s4 + $0x88] sm:$0xf] }
 0x1c0   :  { %2215 = vmatpush.bf16.msrb.mxu1 %v7738_v42  ;;  %2241 = vmatpush.bf16.msrb.mxu3 %v7746_v48  ;;  %v7766_v56 = vor.u32 %v10281_v16, %v7765_v11  ;;  %v7774_v42 = vor.u32 %v10282_v21, %v7773_v41  ;;  %v7749_v48 = vld [vmem:[%s16334_s4 + $0x60] sm:$0xf]  ;;  %v10357_v41 = vld [vmem:[%s16337_s6 + $0x1ec] sm:$0xf0]  ;;  %v10355_v21 = vld [vmem:[%s16337_s6 + $0x1e4] sm:$0xf] }
 0x1c1   :  { %v7750_v32 = vor.u32 %v10277_v5, %v7749_v48  ;;  %v8069_v16 = vld [vmem:[%s16337_s6 + $0x1e0] sm:$0xf]  ;;  %v10353_v5 = vld [vmem:[%s16337_s6 + $0x1cc] sm:$0xf0] }
 0x1c3   :  { %2198 = vmatpush.bf16.msrb.mxu0 %v7798_v46  ;;  %2224 = vmatpush.bf16.msrb.mxu2 %v7806_v35  ;;  %v10273_v46 = vld [vmem:[%s16334_s4 + $0x4c] sm:$0xf0]  ;;  %v7741_v35 = vld [vmem:[%s16334_s4 + $0x48] sm:$0xf] }
 0x1c4   :  { %2216 = vmatpush.bf16.msrb.mxu1 %v7722_v10  ;;  %2242 = vmatpush.bf16.msrb.mxu3 %v7730_v13  ;;  %v7734_v37 = vor.u32 %v10273_v46, %v7733_v36  ;;  %v7742_v10 = vor.u32 %v10274_v59, %v7741_v35  ;;  %v7717_v13 = vld [vmem:[%s16334_s4 + $0x20] sm:$0xf]  ;;  %v10349_v46 = vld [vmem:[%s16337_s6 + $0x1ac] sm:$0xf0]  ;;  %v10347_v35 = vld [vmem:[%s16337_s6 + $0x1a4] sm:$0xf] }
 0x1c5   :  { %v7718_v25 = vor.u32 %v10269_v61, %v7717_v13  ;;  %v8037_v36 = vld [vmem:[%s16337_s6 + $0x1a0] sm:$0xf]  ;;  %v10345_v61 = vld [vmem:[%s16337_s6 + $0x18c] sm:$0xf0] }
 0x1c6   :  { %v8038_v59 = vor.u32 %v10349_v46, %v8037_v36  ;;  %v8021_v13 = vld [vmem:[%s16337_s6 + $0x180] sm:$0xf]  ;;  %v10321_v46 = vld [vmem:[%s16337_s6 + $0xcc] sm:$0xf0] }
 0x1c7   :  { %2199 = vmatpush.bf16.msrb.mxu0 %v7782_v8  ;;  %2225 = vmatpush.bf16.msrb.mxu2 %v7790_v12  ;;  %v10265_v8 = vld [vmem:[%s16334_s4 + $0xc] sm:$0xf0]  ;;  %v7709_v12 = vld [vmem:[%s16334_s4 + $0x8] sm:$0xf]  ;;  %v8022_v47 = vor.u32 %v10345_v61, %v8021_v13  ;;  %v7925_v36 = vld [vmem:[%s16337_s6 + $0xc0] sm:$0xf] }
 0x1c8   :  { %2217 = vmatpush.bf16.msrb.mxu1 %v7706_v52  ;;  %2243 = vmatpush.bf16.msrb.mxu3 %v7714_v14  ;;  %v10266_v52 = vld [vmem:[%s16334_s4 + $0x14] sm:$0xf0]  ;;  %v7702_v14 = vor.u32 %v10265_v8, %v7701_v7  ;;  %v8005_v7 = vld [vmem:[%s16337_s6 + $0x160] sm:$0xf]  ;;  %v10341_v8 = vld [vmem:[%s16337_s6 + $0x16c] sm:$0xf0] }
 0x1c9   :  { %v7710_v11 = vor.u32 %v10266_v52, %v7709_v12  ;;  %v10339_v12 = vld [vmem:[%s16337_s6 + $0x164] sm:$0xf]  ;;  %v8006_v52 = vor.u32 %v10341_v8, %v8005_v7  ;;  %v10333_v13 = vld [vmem:[%s16337_s6 + $0x12c] sm:$0xf0]  ;;  %v7909_v8 = vld [vmem:[%s16337_s6 + $0xa0] sm:$0xf] }
 0x1cb   :  { %2200 = vmatpush.bf16.msrb.mxu0 %v7766_v56  ;;  %2218 = vmatmul.bf16.vlgmr.msrb.gmra.mxu1 %v12689_v55  ;;  %v8070_v56 = vor.u32 %v10357_v41, %v8069_v16  ;;  %v7941_v16 = vld [vmem:[%s16337_s6 + $0xe0] sm:$0xf]  ;;  %v10325_v41 = vld [vmem:[%s16337_s6 + $0xec] sm:$0xf0] }
 0x1cc   :  { %2226 = vmatpush.bf16.msrb.mxu2 %v7774_v42  ;;  %2244 = vmatmul.bf16.vlgmr.msrb.gmra.mxu3 %v12689_v55  ;;  %v8071_v42 = vld [vmem:[%s16337_s6 + $0x1f0] sm:$0xf0] }
 0x1cd   :  { %v8074_v48 = vor.u32 %v10355_v21, %v8071_v42  ;;  %2673 = vmatpush.bf16.msra.mxu1 %v8070_v56  ;;  %v10323_v21 = vld [vmem:[%s16337_s6 + $0xe4] sm:$0xf]  ;;  %v7942_v56 = vor.u32 %v10325_v41, %v7941_v16  ;;  %v7943_v42 = vld [vmem:[%s16337_s6 + $0xf0] sm:$0xf0]  ;;  %v7957_v16 = vld [vmem:[%s16337_s6 + $0x100] sm:$0xf] }
 0x1ce   :  { %1937 = vmatmul.bf16.vlgmr.msra.gmra.mxu0 %v12689_v55  ;;  %1963 = vmatmul.bf16.vlgmr.msra.gmra.mxu2 %v12689_v55  ;;  %v10329_v41 = vld [vmem:[%s16337_s6 + $0x10c] sm:$0xf0] }
 0x1cf   :  { %2201 = vmatpush.bf16.msrb.mxu0 %v7750_v32  ;;  %2699 = vmatpush.bf16.msra.mxu3 %v8074_v48  ;;  %v8055_v32 = vld [vmem:[%s16337_s6 + $0x1d0] sm:$0xf0]  ;;  %v7989_v48 = vld [vmem:[%s16337_s6 + $0x140] sm:$0xf] }
 0x1d0   :  { %2227 = vmatpush.bf16.msrb.mxu2 %v7758_v49  ;;  %v8058_v49 = vor.u32 %v10351_v26, %v8055_v32  ;;  %v7991_v32 = vld [vmem:[%s16337_s6 + $0x150] sm:$0xf0] }
 0x1d3   :  { %2202 = vmatpush.bf16.msrb.mxu0 %v7734_v37  ;;  %2700 = vmatpush.bf16.msra.mxu3 %v8058_v49  ;;  %v8039_v37 = vld [vmem:[%s16337_s6 + $0x1b0] sm:$0xf0] }
 0x1d4   :  { %2228 = vmatpush.bf16.msrb.mxu2 %v7742_v10  ;;  %v8042_v10 = vor.u32 %v10347_v35, %v8039_v37  ;;  %v10319_v35 = vld [vmem:[%s16337_s6 + $0xc4] sm:$0xf]  ;;  %v7927_v37 = vld [vmem:[%s16337_s6 + $0xd0] sm:$0xf0] }
 0x1d5   :  { %v7930_v61 = vor.u32 %v10319_v35, %v7927_v37  ;;  %v10313_v35 = vld [vmem:[%s16337_s6 + $0x8c] sm:$0xf0] }
 0x1d7   :  { %2203 = vmatpush.bf16.msrb.mxu0 %v7718_v25  ;;  %2701 = vmatpush.bf16.msra.mxu3 %v8042_v10  ;;  %v8023_v25 = vld [vmem:[%s16337_s6 + $0x190] sm:$0xf0]  ;;  %v7973_v10 = vld [vmem:[%s16337_s6 + $0x120] sm:$0xf] }
 0x1d8   :  { %2229 = vmatpush.bf16.msrb.mxu2 %v7726_v0  ;;  %v8026_v0 = vor.u32 %v10343_v63, %v8023_v25  ;;  %v7974_v63 = vor.u32 %v10333_v13, %v7973_v10  ;;  %v7975_v25 = vld [vmem:[%s16337_s6 + $0x130] sm:$0xf0] }
 0x1d9   :  { %v7895_v10 = vld [vmem:[%s16337_s6 + $0x90] sm:$0xf0] }
 0x1db   :  { %2204 = vmatpush.bf16.msrb.mxu0 %v7702_v14  ;;  %2702 = vmatpush.bf16.msra.mxu3 %v8026_v0  ;;  %v8007_v14 = vld [vmem:[%s16337_s6 + $0x170] sm:$0xf0] }
 0x1dc   :  { %2230 = vmatpush.bf16.msrb.mxu2 %v7710_v11  ;;  %v8010_v11 = vor.u32 %v10339_v12, %v8007_v14  ;;  %v10317_v12 = vld [vmem:[%s16337_s6 + $0xac] sm:$0xf0] }
 0x1dd   :  { %v7910_v14 = vor.u32 %v10317_v12, %v7909_v8  ;;  %v8063_v8 = vld [vmem:[%s16337_s6 + $0x1d8] sm:$0xf0] }
 0x1de   :  { %2205 = vmatmul.bf16.vlgmr.msrb.gmra.mxu0 %v12689_v55 }
 0x1df   :  { %2231 = vmatmul.bf16.vlgmr.msrb.gmra.mxu2 %v12689_v55  ;;  %v8053_v55 = vld [vmem:[%s16337_s6 + $0x1c0] sm:$0xf]  ;;  %2703 = vmatpush.bf16.msra.mxu3 %v8010_v11  ;;  %v7911_v11 = vld [vmem:[%s16337_s6 + $0xb0] sm:$0xf0] }
 0x1e0   :  { %v8054_v3 = vor.u32 %v10353_v5, %v8053_v55  ;;  %v10337_v55 = vld [vmem:[%s16337_s6 + $0x14c] sm:$0xf0]  ;;  %v7946_v5 = vor.u32 %v10323_v21, %v7943_v42  ;;  %2660 = vmatpush.bf16.msra.mxu0 %v7942_v56  ;;  %v7958_v56 = vor.u32 %v10329_v41, %v7957_v16  ;;  %v10327_v42 = vld [vmem:[%s16337_s6 + $0x104] sm:$0xf] }
 0x1e1   :  { %v7990_v26 = vor.u32 %v10337_v55, %v7989_v48  ;;  %v7959_v48 = vld [vmem:[%s16337_s6 + $0x110] sm:$0xf0]  ;;  %v8077_v55 = vld [vmem:[%s16337_s6 + $0x1e8] sm:$0xf]  ;;  %v10307_v16 = vld [vmem:[%s16337_s6 + $0x64] sm:$0xf] }
 0x1e2   :  { %2674 = vmatpush.bf16.msra.mxu1 %v8054_v3  ;;  %v10335_v3 = vld [vmem:[%s16337_s6 + $0x144] sm:$0xf]  ;;  %2686 = vmatpush.bf16.msra.mxu2 %v7946_v5  ;;  %v7962_v5 = vor.u32 %v10327_v42, %v7959_v48  ;;  %v8045_v42 = vld [vmem:[%s16337_s6 + $0x1a8] sm:$0xf]  ;;  %v10350_v48 = vld [vmem:[%s16337_s6 + $0x1b4] sm:$0xf0] }
 0x1e3   :  { %v7994_v49 = vor.u32 %v10335_v3, %v7991_v32  ;;  %v10356_v3 = vld [vmem:[%s16337_s6 + $0x1ec] sm:$0xf]  ;;  %v8079_v32 = vld [vmem:[%s16337_s6 + $0x1f8] sm:$0xf0] }
 0x1e5   :  { %2704 = vmatpush.bf16.msra.mxu3 %v7994_v49 }
 0x1e6   :  { %2675 = vmatpush.bf16.msra.mxu1 %v8038_v59  ;;  %v7926_v59 = vor.u32 %v10321_v46, %v7925_v36  ;;  %2687 = vmatpush.bf16.msra.mxu2 %v7930_v61  ;;  %v8082_v36 = vor.u32 %v10356_v3, %v8079_v32  ;;  %v7893_v46 = vld [vmem:[%s16337_s6 + $0x80] sm:$0xf] }
 0x1e7   :  { %v7894_v37 = vor.u32 %v10313_v35, %v7893_v46  ;;  %v7861_v32 = vld [vmem:[%s16337_s6 + $0x40] sm:$0xf]  ;;  %v7863_v35 = vld [vmem:[%s16337_s6 + $0x50] sm:$0xf0] }
 0x1e8   :  { %2661 = vmatpush.bf16.msra.mxu0 %v7926_v59  ;;  %v10311_v59 = vld [vmem:[%s16337_s6 + $0x84] sm:$0xf] }
 0x1e9   :  { %v7898_v61 = vor.u32 %v10311_v59, %v7895_v10  ;;  %v8029_v10 = vld [vmem:[%s16337_s6 + $0x188] sm:$0xf] }
 0x1ea   :  { %2676 = vmatpush.bf16.msra.mxu1 %v8022_v47  ;;  %v10331_v47 = vld [vmem:[%s16337_s6 + $0x124] sm:$0xf] }
 0x1eb   :  { %v7978_v0 = vor.u32 %v10331_v47, %v7975_v25  ;;  %v10354_v47 = vld [vmem:[%s16337_s6 + $0x1d4] sm:$0xf0]  ;;  %v10352_v25 = vld [vmem:[%s16337_s6 + $0x1cc] sm:$0xf] }
 0x1ec   :  { %2662 = vmatpush.bf16.msra.mxu0 %v7910_v14  ;;  %v7877_v14 = vld [vmem:[%s16337_s6 + $0x60] sm:$0xf] }
 0x1ed   :  { %2705 = vmatpush.bf16.msra.mxu3 %v7978_v0 }
 0x1ee   :  { %2677 = vmatpush.bf16.msra.mxu1 %v8006_v52  ;;  %v10315_v52 = vld [vmem:[%s16337_s6 + $0xa4] sm:$0xf] }
 0x1ef   :  { %v7914_v21 = vor.u32 %v10315_v52, %v7911_v11  ;;  %v8066_v52 = vor.u32 %v10352_v25, %v8063_v8  ;;  %v10309_v11 = vld [vmem:[%s16337_s6 + $0x6c] sm:$0xf0]  ;;  %v8031_v25 = vld [vmem:[%s16337_s6 + $0x198] sm:$0xf0] }
 0x1f0   :  { %2663 = vmatpush.bf16.msra.mxu0 %v7894_v37  ;;  %v7878_v41 = vor.u32 %v10309_v11, %v7877_v14  ;;  %v10299_v14 = vld [vmem:[%s16337_s6 + $0x24] sm:$0xf] }
 0x1f1   :  { %2688 = vmatpush.bf16.msra.mxu2 %v7914_v21  ;;  %2706 = vmatpush.bf16.msra.mxu3 %v7962_v5  ;;  %v7879_v21 = vld [vmem:[%s16337_s6 + $0x70] sm:$0xf0]  ;;  %v8046_v5 = vor.u32 %v10350_v48, %v8045_v42  ;;  %v10340_v42 = vld [vmem:[%s16337_s6 + $0x16c] sm:$0xf] }
 0x1f2   :  { %2678 = vmatpush.bf16.msra.mxu1 %v7990_v26  ;;  %v10358_v26 = vld [vmem:[%s16337_s6 + $0x1f4] sm:$0xf0] }
 0x1f3   :  { %v8078_v49 = vor.u32 %v10358_v26, %v8077_v55  ;;  %v10348_v55 = vld [vmem:[%s16337_s6 + $0x1ac] sm:$0xf]  ;;  %v8047_v26 = vld [vmem:[%s16337_s6 + $0x1b8] sm:$0xf0] }
 0x1f4   :  { %2664 = vmatpush.bf16.msra.mxu0 %v7878_v41  ;;  %v8050_v3 = vor.u32 %v10348_v55, %v8047_v26  ;;  %v8015_v55 = vld [vmem:[%s16337_s6 + $0x178] sm:$0xf0] }
 0x1f5   :  { %2751 = vmatpush.bf16.msrb.mxu3 %v8082_v36  ;;  %2689 = vmatpush.bf16.msra.mxu2 %v7898_v61  ;;  %v10303_v36 = vld [vmem:[%s16337_s6 + $0x44] sm:$0xf]  ;;  %v10346_v61 = vld [vmem:[%s16337_s6 + $0x194] sm:$0xf0]  ;;  %v8018_v26 = vor.u32 %v10340_v42, %v8015_v55  ;;  %v7933_v42 = vld [vmem:[%s16337_s6 + $0xc8] sm:$0xf] }
 0x1f6   :  { %2679 = vmatpush.bf16.msra.mxu1 %v7974_v63  ;;  %v8061_v63 = vld [vmem:[%s16337_s6 + $0x1c8] sm:$0xf]  ;;  %v7866_v37 = vor.u32 %v10303_v36, %v7863_v35  ;;  %v7831_v35 = vld [vmem:[%s16337_s6 + $0x10] sm:$0xf0] }
 0x1f7   :  { %v8062_v0 = vor.u32 %v10354_v47, %v8061_v63  ;;  %v10344_v63 = vld [vmem:[%s16337_s6 + $0x18c] sm:$0xf]  ;;  %v8030_v47 = vor.u32 %v10346_v61, %v8029_v10 }
 0x1f8   :  { %v8034_v8 = vor.u32 %v10344_v63, %v8031_v25  ;;  %v7951_v25 = vld [vmem:[%s16337_s6 + $0xf8] sm:$0xf0] }
 0x1f9   :  { %2752 = vmatpush.bf16.msrb.mxu3 %v8066_v52  ;;  %v10301_v52 = vld [vmem:[%s16337_s6 + $0x2c] sm:$0xf0] }
 0x1fa   :  { %2680 = vmatpush.bf16.msra.mxu1 %v7958_v56  ;;  %v7882_v56 = vor.u32 %v10307_v16, %v7879_v21  ;;  %v7847_v16 = vld [vmem:[%s16337_s6 + $0x30] sm:$0xf0]  ;;  %v8013_v21 = vld [vmem:[%s16337_s6 + $0x168] sm:$0xf] }
 0x1fb   :  { %v7850_v41 = vor.u32 %v10299_v14, %v7847_v16  ;;  %v10336_v14 = vld [vmem:[%s16337_s6 + $0x14c] sm:$0xf] }
 0x1fc   :  { %2690 = vmatpush.bf16.msra.mxu2 %v7882_v56  ;;  %v10342_v56 = vld [vmem:[%s16337_s6 + $0x174] sm:$0xf0] }
 0x1fd   :  { %2753 = vmatpush.bf16.msrb.mxu3 %v8050_v3  ;;  %v8014_v48 = vor.u32 %v10342_v56, %v8013_v21  ;;  %v7829_v3 = vld [vmem:[%s16337_s6] sm:$0xf] }
 0x1fe   :  { %2725 = vmatpush.bf16.msrb.mxu1 %v8078_v49  ;;  %v10305_v49 = vld [vmem:[%s16337_s6 + $0x4c] sm:$0xf0] }
 0x1ff   :  { %v7862_v46 = vor.u32 %v10305_v49, %v7861_v32  ;;  %v10297_v32 = vld [vmem:[%s16337_s6 + $0xc] sm:$0xf0]  ;;  %v10295_v49 = vld [vmem:[%s16337_s6 + $0x4] sm:$0xf] }
 0x200   :  { %2691 = vmatpush.bf16.msra.mxu2 %v7866_v37  ;;  %v10326_v37 = vld [vmem:[%s16337_s6 + $0xf4] sm:$0xf0]  ;;  %v7834_v61 = vor.u32 %v10295_v49, %v7831_v35  ;;  %v7983_v35 = vld [vmem:[%s16337_s6 + $0x138] sm:$0xf0] }
 0x201   :  { %2665 = vmatpush.bf16.msra.mxu0 %v7862_v46  ;;  %2754 = vmatpush.bf16.msrb.mxu3 %v8034_v8  ;;  %v7830_v46 = vor.u32 %v10297_v32, %v7829_v3  ;;  %v7997_v8 = vld [vmem:[%s16337_s6 + $0x148] sm:$0xf] }
 0x202   :  { %2726 = vmatpush.bf16.msrb.mxu1 %v8062_v0  ;;  %v7981_v3 = vld [vmem:[%s16337_s6 + $0x128] sm:$0xf] }
 0x204   :  { %2692 = vmatpush.bf16.msra.mxu2 %v7850_v41 }
 0x205   :  { %2755 = vmatpush.bf16.msrb.mxu3 %v8018_v26  ;;  %v7935_v26 = vld [vmem:[%s16337_s6 + $0xd8] sm:$0xf0] }
 0x206   :  { %2727 = vmatpush.bf16.msrb.mxu1 %v8046_v5 }
 0x208   :  { %2693 = vmatpush.bf16.msra.mxu2 %v7834_v61 }
 0x20a   :  { %2728 = vmatpush.bf16.msrb.mxu1 %v8030_v47  ;;  %v10324_v47 = vld [vmem:[%s16337_s6 + $0xec] sm:$0xf] }
 0x20e   :  { %2729 = vmatpush.bf16.msrb.mxu1 %v8014_v48  ;;  %v10322_v48 = vld [vmem:[%s16337_s6 + $0xd4] sm:$0xf0] }
 0x227   :  { %v12909_v7 = vpop.f32.mrf.mxu1 }
 0x22d   :  { %v12959_v13 = vpop.f32.mrf.mxu3 }
 0x22f   :  { %v1901_v12 = vpop.f32.mrf.mxu1 }
 0x230   :  { %v7845_v12 = vld [vmem:[%s16337_s6 + $0x20] sm:$0xf] }
 0x231   :  { %v7846_v11 = vor.u32 %v10301_v52, %v7845_v12  ;;  %v7954_v12 = vor.u32 %v10324_v47, %v7951_v25  ;;  %v10338_v52 = vld [vmem:[%s16337_s6 + $0x154] sm:$0xf0]  ;;  %v7917_v25 = vld [vmem:[%s16337_s6 + $0xa8] sm:$0xf] }
 0x232   :  { %v7998_v21 = vor.u32 %v10338_v52, %v7997_v8  ;;  %v10318_v8 = vld [vmem:[%s16337_s6 + $0xb4] sm:$0xf0] }
 0x233   :  { %2666 = vmatpush.bf16.msra.mxu0 %v7846_v11  ;;  %v7999_v11 = vld [vmem:[%s16337_s6 + $0x158] sm:$0xf0]  ;;  %2738 = vmatpush.bf16.msrb.mxu2 %v7954_v12  ;;  %v10316_v12 = vld [vmem:[%s16337_s6 + $0xac] sm:$0xf] }
 0x234   :  { %v8002_v56 = vor.u32 %v10336_v14, %v7999_v11  ;;  %2730 = vmatpush.bf16.msrb.mxu1 %v7998_v21  ;;  %v7918_v14 = vor.u32 %v10318_v8, %v7917_v25  ;;  %v7965_v11 = vld [vmem:[%s16337_s6 + $0x108] sm:$0xf]  ;;  %v7887_v8 = vld [vmem:[%s16337_s6 + $0x78] sm:$0xf0] }
 0x235   :  { %v1927_v59 = vpop.f32.mrf.mxu3 }
 0x236   :  { %v7949_v59 = vld [vmem:[%s16337_s6 + $0xe8] sm:$0xf]  ;;  %2756 = vmatpush.bf16.msrb.mxu3 %v8002_v56 }
 0x237   :  { %v13021_v0 = vpop.f32.mrf.mxu1  ;;  %v7950_v63 = vor.u32 %v10326_v37, %v7949_v59  ;;  %2667 = vmatpush.bf16.msra.mxu0 %v7830_v46  ;;  %v10332_v46 = vld [vmem:[%s16337_s6 + $0x12c] sm:$0xf] }
 0x23b   :  { %v1886_v5 = vpop.f32.mrf.mxu0  ;;  %2712 = vmatpush.bf16.msrb.mxu0 %v7950_v63  ;;  %v7986_v63 = vor.u32 %v10332_v46, %v7983_v35 }
 0x23c   :  { %v1887_v36 = vadd.f32 %v1886_v5, %v12397_v1  ;;  %v7934_v5 = vor.u32 %v10322_v48, %v7933_v42  ;;  %v10328_v42 = vld [vmem:[%s16337_s6 + $0x10c] sm:$0xf]  ;;  %v7967_v48 = vld [vmem:[%s16337_s6 + $0x118] sm:$0xf0] }
 0x23d   :  { %v13066_v10 = vpop.f32.mrf.mxu3  ;;  %2757 = vmatpush.bf16.msrb.mxu3 %v7986_v63  ;;  %v10308_v63 = vld [vmem:[%s16337_s6 + $0x6c] sm:$0xf] }
 0x23e   :  { %v1900_v16 = vadd.f32 %v12909_v7, %v1887_v36  ;;  %v10320_v7 = vld [vmem:[%s16337_s6 + $0xcc] sm:$0xf]  ;;  %v10334_v36 = vld [vmem:[%s16337_s6 + $0x134] sm:$0xf0] }
 0x23f   :  { %v1953_v41 = vpop.f32.mrf.mxu1  ;;  %v7938_v49 = vor.u32 %v10320_v7, %v7935_v26  ;;  %2713 = vmatpush.bf16.msrb.mxu0 %v7934_v5  ;;  %v7982_v61 = vor.u32 %v10334_v36, %v7981_v3  ;;  %v7901_v7 = vld [vmem:[%s16337_s6 + $0x88] sm:$0xf]  ;;  %v10314_v26 = vld [vmem:[%s16337_s6 + $0x94] sm:$0xf0]  ;;  %v7903_v36 = vld [vmem:[%s16337_s6 + $0x98] sm:$0xf0] }
 0x240   :  { %v1981_v59 = vmul.f32 0.5, %v1900_v16  ;;  %v10330_v16 = vld [vmem:[%s16337_s6 + $0x114] sm:$0xf0] }
 0x241   :  { %v1912_v55 = vpop.f32.mrf.mxu2  ;;  %2739 = vmatpush.bf16.msrb.mxu2 %v7938_v49  ;;  %2731 = vmatpush.bf16.msrb.mxu1 %v7982_v61  ;;  %v7966_v56 = vor.u32 %v10330_v16, %v7965_v11  ;;  %v10312_v49 = vld [vmem:[%s16337_s6 + $0x8c] sm:$0xf]  ;;  %v10310_v61 = vld [vmem:[%s16337_s6 + $0x74] sm:$0xf0] }
 0x242   :  { %v1913_v32 = vadd.f32 %v1912_v55, %v12412_v24  ;;  %10878 = vtanh.f32 %v1981_v59  ;;  %v7970_v55 = vor.u32 %v10328_v42, %v7967_v48  ;;  %v7906_v46 = vor.u32 %v10312_v49, %v7903_v36 }
 0x243   :  { %v1888_v37 = vpop.f32.mrf.mxu0  ;;  %2714 = vmatpush.bf16.msrb.mxu0 %v7918_v14  ;;  %v7890_v14 = vor.u32 %v10308_v63, %v7887_v8 }
 0x244   :  { %v1926_v47 = vadd.f32 %v12959_v13, %v1913_v32  ;;  %v7919_v13 = vld [vmem:[%s16337_s6 + $0xb8] sm:$0xf0]  ;;  %2758 = vmatpush.bf16.msrb.mxu3 %v7970_v55  ;;  %v7902_v32 = vor.u32 %v10314_v26, %v7901_v7  ;;  %v7885_v37 = vld [vmem:[%s16337_s6 + $0x68] sm:$0xf] }
 0x245   :  { %v1979_v52 = vpop.f32.mrf.mxu3  ;;  %v7922_v21 = vor.u32 %v10316_v12, %v7919_v13  ;;  %2732 = vmatpush.bf16.msrb.mxu1 %v7966_v56  ;;  %v7886_v25 = vor.u32 %v10310_v61, %v7885_v37  ;;  %v10304_v56 = vld [vmem:[%s16337_s6 + $0x4c] sm:$0xf]  ;;  %v7871_v55 = vld [vmem:[%s16337_s6 + $0x58] sm:$0xf0] }
 0x246   :  { %v1985_v41 = vmul.f32 0.5, %v1926_v47 }
 0x247   :  { %2740 = vmatpush.bf16.msrb.mxu2 %v7922_v21  ;;  %2715 = vmatpush.bf16.msrb.mxu0 %v7902_v32  ;;  %v10306_v21 = vld [vmem:[%s16337_s6 + $0x54] sm:$0xf0] }
 0x248   :  { %10880 = vtanh.f32 %v1985_v41  ;;  %v2219_v5 = vpop.f32.mrf.mxu1  ;;  %v10879_v47 = vpop.eup %10878  ;;  %v7869_v41 = vld [vmem:[%s16337_s6 + $0x48] sm:$0xf] }
 0x249   :  { %v1914_v3 = vpop.f32.mrf.mxu2  ;;  %v7870_v48 = vor.u32 %v10306_v21, %v7869_v41  ;;  %v2250_v7 = vadd.f32 %v2219_v5, %v11678_v51  ;;  %v10300_v51 = vld [vmem:[%s16337_s6 + $0x2c] sm:$0xf]  ;;  %v7855_v5 = vld [vmem:[%s16337_s6 + $0x38] sm:$0xf0] }
 0x24a   :  { %v7874_v3 = vor.u32 %v10304_v56, %v7871_v55  ;;  %v7839_v21 = vld [vmem:[%s16337_s6 + $0x18] sm:$0xf0] }
 0x24b   :  { %v1938_v35 = vpop.f32.mrf.mxu0  ;;  %2741 = vmatpush.bf16.msrb.mxu2 %v7906_v46  ;;  %2716 = vmatpush.bf16.msrb.mxu0 %v7886_v25  ;;  %v7853_v46 = vld [vmem:[%s16337_s6 + $0x28] sm:$0xf]  ;;  %v2257_v61 = vmul.f32 0.5, %v2250_v7 }
 0x24c   :  { %v1939_v59 = vadd.f32 %v1938_v35, %v12510_v38  ;;  %v10302_v35 = vld [vmem:[%s16337_s6 + $0x34] sm:$0xf0] }
 0x24d   :  { %v7854_v37 = vor.u32 %v10302_v35, %v7853_v46  ;;  %v8207_v35 = vld [vmem:[%s16334_s4 + $0xf8] sm:$0xf0] }
 0x24e   :  { %v10881_v12 = vpop.eup %10880  ;;  %v1952_v52 = vadd.f32 %v13021_v0, %v1939_v59  ;;  %v1983_v0 = vmul.f32 0.5, %v10879_v47  ;;  %v7858_v47 = vor.u32 %v10300_v51, %v7855_v5 }
 0x24f   :  { %v1987_v13 = vmul.f32 0.5, %v10881_v12  ;;  %v2245_v11 = vpop.f32.mrf.mxu3  ;;  %2742 = vmatpush.bf16.msrb.mxu2 %v7890_v14  ;;  %2717 = vmatpush.bf16.msrb.mxu0 %v7870_v48  ;;  %v10298_v14 = vld [vmem:[%s16337_s6 + $0x14] sm:$0xf0] }
 0x250   :  { %10882 = vtanh.f32 %v1952_v52  ;;  %v2221_v16 = vpop.f32.mrf.mxu1  ;;  %v1984_v59 = vadd.f32 0.5, %v1983_v0  ;;  %v7837_v52 = vld [vmem:[%s16337_s6 + $0x8] sm:$0xf] }
 0x251   :  { %v1964_v42 = vpop.f32.mrf.mxu2  ;;  %v1988_v32 = vadd.f32 0.5, %v1987_v13  ;;  %v10296_v13 = vld [vmem:[%s16337_s6 + $0xc] sm:$0xf]  ;;  %v7838_v41 = vor.u32 %v10298_v14, %v7837_v52 }
 0x252   :  { %v1965_v26 = vadd.f32 %v1964_v42, %v12539_v28  ;;  %v7842_v56 = vor.u32 %v10296_v13, %v7839_v21  ;;  %v8167_v21 = vld [vmem:[%s16334_s4 + $0xb0] sm:$0xf0] }
 0x253   :  { %v1940_v49 = vpop.f32.mrf.mxu0  ;;  %2743 = vmatpush.bf16.msrb.mxu2 %v7874_v3  ;;  %v1994_v25 = vmul.f32 %v1988_v32, %v12582_v53  ;;  %2718 = vmatpush.bf16.msrb.mxu0 %v7854_v37  ;;  %v2252_v3 = vadd.f32 %v2245_v11, %v11729_v19  ;;  %v10387_v32 = vld [vmem:[%s16334_s4 + $0xe4] sm:$0xf] }
 0x254   :  { %v1978_v36 = vadd.f32 %v13066_v10, %v1965_v26  ;;  %v8199_v49 = vld [vmem:[%s16334_s4 + $0xf0] sm:$0xf0] }
 0x255   :  { %v2262_v5 = vmul.f32 0.5, %v2252_v3 }
 0x256   :  { %v10883_v10 = vpop.eup %10882  ;;  %v1990_v63 = vmul.f32 0.5, %v1978_v36 }
 0x257   :  { %v1995_v8 = vmul.f32 %v10883_v10, %v1984_v59  ;;  %v2247_v12 = vpop.f32.mrf.mxu3  ;;  %2744 = vmatpush.bf16.msrb.mxu2 %v7858_v47  ;;  %2719 = vmatpush.bf16.msrb.mxu0 %v7838_v41  ;;  %v8202_v10 = vor.u32 %v10387_v32, %v8199_v49  ;;  %v10379_v41 = vld [vmem:[%s16334_s4 + $0xa4] sm:$0xf] }
 0x258   :  { %10884 = vtanh.f32 %v1990_v63  ;;  %v10383_v63 = vld [vmem:[%s16334_s4 + $0xc4] sm:$0xf] }
 0x259   :  { %v13200_v16 = vadd.f32 %v1995_v8, %v1994_v25  ;;  %v1966_v53 = vpop.f32.mrf.mxu2  ;;  %10886 = vtanh.f32 %v2257_v61  ;;  %v8183_v25 = vld [vmem:[%s16334_s4 + $0xd0] sm:$0xf0]  ;;  %v10384_v8 = vld [vmem:[%s16334_s4 + $0xcc] sm:$0xf]  ;;  %v10375_v49 = vld [vmem:[%s16334_s4 + $0x84] sm:$0xf] }
 0x25a   :  { %v8186_v13 = vor.u32 %v10383_v63, %v8183_v25  ;;  %v8197_v25 = vld [vmem:[%s16334_s4 + $0xe0] sm:$0xf] }
 0x25b   :  { %10888 = vtanh.f32 %v13200_v16  ;;  %v2206_v0 = vpop.f32.mrf.mxu0  ;;  %2745 = vmatpush.bf16.msrb.mxu2 %v7842_v56 }
 0x25c   :  { %v2249_v42 = vadd.f32 %v2206_v0, %v11666_v44  ;;  %v10388_v44 = vld [vmem:[%s16334_s4 + $0xec] sm:$0xf] }
 0x25d   :  { %v8210_v61 = vor.u32 %v10388_v44, %v8207_v35  ;;  %v10380_v0 = vld [vmem:[%s16334_s4 + $0xac] sm:$0xf] }
 0x25e   :  { %v10885_v48 = vpop.eup %10884  ;;  %v2253_v55 = vmul.f32 0.5, %v2249_v42  ;;  %v8175_v42 = vld [vmem:[%s16334_s4 + $0xb8] sm:$0xf0] }
 0x25f   :  { %v1992_v7 = vmul.f32 0.5, %v10885_v48  ;;  %v10887_v26 = vpop.eup %10886  ;;  %v8178_v32 = vor.u32 %v10380_v0, %v8175_v42 }
 0x260   :  { %10890 = vtanh.f32 %v2253_v55  ;;  %v2259_v51 = vmul.f32 0.5, %v10887_v26 }
 0x261   :  { %v10889_v36 = vpop.eup %10888  ;;  %v1993_v46 = vadd.f32 0.5, %v1992_v7  ;;  %v8170_v7 = vor.u32 %v10379_v41, %v8167_v21  ;;  %v10368_v41 = vld [vmem:[%s16334_s4 + $0x4c] sm:$0xf]  ;;  %v8127_v21 = vld [vmem:[%s16334_s4 + $0x58] sm:$0xf0] }
 0x262   :  { %v2232_v19 = vpop.f32.mrf.mxu2  ;;  %v2260_v14 = vadd.f32 0.5, %v2259_v51 }
 0x263   :  { %v1998_v11 = vmul.f32 %v10889_v36, %v1993_v46  ;;  %v2251_v59 = vadd.f32 %v2232_v19, %v11724_v15  ;;  %v2208_v37 = vpop.f32.mrf.mxu0  ;;  %v8191_v15 = vld [vmem:[%s16334_s4 + $0xd8] sm:$0xf0]  ;;  %v8151_v36 = vld [vmem:[%s16334_s4 + $0x90] sm:$0xf0]  ;;  %v10376_v46 = vld [vmem:[%s16334_s4 + $0x8c] sm:$0xf] }
 0x264   :  { %v8194_v53 = vor.u32 %v10384_v8, %v8191_v15  ;;  %v2266_v26 = vmul.f32 %v2260_v14, %v12644_v31  ;;  %v8159_v31 = vld [vmem:[%s16334_s4 + $0x98] sm:$0xf0]  ;;  %v8154_v19 = vor.u32 %v10375_v49, %v8151_v36  ;;  %v8135_v37 = vld [vmem:[%s16334_s4 + $0x70] sm:$0xf0]  ;;  %v10389_v8 = vld [vmem:[%s16334_s4 + $0xec] sm:$0xf0] }
 0x265   :  { %10892 = vtanh.f32 %v2251_v59  ;;  %v2275_v47 = vpack.c.bf16 %v1998_v11, %v1998_v11  ;;  %v8162_v11 = vor.u32 %v10376_v46, %v8159_v31  ;;  %v10371_v59 = vld [vmem:[%s16334_s4 + $0x64] sm:$0xf]  ;;  %v8205_v15 = vld [vmem:[%s16334_s4 + $0xe8] sm:$0xf]  ;;  %v8198_v0 = vor.u32 %v10389_v8, %v8197_v25  ;;  %v8103_v36 = vld [vmem:[%s16334_s4 + $0x30] sm:$0xf0] }
 0x266   :  { %v10891_v12 = vpop.eup %10890  ;;  %10894 = vtanh.f32 %v2262_v5  ;;  %v10372_v5 = vld [vmem:[%s16334_s4 + $0x6c] sm:$0xf]  ;;  %v10367_v14 = vld [vmem:[%s16334_s4 + $0x44] sm:$0xf]  ;;  %v8111_v31 = vld [vmem:[%s16334_s4 + $0x38] sm:$0xf0] }
 0x267   :  { %v2255_v52 = vmul.f32 0.5, %v10891_v12  ;;  %2681 = vmatmul.bf16.vlgmr.msra.gmra.mxu1 %v2275_v47  ;;  %2707 = vmatmul.bf16.vlgmr.msra.gmra.mxu3 %v2275_v47  ;;  %v10363_v49 = vld [vmem:[%s16334_s4 + $0x24] sm:$0xf]  ;;  %v10364_v46 = vld [vmem:[%s16334_s4 + $0x2c] sm:$0xf] }
 0x268   :  { %2993 = vmatpush.bf16.msra.mxu1 %v8202_v10  ;;  %3019 = vmatpush.bf16.msra.mxu3 %v8210_v61  ;;  %v8143_v10 = vld [vmem:[%s16334_s4 + $0x78] sm:$0xf0]  ;;  %v8138_v61 = vor.u32 %v10371_v59, %v8135_v37  ;;  %v10381_v59 = vld [vmem:[%s16334_s4 + $0xac] sm:$0xf0]  ;;  %v8106_v37 = vor.u32 %v10363_v49, %v8103_v36  ;;  %v10360_v25 = vld [vmem:[%s16334_s4 + $0xc] sm:$0xf] }
 0x269   :  { %v2256_v56 = vadd.f32 0.5, %v2255_v52  ;;  %v8146_v63 = vor.u32 %v10372_v5, %v8143_v10  ;;  %v10390_v52 = vld [vmem:[%s16334_s4 + $0xf4] sm:$0xf0]  ;;  %v8173_v5 = vld [vmem:[%s16334_s4 + $0xa8] sm:$0xf] }
 0x26a   :  { %v2234_v48 = vpop.f32.mrf.mxu2  ;;  %v8206_v42 = vor.u32 %v10390_v52, %v8205_v15  ;;  %v10382_v10 = vld [vmem:[%s16334_s4 + $0xb4] sm:$0xf0]  ;;  %v8095_v8 = vld [vmem:[%s16334_s4 + $0x18] sm:$0xf0]  ;;  %v10369_v49 = vld [vmem:[%s16334_s4 + $0x4c] sm:$0xf0] }
 0x26b   :  { %v10893_v55 = vpop.eup %10892  ;;  %v8181_v48 = vld [vmem:[%s16334_s4 + $0xc0] sm:$0xf]  ;;  %v8125_v36 = vld [vmem:[%s16334_s4 + $0x48] sm:$0xf] }
 0x26c   :  { %v2267_v3 = vmul.f32 %v10893_v55, %v2256_v56  ;;  %2994 = vmatpush.bf16.msra.mxu1 %v8186_v13  ;;  %3020 = vmatpush.bf16.msra.mxu3 %v8194_v53  ;;  %v10895_v44 = vpop.eup %10894  ;;  %v8119_v53 = vld [vmem:[%s16334_s4 + $0x50] sm:$0xf0]  ;;  %v10385_v55 = vld [vmem:[%s16334_s4 + $0xcc] sm:$0xf0] }
 0x26d   :  { %v2264_v51 = vmul.f32 0.5, %v10895_v44  ;;  %v8182_v44 = vor.u32 %v10385_v55, %v8181_v48  ;;  %v10373_v48 = vld [vmem:[%s16334_s4 + $0x6c] sm:$0xf0]  ;;  %v8141_v55 = vld [vmem:[%s16334_s4 + $0x68] sm:$0xf] }
 0x26e   :  { %v13258_v35 = vadd.f32 %v2267_v3, %v2266_v26  ;;  %v8122_v26 = vor.u32 %v10367_v14, %v8119_v53  ;;  %v8130_v3 = vor.u32 %v10368_v41, %v8127_v21  ;;  %v8098_v14 = vor.u32 %v10360_v25, %v8095_v8  ;;  %v10377_v53 = vld [vmem:[%s16334_s4 + $0x8c] sm:$0xf0]  ;;  %v8157_v41 = vld [vmem:[%s16334_s4 + $0x88] sm:$0xf]  ;;  %v10378_v21 = vld [vmem:[%s16334_s4 + $0x94] sm:$0xf0] }
 0x26f   :  { %v2265_v12 = vadd.f32 0.5, %v2264_v51  ;;  %v8114_v51 = vor.u32 %v10364_v46, %v8111_v31  ;;  %v10370_v46 = vld [vmem:[%s16334_s4 + $0x54] sm:$0xf0] }
 0x270   :  { %10896 = vtanh.f32 %v13258_v35  ;;  %2995 = vmatpush.bf16.msra.mxu1 %v8170_v7  ;;  %3021 = vmatpush.bf16.msra.mxu3 %v8178_v32  ;;  %v10386_v32 = vld [vmem:[%s16334_s4 + $0xd4] sm:$0xf0] }
 0x271   :  { %v10362_v25 = vld [vmem:[%s16334_s4 + $0x14] sm:$0xf0] }
 0x274   :  { %2996 = vmatpush.bf16.msra.mxu1 %v8154_v19  ;;  %3022 = vmatpush.bf16.msra.mxu3 %v8162_v11  ;;  %v8165_v11 = vld [vmem:[%s16334_s4 + $0xa0] sm:$0xf] }
 0x275   :  { %v8166_v15 = vor.u32 %v10381_v59, %v8165_v11  ;;  %v10365_v11 = vld [vmem:[%s16334_s4 + $0x2c] sm:$0xf0]  ;;  %v8109_v59 = vld [vmem:[%s16334_s4 + $0x28] sm:$0xf] }
 0x276   :  { %v10897_v13 = vpop.eup %10896 }
 0x277   :  { %v2270_v56 = vmul.f32 %v10897_v13, %v2265_v12  ;;  %2733 = vmatmul.bf16.vlgmr.msrb.gmra.mxu1 %v2275_v47  ;;  %2759 = vmatmul.bf16.vlgmr.msrb.gmra.mxu3 %v2275_v47  ;;  %v8189_v47 = vld [vmem:[%s16334_s4 + $0xc8] sm:$0xf]  ;;  %v8174_v12 = vor.u32 %v10382_v10, %v8173_v5  ;;  %v8149_v13 = vld [vmem:[%s16334_s4 + $0x80] sm:$0xf] }
 0x278   :  { %2997 = vmatpush.bf16.msra.mxu1 %v8138_v61  ;;  %3023 = vmatpush.bf16.msra.mxu3 %v8146_v63  ;;  %v8190_v19 = vor.u32 %v10386_v32, %v8189_v47  ;;  %v10359_v61 = vld [vmem:[%s16334_s4 + $0x4] sm:$0xf]  ;;  %v8087_v63 = vld [vmem:[%s16334_s4 + $0x10] sm:$0xf0]  ;;  %v8117_v32 = vld [vmem:[%s16334_s4 + $0x40] sm:$0xf] }
 0x279   :  { %v13303_v7 = vpack.c.bf16 %v2270_v56, %v2270_v56  ;;  %v8090_v52 = vor.u32 %v10359_v61, %v8087_v63  ;;  %v8150_v56 = vor.u32 %v10377_v53, %v8149_v13  ;;  %v8118_v31 = vor.u32 %v10369_v49, %v8117_v32  ;;  %v8085_v10 = vld [vmem:[%s16334_s4] sm:$0xf]  ;;  %v10361_v61 = vld [vmem:[%s16334_s4 + $0xc] sm:$0xf0]  ;;  %v8093_v63 = vld [vmem:[%s16334_s4 + $0x8] sm:$0xf] }
 0x27a   :  { %v8086_v8 = vor.u32 %v10361_v61, %v8085_v10  ;;  %v8455_v53 = vld [vmem:[%s16337_s6 + $0x1f0] sm:$0xf0] }
 0x27b   :  { %2668 = vmatmul.bf16.vlgmr.msra.gmra.mxu0 %v13303_v7  ;;  %2694 = vmatmul.bf16.vlgmr.msra.gmra.mxu2 %v13303_v7  ;;  %v8423_v32 = vld [vmem:[%s16337_s6 + $0x1b0] sm:$0xf0] }
 0x27c   :  { %2980 = vmatpush.bf16.msra.mxu0 %v8198_v0  ;;  %3006 = vmatpush.bf16.msra.mxu2 %v8206_v42  ;;  %v8158_v0 = vor.u32 %v10378_v21, %v8157_v41  ;;  %v8133_v42 = vld [vmem:[%s16334_s4 + $0x60] sm:$0xf]  ;;  %v10449_v21 = vld [vmem:[%s16337_s6 + $0x1cc] sm:$0xf0]  ;;  %v8391_v10 = vld [vmem:[%s16337_s6 + $0x170] sm:$0xf0] }
 0x27d   :  { %2998 = vmatpush.bf16.msra.mxu1 %v8122_v26  ;;  %3024 = vmatpush.bf16.msra.mxu3 %v8130_v3  ;;  %v10374_v26 = vld [vmem:[%s16334_s4 + $0x74] sm:$0xf0]  ;;  %v8134_v3 = vor.u32 %v10373_v48, %v8133_v42  ;;  %v8439_v42 = vld [vmem:[%s16337_s6 + $0x1d0] sm:$0xf0] }
 0x27e   :  { %v8142_v47 = vor.u32 %v10374_v26, %v8141_v55  ;;  %v8421_v55 = vld [vmem:[%s16337_s6 + $0x1a0] sm:$0xf]  ;;  %v10445_v26 = vld [vmem:[%s16337_s6 + $0x1ac] sm:$0xf0] }
 0x280   :  { %2981 = vmatpush.bf16.msra.mxu0 %v8182_v44  ;;  %3007 = vmatpush.bf16.msra.mxu2 %v8190_v19  ;;  %v8126_v44 = vor.u32 %v10370_v46, %v8125_v36  ;;  %v8101_v19 = vld [vmem:[%s16334_s4 + $0x20] sm:$0xf]  ;;  %v10441_v46 = vld [vmem:[%s16337_s6 + $0x18c] sm:$0xf0] }
 0x281   :  { %2999 = vmatpush.bf16.msra.mxu1 %v8106_v37  ;;  %3025 = vmatpush.bf16.msra.mxu3 %v8114_v51  ;;  %v10366_v37 = vld [vmem:[%s16334_s4 + $0x34] sm:$0xf0]  ;;  %v8102_v51 = vor.u32 %v10365_v11, %v8101_v19  ;;  %v8405_v36 = vld [vmem:[%s16337_s6 + $0x180] sm:$0xf]  ;;  %v8407_v19 = vld [vmem:[%s16337_s6 + $0x190] sm:$0xf0] }
 0x282   :  { %v8110_v5 = vor.u32 %v10366_v37, %v8109_v59  ;;  %v8389_v59 = vld [vmem:[%s16337_s6 + $0x160] sm:$0xf]  ;;  %v10437_v37 = vld [vmem:[%s16337_s6 + $0x16c] sm:$0xf0] }
 0x284   :  { %2982 = vmatpush.bf16.msra.mxu0 %v8166_v15  ;;  %3008 = vmatpush.bf16.msra.mxu2 %v8174_v12  ;;  %v8094_v15 = vor.u32 %v10362_v25, %v8093_v63  ;;  %v8453_v12 = vld [vmem:[%s16337_s6 + $0x1e0] sm:$0xf]  ;;  %v10421_v25 = vld [vmem:[%s16337_s6 + $0xec] sm:$0xf0] }
 0x285   :  { %3000 = vmatpush.bf16.msra.mxu1 %v8090_v52  ;;  %3026 = vmatpush.bf16.msra.mxu3 %v8098_v14  ;;  %v10453_v52 = vld [vmem:[%s16337_s6 + $0x1ec] sm:$0xf0]  ;;  %v10451_v14 = vld [vmem:[%s16337_s6 + $0x1e4] sm:$0xf]  ;;  %v8325_v63 = vld [vmem:[%s16337_s6 + $0xe0] sm:$0xf] }
 0x286   :  { %v8454_v13 = vor.u32 %v10453_v52, %v8453_v12  ;;  %v8458_v41 = vor.u32 %v10451_v14, %v8455_v53  ;;  %v8327_v12 = vld [vmem:[%s16337_s6 + $0xf0] sm:$0xf0]  ;;  %v8373_v52 = vld [vmem:[%s16337_s6 + $0x140] sm:$0xf]  ;;  %v10433_v14 = vld [vmem:[%s16337_s6 + $0x14c] sm:$0xf0] }
 0x287   :  { %v8374_v53 = vor.u32 %v10433_v14, %v8373_v52  ;;  %v10452_v52 = vld [vmem:[%s16337_s6 + $0x1ec] sm:$0xf]  ;;  %v8463_v14 = vld [vmem:[%s16337_s6 + $0x1f8] sm:$0xf0] }
 0x288   :  { %2983 = vmatpush.bf16.msra.mxu0 %v8150_v56  ;;  %3001 = vmatmul.bf16.vlgmr.msra.gmra.mxu1 %v13303_v7  ;;  %v10447_v56 = vld [vmem:[%s16337_s6 + $0x1c4] sm:$0xf] }
 0x289   :  { %3009 = vmatpush.bf16.msra.mxu2 %v8158_v0  ;;  %3027 = vmatmul.bf16.vlgmr.msra.gmra.mxu3 %v13303_v7  ;;  %v8442_v48 = vor.u32 %v10447_v56, %v8439_v42  ;;  %v8309_v56 = vld [vmem:[%s16337_s6 + $0xc0] sm:$0xf]  ;;  %v10415_v42 = vld [vmem:[%s16337_s6 + $0xc4] sm:$0xf] }
 0x28a   :  { %3456 = vmatpush.bf16.msrb.mxu1 %v8454_v13  ;;  %3482 = vmatpush.bf16.msrb.mxu3 %v8458_v41  ;;  %v10431_v41 = vld [vmem:[%s16337_s6 + $0x144] sm:$0xf] }
 0x28b   :  { %2720 = vmatmul.bf16.vlgmr.msrb.gmra.mxu0 %v13303_v7  ;;  %2746 = vmatmul.bf16.vlgmr.msrb.gmra.mxu2 %v13303_v7 }
 0x28c   :  { %2984 = vmatpush.bf16.msra.mxu0 %v8134_v3  ;;  %v10443_v3 = vld [vmem:[%s16337_s6 + $0x1a4] sm:$0xf] }
 0x28d   :  { %3010 = vmatpush.bf16.msra.mxu2 %v8142_v47  ;;  %v8422_v47 = vor.u32 %v10445_v26, %v8421_v55  ;;  %v8426_v49 = vor.u32 %v10443_v3, %v8423_v32  ;;  %v8311_v55 = vld [vmem:[%s16337_s6 + $0xd0] sm:$0xf0]  ;;  %v8357_v26 = vld [vmem:[%s16337_s6 + $0x120] sm:$0xf]  ;;  %v10429_v3 = vld [vmem:[%s16337_s6 + $0x12c] sm:$0xf0] }
 0x28e   :  { %3483 = vmatpush.bf16.msrb.mxu3 %v8442_v48  ;;  %v8358_v32 = vor.u32 %v10429_v3, %v8357_v26  ;;  %v10450_v26 = vld [vmem:[%s16337_s6 + $0x1d4] sm:$0xf0]  ;;  %v10448_v3 = vld [vmem:[%s16337_s6 + $0x1cc] sm:$0xf] }
 0x290   :  { %2985 = vmatpush.bf16.msra.mxu0 %v8118_v31  ;;  %v10439_v31 = vld [vmem:[%s16337_s6 + $0x184] sm:$0xf] }
 0x291   :  { %3011 = vmatpush.bf16.msra.mxu2 %v8126_v44  ;;  %v8406_v44 = vor.u32 %v10441_v46, %v8405_v36  ;;  %v8410_v11 = vor.u32 %v10439_v31, %v8407_v19  ;;  %v8359_v36 = vld [vmem:[%s16337_s6 + $0x130] sm:$0xf0]  ;;  %v10413_v19 = vld [vmem:[%s16337_s6 + $0xac] sm:$0xf0] }
 0x292   :  { %3484 = vmatpush.bf16.msrb.mxu3 %v8426_v49  ;;  %v10427_v49 = vld [vmem:[%s16337_s6 + $0x124] sm:$0xf] }
 0x293   :  { %v8362_v46 = vor.u32 %v10427_v49, %v8359_v36 }
 0x294   :  { %2986 = vmatpush.bf16.msra.mxu0 %v8102_v51  ;;  %v10435_v51 = vld [vmem:[%s16337_s6 + $0x164] sm:$0xf] }
 0x295   :  { %3012 = vmatpush.bf16.msra.mxu2 %v8110_v5  ;;  %v8390_v5 = vor.u32 %v10437_v37, %v8389_v59  ;;  %v8394_v61 = vor.u32 %v10435_v51, %v8391_v10  ;;  %v8295_v37 = vld [vmem:[%s16337_s6 + $0xb0] sm:$0xf0]  ;;  %v8341_v51 = vld [vmem:[%s16337_s6 + $0x100] sm:$0xf] }
 0x296   :  { %3485 = vmatpush.bf16.msrb.mxu3 %v8410_v11  ;;  %v10411_v11 = vld [vmem:[%s16337_s6 + $0xa4] sm:$0xf] }
 0x297   :  { %v8298_v10 = vor.u32 %v10411_v11, %v8295_v37 }
 0x298   :  { %2987 = vmatpush.bf16.msra.mxu0 %v8086_v8  ;;  %v10419_v8 = vld [vmem:[%s16337_s6 + $0xe4] sm:$0xf] }
 0x299   :  { %3013 = vmatpush.bf16.msra.mxu2 %v8094_v15  ;;  %v8326_v15 = vor.u32 %v10421_v25, %v8325_v63  ;;  %v8330_v13 = vor.u32 %v10419_v8, %v8327_v12  ;;  %v10423_v63 = vld [vmem:[%s16337_s6 + $0x104] sm:$0xf]  ;;  %v8343_v25 = vld [vmem:[%s16337_s6 + $0x110] sm:$0xf0]  ;;  %v8461_v8 = vld [vmem:[%s16337_s6 + $0x1e8] sm:$0xf] }
 0x29a   :  { %3486 = vmatpush.bf16.msrb.mxu3 %v8394_v61  ;;  %v10454_v12 = vld [vmem:[%s16337_s6 + $0x1f4] sm:$0xf0] }
 0x29b   :  { %2988 = vmatmul.bf16.vlgmr.msra.gmra.mxu0 %v13303_v7 }
 0x29c   :  { %3014 = vmatmul.bf16.vlgmr.msra.gmra.mxu2 %v13303_v7  ;;  %v8437_v7 = vld [vmem:[%s16337_s6 + $0x1c0] sm:$0xf]  ;;  %3443 = vmatpush.bf16.msrb.mxu0 %v8326_v15  ;;  %v8346_v15 = vor.u32 %v10423_v63, %v8343_v25  ;;  %v8431_v63 = vld [vmem:[%s16337_s6 + $0x1b8] sm:$0xf0] }
 0x29d   :  { %v8438_v0 = vor.u32 %v10449_v21, %v8437_v7  ;;  %v8375_v7 = vld [vmem:[%s16337_s6 + $0x150] sm:$0xf0]  ;;  %3469 = vmatpush.bf16.msrb.mxu2 %v8330_v13  ;;  %v8462_v13 = vor.u32 %v10454_v12, %v8461_v8  ;;  %v8245_v8 = vld [vmem:[%s16337_s6 + $0x40] sm:$0xf]  ;;  %v10399_v12 = vld [vmem:[%s16337_s6 + $0x44] sm:$0xf] }
 0x29e   :  { %v8378_v21 = vor.u32 %v10431_v41, %v8375_v7  ;;  %v8277_v41 = vld [vmem:[%s16337_s6 + $0x80] sm:$0xf]  ;;  %v10409_v7 = vld [vmem:[%s16337_s6 + $0x8c] sm:$0xf0] }
 0x29f   :  { %3457 = vmatpush.bf16.msrb.mxu1 %v8438_v0  ;;  %v10417_v0 = vld [vmem:[%s16337_s6 + $0xcc] sm:$0xf0] }
 0x2a0   :  { %3487 = vmatpush.bf16.msrb.mxu3 %v8378_v21  ;;  %v8310_v48 = vor.u32 %v10417_v0, %v8309_v56  ;;  %v10407_v21 = vld [vmem:[%s16337_s6 + $0x84] sm:$0xf]  ;;  %v8278_v56 = vor.u32 %v10409_v7, %v8277_v41  ;;  %v8279_v0 = vld [vmem:[%s16337_s6 + $0x90] sm:$0xf0]  ;;  %v8413_v41 = vld [vmem:[%s16337_s6 + $0x188] sm:$0xf] }
 0x2a1   :  { %v10442_v7 = vld [vmem:[%s16337_s6 + $0x194] sm:$0xf0] }
 0x2a2   :  { %3444 = vmatpush.bf16.msrb.mxu0 %v8310_v48  ;;  %v8282_v48 = vor.u32 %v10407_v21, %v8279_v0  ;;  %v10440_v21 = vld [vmem:[%s16337_s6 + $0x18c] sm:$0xf]  ;;  %v8415_v0 = vld [vmem:[%s16337_s6 + $0x198] sm:$0xf0] }
 0x2a3   :  { %3458 = vmatpush.bf16.msrb.mxu1 %v8422_v47  ;;  %v8314_v47 = vor.u32 %v10415_v42, %v8311_v55  ;;  %v8445_v55 = vld [vmem:[%s16337_s6 + $0x1c8] sm:$0xf] }
 0x2a4   :  { %3488 = vmatpush.bf16.msrb.mxu3 %v8362_v46  ;;  %v8261_v46 = vld [vmem:[%s16337_s6 + $0x60] sm:$0xf] }
 0x2a5   :  { %3470 = vmatpush.bf16.msrb.mxu2 %v8314_v47  ;;  %v8446_v47 = vor.u32 %v10450_v26, %v8445_v55  ;;  %v8418_v55 = vor.u32 %v10440_v21, %v8415_v0  ;;  %v8229_v26 = vld [vmem:[%s16337_s6 + $0x20] sm:$0xf]  ;;  %v10432_v0 = vld [vmem:[%s16337_s6 + $0x14c] sm:$0xf] }
 0x2a7   :  { %3459 = vmatpush.bf16.msrb.mxu1 %v8406_v44  ;;  %v8293_v44 = vld [vmem:[%s16337_s6 + $0xa0] sm:$0xf] }
 0x2a8   :  { %v8294_v59 = vor.u32 %v10413_v19, %v8293_v44  ;;  %3489 = vmatpush.bf16.msrb.mxu3 %v8346_v15  ;;  %v10405_v44 = vld [vmem:[%s16337_s6 + $0x6c] sm:$0xf0]  ;;  %v10403_v19 = vld [vmem:[%s16337_s6 + $0x64] sm:$0xf] }
 0x2a9   :  { %3471 = vmatpush.bf16.msrb.mxu2 %v8298_v10  ;;  %v8262_v11 = vor.u32 %v10405_v44, %v8261_v46  ;;  %v10444_v10 = vld [vmem:[%s16337_s6 + $0x1ac] sm:$0xf]  ;;  %v10401_v15 = vld [vmem:[%s16337_s6 + $0x4c] sm:$0xf0]  ;;  %v8397_v46 = vld [vmem:[%s16337_s6 + $0x168] sm:$0xf] }
 0x2aa   :  { %3445 = vmatpush.bf16.msrb.mxu0 %v8294_v59  ;;  %v8263_v59 = vld [vmem:[%s16337_s6 + $0x70] sm:$0xf0]  ;;  %v8434_v25 = vor.u32 %v10444_v10, %v8431_v63  ;;  %v10438_v44 = vld [vmem:[%s16337_s6 + $0x174] sm:$0xf0]  ;;  %v10393_v10 = vld [vmem:[%s16337_s6 + $0xc] sm:$0xf0] }
 0x2ab   :  { %3460 = vmatpush.bf16.msrb.mxu1 %v8390_v5  ;;  %v10425_v5 = vld [vmem:[%s16337_s6 + $0x10c] sm:$0xf0]  ;;  %v8266_v37 = vor.u32 %v10403_v19, %v8263_v59  ;;  %v10436_v19 = vld [vmem:[%s16337_s6 + $0x16c] sm:$0xf]  ;;  %v8399_v59 = vld [vmem:[%s16337_s6 + $0x178] sm:$0xf0] }
 0x2ac   :  { %v8342_v61 = vor.u32 %v10425_v5, %v8341_v51  ;;  %v8429_v51 = vld [vmem:[%s16337_s6 + $0x1a8] sm:$0xf]  ;;  %v10446_v5 = vld [vmem:[%s16337_s6 + $0x1b4] sm:$0xf0] }
 0x2ad   :  { %3472 = vmatpush.bf16.msrb.mxu2 %v8282_v48 }
 0x2ae   :  { %3446 = vmatpush.bf16.msrb.mxu0 %v8278_v56  ;;  %v8414_v56 = vor.u32 %v10442_v7, %v8413_v41  ;;  %v8335_v41 = vld [vmem:[%s16337_s6 + $0xf8] sm:$0xf0]  ;;  %v8381_v7 = vld [vmem:[%s16337_s6 + $0x148] sm:$0xf] }
 0x2af   :  { %3461 = vmatpush.bf16.msrb.mxu1 %v8374_v53  ;;  %v8466_v53 = vor.u32 %v10452_v52, %v8463_v14  ;;  %v8246_v52 = vor.u32 %v10401_v15, %v8245_v8  ;;  %v8247_v14 = vld [vmem:[%s16337_s6 + $0x50] sm:$0xf0]  ;;  %v8333_v15 = vld [vmem:[%s16337_s6 + $0xe8] sm:$0xf] }
 0x2b0   :  { %v8215_v8 = vld [vmem:[%s16337_s6 + $0x10] sm:$0xf0] }
 0x2b1   :  { %3534 = vmatpush.bf16.msra.mxu3 %v8466_v53  ;;  %3473 = vmatpush.bf16.msrb.mxu2 %v8266_v37  ;;  %v8250_v53 = vor.u32 %v10399_v12, %v8247_v14  ;;  %v10422_v12 = vld [vmem:[%s16337_s6 + $0xf4] sm:$0xf0] }
 0x2b2   :  { %3447 = vmatpush.bf16.msrb.mxu0 %v8262_v11  ;;  %v8398_v11 = vor.u32 %v10438_v44, %v8397_v46 }
 0x2b3   :  { %3462 = vmatpush.bf16.msrb.mxu1 %v8358_v32  ;;  %v8447_v32 = vld [vmem:[%s16337_s6 + $0x1d8] sm:$0xf0] }
 0x2b4   :  { %v8450_v36 = vor.u32 %v10448_v3, %v8447_v32  ;;  %v10397_v3 = vld [vmem:[%s16337_s6 + $0x2c] sm:$0xf0] }
 0x2b5   :  { %3474 = vmatpush.bf16.msrb.mxu2 %v8250_v53  ;;  %v8230_v32 = vor.u32 %v10397_v3, %v8229_v26  ;;  %v10420_v53 = vld [vmem:[%s16337_s6 + $0xec] sm:$0xf] }
 0x2b6   :  { %3535 = vmatpush.bf16.msra.mxu3 %v8450_v36  ;;  %3448 = vmatpush.bf16.msrb.mxu0 %v8246_v52  ;;  %v8338_v21 = vor.u32 %v10420_v53, %v8335_v41 }
 0x2b7   :  { %3463 = vmatpush.bf16.msrb.mxu1 %v8342_v61  ;;  %v8430_v61 = vor.u32 %v10446_v5, %v8429_v51  ;;  %v8402_v51 = vor.u32 %v10436_v19, %v8399_v59  ;;  %v8213_v5 = vld [vmem:[%s16337_s6] sm:$0xf]  ;;  %v8319_v19 = vld [vmem:[%s16337_s6 + $0xd8] sm:$0xf0] }
 0x2ba   :  { %3536 = vmatpush.bf16.msra.mxu3 %v8434_v25  ;;  %3449 = vmatpush.bf16.msrb.mxu0 %v8230_v32  ;;  %v8214_v25 = vor.u32 %v10393_v10, %v8213_v5  ;;  %v10428_v5 = vld [vmem:[%s16337_s6 + $0x12c] sm:$0xf]  ;;  %v8367_v10 = vld [vmem:[%s16337_s6 + $0x138] sm:$0xf0] }
 0x2bb   :  { %3508 = vmatpush.bf16.msra.mxu1 %v8462_v13 }
 0x2be   :  { %3537 = vmatpush.bf16.msra.mxu3 %v8418_v55  ;;  %3450 = vmatpush.bf16.msrb.mxu0 %v8214_v25  ;;  %v8383_v55 = vld [vmem:[%s16337_s6 + $0x158] sm:$0xf0] }
 0x2bf   :  { %3509 = vmatpush.bf16.msra.mxu1 %v8446_v47  ;;  %v10395_v47 = vld [vmem:[%s16337_s6 + $0x24] sm:$0xf]  ;;  %v8386_v32 = vor.u32 %v10432_v0, %v8383_v55 }
 0x2c2   :  { %3538 = vmatpush.bf16.msra.mxu3 %v8402_v51  ;;  %v10430_v51 = vld [vmem:[%s16337_s6 + $0x134] sm:$0xf0] }
 0x2c3   :  { %3510 = vmatpush.bf16.msra.mxu1 %v8430_v61  ;;  %v10391_v61 = vld [vmem:[%s16337_s6 + $0x4] sm:$0xf] }
 0x2c4   :  { %v8218_v14 = vor.u32 %v10391_v61, %v8215_v8  ;;  %v8370_v8 = vor.u32 %v10428_v5, %v8367_v10  ;;  %v10406_v5 = vld [vmem:[%s16337_s6 + $0x74] sm:$0xf0]  ;;  %v10404_v10 = vld [vmem:[%s16337_s6 + $0x6c] sm:$0xf] }
 0x2c6   :  { %3539 = vmatpush.bf16.msra.mxu3 %v8386_v32 }
 0x2c7   :  { %3511 = vmatpush.bf16.msra.mxu1 %v8414_v56  ;;  %v10434_v56 = vld [vmem:[%s16337_s6 + $0x154] sm:$0xf0] }
 0x2ca   :  { %3540 = vmatpush.bf16.msra.mxu3 %v8370_v8 }
 0x2cb   :  { %3512 = vmatpush.bf16.msra.mxu1 %v8398_v11  ;;  %v8365_v11 = vld [vmem:[%s16337_s6 + $0x128] sm:$0xf] }
 0x2cc   :  { %v8366_v25 = vor.u32 %v10430_v51, %v8365_v11  ;;  %v8269_v51 = vld [vmem:[%s16337_s6 + $0x68] sm:$0xf] }
 0x2e4   :  { %v13523_v31 = vpop.f32.mrf.mxu1 }
 0x2ea   :  { %v13573_v42 = vpop.f32.mrf.mxu3 }
 0x2ec   :  { %v2684_v49 = vpop.f32.mrf.mxu1 }
 0x2ed   :  { %v8231_v49 = vld [vmem:[%s16337_s6 + $0x30] sm:$0xf0] }
 0x2ee   :  { %v8234_v36 = vor.u32 %v10395_v47, %v8231_v49  ;;  %v8382_v47 = vor.u32 %v10434_v56, %v8381_v7  ;;  %v8317_v49 = vld [vmem:[%s16337_s6 + $0xc8] sm:$0xf] }
 0x2ef   :  { %v8349_v7 = vld [vmem:[%s16337_s6 + $0x108] sm:$0xf] }
 0x2f0   :  { %3475 = vmatpush.bf16.msrb.mxu2 %v8234_v36  ;;  %v10418_v36 = vld [vmem:[%s16337_s6 + $0xd4] sm:$0xf0]  ;;  %3513 = vmatpush.bf16.msra.mxu1 %v8382_v47 }
 0x2f1   :  { %v8318_v44 = vor.u32 %v10418_v36, %v8317_v49  ;;  %v8285_v49 = vld [vmem:[%s16337_s6 + $0x88] sm:$0xf]  ;;  %v10410_v36 = vld [vmem:[%s16337_s6 + $0x94] sm:$0xf0] }
 0x2f2   :  { %v2710_v13 = vpop.f32.mrf.mxu3 }
 0x2f3   :  { %v8334_v13 = vor.u32 %v10422_v12, %v8333_v15  ;;  %v8301_v12 = vld [vmem:[%s16337_s6 + $0xa8] sm:$0xf] }
 0x2f4   :  { %v13635_v48 = vpop.f32.mrf.mxu1  ;;  %3476 = vmatpush.bf16.msrb.mxu2 %v8218_v14  ;;  %v10414_v14 = vld [vmem:[%s16337_s6 + $0xb4] sm:$0xf0]  ;;  %3514 = vmatpush.bf16.msra.mxu1 %v8366_v25  ;;  %v8271_v25 = vld [vmem:[%s16337_s6 + $0x78] sm:$0xf0] }
 0x2f5   :  { %3495 = vmatpush.bf16.msra.mxu0 %v8334_v13  ;;  %v10412_v13 = vld [vmem:[%s16337_s6 + $0xac] sm:$0xf]  ;;  %v8302_v41 = vor.u32 %v10414_v14, %v8301_v12  ;;  %v8274_v12 = vor.u32 %v10404_v10, %v8271_v25  ;;  %v10394_v25 = vld [vmem:[%s16337_s6 + $0x14] sm:$0xf0] }
 0x2f8   :  { %v2669_v37 = vpop.f32.mrf.mxu0  ;;  %3521 = vmatpush.bf16.msra.mxu2 %v8338_v21  ;;  %v10426_v21 = vld [vmem:[%s16337_s6 + $0x114] sm:$0xf0] }
 0x2f9   :  { %v2670_v63 = vadd.f32 %v2669_v37, %v12397_v1  ;;  %3496 = vmatpush.bf16.msra.mxu0 %v8318_v44  ;;  %v8350_v55 = vor.u32 %v10426_v21, %v8349_v7  ;;  %v8286_v44 = vor.u32 %v10410_v36, %v8285_v49  ;;  %v10402_v7 = vld [vmem:[%s16337_s6 + $0x54] sm:$0xf0] }
 0x2fa   :  { %v13680_v52 = vpop.f32.mrf.mxu3 }
 0x2fb   :  { %v2683_v26 = vadd.f32 %v13523_v31, %v2670_v63  ;;  %v10416_v31 = vld [vmem:[%s16337_s6 + $0xcc] sm:$0xf]  ;;  %3515 = vmatpush.bf16.msra.mxu1 %v8350_v55 }
 0x2fc   :  { %v2736_v3 = vpop.f32.mrf.mxu1  ;;  %v8322_v37 = vor.u32 %v10416_v31, %v8319_v19  ;;  %v10408_v31 = vld [vmem:[%s16337_s6 + $0x8c] sm:$0xf]  ;;  %v8287_v19 = vld [vmem:[%s16337_s6 + $0x98] sm:$0xf0] }
 0x2fd   :  { %v2764_v61 = vmul.f32 0.5, %v2683_v26  ;;  %v10424_v26 = vld [vmem:[%s16337_s6 + $0x10c] sm:$0xf]  ;;  %v8351_v3 = vld [vmem:[%s16337_s6 + $0x118] sm:$0xf0]  ;;  %3497 = vmatpush.bf16.msra.mxu0 %v8302_v41  ;;  %v8290_v11 = vor.u32 %v10408_v31, %v8287_v19 }
 0x2fe   :  { %v2695_v46 = vpop.f32.mrf.mxu2  ;;  %3522 = vmatpush.bf16.msra.mxu2 %v8322_v37  ;;  %v8354_v47 = vor.u32 %v10424_v26, %v8351_v3 }
 0x2ff   :  { %v2696_v59 = vadd.f32 %v2695_v46, %v12412_v24  ;;  %10898 = vtanh.f32 %v2764_v61 }
 0x300   :  { %v2671_v63 = vpop.f32.mrf.mxu0  ;;  %3541 = vmatpush.bf16.msra.mxu3 %v8354_v47 }
 0x301   :  { %v2709_v15 = vadd.f32 %v13573_v42, %v2696_v59  ;;  %v8303_v42 = vld [vmem:[%s16337_s6 + $0xb8] sm:$0xf0]  ;;  %3498 = vmatpush.bf16.msra.mxu0 %v8286_v44  ;;  %v8270_v63 = vor.u32 %v10406_v5, %v8269_v51  ;;  %v10398_v44 = vld [vmem:[%s16337_s6 + $0x34] sm:$0xf0] }
 0x302   :  { %v2762_v53 = vpop.f32.mrf.mxu3  ;;  %v8306_v0 = vor.u32 %v10412_v13, %v8303_v42  ;;  %v8253_v42 = vld [vmem:[%s16337_s6 + $0x48] sm:$0xf] }
 0x303   :  { %v2768_v56 = vmul.f32 0.5, %v2709_v15  ;;  %v315_v53 = vadd.f32 %v11731_v20, %v11661_v40  ;;  %v8255_v20 = vld [vmem:[%s16337_s6 + $0x58] sm:$0xf0] }
 0x304   :  { %3523 = vmatpush.bf16.msra.mxu2 %v8306_v0  ;;  %v8254_v0 = vor.u32 %v10402_v7, %v8253_v42 }
 0x305   :  { %10900 = vtanh.f32 %v2768_v56  ;;  %v3002_v32 = vpop.f32.mrf.mxu1  ;;  %v10899_v61 = vpop.eup %10898  ;;  %3499 = vmatpush.bf16.msra.mxu0 %v8270_v63  ;;  %v8221_v63 = vld [vmem:[%s16337_s6 + $0x8] sm:$0xf] }
 0x306   :  { %v2697_v46 = vpop.f32.mrf.mxu2  ;;  %v2766_v21 = vmul.f32 0.5, %v10899_v61  ;;  %v3033_v55 = vadd.f32 %v3002_v32, %v315_v53  ;;  %v10396_v32 = vld [vmem:[%s16337_s6 + $0x2c] sm:$0xf]  ;;  %v286_v53 = vadd.f32 %v11726_v17, %v11651_v34  ;;  %v10483_v17 = vld [vmem:[%s16334_s4 + $0xe4] sm:$0xf] }
 0x307   :  { %v8237_v46 = vld [vmem:[%s16337_s6 + $0x28] sm:$0xf] }
 0x308   :  { %v2721_v59 = vpop.f32.mrf.mxu0  ;;  %3524 = vmatpush.bf16.msra.mxu2 %v8290_v11  ;;  %v2767_v31 = vadd.f32 0.5, %v2766_v21  ;;  %v8238_v19 = vor.u32 %v10398_v44, %v8237_v46  ;;  %v8239_v11 = vld [vmem:[%s16337_s6 + $0x38] sm:$0xf0]  ;;  %v373_v21 = vadd.f32 %v11788_v54, %v11715_v6  ;;  %v10484_v54 = vld [vmem:[%s16334_s4 + $0xec] sm:$0xf] }
 0x309   :  { %v2722_v37 = vadd.f32 %v2721_v59, %v12510_v38  ;;  %3500 = vmatpush.bf16.msra.mxu0 %v8254_v0  ;;  %v3040_v59 = vmul.f32 0.5, %v3033_v55  ;;  %v8242_v51 = vor.u32 %v10396_v32, %v8239_v11 }
 0x30b   :  { %v10901_v8 = vpop.eup %10900  ;;  %v2735_v15 = vadd.f32 %v13635_v48, %v2722_v37  ;;  %v10400_v48 = vld [vmem:[%s16337_s6 + $0x4c] sm:$0xf] }
 0x30c   :  { %v2770_v14 = vmul.f32 0.5, %v10901_v8  ;;  %v3028_v13 = vpop.f32.mrf.mxu3  ;;  %3525 = vmatpush.bf16.msra.mxu2 %v8274_v12  ;;  %v8258_v3 = vor.u32 %v10400_v48, %v8255_v20  ;;  %v10392_v8 = vld [vmem:[%s16337_s6 + $0xc] sm:$0xf]  ;;  %v8222_v12 = vor.u32 %v10394_v25, %v8221_v63 }
 0x30d   :  { %10902 = vtanh.f32 %v2735_v15  ;;  %v3004_v41 = vpop.f32.mrf.mxu1  ;;  %3501 = vmatpush.bf16.msra.mxu0 %v8238_v19  ;;  %v3035_v55 = vadd.f32 %v3028_v13, %v373_v21  ;;  %v8591_v13 = vld [vmem:[%s16334_s4 + $0xf8] sm:$0xf0] }
 0x30e   :  { %v2747_v56 = vpop.f32.mrf.mxu2  ;;  %v2771_v47 = vadd.f32 0.5, %v2770_v14  ;;  %v8223_v14 = vld [vmem:[%s16337_s6 + $0x18] sm:$0xf0] }
 0x30f   :  { %v2748_v26 = vadd.f32 %v2747_v56, %v12539_v28  ;;  %v8226_v41 = vor.u32 %v10392_v8, %v8223_v14  ;;  %v3045_v32 = vmul.f32 0.5, %v3035_v55  ;;  %v8535_v55 = vld [vmem:[%s16334_s4 + $0x90] sm:$0xf0] }
 0x310   :  { %v2723_v49 = vpop.f32.mrf.mxu0  ;;  %3526 = vmatpush.bf16.msra.mxu2 %v8258_v3  ;;  %v2777_v5 = vmul.f32 %v2771_v47, %v13200_v16  ;;  %v344_v47 = vadd.f32 %v11775_v45, %v11695_v60  ;;  %v10479_v45 = vld [vmem:[%s16334_s4 + $0xc4] sm:$0xf] }
 0x311   :  { %v2761_v36 = vadd.f32 %v13680_v52, %v2748_v26  ;;  %3502 = vmatpush.bf16.msra.mxu0 %v8222_v12  ;;  %v8583_v26 = vld [vmem:[%s16334_s4 + $0xf0] sm:$0xf0] }
 0x312   :  { %v8586_v11 = vor.u32 %v10483_v17, %v8583_v26  ;;  %v8551_v12 = vld [vmem:[%s16334_s4 + $0xb0] sm:$0xf0]  ;;  %v10472_v17 = vld [vmem:[%s16334_s4 + $0x8c] sm:$0xf] }
 0x313   :  { %v10903_v52 = vpop.eup %10902  ;;  %v2773_v37 = vmul.f32 0.5, %v2761_v36 }
 0x314   :  { %v2778_v10 = vmul.f32 %v10903_v52, %v2767_v31  ;;  %v3030_v61 = vpop.f32.mrf.mxu3  ;;  %3527 = vmatpush.bf16.msra.mxu2 %v8242_v51  ;;  %v8594_v52 = vor.u32 %v10484_v54, %v8591_v13  ;;  %v10480_v51 = vld [vmem:[%s16334_s4 + $0xcc] sm:$0xf]  ;;  %v10467_v54 = vld [vmem:[%s16334_s4 + $0x64] sm:$0xf]  ;;  %v8519_v13 = vld [vmem:[%s16334_s4 + $0x70] sm:$0xf0] }
 0x315   :  { %10904 = vtanh.f32 %v2773_v37  ;;  %v8567_v37 = vld [vmem:[%s16334_s4 + $0xd0] sm:$0xf0] }
 0x316   :  { %v13815_v15 = vadd.f32 %v2778_v10, %v2777_v5  ;;  %v2749_v16 = vpop.f32.mrf.mxu2  ;;  %10906 = vtanh.f32 %v3040_v59  ;;  %v8575_v5 = vld [vmem:[%s16334_s4 + $0xd8] sm:$0xf0]  ;;  %v8570_v25 = vor.u32 %v10479_v45, %v8567_v37  ;;  %v10486_v37 = vld [vmem:[%s16334_s4 + $0xf4] sm:$0xf0] }
 0x317   :  { %v8578_v8 = vor.u32 %v10480_v51, %v8575_v5  ;;  %v10475_v16 = vld [vmem:[%s16334_s4 + $0xa4] sm:$0xf] }
 0x318   :  { %10908 = vtanh.f32 %v13815_v15  ;;  %v2989_v42 = vpop.f32.mrf.mxu0  ;;  %3528 = vmatpush.bf16.msra.mxu2 %v8226_v41  ;;  %v8559_v41 = vld [vmem:[%s16334_s4 + $0xb8] sm:$0xf0]  ;;  %v10463_v51 = vld [vmem:[%s16334_s4 + $0x44] sm:$0xf] }
 0x319   :  { %v3032_v7 = vadd.f32 %v2989_v42, %v286_v53  ;;  %v10476_v53 = vld [vmem:[%s16334_s4 + $0xac] sm:$0xf] }
 0x31b   :  { %v10905_v48 = vpop.eup %10904  ;;  %v3036_v56 = vmul.f32 0.5, %v3032_v7 }
 0x31c   :  { %v2775_v0 = vmul.f32 0.5, %v10905_v48  ;;  %v10907_v20 = vpop.eup %10906  ;;  %v8554_v48 = vor.u32 %v10475_v16, %v8551_v12  ;;  %v8565_v12 = vld [vmem:[%s16334_s4 + $0xc0] sm:$0xf] }
 0x31d   :  { %10910 = vtanh.f32 %v3036_v56  ;;  %v3042_v19 = vmul.f32 0.5, %v10907_v20  ;;  %v10471_v20 = vld [vmem:[%s16334_s4 + $0x84] sm:$0xf] }
 0x31e   :  { %v10909_v3 = vpop.eup %10908  ;;  %v2776_v49 = vadd.f32 0.5, %v2775_v0  ;;  %v8562_v0 = vor.u32 %v10476_v53, %v8559_v41 }
 0x31f   :  { %v3015_v36 = vpop.f32.mrf.mxu2  ;;  %v3043_v63 = vadd.f32 0.5, %v3042_v19 }
 0x320   :  { %v2781_v46 = vmul.f32 %v10909_v3, %v2776_v49  ;;  %v3034_v44 = vadd.f32 %v3015_v36, %v344_v47  ;;  %v2991_v31 = vpop.f32.mrf.mxu0  ;;  %v8538_v47 = vor.u32 %v10471_v20, %v8535_v55 }
 0x321   :  { %v3049_v21 = vmul.f32 %v3043_v63, %v13258_v35  ;;  %v8543_v35 = vld [vmem:[%s16334_s4 + $0x98] sm:$0xf0]  ;;  %v8522_v31 = vor.u32 %v10467_v54, %v8519_v13  ;;  %v10478_v54 = vld [vmem:[%s16334_s4 + $0xb4] sm:$0xf0]  ;;  %v10455_v13 = vld [vmem:[%s16334_s4 + $0x4] sm:$0xf] }
 0x322   :  { %v3058_v59 = vpack.c.bf16 %v2781_v46, %v2781_v46  ;;  %10912 = vtanh.f32 %v3034_v44  ;;  %v8546_v49 = vor.u32 %v10472_v17, %v8543_v35  ;;  %v10468_v46 = vld [vmem:[%s16334_s4 + $0x6c] sm:$0xf]  ;;  %v8527_v44 = vld [vmem:[%s16334_s4 + $0x78] sm:$0xf0]  ;;  %v8549_v17 = vld [vmem:[%s16334_s4 + $0xa0] sm:$0xf] }
 0x323   :  { %v10911_v10 = vpop.eup %10910  ;;  %10914 = vtanh.f32 %v3045_v32  ;;  %v8530_v19 = vor.u32 %v10468_v46, %v8527_v44  ;;  %v8581_v32 = vld [vmem:[%s16334_s4 + $0xe0] sm:$0xf]  ;;  %v8511_v63 = vld [vmem:[%s16334_s4 + $0x58] sm:$0xf0]  ;;  %v10477_v35 = vld [vmem:[%s16334_s4 + $0xac] sm:$0xf0] }
 0x324   :  { %v3038_v61 = vmul.f32 0.5, %v10911_v10  ;;  %3464 = vmatmul.bf16.vlgmr.msrb.gmra.mxu1 %v3058_v59  ;;  %3490 = vmatmul.bf16.vlgmr.msrb.gmra.mxu3 %v3058_v59  ;;  %v8503_v10 = vld [vmem:[%s16334_s4 + $0x50] sm:$0xf0]  ;;  %v10456_v46 = vld [vmem:[%s16334_s4 + $0xc] sm:$0xf] }
 0x325   :  { %3776 = vmatpush.bf16.msrb.mxu1 %v8586_v11  ;;  %3802 = vmatpush.bf16.msrb.mxu3 %v8594_v52  ;;  %v10485_v11 = vld [vmem:[%s16334_s4 + $0xec] sm:$0xf0]  ;;  %v8589_v52 = vld [vmem:[%s16334_s4 + $0xe8] sm:$0xf]  ;;  %v8506_v41 = vor.u32 %v10463_v51, %v8503_v10  ;;  %v8479_v44 = vld [vmem:[%s16334_s4 + $0x18] sm:$0xf0] }
 0x326   :  { %v3039_v14 = vadd.f32 0.5, %v3038_v61  ;;  %v10464_v61 = vld [vmem:[%s16334_s4 + $0x4c] sm:$0xf]  ;;  %v8590_v16 = vor.u32 %v10486_v37, %v8589_v52  ;;  %v8533_v52 = vld [vmem:[%s16334_s4 + $0x80] sm:$0xf] }
 0x327   :  { %v3017_v42 = vpop.f32.mrf.mxu2  ;;  %v8541_v37 = vld [vmem:[%s16334_s4 + $0x88] sm:$0xf]  ;;  %v10474_v51 = vld [vmem:[%s16334_s4 + $0x94] sm:$0xf0] }
 0x328   :  { %v10913_v7 = vpop.eup %10912  ;;  %v8514_v42 = vor.u32 %v10464_v61, %v8511_v63  ;;  %v8542_v10 = vor.u32 %v10474_v51, %v8541_v37  ;;  %v8517_v61 = vld [vmem:[%s16334_s4 + $0x60] sm:$0xf]  ;;  %v10469_v63 = vld [vmem:[%s16334_s4 + $0x6c] sm:$0xf0]  ;;  %v8823_v37 = vld [vmem:[%s16337_s6 + $0x1d0] sm:$0xf0] }
 0x329   :  { %v3050_v56 = vmul.f32 %v10913_v7, %v3039_v14  ;;  %3777 = vmatpush.bf16.msrb.mxu1 %v8570_v25  ;;  %3803 = vmatpush.bf16.msrb.mxu3 %v8578_v8  ;;  %v10915_v26 = vpop.eup %10914  ;;  %v8582_v8 = vor.u32 %v10485_v11, %v8581_v32  ;;  %v10481_v14 = vld [vmem:[%s16334_s4 + $0xcc] sm:$0xf0]  ;;  %v10482_v7 = vld [vmem:[%s16334_s4 + $0xd4] sm:$0xf0]  ;;  %v8482_v11 = vor.u32 %v10456_v46, %v8479_v44  ;;  %v10547_v44 = vld [vmem:[%s16337_s6 + $0x1e4] sm:$0xf] }
 0x32a   :  { %v3047_v36 = vmul.f32 0.5, %v10915_v26  ;;  %v8566_v20 = vor.u32 %v10481_v14, %v8565_v12  ;;  %v8501_v14 = vld [vmem:[%s16334_s4 + $0x40] sm:$0xf]  ;;  %v10549_v46 = vld [vmem:[%s16337_s6 + $0x1ec] sm:$0xf0] }
 0x32b   :  { %v13876_v3 = vadd.f32 %v3050_v56, %v3049_v21  ;;  %v8487_v21 = vld [vmem:[%s16334_s4 + $0x30] sm:$0xf0]  ;;  %v10460_v56 = vld [vmem:[%s16334_s4 + $0x2c] sm:$0xf] }
 0x32c   :  { %v3048_v45 = vadd.f32 0.5, %v3047_v36  ;;  %v8471_v36 = vld [vmem:[%s16334_s4 + $0x10] sm:$0xf0] }
 0x32d   :  { %10916 = vtanh.f32 %v13876_v3  ;;  %3778 = vmatpush.bf16.msrb.mxu1 %v8554_v48  ;;  %3804 = vmatpush.bf16.msrb.mxu3 %v8562_v0  ;;  %v10459_v48 = vld [vmem:[%s16334_s4 + $0x24] sm:$0xf]  ;;  %v8495_v0 = vld [vmem:[%s16334_s4 + $0x38] sm:$0xf0]  ;;  %v8474_v32 = vor.u32 %v10455_v13, %v8471_v36  ;;  %v8837_v36 = vld [vmem:[%s16337_s6 + $0x1e0] sm:$0xf] }
 0x32e   :  { %v8490_v26 = vor.u32 %v10459_v48, %v8487_v21  ;;  %v8485_v21 = vld [vmem:[%s16334_s4 + $0x20] sm:$0xf] }
 0x331   :  { %3779 = vmatpush.bf16.msrb.mxu1 %v8538_v47  ;;  %3805 = vmatpush.bf16.msrb.mxu3 %v8546_v49  ;;  %v8498_v47 = vor.u32 %v10460_v56, %v8495_v0  ;;  %v8557_v49 = vld [vmem:[%s16334_s4 + $0xa8] sm:$0xf]  ;;  %v10461_v56 = vld [vmem:[%s16334_s4 + $0x2c] sm:$0xf0] }
 0x332   :  { %v8493_v0 = vld [vmem:[%s16334_s4 + $0x28] sm:$0xf] }
 0x333   :  { %v10917_v5 = vpop.eup %10916 }
 0x334   :  { %v3053_v25 = vmul.f32 %v10917_v5, %v3048_v45  ;;  %3516 = vmatmul.bf16.vlgmr.msra.gmra.mxu1 %v3058_v59  ;;  %3542 = vmatmul.bf16.vlgmr.msra.gmra.mxu3 %v3058_v59  ;;  %v8573_v59 = vld [vmem:[%s16334_s4 + $0xc8] sm:$0xf]  ;;  %v10473_v45 = vld [vmem:[%s16334_s4 + $0x8c] sm:$0xf0] }
 0x335   :  { %3780 = vmatpush.bf16.msrb.mxu1 %v8522_v31  ;;  %3806 = vmatpush.bf16.msrb.mxu3 %v8530_v19  ;;  %v8574_v55 = vor.u32 %v10482_v7, %v8573_v59  ;;  %v8550_v31 = vor.u32 %v10477_v35, %v8549_v17  ;;  %v8558_v19 = vor.u32 %v10478_v54, %v8557_v49  ;;  %v10466_v59 = vld [vmem:[%s16334_s4 + $0x54] sm:$0xf0]  ;;  %v8469_v35 = vld [vmem:[%s16334_s4] sm:$0xf] }
 0x336   :  { %v13921_v53 = vpack.c.bf16 %v3053_v25, %v3053_v25  ;;  %v8534_v5 = vor.u32 %v10473_v45, %v8533_v52  ;;  %v8525_v25 = vld [vmem:[%s16334_s4 + $0x68] sm:$0xf]  ;;  %v10458_v49 = vld [vmem:[%s16334_s4 + $0x14] sm:$0xf0]  ;;  %v10543_v52 = vld [vmem:[%s16337_s6 + $0x1c4] sm:$0xf] }
 0x337   :  { %v8826_v51 = vor.u32 %v10543_v52, %v8823_v37  ;;  %v8695_v52 = vld [vmem:[%s16337_s6 + $0xd0] sm:$0xf0]  ;;  %v10525_v37 = vld [vmem:[%s16337_s6 + $0x12c] sm:$0xf0] }
 0x338   :  { %3451 = vmatmul.bf16.vlgmr.msrb.gmra.mxu0 %v13921_v53  ;;  %3477 = vmatmul.bf16.vlgmr.msrb.gmra.mxu2 %v13921_v53 }
 0x339   :  { %3763 = vmatpush.bf16.msrb.mxu0 %v8582_v8  ;;  %3789 = vmatpush.bf16.msrb.mxu2 %v8590_v16  ;;  %v10470_v8 = vld [vmem:[%s16334_s4 + $0x74] sm:$0xf0]  ;;  %v8518_v16 = vor.u32 %v10469_v63, %v8517_v61  ;;  %v10539_v61 = vld [vmem:[%s16337_s6 + $0x1a4] sm:$0xf] }
 0x33a   :  { %3781 = vmatpush.bf16.msrb.mxu1 %v8506_v41  ;;  %3807 = vmatpush.bf16.msrb.mxu3 %v8514_v42  ;;  %v8526_v12 = vor.u32 %v10470_v8, %v8525_v25  ;;  %v10465_v41 = vld [vmem:[%s16334_s4 + $0x4c] sm:$0xf0]  ;;  %v8509_v42 = vld [vmem:[%s16334_s4 + $0x48] sm:$0xf]  ;;  %v8807_v25 = vld [vmem:[%s16337_s6 + $0x1b0] sm:$0xf0] }
 0x33b   :  { %v8502_v7 = vor.u32 %v10465_v41, %v8501_v14  ;;  %v8510_v48 = vor.u32 %v10466_v59, %v8509_v42  ;;  %v8810_v8 = vor.u32 %v10539_v61, %v8807_v25  ;;  %v10535_v14 = vld [vmem:[%s16337_s6 + $0x184] sm:$0xf]  ;;  %v8791_v42 = vld [vmem:[%s16337_s6 + $0x190] sm:$0xf0] }
 0x33c   :  { %v8794_v59 = vor.u32 %v10535_v14, %v8791_v42  ;;  %v8743_v61 = vld [vmem:[%s16337_s6 + $0x130] sm:$0xf0]  ;;  %v8725_v42 = vld [vmem:[%s16337_s6 + $0x100] sm:$0xf] }
 0x33d   :  { %3764 = vmatpush.bf16.msrb.mxu0 %v8566_v20  ;;  %3790 = vmatpush.bf16.msrb.mxu2 %v8574_v55  ;;  %v10462_v20 = vld [vmem:[%s16334_s4 + $0x34] sm:$0xf0]  ;;  %v8486_v55 = vor.u32 %v10461_v56, %v8485_v21  ;;  %v10531_v21 = vld [vmem:[%s16337_s6 + $0x164] sm:$0xf] }
 0x33e   :  { %3782 = vmatpush.bf16.msrb.mxu1 %v8490_v26  ;;  %3808 = vmatpush.bf16.msrb.mxu3 %v8498_v47  ;;  %v8494_v17 = vor.u32 %v10462_v20, %v8493_v0  ;;  %v10457_v26 = vld [vmem:[%s16334_s4 + $0xc] sm:$0xf0]  ;;  %v8477_v47 = vld [vmem:[%s16334_s4 + $0x8] sm:$0xf]  ;;  %v8775_v0 = vld [vmem:[%s16337_s6 + $0x170] sm:$0xf0] }
 0x33f   :  { %v8470_v54 = vor.u32 %v10457_v26, %v8469_v35  ;;  %v8478_v13 = vor.u32 %v10458_v49, %v8477_v47  ;;  %v8778_v20 = vor.u32 %v10531_v21, %v8775_v0  ;;  %v10515_v35 = vld [vmem:[%s16337_s6 + $0xe4] sm:$0xf]  ;;  %v8711_v47 = vld [vmem:[%s16337_s6 + $0xf0] sm:$0xf0]  ;;  %v8757_v49 = vld [vmem:[%s16337_s6 + $0x140] sm:$0xf] }
 0x340   :  { %v10519_v21 = vld [vmem:[%s16337_s6 + $0x104] sm:$0xf]  ;;  %v8845_v0 = vld [vmem:[%s16337_s6 + $0x1e8] sm:$0xf] }
 0x341   :  { %3765 = vmatpush.bf16.msrb.mxu0 %v8550_v31  ;;  %3791 = vmatpush.bf16.msrb.mxu2 %v8558_v19  ;;  %v8838_v31 = vor.u32 %v10549_v46, %v8837_v36  ;;  %v8839_v19 = vld [vmem:[%s16337_s6 + $0x1f0] sm:$0xf0]  ;;  %v10527_v46 = vld [vmem:[%s16337_s6 + $0x144] sm:$0xf] }
 0x342   :  { %3783 = vmatpush.bf16.msrb.mxu1 %v8474_v32  ;;  %3809 = vmatpush.bf16.msrb.mxu3 %v8482_v11  ;;  %v8842_v32 = vor.u32 %v10547_v44, %v8839_v19  ;;  %v10545_v11 = vld [vmem:[%s16337_s6 + $0x1cc] sm:$0xf0]  ;;  %v8759_v44 = vld [vmem:[%s16337_s6 + $0x150] sm:$0xf0]  ;;  %v8693_v19 = vld [vmem:[%s16337_s6 + $0xc0] sm:$0xf] }
 0x345   :  { %3766 = vmatpush.bf16.msrb.mxu0 %v8534_v5  ;;  %3784 = vmatmul.bf16.vlgmr.msrb.gmra.mxu1 %v13921_v53  ;;  %v8805_v5 = vld [vmem:[%s16337_s6 + $0x1a0] sm:$0xf] }
 0x346   :  { %3792 = vmatpush.bf16.msrb.mxu2 %v8542_v10  ;;  %3810 = vmatmul.bf16.vlgmr.msrb.gmra.mxu3 %v13921_v53  ;;  %v10541_v10 = vld [vmem:[%s16337_s6 + $0x1ac] sm:$0xf0] }
 0x347   :  { %4239 = vmatpush.bf16.msra.mxu1 %v8838_v31  ;;  %4265 = vmatpush.bf16.msra.mxu3 %v8842_v32  ;;  %v8806_v63 = vor.u32 %v10541_v10, %v8805_v5  ;;  %v8762_v31 = vor.u32 %v10527_v46, %v8759_v44  ;;  %v10513_v32 = vld [vmem:[%s16337_s6 + $0xcc] sm:$0xf0]  ;;  %v10523_v10 = vld [vmem:[%s16337_s6 + $0x124] sm:$0xf]  ;;  %v8663_v46 = vld [vmem:[%s16337_s6 + $0x90] sm:$0xf0] }
 0x348   :  { %3503 = vmatmul.bf16.vlgmr.msra.gmra.mxu0 %v13921_v53  ;;  %3529 = vmatmul.bf16.vlgmr.msra.gmra.mxu2 %v13921_v53 }
 0x349   :  { %3767 = vmatpush.bf16.msrb.mxu0 %v8518_v16  ;;  %v8789_v16 = vld [vmem:[%s16337_s6 + $0x180] sm:$0xf] }
 0x34a   :  { %3793 = vmatpush.bf16.msrb.mxu2 %v8526_v12  ;;  %v10537_v12 = vld [vmem:[%s16337_s6 + $0x18c] sm:$0xf0] }
 0x34b   :  { %4266 = vmatpush.bf16.msra.mxu3 %v8826_v51  ;;  %v8790_v41 = vor.u32 %v10537_v12, %v8789_v16  ;;  %v10509_v16 = vld [vmem:[%s16337_s6 + $0xac] sm:$0xf0]  ;;  %v10507_v12 = vld [vmem:[%s16337_s6 + $0xa4] sm:$0xf] }
 0x34d   :  { %3768 = vmatpush.bf16.msrb.mxu0 %v8502_v7  ;;  %v8773_v7 = vld [vmem:[%s16337_s6 + $0x160] sm:$0xf] }
 0x34e   :  { %3794 = vmatpush.bf16.msrb.mxu2 %v8510_v48  ;;  %v10533_v48 = vld [vmem:[%s16337_s6 + $0x16c] sm:$0xf0] }
 0x34f   :  { %4267 = vmatpush.bf16.msra.mxu3 %v8810_v8  ;;  %v8774_v56 = vor.u32 %v10533_v48, %v8773_v7  ;;  %v8677_v8 = vld [vmem:[%s16337_s6 + $0xa0] sm:$0xf] }
 0x350   :  { %v8678_v14 = vor.u32 %v10509_v16, %v8677_v8  ;;  %v8813_v16 = vld [vmem:[%s16337_s6 + $0x1a8] sm:$0xf] }
 0x351   :  { %3769 = vmatpush.bf16.msrb.mxu0 %v8486_v55  ;;  %v8709_v55 = vld [vmem:[%s16337_s6 + $0xe0] sm:$0xf] }
 0x352   :  { %3795 = vmatpush.bf16.msrb.mxu2 %v8494_v17  ;;  %v10517_v17 = vld [vmem:[%s16337_s6 + $0xec] sm:$0xf0] }
 0x353   :  { %4268 = vmatpush.bf16.msra.mxu3 %v8794_v59  ;;  %v8710_v26 = vor.u32 %v10517_v17, %v8709_v55  ;;  %v10521_v59 = vld [vmem:[%s16337_s6 + $0x10c] sm:$0xf0]  ;;  %v10550_v55 = vld [vmem:[%s16337_s6 + $0x1f4] sm:$0xf0]  ;;  %v10548_v17 = vld [vmem:[%s16337_s6 + $0x1ec] sm:$0xf] }
 0x354   :  { %v8726_v48 = vor.u32 %v10521_v59, %v8725_v42  ;;  %v8815_v42 = vld [vmem:[%s16337_s6 + $0x1b8] sm:$0xf0] }
 0x355   :  { %3770 = vmatpush.bf16.msrb.mxu0 %v8470_v54  ;;  %v10529_v54 = vld [vmem:[%s16337_s6 + $0x14c] sm:$0xf0] }
 0x356   :  { %3796 = vmatpush.bf16.msrb.mxu2 %v8478_v13  ;;  %v8714_v13 = vor.u32 %v10515_v35, %v8711_v47  ;;  %v8758_v36 = vor.u32 %v10529_v54, %v8757_v49  ;;  %v8847_v35 = vld [vmem:[%s16337_s6 + $0x1f8] sm:$0xf0]  ;;  %v8661_v49 = vld [vmem:[%s16337_s6 + $0x80] sm:$0xf]  ;;  %v10505_v54 = vld [vmem:[%s16337_s6 + $0x8c] sm:$0xf0] }
 0x357   :  { %4269 = vmatpush.bf16.msra.mxu3 %v8778_v20  ;;  %v8850_v47 = vor.u32 %v10548_v17, %v8847_v35  ;;  %v8797_v17 = vld [vmem:[%s16337_s6 + $0x188] sm:$0xf]  ;;  %v10538_v35 = vld [vmem:[%s16337_s6 + $0x194] sm:$0xf0] }
 0x358   :  { %3771 = vmatmul.bf16.vlgmr.msrb.gmra.mxu0 %v13921_v53 }
 0x359   :  { %3797 = vmatmul.bf16.vlgmr.msrb.gmra.mxu2 %v13921_v53  ;;  %v8821_v53 = vld [vmem:[%s16337_s6 + $0x1c0] sm:$0xf]  ;;  %4226 = vmatpush.bf16.msra.mxu0 %v8710_v26  ;;  %v8846_v26 = vor.u32 %v10550_v55, %v8845_v0  ;;  %v8631_v0 = vld [vmem:[%s16337_s6 + $0x50] sm:$0xf0] }
 0x35a   :  { %v8822_v45 = vor.u32 %v10545_v11, %v8821_v53  ;;  %4252 = vmatpush.bf16.msra.mxu2 %v8714_v13  ;;  %v10511_v53 = vld [vmem:[%s16337_s6 + $0xc4] sm:$0xf]  ;;  %v8694_v11 = vor.u32 %v10513_v32, %v8693_v19  ;;  %v8829_v19 = vld [vmem:[%s16337_s6 + $0x1c8] sm:$0xf]  ;;  %v10546_v32 = vld [vmem:[%s16337_s6 + $0x1d4] sm:$0xf0] }
 0x35b   :  { %4270 = vmatpush.bf16.msra.mxu3 %v8762_v31  ;;  %v8698_v51 = vor.u32 %v10511_v53, %v8695_v52  ;;  %v10503_v13 = vld [vmem:[%s16337_s6 + $0x84] sm:$0xf]  ;;  %v10544_v53 = vld [vmem:[%s16337_s6 + $0x1cc] sm:$0xf]  ;;  %v8831_v52 = vld [vmem:[%s16337_s6 + $0x1d8] sm:$0xf0] }
 0x35c   :  { %4240 = vmatpush.bf16.msra.mxu1 %v8822_v45  ;;  %v8741_v45 = vld [vmem:[%s16337_s6 + $0x120] sm:$0xf]  ;;  %v8666_v31 = vor.u32 %v10503_v13, %v8663_v46  ;;  %v10493_v46 = vld [vmem:[%s16337_s6 + $0x2c] sm:$0xf0] }
 0x35d   :  { %v8742_v5 = vor.u32 %v10525_v37, %v8741_v45  ;;  %4227 = vmatpush.bf16.msra.mxu0 %v8694_v11  ;;  %v8830_v11 = vor.u32 %v10546_v32, %v8829_v19  ;;  %v8834_v37 = vor.u32 %v10544_v53, %v8831_v52  ;;  %v8615_v32 = vld [vmem:[%s16337_s6 + $0x30] sm:$0xf0]  ;;  %v10534_v52 = vld [vmem:[%s16337_s6 + $0x174] sm:$0xf0] }
 0x35e   :  { %4253 = vmatpush.bf16.msra.mxu2 %v8698_v51  ;;  %v8645_v51 = vld [vmem:[%s16337_s6 + $0x60] sm:$0xf] }
 0x360   :  { %4241 = vmatpush.bf16.msra.mxu1 %v8806_v63  ;;  %v8746_v63 = vor.u32 %v10523_v10, %v8743_v61  ;;  %v10499_v10 = vld [vmem:[%s16337_s6 + $0x64] sm:$0xf] }
 0x361   :  { %4228 = vmatpush.bf16.msra.mxu0 %v8678_v14  ;;  %v10540_v14 = vld [vmem:[%s16337_s6 + $0x1ac] sm:$0xf] }
 0x362   :  { %4271 = vmatpush.bf16.msra.mxu3 %v8746_v63  ;;  %v8647_v63 = vld [vmem:[%s16337_s6 + $0x70] sm:$0xf0]  ;;  %v8818_v59 = vor.u32 %v10540_v14, %v8815_v42  ;;  %v10518_v42 = vld [vmem:[%s16337_s6 + $0xf4] sm:$0xf0] }
 0x363   :  { %v8650_v8 = vor.u32 %v10499_v10, %v8647_v63  ;;  %v10489_v63 = vld [vmem:[%s16337_s6 + $0xc] sm:$0xf0]  ;;  %v8599_v14 = vld [vmem:[%s16337_s6 + $0x10] sm:$0xf0] }
 0x364   :  { %4242 = vmatpush.bf16.msra.mxu1 %v8790_v41  ;;  %v8679_v41 = vld [vmem:[%s16337_s6 + $0xb0] sm:$0xf0] }
 0x365   :  { %v8682_v7 = vor.u32 %v10507_v12, %v8679_v41  ;;  %v10542_v12 = vld [vmem:[%s16337_s6 + $0x1b4] sm:$0xf0] }
 0x366   :  { %v8814_v41 = vor.u32 %v10542_v12, %v8813_v16 }
 0x367   :  { %4254 = vmatpush.bf16.msra.mxu2 %v8682_v7  ;;  %v8629_v7 = vld [vmem:[%s16337_s6 + $0x40] sm:$0xf] }
 0x368   :  { %4243 = vmatpush.bf16.msra.mxu1 %v8774_v56  ;;  %v8727_v56 = vld [vmem:[%s16337_s6 + $0x110] sm:$0xf0] }
 0x369   :  { %v8730_v20 = vor.u32 %v10519_v21, %v8727_v56  ;;  %v10495_v21 = vld [vmem:[%s16337_s6 + $0x44] sm:$0xf] }
 0x36a   :  { %v8634_v55 = vor.u32 %v10495_v21, %v8631_v0  ;;  %v10516_v21 = vld [vmem:[%s16337_s6 + $0xec] sm:$0xf]  ;;  %v8765_v0 = vld [vmem:[%s16337_s6 + $0x148] sm:$0xf] }
 0x36b   :  { %4272 = vmatpush.bf16.msra.mxu3 %v8730_v20  ;;  %4255 = vmatpush.bf16.msra.mxu2 %v8666_v31  ;;  %v10491_v31 = vld [vmem:[%s16337_s6 + $0x24] sm:$0xf] }
 0x36c   :  { %4244 = vmatpush.bf16.msra.mxu1 %v8758_v36  ;;  %v8662_v36 = vor.u32 %v10505_v54, %v8661_v49  ;;  %v8799_v49 = vld [vmem:[%s16337_s6 + $0x198] sm:$0xf0]  ;;  %v8618_v53 = vor.u32 %v10491_v31, %v8615_v32 }
 0x36d   :  { %v8703_v32 = vld [vmem:[%s16337_s6 + $0xd8] sm:$0xf0] }
 0x36e   :  { %4229 = vmatpush.bf16.msra.mxu0 %v8662_v36  ;;  %v8613_v36 = vld [vmem:[%s16337_s6 + $0x20] sm:$0xf] }
 0x36f   :  { %4317 = vmatpush.bf16.msrb.mxu3 %v8850_v47  ;;  %4256 = vmatpush.bf16.msra.mxu2 %v8650_v8  ;;  %v8798_v47 = vor.u32 %v10538_v35, %v8797_v17  ;;  %v8614_v19 = vor.u32 %v10493_v46, %v8613_v36  ;;  %v10487_v8 = vld [vmem:[%s16337_s6 + $0x4] sm:$0xf]  ;;  %v10528_v17 = vld [vmem:[%s16337_s6 + $0x14c] sm:$0xf]  ;;  %v8767_v35 = vld [vmem:[%s16337_s6 + $0x158] sm:$0xf0] }
 0x370   :  { %4245 = vmatpush.bf16.msra.mxu1 %v8742_v5  ;;  %v10501_v5 = vld [vmem:[%s16337_s6 + $0x6c] sm:$0xf0]  ;;  %v8701_v36 = vld [vmem:[%s16337_s6 + $0xc8] sm:$0xf]  ;;  %v10514_v46 = vld [vmem:[%s16337_s6 + $0xd4] sm:$0xf0] }
 0x371   :  { %v8646_v61 = vor.u32 %v10501_v5, %v8645_v51  ;;  %v8783_v51 = vld [vmem:[%s16337_s6 + $0x178] sm:$0xf0] }
 0x373   :  { %4318 = vmatpush.bf16.msrb.mxu3 %v8834_v37  ;;  %4230 = vmatpush.bf16.msra.mxu0 %v8646_v61  ;;  %v8597_v61 = vld [vmem:[%s16337_s6] sm:$0xf] }
 0x374   :  { %4246 = vmatpush.bf16.msra.mxu1 %v8726_v48  ;;  %v10497_v48 = vld [vmem:[%s16337_s6 + $0x4c] sm:$0xf0]  ;;  %4257 = vmatpush.bf16.msra.mxu2 %v8634_v55  ;;  %v8598_v12 = vor.u32 %v10489_v63, %v8597_v61  ;;  %v10530_v55 = vld [vmem:[%s16337_s6 + $0x154] sm:$0xf0] }
 0x375   :  { %v8630_v56 = vor.u32 %v10497_v48, %v8629_v7  ;;  %v8602_v7 = vor.u32 %v10487_v8, %v8599_v14  ;;  %v10508_v14 = vld [vmem:[%s16337_s6 + $0xac] sm:$0xf] }
 0x377   :  { %4319 = vmatpush.bf16.msrb.mxu3 %v8818_v59  ;;  %4231 = vmatpush.bf16.msra.mxu0 %v8630_v56  ;;  %v8719_v56 = vld [vmem:[%s16337_s6 + $0xf8] sm:$0xf0] }
 0x378   :  { %4291 = vmatpush.bf16.msrb.mxu1 %v8846_v26  ;;  %v10536_v26 = vld [vmem:[%s16337_s6 + $0x18c] sm:$0xf]  ;;  %4258 = vmatpush.bf16.msra.mxu2 %v8618_v53  ;;  %v8749_v53 = vld [vmem:[%s16337_s6 + $0x128] sm:$0xf] }
 0x379   :  { %v8802_v13 = vor.u32 %v10536_v26, %v8799_v49  ;;  %v8766_v49 = vor.u32 %v10530_v55, %v8765_v0  ;;  %v8735_v55 = vld [vmem:[%s16337_s6 + $0x118] sm:$0xf0] }
 0x37b   :  { %4320 = vmatpush.bf16.msrb.mxu3 %v8802_v13  ;;  %4232 = vmatpush.bf16.msra.mxu0 %v8614_v19  ;;  %v8770_v13 = vor.u32 %v10528_v17, %v8767_v35  ;;  %v8702_v19 = vor.u32 %v10514_v46, %v8701_v36  ;;  %v10504_v36 = vld [vmem:[%s16337_s6 + $0x8c] sm:$0xf]  ;;  %v8671_v46 = vld [vmem:[%s16337_s6 + $0x98] sm:$0xf0] }
 0x37c   :  { %4292 = vmatpush.bf16.msrb.mxu1 %v8830_v11  ;;  %v8781_v11 = vld [vmem:[%s16337_s6 + $0x168] sm:$0xf]  ;;  %4259 = vmatpush.bf16.msra.mxu2 %v8602_v7 }
 0x37d   :  { %v8782_v37 = vor.u32 %v10534_v52, %v8781_v11  ;;  %v8733_v7 = vld [vmem:[%s16337_s6 + $0x108] sm:$0xf] }
 0x37f   :  { %4233 = vmatpush.bf16.msra.mxu0 %v8598_v12  ;;  %v10510_v12 = vld [vmem:[%s16337_s6 + $0xb4] sm:$0xf0] }
 0x380   :  { %4293 = vmatpush.bf16.msrb.mxu1 %v8814_v41  ;;  %v8717_v41 = vld [vmem:[%s16337_s6 + $0xe8] sm:$0xf] }
 0x381   :  { %v8718_v48 = vor.u32 %v10518_v42, %v8717_v41 }
 0x383   :  { %4278 = vmatpush.bf16.msrb.mxu0 %v8718_v48  ;;  %v10522_v48 = vld [vmem:[%s16337_s6 + $0x114] sm:$0xf0] }
 0x384   :  { %4294 = vmatpush.bf16.msrb.mxu1 %v8798_v47  ;;  %v8734_v0 = vor.u32 %v10522_v48, %v8733_v7 }
 0x387   :  { %4279 = vmatpush.bf16.msrb.mxu0 %v8702_v19 }
 0x388   :  { %4295 = vmatpush.bf16.msrb.mxu1 %v8782_v37  ;;  %v10524_v37 = vld [vmem:[%s16337_s6 + $0x12c] sm:$0xf] }
 0x38c   :  { %4296 = vmatpush.bf16.msrb.mxu1 %v8766_v49 }
 0x3a1   :  { %v14141_v25 = vpop.f32.mrf.mxu1 }
 0x3a7   :  { %v14191_v44 = vpop.f32.mrf.mxu3 }
 0x3a9   :  { %v3467_v45 = vpop.f32.mrf.mxu1 }
 0x3aa   :  { %v10532_v45 = vld [vmem:[%s16337_s6 + $0x16c] sm:$0xf] }
 0x3ab   :  { %v8786_v10 = vor.u32 %v10532_v45, %v8783_v51  ;;  %v10526_v45 = vld [vmem:[%s16337_s6 + $0x134] sm:$0xf0]  ;;  %v8751_v51 = vld [vmem:[%s16337_s6 + $0x138] sm:$0xf0] }
 0x3ac   :  { %v8750_v61 = vor.u32 %v10526_v45, %v8749_v53  ;;  %v8754_v63 = vor.u32 %v10524_v37, %v8751_v51  ;;  %v10502_v53 = vld [vmem:[%s16337_s6 + $0x74] sm:$0xf0]  ;;  %v8655_v37 = vld [vmem:[%s16337_s6 + $0x78] sm:$0xf0] }
 0x3ad   :  { %4321 = vmatpush.bf16.msrb.mxu3 %v8786_v10 }
 0x3ae   :  { %4297 = vmatpush.bf16.msrb.mxu1 %v8750_v61 }
 0x3af   :  { %v3493_v20 = vpop.f32.mrf.mxu3 }
 0x3b0   :  { %v8722_v20 = vor.u32 %v10516_v21, %v8719_v56 }
 0x3b1   :  { %v14253_v54 = vpop.f32.mrf.mxu1  ;;  %4322 = vmatpush.bf16.msrb.mxu3 %v8770_v13 }
 0x3b2   :  { %4304 = vmatpush.bf16.msrb.mxu2 %v8722_v20  ;;  %v10520_v20 = vld [vmem:[%s16337_s6 + $0x10c] sm:$0xf]  ;;  %4298 = vmatpush.bf16.msrb.mxu1 %v8734_v0 }
 0x3b3   :  { %v8738_v17 = vor.u32 %v10520_v20, %v8735_v55  ;;  %v8621_v55 = vld [vmem:[%s16337_s6 + $0x28] sm:$0xf] }
 0x3b5   :  { %v3452_v5 = vpop.f32.mrf.mxu0  ;;  %4323 = vmatpush.bf16.msrb.mxu3 %v8754_v63 }
 0x3b6   :  { %v3453_v16 = vadd.f32 %v3452_v5, %v12397_v1 }
 0x3b7   :  { %v14298_v59 = vpop.f32.mrf.mxu3 }
 0x3b8   :  { %v3466_v26 = vadd.f32 %v14141_v25, %v3453_v16  ;;  %v10512_v25 = vld [vmem:[%s16337_s6 + $0xcc] sm:$0xf]  ;;  %v8685_v16 = vld [vmem:[%s16337_s6 + $0xa8] sm:$0xf] }
 0x3b9   :  { %v3519_v47 = vpop.f32.mrf.mxu1  ;;  %v8706_v52 = vor.u32 %v10512_v25, %v8703_v32  ;;  %v8686_v42 = vor.u32 %v10510_v12, %v8685_v16  ;;  %4324 = vmatpush.bf16.msrb.mxu3 %v8738_v17  ;;  %v8653_v32 = vld [vmem:[%s16337_s6 + $0x68] sm:$0xf]  ;;  %v10498_v12 = vld [vmem:[%s16337_s6 + $0x54] sm:$0xf0] }
 0x3ba   :  { %v3547_v5 = vmul.f32 0.5, %v3466_v26  ;;  %v8669_v26 = vld [vmem:[%s16337_s6 + $0x88] sm:$0xf]  ;;  %v10506_v47 = vld [vmem:[%s16337_s6 + $0x94] sm:$0xf0]  ;;  %v8654_v45 = vor.u32 %v10502_v53, %v8653_v32 }
 0x3bb   :  { %v3478_v31 = vpop.f32.mrf.mxu2  ;;  %4305 = vmatpush.bf16.msrb.mxu2 %v8706_v52  ;;  %4280 = vmatpush.bf16.msrb.mxu0 %v8686_v42  ;;  %v8670_v13 = vor.u32 %v10506_v47, %v8669_v26  ;;  %v8637_v16 = vld [vmem:[%s16337_s6 + $0x48] sm:$0xf]  ;;  %v10494_v17 = vld [vmem:[%s16337_s6 + $0x34] sm:$0xf0]  ;;  %v10488_v53 = vld [vmem:[%s16337_s6 + $0xc] sm:$0xf] }
 0x3bc   :  { %v3479_v11 = vadd.f32 %v3478_v31, %v12412_v24  ;;  %10918 = vtanh.f32 %v3547_v5  ;;  %v8674_v31 = vor.u32 %v10504_v36, %v8671_v46  ;;  %v8638_v42 = vor.u32 %v10498_v12, %v8637_v16  ;;  %v10490_v32 = vld [vmem:[%s16337_s6 + $0x14] sm:$0xf0] }
 0x3bd   :  { %v3454_v10 = vpop.f32.mrf.mxu0  ;;  %v8622_v47 = vor.u32 %v10494_v17, %v8621_v55  ;;  %v10575_v55 = vld [vmem:[%s16334_s4 + $0xc4] sm:$0xf] }
 0x3be   :  { %v3492_v8 = vadd.f32 %v14191_v44, %v3479_v11  ;;  %v8687_v44 = vld [vmem:[%s16337_s6 + $0xb8] sm:$0xf0]  ;;  %v10500_v11 = vld [vmem:[%s16337_s6 + $0x6c] sm:$0xf] }
 0x3bf   :  { %v3545_v41 = vpop.f32.mrf.mxu3  ;;  %v8690_v56 = vor.u32 %v10508_v14, %v8687_v44  ;;  %4281 = vmatpush.bf16.msrb.mxu0 %v8670_v13  ;;  %v8658_v10 = vor.u32 %v10500_v11, %v8655_v37  ;;  %v10496_v14 = vld [vmem:[%s16337_s6 + $0x4c] sm:$0xf]  ;;  %v8639_v44 = vld [vmem:[%s16337_s6 + $0x58] sm:$0xf0] }
 0x3c0   :  { %v3551_v21 = vmul.f32 0.5, %v3492_v8 }
 0x3c1   :  { %4306 = vmatpush.bf16.msrb.mxu2 %v8690_v56 }
 0x3c2   :  { %10920 = vtanh.f32 %v3551_v21  ;;  %v3785_v35 = vpop.f32.mrf.mxu1  ;;  %v10919_v52 = vpop.eup %10918  ;;  %v8642_v21 = vor.u32 %v10496_v14, %v8639_v44  ;;  %v10579_v14 = vld [vmem:[%s16334_s4 + $0xe4] sm:$0xf]  ;;  %v8975_v44 = vld [vmem:[%s16334_s4 + $0xf8] sm:$0xf0] }
 0x3c3   :  { %v3480_v49 = vpop.f32.mrf.mxu2  ;;  %4282 = vmatpush.bf16.msrb.mxu0 %v8654_v45  ;;  %v3816_v7 = vadd.f32 %v3785_v35, %v11813_v4  ;;  %v10492_v4 = vld [vmem:[%s16337_s6 + $0x2c] sm:$0xf]  ;;  %v8623_v35 = vld [vmem:[%s16337_s6 + $0x38] sm:$0xf0] }
 0x3c4   :  { %v8626_v36 = vor.u32 %v10492_v4, %v8623_v35  ;;  %v8607_v45 = vld [vmem:[%s16337_s6 + $0x18] sm:$0xf0] }
 0x3c5   :  { %v3504_v19 = vpop.f32.mrf.mxu0  ;;  %4307 = vmatpush.bf16.msrb.mxu2 %v8674_v31  ;;  %v3823_v49 = vmul.f32 0.5, %v3816_v7  ;;  %v8610_v37 = vor.u32 %v10488_v53, %v8607_v45 }
 0x3c6   :  { %v3505_v25 = vadd.f32 %v3504_v19, %v12510_v38 }
 0x3c7   :  { %4283 = vmatpush.bf16.msrb.mxu0 %v8638_v42 }
 0x3c8   :  { %v10921_v51 = vpop.eup %10920  ;;  %v3518_v5 = vadd.f32 %v14253_v54, %v3505_v25  ;;  %v3549_v54 = vmul.f32 0.5, %v10919_v52  ;;  %v8605_v25 = vld [vmem:[%s16337_s6 + $0x8] sm:$0xf] }
 0x3c9   :  { %v3553_v61 = vmul.f32 0.5, %v10921_v51  ;;  %v3811_v63 = vpop.f32.mrf.mxu3  ;;  %4308 = vmatpush.bf16.msrb.mxu2 %v8658_v10  ;;  %v8606_v52 = vor.u32 %v10490_v32, %v8605_v25  ;;  %v8943_v25 = vld [vmem:[%s16334_s4 + $0xb8] sm:$0xf0] }
 0x3ca   :  { %10922 = vtanh.f32 %v3518_v5  ;;  %v3787_v8 = vpop.f32.mrf.mxu1  ;;  %v3550_v26 = vadd.f32 0.5, %v3549_v54  ;;  %v3818_v12 = vadd.f32 %v3811_v63, %v11876_v57  ;;  %v8967_v54 = vld [vmem:[%s16334_s4 + $0xf0] sm:$0xf0] }
 0x3cb   :  { %v3530_v41 = vpop.f32.mrf.mxu2  ;;  %v3554_v56 = vadd.f32 0.5, %v3553_v61  ;;  %4284 = vmatpush.bf16.msrb.mxu0 %v8622_v47  ;;  %v10576_v47 = vld [vmem:[%s16334_s4 + $0xcc] sm:$0xf] }
 0x3cc   :  { %v3531_v48 = vadd.f32 %v3530_v41, %v12539_v28 }
 0x3cd   :  { %v3506_v0 = vpop.f32.mrf.mxu0  ;;  %4309 = vmatpush.bf16.msrb.mxu2 %v8642_v21  ;;  %v3560_v46 = vmul.f32 %v3554_v56, %v13815_v15  ;;  %v3828_v56 = vmul.f32 0.5, %v3818_v12 }
 0x3ce   :  { %v3544_v20 = vadd.f32 %v14298_v59, %v3531_v48  ;;  %v8970_v0 = vor.u32 %v10579_v14, %v8967_v54  ;;  %v10563_v14 = vld [vmem:[%s16334_s4 + $0x64] sm:$0xf]  ;;  %v8903_v54 = vld [vmem:[%s16334_s4 + $0x70] sm:$0xf0] }
 0x3cf   :  { %4285 = vmatpush.bf16.msrb.mxu0 %v8606_v52 }
 0x3d0   :  { %v10923_v59 = vpop.eup %10922  ;;  %v3556_v13 = vmul.f32 0.5, %v3544_v20 }
 0x3d1   :  { %v3561_v31 = vmul.f32 %v10923_v59, %v3550_v26  ;;  %v3813_v19 = vpop.f32.mrf.mxu3  ;;  %4310 = vmatpush.bf16.msrb.mxu2 %v8626_v36  ;;  %v8951_v26 = vld [vmem:[%s16334_s4 + $0xd0] sm:$0xf0]  ;;  %v10571_v36 = vld [vmem:[%s16334_s4 + $0xa4] sm:$0xf] }
 0x3d2   :  { %10924 = vtanh.f32 %v3556_v13  ;;  %v10572_v19 = vld [vmem:[%s16334_s4 + $0xac] sm:$0xf] }
 0x3d3   :  { %v14432_v11 = vadd.f32 %v3561_v31, %v3560_v46  ;;  %v3532_v15 = vpop.f32.mrf.mxu2  ;;  %10926 = vtanh.f32 %v3823_v49  ;;  %v8954_v49 = vor.u32 %v10575_v55, %v8951_v26  ;;  %v8935_v46 = vld [vmem:[%s16334_s4 + $0xb0] sm:$0xf0]  ;;  %v10560_v26 = vld [vmem:[%s16334_s4 + $0x4c] sm:$0xf] }
 0x3d4   :  { %v8938_v15 = vor.u32 %v10571_v36, %v8935_v46  ;;  %v8887_v55 = vld [vmem:[%s16334_s4 + $0x50] sm:$0xf0] }
 0x3d5   :  { %10928 = vtanh.f32 %v14432_v11  ;;  %v3772_v51 = vpop.f32.mrf.mxu0  ;;  %4311 = vmatpush.bf16.msrb.mxu2 %v8610_v37  ;;  %v8946_v37 = vor.u32 %v10572_v19, %v8943_v25  ;;  %v10555_v19 = vld [vmem:[%s16334_s4 + $0x24] sm:$0xf]  ;;  %v8871_v25 = vld [vmem:[%s16334_s4 + $0x30] sm:$0xf0] }
 0x3d6   :  { %v3815_v5 = vadd.f32 %v3772_v51, %v11800_v62  ;;  %v10580_v62 = vld [vmem:[%s16334_s4 + $0xec] sm:$0xf]  ;;  %v10567_v51 = vld [vmem:[%s16334_s4 + $0x84] sm:$0xf] }
 0x3d7   :  { %v8978_v20 = vor.u32 %v10580_v62, %v8975_v44  ;;  %v8911_v62 = vld [vmem:[%s16334_s4 + $0x78] sm:$0xf0]  ;;  %v8906_v44 = vor.u32 %v10563_v14, %v8903_v54 }
 0x3d8   :  { %v10925_v10 = vpop.eup %10924  ;;  %v3819_v61 = vmul.f32 0.5, %v3815_v5  ;;  %v8919_v5 = vld [vmem:[%s16334_s4 + $0x90] sm:$0xf0]  ;;  %v8863_v14 = vld [vmem:[%s16334_s4 + $0x18] sm:$0xf0] }
 0x3d9   :  { %v3558_v8 = vmul.f32 0.5, %v10925_v10  ;;  %v10927_v16 = vpop.eup %10926  ;;  %v10568_v10 = vld [vmem:[%s16334_s4 + $0x8c] sm:$0xf] }
 0x3da   :  { %10930 = vtanh.f32 %v3819_v61  ;;  %v3825_v21 = vmul.f32 0.5, %v10927_v16  ;;  %v8922_v16 = vor.u32 %v10567_v51, %v8919_v5  ;;  %v8874_v51 = vor.u32 %v10555_v19, %v8871_v25  ;;  %v10558_v19 = vld [vmem:[%s16334_s4 + $0x34] sm:$0xf0] }
 0x3db   :  { %v10929_v41 = vpop.eup %10928  ;;  %v3559_v42 = vadd.f32 0.5, %v3558_v8 }
 0x3dc   :  { %v3798_v57 = vpop.f32.mrf.mxu2  ;;  %v3826_v59 = vadd.f32 0.5, %v3825_v21 }
 0x3dd   :  { %v3564_v63 = vmul.f32 %v10929_v41, %v3559_v42  ;;  %v3817_v7 = vadd.f32 %v3798_v57, %v11865_v43  ;;  %v3774_v48 = vpop.f32.mrf.mxu0  ;;  %v8959_v43 = vld [vmem:[%s16334_s4 + $0xd8] sm:$0xf0]  ;;  %v10564_v42 = vld [vmem:[%s16334_s4 + $0x6c] sm:$0xf] }
 0x3de   :  { %v8962_v13 = vor.u32 %v10576_v47, %v8959_v43  ;;  %v3832_v52 = vmul.f32 %v3826_v59, %v13876_v3  ;;  %v8927_v3 = vld [vmem:[%s16334_s4 + $0x98] sm:$0xf0]  ;;  %v8914_v57 = vor.u32 %v10564_v42, %v8911_v62  ;;  %v8973_v48 = vld [vmem:[%s16334_s4 + $0xe8] sm:$0xf]  ;;  %v8949_v59 = vld [vmem:[%s16334_s4 + $0xc0] sm:$0xf] }
 0x3df   :  { %v3841_v17 = vpack.c.bf16 %v3564_v63, %v3564_v63  ;;  %10932 = vtanh.f32 %v3817_v7  ;;  %v8930_v12 = vor.u32 %v10568_v10, %v8927_v3  ;;  %v8965_v63 = vld [vmem:[%s16334_s4 + $0xe0] sm:$0xf]  ;;  %v10581_v7 = vld [vmem:[%s16334_s4 + $0xec] sm:$0xf0]  ;;  %v8895_v47 = vld [vmem:[%s16334_s4 + $0x58] sm:$0xf0] }
 0x3e0   :  { %v10931_v4 = vpop.eup %10930  ;;  %10934 = vtanh.f32 %v3828_v56  ;;  %v10582_v56 = vld [vmem:[%s16334_s4 + $0xf4] sm:$0xf0]  ;;  %v8898_v46 = vor.u32 %v10560_v26, %v8895_v47  ;;  %v8941_v10 = vld [vmem:[%s16334_s4 + $0xa8] sm:$0xf] }
 0x3e1   :  { %v3821_v35 = vmul.f32 0.5, %v10931_v4  ;;  %4247 = vmatmul.bf16.vlgmr.msra.gmra.mxu1 %v3841_v17  ;;  %4273 = vmatmul.bf16.vlgmr.msra.gmra.mxu3 %v3841_v17  ;;  %v8966_v4 = vor.u32 %v10581_v7, %v8965_v63  ;;  %v10574_v3 = vld [vmem:[%s16334_s4 + $0xb4] sm:$0xf0]  ;;  %v8925_v63 = vld [vmem:[%s16334_s4 + $0x88] sm:$0xf] }
 0x3e2   :  { %4559 = vmatpush.bf16.msra.mxu1 %v8970_v0  ;;  %4585 = vmatpush.bf16.msra.mxu3 %v8978_v20  ;;  %v10559_v0 = vld [vmem:[%s16334_s4 + $0x44] sm:$0xf]  ;;  %v10570_v7 = vld [vmem:[%s16334_s4 + $0x94] sm:$0xf0] }
 0x3e3   :  { %v3822_v31 = vadd.f32 0.5, %v3821_v35  ;;  %v8974_v35 = vor.u32 %v10582_v56, %v8973_v48  ;;  %v8890_v36 = vor.u32 %v10559_v0, %v8887_v55  ;;  %v8901_v56 = vld [vmem:[%s16334_s4 + $0x60] sm:$0xf]  ;;  %v10565_v0 = vld [vmem:[%s16334_s4 + $0x6c] sm:$0xf0] }
 0x3e4   :  { %v3800_v32 = vpop.f32.mrf.mxu2  ;;  %v10566_v55 = vld [vmem:[%s16334_s4 + $0x74] sm:$0xf0]  ;;  %v8902_v26 = vor.u32 %v10565_v0, %v8901_v56  ;;  %v9173_v56 = vld [vmem:[%s16337_s6 + $0x180] sm:$0xf]  ;;  %v10633_v0 = vld [vmem:[%s16337_s6 + $0x18c] sm:$0xf0] }
 0x3e5   :  { %v10933_v53 = vpop.eup %10932  ;;  %v10556_v32 = vld [vmem:[%s16334_s4 + $0x2c] sm:$0xf] }
 0x3e6   :  { %v3833_v45 = vmul.f32 %v10933_v53, %v3822_v31  ;;  %4560 = vmatpush.bf16.msra.mxu1 %v8954_v49  ;;  %4586 = vmatpush.bf16.msra.mxu3 %v8962_v13  ;;  %v10935_v61 = vpop.eup %10934  ;;  %v10577_v49 = vld [vmem:[%s16334_s4 + $0xcc] sm:$0xf0]  ;;  %v10578_v31 = vld [vmem:[%s16334_s4 + $0xd4] sm:$0xf0]  ;;  %v8879_v53 = vld [vmem:[%s16334_s4 + $0x38] sm:$0xf0] }
 0x3e7   :  { %v3830_v41 = vmul.f32 0.5, %v10935_v61  ;;  %v8882_v5 = vor.u32 %v10556_v32, %v8879_v53  ;;  %v10551_v61 = vld [vmem:[%s16334_s4 + $0x4] sm:$0xf]  ;;  %v8853_v53 = vld [vmem:[%s16334_s4] sm:$0xf] }
 0x3e8   :  { %v14490_v8 = vadd.f32 %v3833_v45, %v3832_v52  ;;  %v8933_v45 = vld [vmem:[%s16334_s4 + $0xa0] sm:$0xf] }
 0x3e9   :  { %v3831_v21 = vadd.f32 0.5, %v3830_v41  ;;  %v8942_v41 = vor.u32 %v10574_v3, %v8941_v10  ;;  %v10645_v10 = vld [vmem:[%s16337_s6 + $0x1ec] sm:$0xf0]  ;;  %v10643_v3 = vld [vmem:[%s16337_s6 + $0x1e4] sm:$0xf] }
 0x3ea   :  { %10936 = vtanh.f32 %v14490_v8  ;;  %4561 = vmatpush.bf16.msra.mxu1 %v8938_v15  ;;  %4587 = vmatpush.bf16.msra.mxu3 %v8946_v37  ;;  %v8950_v15 = vor.u32 %v10577_v49, %v8949_v59  ;;  %v10573_v37 = vld [vmem:[%s16334_s4 + $0xac] sm:$0xf0]  ;;  %v10562_v59 = vld [vmem:[%s16334_s4 + $0x54] sm:$0xf0] }
 0x3eb   :  { %v8934_v54 = vor.u32 %v10573_v37, %v8933_v45  ;;  %v10554_v45 = vld [vmem:[%s16334_s4 + $0x14] sm:$0xf0] }
 0x3ee   :  { %4562 = vmatpush.bf16.msra.mxu1 %v8922_v16  ;;  %4588 = vmatpush.bf16.msra.mxu3 %v8930_v12  ;;  %v8855_v16 = vld [vmem:[%s16334_s4 + $0x10] sm:$0xf0]  ;;  %v10552_v12 = vld [vmem:[%s16334_s4 + $0xc] sm:$0xf] }
 0x3ef   :  { %v8858_v42 = vor.u32 %v10551_v61, %v8855_v16  ;;  %v8866_v62 = vor.u32 %v10552_v12, %v8863_v14  ;;  %v9223_v16 = vld [vmem:[%s16337_s6 + $0x1f0] sm:$0xf0]  ;;  %v10641_v14 = vld [vmem:[%s16337_s6 + $0x1cc] sm:$0xf0] }
 0x3f0   :  { %v10937_v20 = vpop.eup %10936  ;;  %v9226_v12 = vor.u32 %v10643_v3, %v9223_v16  ;;  %v10607_v3 = vld [vmem:[%s16337_s6 + $0xc4] sm:$0xf]  ;;  %v9079_v16 = vld [vmem:[%s16337_s6 + $0xd0] sm:$0xf0] }
 0x3f1   :  { %v3836_v43 = vmul.f32 %v10937_v20, %v3831_v21  ;;  %4299 = vmatmul.bf16.vlgmr.msrb.gmra.mxu1 %v3841_v17  ;;  %4325 = vmatmul.bf16.vlgmr.msrb.gmra.mxu3 %v3841_v17  ;;  %v8957_v17 = vld [vmem:[%s16334_s4 + $0xc8] sm:$0xf]  ;;  %v8926_v21 = vor.u32 %v10570_v7, %v8925_v63  ;;  %v10635_v63 = vld [vmem:[%s16337_s6 + $0x1a4] sm:$0xf] }
 0x3f2   :  { %4563 = vmatpush.bf16.msra.mxu1 %v8906_v44  ;;  %4589 = vmatpush.bf16.msra.mxu3 %v8914_v57  ;;  %v8958_v52 = vor.u32 %v10578_v31, %v8957_v17  ;;  %v8917_v44 = vld [vmem:[%s16334_s4 + $0x80] sm:$0xf]  ;;  %v10569_v57 = vld [vmem:[%s16334_s4 + $0x8c] sm:$0xf0]  ;;  %v8909_v20 = vld [vmem:[%s16334_s4 + $0x68] sm:$0xf] }
 0x3f3   :  { %v14535_v13 = vpack.c.bf16 %v3836_v43, %v3836_v43  ;;  %v8918_v48 = vor.u32 %v10569_v57, %v8917_v44  ;;  %v8910_v47 = vor.u32 %v10566_v55, %v8909_v20  ;;  %v8885_v43 = vld [vmem:[%s16334_s4 + $0x40] sm:$0xf]  ;;  %v10557_v17 = vld [vmem:[%s16334_s4 + $0x2c] sm:$0xf0]  ;;  %v8877_v31 = vld [vmem:[%s16334_s4 + $0x28] sm:$0xf]  ;;  %v9174_v55 = vor.u32 %v10633_v0, %v9173_v56 }
 0x3f4   :  { %v8878_v32 = vor.u32 %v10558_v19, %v8877_v31  ;;  %v9189_v44 = vld [vmem:[%s16337_s6 + $0x1a0] sm:$0xf]  ;;  %v10637_v57 = vld [vmem:[%s16337_s6 + $0x1ac] sm:$0xf0]  ;;  %v10631_v20 = vld [vmem:[%s16337_s6 + $0x184] sm:$0xf] }
 0x3f5   :  { %4234 = vmatmul.bf16.vlgmr.msra.gmra.mxu0 %v14535_v13  ;;  %4260 = vmatmul.bf16.vlgmr.msra.gmra.mxu2 %v14535_v13  ;;  %v9190_v7 = vor.u32 %v10637_v57, %v9189_v44  ;;  %v10611_v31 = vld [vmem:[%s16337_s6 + $0xe4] sm:$0xf]  ;;  %v9061_v57 = vld [vmem:[%s16337_s6 + $0xa0] sm:$0xf]  ;;  %v10617_v0 = vld [vmem:[%s16337_s6 + $0x10c] sm:$0xf0] }
 0x3f6   :  { %4546 = vmatpush.bf16.msra.mxu0 %v8966_v4  ;;  %4572 = vmatpush.bf16.msra.mxu2 %v8974_v35  ;;  %v10561_v4 = vld [vmem:[%s16334_s4 + $0x4c] sm:$0xf0]  ;;  %v8893_v35 = vld [vmem:[%s16334_s4 + $0x48] sm:$0xf]  ;;  %v9109_v56 = vld [vmem:[%s16337_s6 + $0x100] sm:$0xf] }
 0x3f7   :  { %4564 = vmatpush.bf16.msra.mxu1 %v8890_v36  ;;  %4590 = vmatpush.bf16.msra.mxu3 %v8898_v46  ;;  %v8886_v49 = vor.u32 %v10561_v4, %v8885_v43  ;;  %v8894_v36 = vor.u32 %v10562_v59, %v8893_v35  ;;  %v8869_v46 = vld [vmem:[%s16334_s4 + $0x20] sm:$0xf]  ;;  %v10629_v4 = vld [vmem:[%s16337_s6 + $0x16c] sm:$0xf0]  ;;  %v10627_v35 = vld [vmem:[%s16337_s6 + $0x164] sm:$0xf] }
 0x3f8   :  { %v8870_v25 = vor.u32 %v10557_v17, %v8869_v46  ;;  %v9157_v43 = vld [vmem:[%s16337_s6 + $0x160] sm:$0xf]  ;;  %v10613_v17 = vld [vmem:[%s16337_s6 + $0xec] sm:$0xf0] }
 0x3f9   :  { %v9158_v59 = vor.u32 %v10629_v4, %v9157_v43  ;;  %v9093_v46 = vld [vmem:[%s16337_s6 + $0xe0] sm:$0xf]  ;;  %v9229_v43 = vld [vmem:[%s16337_s6 + $0x1e8] sm:$0xf] }
 0x3fa   :  { %4547 = vmatpush.bf16.msra.mxu0 %v8950_v15  ;;  %4573 = vmatpush.bf16.msra.mxu2 %v8958_v52  ;;  %v10553_v15 = vld [vmem:[%s16334_s4 + $0xc] sm:$0xf0]  ;;  %v8861_v52 = vld [vmem:[%s16334_s4 + $0x8] sm:$0xf]  ;;  %v9094_v19 = vor.u32 %v10613_v17, %v9093_v46  ;;  %v9045_v17 = vld [vmem:[%s16337_s6 + $0x80] sm:$0xf] }
 0x3fb   :  { %4565 = vmatpush.bf16.msra.mxu1 %v8874_v51  ;;  %4591 = vmatpush.bf16.msra.mxu3 %v8882_v5  ;;  %v8854_v37 = vor.u32 %v10553_v15, %v8853_v53  ;;  %v8862_v51 = vor.u32 %v10554_v45, %v8861_v52  ;;  %v9221_v5 = vld [vmem:[%s16337_s6 + $0x1e0] sm:$0xf]  ;;  %v10625_v53 = vld [vmem:[%s16337_s6 + $0x14c] sm:$0xf0]  ;;  %v10623_v45 = vld [vmem:[%s16337_s6 + $0x144] sm:$0xf] }
 0x3fc   :  { %v9222_v61 = vor.u32 %v10645_v10, %v9221_v5  ;;  %v9077_v5 = vld [vmem:[%s16337_s6 + $0xc0] sm:$0xf]  ;;  %v10609_v10 = vld [vmem:[%s16337_s6 + $0xcc] sm:$0xf0] }
 0x3fe   :  { %4548 = vmatpush.bf16.msra.mxu0 %v8934_v54  ;;  %4574 = vmatpush.bf16.msra.mxu2 %v8942_v41  ;;  %v10639_v54 = vld [vmem:[%s16337_s6 + $0x1c4] sm:$0xf] }
 0x3ff   :  { %4566 = vmatpush.bf16.msra.mxu1 %v8858_v42  ;;  %4592 = vmatpush.bf16.msra.mxu3 %v8866_v62  ;;  %v9207_v42 = vld [vmem:[%s16337_s6 + $0x1d0] sm:$0xf0] }
 0x400   :  { %v9210_v62 = vor.u32 %v10639_v54, %v9207_v42  ;;  %v9127_v42 = vld [vmem:[%s16337_s6 + $0x130] sm:$0xf0] }
 0x402   :  { %4549 = vmatpush.bf16.msra.mxu0 %v8918_v48  ;;  %4567 = vmatmul.bf16.vlgmr.msra.gmra.mxu1 %v14535_v13  ;;  %v9191_v48 = vld [vmem:[%s16337_s6 + $0x1b0] sm:$0xf0] }
 0x403   :  { %4575 = vmatpush.bf16.msra.mxu2 %v8926_v21  ;;  %4593 = vmatmul.bf16.vlgmr.msra.gmra.mxu3 %v14535_v13  ;;  %v9194_v21 = vor.u32 %v10635_v63, %v9191_v48  ;;  %v10605_v63 = vld [vmem:[%s16337_s6 + $0xac] sm:$0xf0] }
 0x404   :  { %5022 = vmatpush.bf16.msrb.mxu1 %v9222_v61  ;;  %5048 = vmatpush.bf16.msrb.mxu3 %v9226_v12  ;;  %v9078_v61 = vor.u32 %v10609_v10, %v9077_v5  ;;  %v9125_v12 = vld [vmem:[%s16337_s6 + $0x120] sm:$0xf]  ;;  %v9062_v48 = vor.u32 %v10605_v63, %v9061_v57  ;;  %v9215_v5 = vld [vmem:[%s16337_s6 + $0x1d8] sm:$0xf0] }
 0x405   :  { %4286 = vmatmul.bf16.vlgmr.msrb.gmra.mxu0 %v14535_v13  ;;  %4312 = vmatmul.bf16.vlgmr.msrb.gmra.mxu2 %v14535_v13  ;;  %v9199_v63 = vld [vmem:[%s16337_s6 + $0x1b8] sm:$0xf0] }
 0x406   :  { %4550 = vmatpush.bf16.msra.mxu0 %v8902_v26  ;;  %v9175_v26 = vld [vmem:[%s16337_s6 + $0x190] sm:$0xf0] }
 0x407   :  { %4576 = vmatpush.bf16.msra.mxu2 %v8910_v47  ;;  %v9178_v47 = vor.u32 %v10631_v20, %v9175_v26  ;;  %v10615_v26 = vld [vmem:[%s16337_s6 + $0x104] sm:$0xf] }
 0x408   :  { %5049 = vmatpush.bf16.msrb.mxu3 %v9210_v62 }
 0x40a   :  { %4551 = vmatpush.bf16.msra.mxu0 %v8886_v49  ;;  %v9159_v49 = vld [vmem:[%s16337_s6 + $0x170] sm:$0xf0] }
 0x40b   :  { %4577 = vmatpush.bf16.msra.mxu2 %v8894_v36  ;;  %v9162_v36 = vor.u32 %v10627_v35, %v9159_v49  ;;  %v10646_v35 = vld [vmem:[%s16337_s6 + $0x1f4] sm:$0xf0]  ;;  %v9231_v49 = vld [vmem:[%s16337_s6 + $0x1f8] sm:$0xf0] }
 0x40c   :  { %5050 = vmatpush.bf16.msrb.mxu3 %v9194_v21  ;;  %v9063_v21 = vld [vmem:[%s16337_s6 + $0xb0] sm:$0xf0] }
 0x40e   :  { %4552 = vmatpush.bf16.msra.mxu0 %v8870_v25  ;;  %v9095_v25 = vld [vmem:[%s16337_s6 + $0xf0] sm:$0xf0] }
 0x40f   :  { %4578 = vmatpush.bf16.msra.mxu2 %v8878_v32  ;;  %v9141_v32 = vld [vmem:[%s16337_s6 + $0x140] sm:$0xf]  ;;  %v9098_v15 = vor.u32 %v10611_v31, %v9095_v25  ;;  %v10601_v31 = vld [vmem:[%s16337_s6 + $0x8c] sm:$0xf0] }
 0x410   :  { %5051 = vmatpush.bf16.msrb.mxu3 %v9178_v47  ;;  %v9142_v52 = vor.u32 %v10625_v53, %v9141_v32  ;;  %v9111_v47 = vld [vmem:[%s16337_s6 + $0x110] sm:$0xf0]  ;;  %v9046_v25 = vor.u32 %v10601_v31, %v9045_v17  ;;  %v10589_v17 = vld [vmem:[%s16337_s6 + $0x2c] sm:$0xf0]  ;;  %v10587_v31 = vld [vmem:[%s16337_s6 + $0x24] sm:$0xf] }
 0x411   :  { %v9114_v4 = vor.u32 %v10615_v26, %v9111_v47  ;;  %v9047_v32 = vld [vmem:[%s16337_s6 + $0x90] sm:$0xf0]  ;;  %v9181_v47 = vld [vmem:[%s16337_s6 + $0x188] sm:$0xf] }
 0x412   :  { %4553 = vmatpush.bf16.msra.mxu0 %v8854_v37  ;;  %v9143_v37 = vld [vmem:[%s16337_s6 + $0x150] sm:$0xf0] }
 0x413   :  { %4579 = vmatpush.bf16.msra.mxu2 %v8862_v51  ;;  %v9146_v51 = vor.u32 %v10623_v45, %v9143_v37  ;;  %v10642_v45 = vld [vmem:[%s16337_s6 + $0x1d4] sm:$0xf0]  ;;  %v10640_v37 = vld [vmem:[%s16337_s6 + $0x1cc] sm:$0xf] }
 0x414   :  { %5052 = vmatpush.bf16.msrb.mxu3 %v9162_v36  ;;  %v9230_v36 = vor.u32 %v10646_v35, %v9229_v43  ;;  %v10634_v43 = vld [vmem:[%s16337_s6 + $0x194] sm:$0xf0] }
 0x415   :  { %4554 = vmatmul.bf16.vlgmr.msra.gmra.mxu0 %v14535_v13  ;;  %v9182_v35 = vor.u32 %v10634_v43, %v9181_v47 }
 0x416   :  { %4580 = vmatmul.bf16.vlgmr.msra.gmra.mxu2 %v14535_v13  ;;  %v9205_v13 = vld [vmem:[%s16337_s6 + $0x1c0] sm:$0xf]  ;;  %5009 = vmatpush.bf16.msrb.mxu0 %v9094_v19  ;;  %v10599_v19 = vld [vmem:[%s16337_s6 + $0x84] sm:$0xf] }
 0x417   :  { %v9206_v41 = vor.u32 %v10641_v14, %v9205_v13  ;;  %5035 = vmatpush.bf16.msrb.mxu2 %v9098_v15  ;;  %v10621_v13 = vld [vmem:[%s16337_s6 + $0x12c] sm:$0xf0]  ;;  %v9082_v14 = vor.u32 %v10607_v3, %v9079_v16  ;;  %v9050_v15 = vor.u32 %v10599_v19, %v9047_v32  ;;  %v9218_v3 = vor.u32 %v10640_v37, %v9215_v5 }
 0x418   :  { %5053 = vmatpush.bf16.msrb.mxu3 %v9146_v51  ;;  %v9126_v54 = vor.u32 %v10621_v13, %v9125_v12  ;;  %v10597_v16 = vld [vmem:[%s16337_s6 + $0x6c] sm:$0xf0]  ;;  %v10595_v12 = vld [vmem:[%s16337_s6 + $0x64] sm:$0xf] }
 0x419   :  { %5023 = vmatpush.bf16.msrb.mxu1 %v9206_v41  ;;  %v10619_v41 = vld [vmem:[%s16337_s6 + $0x124] sm:$0xf] }
 0x41a   :  { %5010 = vmatpush.bf16.msrb.mxu0 %v9078_v61  ;;  %v9130_v62 = vor.u32 %v10619_v41, %v9127_v42  ;;  %v9029_v61 = vld [vmem:[%s16337_s6 + $0x60] sm:$0xf]  ;;  %v9197_v41 = vld [vmem:[%s16337_s6 + $0x1a8] sm:$0xf]  ;;  %v10638_v42 = vld [vmem:[%s16337_s6 + $0x1b4] sm:$0xf0] }
 0x41b   :  { %5036 = vmatpush.bf16.msrb.mxu2 %v9082_v14  ;;  %v9030_v13 = vor.u32 %v10597_v16, %v9029_v61  ;;  %v9031_v14 = vld [vmem:[%s16337_s6 + $0x70] sm:$0xf0]  ;;  %v9198_v57 = vor.u32 %v10638_v42, %v9197_v41  ;;  %v10585_v61 = vld [vmem:[%s16337_s6 + $0xc] sm:$0xf0]  ;;  %v10583_v16 = vld [vmem:[%s16337_s6 + $0x4] sm:$0xf] }
 0x41c   :  { %5054 = vmatpush.bf16.msrb.mxu3 %v9130_v62  ;;  %v10636_v62 = vld [vmem:[%s16337_s6 + $0x1ac] sm:$0xf]  ;;  %v10614_v41 = vld [vmem:[%s16337_s6 + $0xf4] sm:$0xf0] }
 0x41d   :  { %5024 = vmatpush.bf16.msrb.mxu1 %v9190_v7  ;;  %v10603_v7 = vld [vmem:[%s16337_s6 + $0xa4] sm:$0xf] }
 0x41e   :  { %v9066_v20 = vor.u32 %v10603_v7, %v9063_v21  ;;  %5011 = vmatpush.bf16.msrb.mxu0 %v9062_v48  ;;  %v9202_v7 = vor.u32 %v10636_v62, %v9199_v63  ;;  %v9013_v48 = vld [vmem:[%s16337_s6 + $0x40] sm:$0xf]  ;;  %v10593_v21 = vld [vmem:[%s16337_s6 + $0x4c] sm:$0xf0]  ;;  %v10612_v63 = vld [vmem:[%s16337_s6 + $0xec] sm:$0xf] }
 0x420   :  { %5037 = vmatpush.bf16.msrb.mxu2 %v9066_v20  ;;  %5055 = vmatpush.bf16.msrb.mxu3 %v9114_v4  ;;  %v9015_v20 = vld [vmem:[%s16337_s6 + $0x50] sm:$0xf0]  ;;  %v10632_v4 = vld [vmem:[%s16337_s6 + $0x18c] sm:$0xf] }
 0x421   :  { %5025 = vmatpush.bf16.msrb.mxu1 %v9174_v55  ;;  %v9110_v55 = vor.u32 %v10617_v0, %v9109_v56  ;;  %v10591_v56 = vld [vmem:[%s16337_s6 + $0x44] sm:$0xf]  ;;  %v9014_v0 = vor.u32 %v10593_v21, %v9013_v48  ;;  %v9149_v48 = vld [vmem:[%s16337_s6 + $0x148] sm:$0xf] }
 0x422   :  { %5012 = vmatpush.bf16.msrb.mxu0 %v9046_v25  ;;  %v9018_v26 = vor.u32 %v10591_v56, %v9015_v20  ;;  %v8999_v25 = vld [vmem:[%s16337_s6 + $0x30] sm:$0xf0]  ;;  %v10626_v56 = vld [vmem:[%s16337_s6 + $0x154] sm:$0xf0]  ;;  %v9151_v20 = vld [vmem:[%s16337_s6 + $0x158] sm:$0xf0] }
 0x423   :  { %v9002_v32 = vor.u32 %v10587_v31, %v8999_v25  ;;  %v9150_v47 = vor.u32 %v10626_v56, %v9149_v48  ;;  %v10622_v25 = vld [vmem:[%s16337_s6 + $0x134] sm:$0xf0] }
 0x424   :  { %5038 = vmatpush.bf16.msrb.mxu2 %v9050_v15  ;;  %v9165_v15 = vld [vmem:[%s16337_s6 + $0x168] sm:$0xf]  ;;  %v10602_v56 = vld [vmem:[%s16337_s6 + $0x94] sm:$0xf0] }
 0x425   :  { %5026 = vmatpush.bf16.msrb.mxu1 %v9158_v59  ;;  %v10644_v59 = vld [vmem:[%s16337_s6 + $0x1ec] sm:$0xf] }
 0x426   :  { %v9234_v46 = vor.u32 %v10644_v59, %v9231_v49  ;;  %5013 = vmatpush.bf16.msrb.mxu0 %v9030_v13  ;;  %v9183_v59 = vld [vmem:[%s16337_s6 + $0x198] sm:$0xf0] }
 0x428   :  { %5100 = vmatpush.bf16.msra.mxu3 %v9234_v46  ;;  %v8997_v46 = vld [vmem:[%s16337_s6 + $0x20] sm:$0xf] }
 0x429   :  { %5027 = vmatpush.bf16.msrb.mxu1 %v9142_v52  ;;  %v9213_v52 = vld [vmem:[%s16337_s6 + $0x1c8] sm:$0xf]  ;;  %v8998_v19 = vor.u32 %v10589_v17, %v8997_v46  ;;  %v9087_v46 = vld [vmem:[%s16337_s6 + $0xd8] sm:$0xf0] }
 0x42a   :  { %v9214_v51 = vor.u32 %v10642_v45, %v9213_v52  ;;  %5014 = vmatpush.bf16.msrb.mxu0 %v9014_v0  ;;  %v10630_v52 = vld [vmem:[%s16337_s6 + $0x174] sm:$0xf0]  ;;  %v10628_v45 = vld [vmem:[%s16337_s6 + $0x16c] sm:$0xf]  ;;  %v9133_v17 = vld [vmem:[%s16337_s6 + $0x128] sm:$0xf] }
 0x42b   :  { %v9166_v37 = vor.u32 %v10630_v52, %v9165_v15  ;;  %v10624_v0 = vld [vmem:[%s16337_s6 + $0x14c] sm:$0xf]  ;;  %v9135_v15 = vld [vmem:[%s16337_s6 + $0x138] sm:$0xf0] }
 0x42c   :  { %5101 = vmatpush.bf16.msra.mxu3 %v9218_v3  ;;  %v8981_v3 = vld [vmem:[%s16337_s6] sm:$0xf]  ;;  %v9154_v43 = vor.u32 %v10624_v0, %v9151_v20 }
 0x42d   :  { %5028 = vmatpush.bf16.msrb.mxu1 %v9126_v54  ;;  %v9034_v54 = vor.u32 %v10595_v12, %v9031_v14  ;;  %v8982_v13 = vor.u32 %v10585_v61, %v8981_v3  ;;  %v8983_v14 = vld [vmem:[%s16337_s6 + $0x10] sm:$0xf0]  ;;  %v10606_v3 = vld [vmem:[%s16337_s6 + $0xb4] sm:$0xf0]  ;;  %v10604_v61 = vld [vmem:[%s16337_s6 + $0xac] sm:$0xf] }
 0x42e   :  { %5015 = vmatpush.bf16.msrb.mxu0 %v8998_v19  ;;  %v8986_v62 = vor.u32 %v10583_v16, %v8983_v14  ;;  %v10618_v14 = vld [vmem:[%s16337_s6 + $0x114] sm:$0xf0] }
 0x42f   :  { %5039 = vmatpush.bf16.msrb.mxu2 %v9034_v54  ;;  %v9101_v54 = vld [vmem:[%s16337_s6 + $0xe8] sm:$0xf] }
 0x430   :  { %5102 = vmatpush.bf16.msra.mxu3 %v9202_v7  ;;  %v9103_v7 = vld [vmem:[%s16337_s6 + $0xf8] sm:$0xf0] }
 0x431   :  { %5029 = vmatpush.bf16.msrb.mxu1 %v9110_v55  ;;  %v9106_v21 = vor.u32 %v10612_v63, %v9103_v7  ;;  %v9119_v63 = vld [vmem:[%s16337_s6 + $0x118] sm:$0xf0] }
 0x432   :  { %5016 = vmatpush.bf16.msrb.mxu0 %v8982_v13  ;;  %v9117_v13 = vld [vmem:[%s16337_s6 + $0x108] sm:$0xf] }
 0x433   :  { %5040 = vmatpush.bf16.msrb.mxu2 %v9018_v26 }
 0x435   :  { %5074 = vmatpush.bf16.msra.mxu1 %v9230_v36  ;;  %v9186_v36 = vor.u32 %v10632_v4, %v9183_v59  ;;  %v9085_v4 = vld [vmem:[%s16337_s6 + $0xc8] sm:$0xf] }
 0x437   :  { %5103 = vmatpush.bf16.msra.mxu3 %v9186_v36  ;;  %5041 = vmatpush.bf16.msrb.mxu2 %v9002_v32  ;;  %v10620_v32 = vld [vmem:[%s16337_s6 + $0x12c] sm:$0xf] }
 0x439   :  { %5075 = vmatpush.bf16.msra.mxu1 %v9214_v51  ;;  %v9167_v51 = vld [vmem:[%s16337_s6 + $0x178] sm:$0xf0] }
 0x43b   :  { %5042 = vmatpush.bf16.msrb.mxu2 %v8986_v62  ;;  %v9118_v62 = vor.u32 %v10618_v14, %v9117_v13 }
 0x43d   :  { %5076 = vmatpush.bf16.msra.mxu1 %v9198_v57  ;;  %v9102_v57 = vor.u32 %v10614_v41, %v9101_v54 }
 0x43f   :  { %5061 = vmatpush.bf16.msra.mxu0 %v9102_v57  ;;  %5087 = vmatpush.bf16.msra.mxu2 %v9106_v21  ;;  %v10616_v57 = vld [vmem:[%s16337_s6 + $0x10c] sm:$0xf]  ;;  %v9053_v21 = vld [vmem:[%s16337_s6 + $0x88] sm:$0xf] }
 0x440   :  { %v9122_v7 = vor.u32 %v10616_v57, %v9119_v63  ;;  %v9054_v20 = vor.u32 %v10602_v56, %v9053_v21  ;;  %v10588_v63 = vld [vmem:[%s16337_s6 + $0x2c] sm:$0xf] }
 0x441   :  { %5077 = vmatpush.bf16.msra.mxu1 %v9182_v35  ;;  %v10610_v35 = vld [vmem:[%s16337_s6 + $0xd4] sm:$0xf0] }
 0x442   :  { %v9086_v36 = vor.u32 %v10610_v35, %v9085_v4  ;;  %v9037_v35 = vld [vmem:[%s16337_s6 + $0x68] sm:$0xf] }
 0x444   :  { %5062 = vmatpush.bf16.msra.mxu0 %v9086_v36  ;;  %v10596_v36 = vld [vmem:[%s16337_s6 + $0x6c] sm:$0xf] }
 0x445   :  { %5078 = vmatpush.bf16.msra.mxu1 %v9166_v37  ;;  %v9134_v37 = vor.u32 %v10622_v25, %v9133_v17  ;;  %v9039_v17 = vld [vmem:[%s16337_s6 + $0x78] sm:$0xf0] }
 0x446   :  { %v9042_v25 = vor.u32 %v10596_v36, %v9039_v17  ;;  %v291_v36 = vadd.f32 %v11867_v50, %v11651_v34  ;;  %v10675_v50 = vld [vmem:[%s16334_s4 + $0xe4] sm:$0xf] }
 0x449   :  { %5079 = vmatpush.bf16.msra.mxu1 %v9150_v47 }
 0x44d   :  { %5080 = vmatpush.bf16.msra.mxu1 %v9134_v37  ;;  %v9021_v37 = vld [vmem:[%s16337_s6 + $0x48] sm:$0xf] }
 0x451   :  { %5081 = vmatpush.bf16.msra.mxu1 %v9118_v62 }
 0x45e   :  { %v14755_v44 = vpop.f32.mrf.mxu1 }
 0x464   :  { %v14805_v53 = vpop.f32.mrf.mxu3 }
 0x466   :  { %v4250_v10 = vpop.f32.mrf.mxu1 }
 0x467   :  { %v9170_v10 = vor.u32 %v10628_v45, %v9167_v51  ;;  %v9138_v51 = vor.u32 %v10620_v32, %v9135_v15 }
 0x469   :  { %5104 = vmatpush.bf16.msra.mxu3 %v9170_v10  ;;  %v9069_v10 = vld [vmem:[%s16337_s6 + $0xa8] sm:$0xf] }
 0x46c   :  { %v4276_v55 = vpop.f32.mrf.mxu3 }
 0x46d   :  { %5105 = vmatpush.bf16.msra.mxu3 %v9154_v43 }
 0x46e   :  { %v14867_v49 = vpop.f32.mrf.mxu1 }
 0x471   :  { %5106 = vmatpush.bf16.msra.mxu3 %v9138_v51  ;;  %v10594_v51 = vld [vmem:[%s16337_s6 + $0x54] sm:$0xf0] }
 0x472   :  { %v4235_v5 = vpop.f32.mrf.mxu0 }
 0x473   :  { %v4236_v12 = vadd.f32 %v4235_v5, %v12397_v1 }
 0x474   :  { %v14912_v42 = vpop.f32.mrf.mxu3 }
 0x475   :  { %v4249_v55 = vadd.f32 %v14755_v44, %v4236_v12  ;;  %v10608_v44 = vld [vmem:[%s16337_s6 + $0xcc] sm:$0xf]  ;;  %v9070_v12 = vor.u32 %v10606_v3, %v9069_v10  ;;  %5107 = vmatpush.bf16.msra.mxu3 %v9122_v7  ;;  %v9022_v3 = vor.u32 %v10594_v51, %v9021_v37  ;;  %v9007_v7 = vld [vmem:[%s16337_s6 + $0x38] sm:$0xf0]  ;;  %v9351_v37 = vld [vmem:[%s16334_s4 + $0xf0] sm:$0xf0] }
 0x476   :  { %v4302_v26 = vpop.f32.mrf.mxu1  ;;  %v9090_v19 = vor.u32 %v10608_v44, %v9087_v46  ;;  %v9010_v56 = vor.u32 %v10588_v63, %v9007_v7 }
 0x477   :  { %v4330_v52 = vmul.f32 0.5, %v4249_v55  ;;  %5063 = vmatpush.bf16.msra.mxu0 %v9070_v12  ;;  %v10600_v55 = vld [vmem:[%s16337_s6 + $0x8c] sm:$0xf]  ;;  %v9055_v26 = vld [vmem:[%s16337_s6 + $0x98] sm:$0xf0] }
 0x478   :  { %v4261_v59 = vpop.f32.mrf.mxu2  ;;  %5088 = vmatpush.bf16.msra.mxu2 %v9090_v19  ;;  %v9058_v47 = vor.u32 %v10600_v55, %v9055_v26  ;;  %v8989_v26 = vld [vmem:[%s16337_s6 + $0x8] sm:$0xf] }
 0x479   :  { %v4262_v31 = vadd.f32 %v4261_v59, %v12412_v24  ;;  %10938 = vtanh.f32 %v4330_v52  ;;  %v10598_v59 = vld [vmem:[%s16337_s6 + $0x74] sm:$0xf0]  ;;  %v320_v52 = vadd.f32 %v11878_v58, %v11661_v40  ;;  %v9023_v58 = vld [vmem:[%s16337_s6 + $0x58] sm:$0xf0] }
 0x47a   :  { %v4237_v45 = vpop.f32.mrf.mxu0  ;;  %v9038_v46 = vor.u32 %v10598_v59, %v9037_v35  ;;  %v8991_v59 = vld [vmem:[%s16337_s6 + $0x18] sm:$0xf0] }
 0x47b   :  { %v4275_v5 = vadd.f32 %v14805_v53, %v4262_v31  ;;  %v9071_v53 = vld [vmem:[%s16337_s6 + $0xb8] sm:$0xf0]  ;;  %5064 = vmatpush.bf16.msra.mxu0 %v9054_v20 }
 0x47c   :  { %v4328_v16 = vpop.f32.mrf.mxu3  ;;  %v9074_v41 = vor.u32 %v10604_v61, %v9071_v53 }
 0x47d   :  { %v4334_v54 = vmul.f32 0.5, %v4275_v5 }
 0x47e   :  { %5089 = vmatpush.bf16.msra.mxu2 %v9074_v41  ;;  %v10590_v41 = vld [vmem:[%s16337_s6 + $0x34] sm:$0xf0] }
 0x47f   :  { %10940 = vtanh.f32 %v4334_v54  ;;  %v4568_v48 = vpop.f32.mrf.mxu1  ;;  %v10939_v44 = vpop.eup %10938  ;;  %5065 = vmatpush.bf16.msra.mxu0 %v9038_v46  ;;  %v9005_v54 = vld [vmem:[%s16337_s6 + $0x28] sm:$0xf] }
 0x480   :  { %v4263_v0 = vpop.f32.mrf.mxu2  ;;  %v4332_v5 = vmul.f32 0.5, %v10939_v44  ;;  %v4599_v61 = vadd.f32 %v4568_v48, %v320_v52  ;;  %v9006_v57 = vor.u32 %v10590_v41, %v9005_v54  ;;  %v9335_v54 = vld [vmem:[%s16334_s4 + $0xd0] sm:$0xf0]  ;;  %v10672_v41 = vld [vmem:[%s16334_s4 + $0xcc] sm:$0xf] }
 0x482   :  { %v4287_v43 = vpop.f32.mrf.mxu0  ;;  %5090 = vmatpush.bf16.msra.mxu2 %v9058_v47  ;;  %v4333_v62 = vadd.f32 0.5, %v4332_v5  ;;  %v4606_v48 = vmul.f32 0.5, %v4599_v61  ;;  %v10586_v47 = vld [vmem:[%s16337_s6 + $0x14] sm:$0xf0] }
 0x483   :  { %v4288_v4 = vadd.f32 %v4287_v43, %v12510_v38  ;;  %5066 = vmatpush.bf16.msra.mxu0 %v9022_v3  ;;  %v10584_v43 = vld [vmem:[%s16337_s6 + $0xc] sm:$0xf]  ;;  %v8990_v35 = vor.u32 %v10586_v47, %v8989_v26 }
 0x484   :  { %v8994_v44 = vor.u32 %v10584_v43, %v8991_v59 }
 0x485   :  { %v10941_v31 = vpop.eup %10940  ;;  %v4301_v19 = vadd.f32 %v14867_v49, %v4288_v4  ;;  %v10592_v49 = vld [vmem:[%s16337_s6 + $0x4c] sm:$0xf] }
 0x486   :  { %v4336_v32 = vmul.f32 0.5, %v10941_v31  ;;  %v4594_v15 = vpop.f32.mrf.mxu3  ;;  %5091 = vmatpush.bf16.msra.mxu2 %v9042_v25  ;;  %v9026_v12 = vor.u32 %v10592_v49, %v9023_v58  ;;  %v349_v49 = vadd.f32 %v11910_v22, %v11695_v60  ;;  %v10671_v22 = vld [vmem:[%s16334_s4 + $0xc4] sm:$0xf] }
 0x487   :  { %10942 = vtanh.f32 %v4301_v19  ;;  %v4570_v45 = vpop.f32.mrf.mxu1  ;;  %5067 = vmatpush.bf16.msra.mxu0 %v9006_v57  ;;  %v378_v19 = vadd.f32 %v11921_v27, %v11715_v6  ;;  %v10676_v27 = vld [vmem:[%s16334_s4 + $0xec] sm:$0xf] }
 0x488   :  { %v4313_v10 = vpop.f32.mrf.mxu2  ;;  %v4337_v53 = vadd.f32 0.5, %v4336_v32 }
 0x489   :  { %v4314_v16 = vadd.f32 %v4313_v10, %v12539_v28  ;;  %v4601_v45 = vadd.f32 %v4594_v15, %v378_v19  ;;  %v9359_v15 = vld [vmem:[%s16334_s4 + $0xf8] sm:$0xf0] }
 0x48a   :  { %v4289_v13 = vpop.f32.mrf.mxu0  ;;  %5092 = vmatpush.bf16.msra.mxu2 %v9026_v12  ;;  %v4343_v0 = vmul.f32 %v4337_v53, %v14432_v11  ;;  %v9354_v53 = vor.u32 %v10675_v50, %v9351_v37  ;;  %v10660_v50 = vld [vmem:[%s16334_s4 + $0x6c] sm:$0xf]  ;;  %v9295_v37 = vld [vmem:[%s16334_s4 + $0x78] sm:$0xf0] }
 0x48b   :  { %v4327_v14 = vadd.f32 %v14912_v42, %v4314_v16  ;;  %5068 = vmatpush.bf16.msra.mxu0 %v8990_v35  ;;  %v4611_v12 = vmul.f32 0.5, %v4601_v45  ;;  %v9362_v13 = vor.u32 %v10676_v27, %v9359_v15  ;;  %v10677_v27 = vld [vmem:[%s16334_s4 + $0xec] sm:$0xf0]  ;;  %v9357_v15 = vld [vmem:[%s16334_s4 + $0xe8] sm:$0xf] }
 0x48d   :  { %v10943_v42 = vpop.eup %10942  ;;  %v4339_v21 = vmul.f32 0.5, %v4327_v14 }
 0x48e   :  { %v4344_v20 = vmul.f32 %v10943_v42, %v4333_v62  ;;  %v4596_v55 = vpop.f32.mrf.mxu3  ;;  %5093 = vmatpush.bf16.msra.mxu2 %v9010_v56  ;;  %v9343_v62 = vld [vmem:[%s16334_s4 + $0xd8] sm:$0xf0]  ;;  %v9338_v42 = vor.u32 %v10671_v22, %v9335_v54  ;;  %v9319_v56 = vld [vmem:[%s16334_s4 + $0xb0] sm:$0xf0] }
 0x48f   :  { %10944 = vtanh.f32 %v4339_v21  ;;  %v10667_v21 = vld [vmem:[%s16334_s4 + $0xa4] sm:$0xf]  ;;  %v9327_v55 = vld [vmem:[%s16334_s4 + $0xb8] sm:$0xf0] }
 0x490   :  { %v15047_v4 = vadd.f32 %v4344_v20, %v4343_v0  ;;  %v4315_v11 = vpop.f32.mrf.mxu2  ;;  %10946 = vtanh.f32 %v4606_v48  ;;  %v9346_v48 = vor.u32 %v10672_v41, %v9343_v62  ;;  %v10668_v20 = vld [vmem:[%s16334_s4 + $0xac] sm:$0xf]  ;;  %v9322_v43 = vor.u32 %v10667_v21, %v9319_v56  ;;  %v9333_v41 = vld [vmem:[%s16334_s4 + $0xc0] sm:$0xf]  ;;  %v10673_v62 = vld [vmem:[%s16334_s4 + $0xcc] sm:$0xf0] }
 0x491   :  { %v9330_v59 = vor.u32 %v10668_v20, %v9327_v55  ;;  %v9255_v21 = vld [vmem:[%s16334_s4 + $0x30] sm:$0xf0]  ;;  %v10652_v56 = vld [vmem:[%s16334_s4 + $0x2c] sm:$0xf]  ;;  %v9334_v20 = vor.u32 %v10673_v62, %v9333_v41  ;;  %v10653_v41 = vld [vmem:[%s16334_s4 + $0x2c] sm:$0xf0] }
 0x492   :  { %10948 = vtanh.f32 %v15047_v4  ;;  %v4555_v46 = vpop.f32.mrf.mxu0  ;;  %5094 = vmatpush.bf16.msra.mxu2 %v8994_v44  ;;  %v9303_v44 = vld [vmem:[%s16334_s4 + $0x90] sm:$0xf0]  ;;  %v9261_v62 = vld [vmem:[%s16334_s4 + $0x28] sm:$0xf] }
 0x493   :  { %v4598_v17 = vadd.f32 %v4555_v46, %v291_v36  ;;  %v10663_v36 = vld [vmem:[%s16334_s4 + $0x84] sm:$0xf]  ;;  %v10664_v46 = vld [vmem:[%s16334_s4 + $0x8c] sm:$0xf] }
 0x494   :  { %v9306_v19 = vor.u32 %v10663_v36, %v9303_v44  ;;  %v10647_v36 = vld [vmem:[%s16334_s4 + $0x4] sm:$0xf]  ;;  %v9239_v44 = vld [vmem:[%s16334_s4 + $0x10] sm:$0xf0] }
 0x495   :  { %v10945_v31 = vpop.eup %10944  ;;  %v4602_v25 = vmul.f32 0.5, %v4598_v17 }
 0x496   :  { %v4341_v32 = vmul.f32 0.5, %v10945_v31  ;;  %v10947_v52 = vpop.eup %10946 }
 0x497   :  { %10950 = vtanh.f32 %v4602_v25  ;;  %v4608_v16 = vmul.f32 0.5, %v10947_v52  ;;  %v9287_v52 = vld [vmem:[%s16334_s4 + $0x70] sm:$0xf0] }
 0x498   :  { %v10949_v51 = vpop.eup %10948  ;;  %v4342_v5 = vadd.f32 0.5, %v4341_v32  ;;  %v10659_v32 = vld [vmem:[%s16334_s4 + $0x64] sm:$0xf] }
 0x499   :  { %v4581_v10 = vpop.f32.mrf.mxu2  ;;  %v4609_v7 = vadd.f32 0.5, %v4608_v16  ;;  %v9271_v16 = vld [vmem:[%s16334_s4 + $0x50] sm:$0xf0] }
 0x49a   :  { %v4347_v3 = vmul.f32 %v10949_v51, %v4342_v5  ;;  %v4600_v58 = vadd.f32 %v4581_v10, %v349_v49  ;;  %v4557_v61 = vpop.f32.mrf.mxu0  ;;  %v9290_v51 = vor.u32 %v10659_v32, %v9287_v52  ;;  %v9298_v49 = vor.u32 %v10660_v50, %v9295_v37  ;;  %v9349_v5 = vld [vmem:[%s16334_s4 + $0xe0] sm:$0xf]  ;;  %v9309_v50 = vld [vmem:[%s16334_s4 + $0x88] sm:$0xf]  ;;  %v10666_v37 = vld [vmem:[%s16334_s4 + $0x94] sm:$0xf0] }
 0x49b   :  { %v4615_v11 = vmul.f32 %v4609_v7, %v14490_v8  ;;  %v9311_v8 = vld [vmem:[%s16334_s4 + $0x98] sm:$0xf0]  ;;  %v9350_v22 = vor.u32 %v10677_v27, %v9349_v5  ;;  %v9301_v52 = vld [vmem:[%s16334_s4 + $0x80] sm:$0xf]  ;;  %v10661_v27 = vld [vmem:[%s16334_s4 + $0x6c] sm:$0xf0] }
 0x49c   :  { %v4624_v14 = vpack.c.bf16 %v4347_v3, %v4347_v3  ;;  %10952 = vtanh.f32 %v4600_v58  ;;  %v9314_v25 = vor.u32 %v10664_v46, %v9311_v8  ;;  %v10678_v3 = vld [vmem:[%s16334_s4 + $0xf4] sm:$0xf0]  ;;  %v10655_v58 = vld [vmem:[%s16334_s4 + $0x44] sm:$0xf]  ;;  %v10648_v46 = vld [vmem:[%s16334_s4 + $0xc] sm:$0xf] }
 0x49d   :  { %v10951_v57 = vpop.eup %10950  ;;  %10954 = vtanh.f32 %v4611_v12  ;;  %v10656_v12 = vld [vmem:[%s16334_s4 + $0x4c] sm:$0xf]  ;;  %v9358_v54 = vor.u32 %v10678_v3, %v9357_v15  ;;  %v9247_v8 = vld [vmem:[%s16334_s4 + $0x18] sm:$0xf0]  ;;  %v9285_v5 = vld [vmem:[%s16334_s4 + $0x60] sm:$0xf] }
 0x49e   :  { %v4604_v63 = vmul.f32 0.5, %v10951_v57  ;;  %5030 = vmatmul.bf16.vlgmr.msrb.gmra.mxu1 %v4624_v14  ;;  %5056 = vmatmul.bf16.vlgmr.msrb.gmra.mxu3 %v4624_v14  ;;  %v9250_v32 = vor.u32 %v10648_v46, %v9247_v8  ;;  %v9293_v15 = vld [vmem:[%s16334_s4 + $0x68] sm:$0xf]  ;;  %v9286_v3 = vor.u32 %v10661_v27, %v9285_v5  ;;  %v9591_v46 = vld [vmem:[%s16337_s6 + $0x1d0] sm:$0xf0] }
 0x49f   :  { %5342 = vmatpush.bf16.msrb.mxu1 %v9354_v53  ;;  %5368 = vmatpush.bf16.msrb.mxu3 %v9362_v13  ;;  %v9279_v53 = vld [vmem:[%s16334_s4 + $0x58] sm:$0xf0]  ;;  %v9559_v5 = vld [vmem:[%s16337_s6 + $0x190] sm:$0xf0] }
 0x4a0   :  { %v4605_v0 = vadd.f32 0.5, %v4604_v63  ;;  %v9274_v63 = vor.u32 %v10655_v58, %v9271_v16  ;;  %v9282_v7 = vor.u32 %v10656_v12, %v9279_v53  ;;  %v10657_v16 = vld [vmem:[%s16334_s4 + $0x4c] sm:$0xf0]  ;;  %v9277_v12 = vld [vmem:[%s16334_s4 + $0x48] sm:$0xf] }
 0x4a1   :  { %v4583_v26 = vpop.f32.mrf.mxu2  ;;  %v10658_v53 = vld [vmem:[%s16334_s4 + $0x54] sm:$0xf0] }
 0x4a2   :  { %v10953_v47 = vpop.eup %10952  ;;  %v9317_v26 = vld [vmem:[%s16334_s4 + $0xa0] sm:$0xf] }
 0x4a3   :  { %v4616_v35 = vmul.f32 %v10953_v47, %v4605_v0  ;;  %5343 = vmatpush.bf16.msrb.mxu1 %v9338_v42  ;;  %5369 = vmatpush.bf16.msrb.mxu3 %v9346_v48  ;;  %v10955_v17 = vpop.eup %10954  ;;  %v10674_v42 = vld [vmem:[%s16334_s4 + $0xd4] sm:$0xf0]  ;;  %v10651_v48 = vld [vmem:[%s16334_s4 + $0x24] sm:$0xf]  ;;  %v9263_v0 = vld [vmem:[%s16334_s4 + $0x38] sm:$0xf0] }
 0x4a4   :  { %v4613_v45 = vmul.f32 0.5, %v10955_v17  ;;  %v10669_v47 = vld [vmem:[%s16334_s4 + $0xac] sm:$0xf0] }
 0x4a5   :  { %v15108_v31 = vadd.f32 %v4616_v35, %v4615_v11  ;;  %v9266_v11 = vor.u32 %v10652_v56, %v9263_v0  ;;  %v9325_v35 = vld [vmem:[%s16334_s4 + $0xa8] sm:$0xf]  ;;  %v9318_v17 = vor.u32 %v10669_v47, %v9317_v26  ;;  %v10650_v56 = vld [vmem:[%s16334_s4 + $0x14] sm:$0xf0]  ;;  %v10741_v26 = vld [vmem:[%s16337_s6 + $0x1ec] sm:$0xf0] }
 0x4a6   :  { %v4614_v10 = vadd.f32 0.5, %v4613_v45  ;;  %v10665_v45 = vld [vmem:[%s16334_s4 + $0x8c] sm:$0xf0]  ;;  %v10739_v47 = vld [vmem:[%s16337_s6 + $0x1e4] sm:$0xf] }
 0x4a7   :  { %10956 = vtanh.f32 %v15108_v31  ;;  %5344 = vmatpush.bf16.msrb.mxu1 %v9322_v43  ;;  %5370 = vmatpush.bf16.msrb.mxu3 %v9330_v59  ;;  %v9258_v43 = vor.u32 %v10651_v48, %v9255_v21  ;;  %v10670_v59 = vld [vmem:[%s16334_s4 + $0xb4] sm:$0xf0]  ;;  %v10649_v48 = vld [vmem:[%s16334_s4 + $0xc] sm:$0xf0]  ;;  %v9245_v21 = vld [vmem:[%s16334_s4 + $0x8] sm:$0xf] }
 0x4ab   :  { %5345 = vmatpush.bf16.msrb.mxu1 %v9306_v19  ;;  %5371 = vmatpush.bf16.msrb.mxu3 %v9314_v25  ;;  %v9326_v19 = vor.u32 %v10670_v59, %v9325_v35  ;;  %v9242_v25 = vor.u32 %v10647_v36, %v9239_v44  ;;  %v10737_v59 = vld [vmem:[%s16337_s6 + $0x1cc] sm:$0xf0]  ;;  %v10735_v36 = vld [vmem:[%s16337_s6 + $0x1c4] sm:$0xf] }
 0x4ac   :  { %v9594_v8 = vor.u32 %v10735_v36, %v9591_v46  ;;  %v10701_v46 = vld [vmem:[%s16337_s6 + $0xac] sm:$0xf0] }
 0x4ad   :  { %v10957_v61 = vpop.eup %10956 }
 0x4ae   :  { %v4619_v13 = vmul.f32 %v10957_v61, %v4614_v10  ;;  %5082 = vmatmul.bf16.vlgmr.msra.gmra.mxu1 %v4624_v14  ;;  %5108 = vmatmul.bf16.vlgmr.msra.gmra.mxu3 %v4624_v14  ;;  %v9341_v14 = vld [vmem:[%s16334_s4 + $0xc8] sm:$0xf]  ;;  %v10662_v10 = vld [vmem:[%s16334_s4 + $0x74] sm:$0xf0]  ;;  %v9269_v61 = vld [vmem:[%s16334_s4 + $0x40] sm:$0xf] }
 0x4af   :  { %5346 = vmatpush.bf16.msrb.mxu1 %v9290_v51  ;;  %5372 = vmatpush.bf16.msrb.mxu3 %v9298_v49  ;;  %v9342_v55 = vor.u32 %v10674_v42, %v9341_v14  ;;  %v9302_v51 = vor.u32 %v10665_v45, %v9301_v52  ;;  %v9310_v49 = vor.u32 %v10666_v37, %v9309_v50  ;;  %v9237_v42 = vld [vmem:[%s16334_s4] sm:$0xf]  ;;  %v9575_v52 = vld [vmem:[%s16337_s6 + $0x1b0] sm:$0xf0]  ;;  %v10729_v37 = vld [vmem:[%s16337_s6 + $0x18c] sm:$0xf0] }
 0x4b0   :  { %v15153_v57 = vpack.c.bf16 %v4619_v13, %v4619_v13  ;;  %v9294_v58 = vor.u32 %v10662_v10, %v9293_v15  ;;  %v9270_v13 = vor.u32 %v10657_v16, %v9269_v61  ;;  %v9238_v0 = vor.u32 %v10649_v48, %v9237_v42  ;;  %v9557_v50 = vld [vmem:[%s16337_s6 + $0x180] sm:$0xf]  ;;  %v10725_v10 = vld [vmem:[%s16337_s6 + $0x16c] sm:$0xf0]  ;;  %v9543_v61 = vld [vmem:[%s16337_s6 + $0x170] sm:$0xf0] }
 0x4b1   :  { %v9541_v15 = vld [vmem:[%s16337_s6 + $0x160] sm:$0xf]  ;;  %v9527_v42 = vld [vmem:[%s16337_s6 + $0x150] sm:$0xf0] }
 0x4b2   :  { %5017 = vmatmul.bf16.vlgmr.msrb.gmra.mxu0 %v15153_v57  ;;  %5043 = vmatmul.bf16.vlgmr.msrb.gmra.mxu2 %v15153_v57 }
 0x4b3   :  { %5329 = vmatpush.bf16.msrb.mxu0 %v9350_v22  ;;  %5355 = vmatpush.bf16.msrb.mxu2 %v9358_v54  ;;  %v9278_v22 = vor.u32 %v10658_v53, %v9277_v12  ;;  %v9253_v54 = vld [vmem:[%s16334_s4 + $0x20] sm:$0xf]  ;;  %v10709_v53 = vld [vmem:[%s16337_s6 + $0xec] sm:$0xf0] }
 0x4b4   :  { %5347 = vmatpush.bf16.msrb.mxu1 %v9274_v63  ;;  %5373 = vmatpush.bf16.msrb.mxu3 %v9282_v7  ;;  %v10654_v63 = vld [vmem:[%s16334_s4 + $0x34] sm:$0xf0]  ;;  %v9254_v7 = vor.u32 %v10653_v41, %v9253_v54  ;;  %v9477_v12 = vld [vmem:[%s16337_s6 + $0xe0] sm:$0xf]  ;;  %v9479_v54 = vld [vmem:[%s16337_s6 + $0xf0] sm:$0xf0] }
 0x4b5   :  { %v9262_v14 = vor.u32 %v10654_v63, %v9261_v62  ;;  %v9525_v41 = vld [vmem:[%s16337_s6 + $0x140] sm:$0xf]  ;;  %v10721_v62 = vld [vmem:[%s16337_s6 + $0x14c] sm:$0xf0] }
 0x4b7   :  { %5330 = vmatpush.bf16.msrb.mxu0 %v9334_v20  ;;  %5356 = vmatpush.bf16.msrb.mxu2 %v9342_v55  ;;  %v9246_v20 = vor.u32 %v10650_v56, %v9245_v21  ;;  %v9605_v55 = vld [vmem:[%s16337_s6 + $0x1e0] sm:$0xf]  ;;  %v10705_v56 = vld [vmem:[%s16337_s6 + $0xcc] sm:$0xf0] }
 0x4b8   :  { %5348 = vmatpush.bf16.msrb.mxu1 %v9258_v43  ;;  %5374 = vmatpush.bf16.msrb.mxu3 %v9266_v11  ;;  %v9606_v43 = vor.u32 %v10741_v26, %v9605_v55  ;;  %v9607_v11 = vld [vmem:[%s16337_s6 + $0x1f0] sm:$0xf0]  ;;  %v9461_v21 = vld [vmem:[%s16337_s6 + $0xc0] sm:$0xf] }
 0x4b9   :  { %v9610_v35 = vor.u32 %v10739_v47, %v9607_v11  ;;  %v9463_v55 = vld [vmem:[%s16337_s6 + $0xd0] sm:$0xf0]  ;;  %v9509_v26 = vld [vmem:[%s16337_s6 + $0x120] sm:$0xf]  ;;  %v10717_v47 = vld [vmem:[%s16337_s6 + $0x12c] sm:$0xf0] }
 0x4ba   :  { %v9510_v11 = vor.u32 %v10717_v47, %v9509_v26  ;;  %v9581_v26 = vld [vmem:[%s16337_s6 + $0x1a8] sm:$0xf]  ;;  %v10734_v47 = vld [vmem:[%s16337_s6 + $0x1b4] sm:$0xf0] }
 0x4bb   :  { %5331 = vmatpush.bf16.msrb.mxu0 %v9318_v17  ;;  %5357 = vmatpush.bf16.msrb.mxu2 %v9326_v19  ;;  %v9573_v17 = vld [vmem:[%s16337_s6 + $0x1a0] sm:$0xf]  ;;  %v10733_v19 = vld [vmem:[%s16337_s6 + $0x1ac] sm:$0xf0] }
 0x4bc   :  { %5349 = vmatpush.bf16.msrb.mxu1 %v9242_v25  ;;  %5375 = vmatpush.bf16.msrb.mxu3 %v9250_v32  ;;  %v10731_v25 = vld [vmem:[%s16337_s6 + $0x1a4] sm:$0xf]  ;;  %v9574_v32 = vor.u32 %v10733_v19, %v9573_v17  ;;  %v9447_v19 = vld [vmem:[%s16337_s6 + $0xb0] sm:$0xf0] }
 0x4bd   :  { %v9578_v45 = vor.u32 %v10731_v25, %v9575_v52  ;;  %v9493_v25 = vld [vmem:[%s16337_s6 + $0x100] sm:$0xf] }
 0x4bf   :  { %5332 = vmatpush.bf16.msrb.mxu0 %v9302_v51  ;;  %5350 = vmatmul.bf16.vlgmr.msrb.gmra.mxu1 %v15153_v57  ;;  %v10727_v51 = vld [vmem:[%s16337_s6 + $0x184] sm:$0xf] }
 0x4c0   :  { %5358 = vmatpush.bf16.msrb.mxu2 %v9310_v49  ;;  %5376 = vmatmul.bf16.vlgmr.msrb.gmra.mxu3 %v15153_v57  ;;  %v9558_v49 = vor.u32 %v10729_v37, %v9557_v50  ;;  %v9562_v27 = vor.u32 %v10727_v51, %v9559_v5  ;;  %v10711_v50 = vld [vmem:[%s16337_s6 + $0x104] sm:$0xf]  ;;  %v9495_v37 = vld [vmem:[%s16337_s6 + $0x110] sm:$0xf0]  ;;  %v9613_v51 = vld [vmem:[%s16337_s6 + $0x1e8] sm:$0xf] }
 0x4c1   :  { %5805 = vmatpush.bf16.msra.mxu1 %v9606_v43  ;;  %5831 = vmatpush.bf16.msra.mxu3 %v9610_v35  ;;  %v10715_v35 = vld [vmem:[%s16337_s6 + $0x124] sm:$0xf]  ;;  %v10742_v5 = vld [vmem:[%s16337_s6 + $0x1f4] sm:$0xf0] }
 0x4c2   :  { %5069 = vmatmul.bf16.vlgmr.msra.gmra.mxu0 %v15153_v57  ;;  %5095 = vmatmul.bf16.vlgmr.msra.gmra.mxu2 %v15153_v57 }
 0x4c3   :  { %5333 = vmatpush.bf16.msrb.mxu0 %v9286_v3  ;;  %v10723_v3 = vld [vmem:[%s16337_s6 + $0x164] sm:$0xf] }
 0x4c4   :  { %5359 = vmatpush.bf16.msrb.mxu2 %v9294_v58  ;;  %v9542_v58 = vor.u32 %v10725_v10, %v9541_v15  ;;  %v9546_v16 = vor.u32 %v10723_v3, %v9543_v61  ;;  %v9615_v15 = vld [vmem:[%s16337_s6 + $0x1f8] sm:$0xf0]  ;;  %v9614_v10 = vor.u32 %v10742_v5, %v9613_v51  ;;  %v10697_v61 = vld [vmem:[%s16337_s6 + $0x8c] sm:$0xf0]  ;;  %v9381_v5 = vld [vmem:[%s16337_s6 + $0x20] sm:$0xf] }
 0x4c5   :  { %5832 = vmatpush.bf16.msra.mxu3 %v9594_v8  ;;  %v10699_v8 = vld [vmem:[%s16337_s6 + $0xa4] sm:$0xf] }
 0x4c6   :  { %v9450_v52 = vor.u32 %v10699_v8, %v9447_v19 }
 0x4c7   :  { %5334 = vmatpush.bf16.msrb.mxu0 %v9270_v13  ;;  %v10707_v13 = vld [vmem:[%s16337_s6 + $0xe4] sm:$0xf] }
 0x4c8   :  { %5360 = vmatpush.bf16.msrb.mxu2 %v9278_v22  ;;  %v9478_v22 = vor.u32 %v10709_v53, %v9477_v12  ;;  %v9482_v63 = vor.u32 %v10707_v13, %v9479_v54  ;;  %v9431_v53 = vld [vmem:[%s16337_s6 + $0x90] sm:$0xf0]  ;;  %v9597_v54 = vld [vmem:[%s16337_s6 + $0x1c8] sm:$0xf] }
 0x4c9   :  { %5833 = vmatpush.bf16.msra.mxu3 %v9578_v45 }
 0x4cb   :  { %5335 = vmatpush.bf16.msrb.mxu0 %v9254_v7  ;;  %v9526_v7 = vor.u32 %v10721_v62, %v9525_v41  ;;  %v10738_v41 = vld [vmem:[%s16337_s6 + $0x1d4] sm:$0xf0]  ;;  %v10736_v62 = vld [vmem:[%s16337_s6 + $0x1cc] sm:$0xf] }
 0x4cc   :  { %5361 = vmatpush.bf16.msrb.mxu2 %v9262_v14  ;;  %v10719_v14 = vld [vmem:[%s16337_s6 + $0x144] sm:$0xf] }
 0x4cd   :  { %5834 = vmatpush.bf16.msra.mxu3 %v9562_v27  ;;  %v9530_v48 = vor.u32 %v10719_v14, %v9527_v42  ;;  %v10740_v27 = vld [vmem:[%s16337_s6 + $0x1ec] sm:$0xf] }
 0x4ce   :  { %v9618_v3 = vor.u32 %v10740_v27, %v9615_v15  ;;  %v10685_v27 = vld [vmem:[%s16337_s6 + $0x2c] sm:$0xf0]  ;;  %v10683_v15 = vld [vmem:[%s16337_s6 + $0x24] sm:$0xf] }
 0x4cf   :  { %5336 = vmatpush.bf16.msrb.mxu0 %v9238_v0  ;;  %v10703_v0 = vld [vmem:[%s16337_s6 + $0xc4] sm:$0xf] }
 0x4d0   :  { %5362 = vmatpush.bf16.msrb.mxu2 %v9246_v20  ;;  %v9462_v20 = vor.u32 %v10705_v56, %v9461_v21  ;;  %v9466_v43 = vor.u32 %v10703_v0, %v9463_v55  ;;  %v10693_v21 = vld [vmem:[%s16337_s6 + $0x6c] sm:$0xf0]  ;;  %v10691_v56 = vld [vmem:[%s16337_s6 + $0x64] sm:$0xf] }
 0x4d1   :  { %5835 = vmatpush.bf16.msra.mxu3 %v9546_v16  ;;  %v10695_v16 = vld [vmem:[%s16337_s6 + $0x84] sm:$0xf] }
 0x4d2   :  { %5337 = vmatmul.bf16.vlgmr.msrb.gmra.mxu0 %v15153_v57 }
 0x4d3   :  { %5363 = vmatmul.bf16.vlgmr.msrb.gmra.mxu2 %v15153_v57  ;;  %v9589_v57 = vld [vmem:[%s16337_s6 + $0x1c0] sm:$0xf]  ;;  %5792 = vmatpush.bf16.msra.mxu0 %v9478_v22  ;;  %v9434_v22 = vor.u32 %v10695_v16, %v9431_v53  ;;  %v10726_v16 = vld [vmem:[%s16337_s6 + $0x174] sm:$0xf0] }
 0x4d4   :  { %v9590_v44 = vor.u32 %v10737_v59, %v9589_v57  ;;  %5818 = vmatpush.bf16.msra.mxu2 %v9482_v63  ;;  %v9511_v57 = vld [vmem:[%s16337_s6 + $0x130] sm:$0xf0]  ;;  %v9598_v63 = vor.u32 %v10738_v41, %v9597_v54 }
 0x4d5   :  { %5836 = vmatpush.bf16.msra.mxu3 %v9530_v48  ;;  %v9514_v59 = vor.u32 %v10715_v35, %v9511_v57  ;;  %v9413_v48 = vld [vmem:[%s16337_s6 + $0x60] sm:$0xf]  ;;  %v9583_v35 = vld [vmem:[%s16337_s6 + $0x1b8] sm:$0xf0] }
 0x4d6   :  { %5806 = vmatpush.bf16.msra.mxu1 %v9590_v44  ;;  %v9445_v44 = vld [vmem:[%s16337_s6 + $0xa0] sm:$0xf]  ;;  %v9414_v0 = vor.u32 %v10693_v21, %v9413_v48  ;;  %v9367_v48 = vld [vmem:[%s16337_s6 + $0x10] sm:$0xf0]  ;;  %v9485_v21 = vld [vmem:[%s16337_s6 + $0xe8] sm:$0xf] }
 0x4d7   :  { %5793 = vmatpush.bf16.msra.mxu0 %v9462_v20  ;;  %v9446_v17 = vor.u32 %v10701_v46, %v9445_v44  ;;  %v9415_v20 = vld [vmem:[%s16337_s6 + $0x70] sm:$0xf0]  ;;  %v10689_v44 = vld [vmem:[%s16337_s6 + $0x4c] sm:$0xf0]  ;;  %v10687_v46 = vld [vmem:[%s16337_s6 + $0x44] sm:$0xf] }
 0x4d8   :  { %5819 = vmatpush.bf16.msra.mxu2 %v9466_v43  ;;  %v9418_v55 = vor.u32 %v10691_v56, %v9415_v20  ;;  %v10732_v43 = vld [vmem:[%s16337_s6 + $0x1ac] sm:$0xf]  ;;  %v10710_v56 = vld [vmem:[%s16337_s6 + $0xf4] sm:$0xf0] }
 0x4d9   :  { %5837 = vmatpush.bf16.msra.mxu3 %v9514_v59  ;;  %v9586_v57 = vor.u32 %v10732_v43, %v9583_v35  ;;  %v9397_v59 = vld [vmem:[%s16337_s6 + $0x40] sm:$0xf]  ;;  %v9533_v43 = vld [vmem:[%s16337_s6 + $0x148] sm:$0xf]  ;;  %v10722_v35 = vld [vmem:[%s16337_s6 + $0x154] sm:$0xf0] }
 0x4da   :  { %5807 = vmatpush.bf16.msra.mxu1 %v9574_v32  ;;  %v10713_v32 = vld [vmem:[%s16337_s6 + $0x10c] sm:$0xf0]  ;;  %v9398_v8 = vor.u32 %v10689_v44, %v9397_v59  ;;  %v9535_v59 = vld [vmem:[%s16337_s6 + $0x158] sm:$0xf0] }
 0x4db   :  { %v9494_v45 = vor.u32 %v10713_v32, %v9493_v25  ;;  %5794 = vmatpush.bf16.msra.mxu0 %v9446_v17  ;;  %v9399_v17 = vld [vmem:[%s16337_s6 + $0x50] sm:$0xf0]  ;;  %v9565_v32 = vld [vmem:[%s16337_s6 + $0x188] sm:$0xf] }
 0x4dc   :  { %5820 = vmatpush.bf16.msra.mxu2 %v9450_v52  ;;  %v9402_v25 = vor.u32 %v10687_v46, %v9399_v17  ;;  %v10730_v52 = vld [vmem:[%s16337_s6 + $0x194] sm:$0xf0] }
 0x4de   :  { %5808 = vmatpush.bf16.msra.mxu1 %v9558_v49  ;;  %v9498_v49 = vor.u32 %v10711_v50, %v9495_v37  ;;  %v9566_v50 = vor.u32 %v10730_v52, %v9565_v32  ;;  %v9567_v37 = vld [vmem:[%s16337_s6 + $0x198] sm:$0xf0] }
 0x4e0   :  { %5838 = vmatpush.bf16.msra.mxu3 %v9498_v49  ;;  %5821 = vmatpush.bf16.msra.mxu2 %v9434_v22  ;;  %v9551_v22 = vld [vmem:[%s16337_s6 + $0x178] sm:$0xf0] }
 0x4e2   :  { %5809 = vmatpush.bf16.msra.mxu1 %v9542_v58  ;;  %v9429_v58 = vld [vmem:[%s16337_s6 + $0x80] sm:$0xf] }
 0x4e3   :  { %v9430_v12 = vor.u32 %v10697_v61, %v9429_v58  ;;  %v9549_v61 = vld [vmem:[%s16337_s6 + $0x168] sm:$0xf] }
 0x4e4   :  { %5883 = vmatpush.bf16.msrb.mxu3 %v9618_v3  ;;  %5822 = vmatpush.bf16.msra.mxu2 %v9418_v55  ;;  %v9383_v3 = vld [vmem:[%s16337_s6 + $0x30] sm:$0xf0]  ;;  %v9550_v53 = vor.u32 %v10726_v16, %v9549_v61  ;;  %v9486_v55 = vor.u32 %v10710_v56, %v9485_v21  ;;  %v9503_v21 = vld [vmem:[%s16337_s6 + $0x118] sm:$0xf0] }
 0x4e5   :  { %5795 = vmatpush.bf16.msra.mxu0 %v9430_v12  ;;  %v9386_v58 = vor.u32 %v10683_v15, %v9383_v3  ;;  %v10724_v12 = vld [vmem:[%s16337_s6 + $0x16c] sm:$0xf]  ;;  %v9519_v15 = vld [vmem:[%s16337_s6 + $0x138] sm:$0xf0] }
 0x4e6   :  { %5810 = vmatpush.bf16.msra.mxu1 %v9526_v7  ;;  %v9599_v7 = vld [vmem:[%s16337_s6 + $0x1d8] sm:$0xf0]  ;;  %v9554_v41 = vor.u32 %v10724_v12, %v9551_v22  ;;  %v9453_v12 = vld [vmem:[%s16337_s6 + $0xa8] sm:$0xf]  ;;  %v10700_v22 = vld [vmem:[%s16337_s6 + $0xac] sm:$0xf] }
 0x4e7   :  { %v9602_v42 = vor.u32 %v10736_v62, %v9599_v7  ;;  %v9365_v62 = vld [vmem:[%s16337_s6] sm:$0xf]  ;;  %v10679_v7 = vld [vmem:[%s16337_s6 + $0x4] sm:$0xf] }
 0x4e8   :  { %5823 = vmatpush.bf16.msra.mxu2 %v9402_v25  ;;  %v9370_v20 = vor.u32 %v10679_v7, %v9367_v48  ;;  %v10706_v25 = vld [vmem:[%s16337_s6 + $0xd4] sm:$0xf0]  ;;  %v10712_v48 = vld [vmem:[%s16337_s6 + $0x10c] sm:$0xf] }
 0x4e9   :  { %5884 = vmatpush.bf16.msrb.mxu3 %v9602_v42  ;;  %5796 = vmatpush.bf16.msra.mxu0 %v9414_v0  ;;  %v9506_v56 = vor.u32 %v10712_v48, %v9503_v21 }
 0x4ea   :  { %5811 = vmatpush.bf16.msra.mxu1 %v9510_v11  ;;  %v9582_v11 = vor.u32 %v10734_v47, %v9581_v26  ;;  %v10708_v26 = vld [vmem:[%s16337_s6 + $0xec] sm:$0xf]  ;;  %v9487_v47 = vld [vmem:[%s16337_s6 + $0xf8] sm:$0xf0] }
 0x4ec   :  { %5824 = vmatpush.bf16.msra.mxu2 %v9386_v58 }
 0x4ed   :  { %5885 = vmatpush.bf16.msrb.mxu3 %v9586_v57  ;;  %5797 = vmatpush.bf16.msra.mxu0 %v9398_v8  ;;  %v10720_v57 = vld [vmem:[%s16337_s6 + $0x14c] sm:$0xf]  ;;  %v9534_v8 = vor.u32 %v10722_v35, %v9533_v43  ;;  %v9439_v35 = vld [vmem:[%s16337_s6 + $0x98] sm:$0xf0] }
 0x4ee   :  { %5812 = vmatpush.bf16.msra.mxu1 %v9494_v45  ;;  %v10728_v45 = vld [vmem:[%s16337_s6 + $0x18c] sm:$0xf]  ;;  %v9538_v17 = vor.u32 %v10720_v57, %v9535_v59 }
 0x4ef   :  { %v9570_v49 = vor.u32 %v10728_v45, %v9567_v37  ;;  %v9471_v45 = vld [vmem:[%s16337_s6 + $0xd8] sm:$0xf0] }
 0x4f0   :  { %5825 = vmatpush.bf16.msra.mxu2 %v9370_v20 }
 0x4f1   :  { %5886 = vmatpush.bf16.msrb.mxu3 %v9570_v49 }
 0x4f2   :  { %5857 = vmatpush.bf16.msrb.mxu1 %v9614_v10  ;;  %v9382_v10 = vor.u32 %v10685_v27, %v9381_v5  ;;  %v10718_v5 = vld [vmem:[%s16337_s6 + $0x134] sm:$0xf0]  ;;  %v10716_v27 = vld [vmem:[%s16337_s6 + $0x12c] sm:$0xf] }
 0x4f3   :  { %v9522_v61 = vor.u32 %v10716_v27, %v9519_v15  ;;  %v10690_v27 = vld [vmem:[%s16337_s6 + $0x54] sm:$0xf0]  ;;  %v10688_v15 = vld [vmem:[%s16337_s6 + $0x4c] sm:$0xf] }
 0x4f4   :  { %5798 = vmatpush.bf16.msra.mxu0 %v9382_v10 }
 0x4f5   :  { %5887 = vmatpush.bf16.msrb.mxu3 %v9554_v41 }
 0x4f6   :  { %5858 = vmatpush.bf16.msrb.mxu1 %v9598_v63  ;;  %v10681_v63 = vld [vmem:[%s16337_s6 + $0xc] sm:$0xf0] }
 0x4f7   :  { %v9366_v42 = vor.u32 %v10681_v63, %v9365_v62  ;;  %v9501_v62 = vld [vmem:[%s16337_s6 + $0x108] sm:$0xf]  ;;  %v10714_v63 = vld [vmem:[%s16337_s6 + $0x114] sm:$0xf0] }
 0x4f9   :  { %5799 = vmatpush.bf16.msra.mxu0 %v9366_v42  ;;  %5888 = vmatpush.bf16.msrb.mxu3 %v9538_v17  ;;  %v9502_v42 = vor.u32 %v10714_v63, %v9501_v62  ;;  %v10692_v17 = vld [vmem:[%s16337_s6 + $0x6c] sm:$0xf] }
 0x4fa   :  { %5859 = vmatpush.bf16.msrb.mxu1 %v9582_v11  ;;  %v9490_v11 = vor.u32 %v10708_v26, %v9487_v47  ;;  %v10698_v26 = vld [vmem:[%s16337_s6 + $0x94] sm:$0xf0] }
 0x4fc   :  { %5870 = vmatpush.bf16.msrb.mxu2 %v9490_v11  ;;  %v10696_v11 = vld [vmem:[%s16337_s6 + $0x8c] sm:$0xf] }
 0x4fd   :  { %5844 = vmatpush.bf16.msrb.mxu0 %v9486_v55  ;;  %5889 = vmatpush.bf16.msrb.mxu3 %v9522_v61  ;;  %v9437_v55 = vld [vmem:[%s16337_s6 + $0x88] sm:$0xf]  ;;  %v9442_v57 = vor.u32 %v10696_v11, %v9439_v35  ;;  %v9375_v35 = vld [vmem:[%s16337_s6 + $0x18] sm:$0xf0] }
 0x4fe   :  { %5860 = vmatpush.bf16.msrb.mxu1 %v9566_v50  ;;  %v9517_v50 = vld [vmem:[%s16337_s6 + $0x128] sm:$0xf]  ;;  %v9438_v43 = vor.u32 %v10698_v26, %v9437_v55  ;;  %v10682_v26 = vld [vmem:[%s16337_s6 + $0x14] sm:$0xf0] }
 0x4ff   :  { %v9518_v58 = vor.u32 %v10718_v5, %v9517_v50  ;;  %v9405_v5 = vld [vmem:[%s16337_s6 + $0x48] sm:$0xf] }
 0x500   :  { %v9373_v55 = vld [vmem:[%s16337_s6 + $0x8] sm:$0xf] }
 0x501   :  { %5890 = vmatpush.bf16.msrb.mxu3 %v9506_v56  ;;  %v9374_v11 = vor.u32 %v10682_v26, %v9373_v55  ;;  %v9687_v55 = vld [vmem:[%s16334_s4 + $0x90] sm:$0xf0]  ;;  %v10760_v26 = vld [vmem:[%s16334_s4 + $0x8c] sm:$0xf] }
 0x502   :  { %5861 = vmatpush.bf16.msrb.mxu1 %v9550_v53  ;;  %v10702_v53 = vld [vmem:[%s16337_s6 + $0xb4] sm:$0xf0] }
 0x503   :  { %v9454_v41 = vor.u32 %v10702_v53, %v9453_v12 }
 0x506   :  { %5862 = vmatpush.bf16.msrb.mxu1 %v9534_v8  ;;  %v10694_v8 = vld [vmem:[%s16337_s6 + $0x74] sm:$0xf0] }
 0x50a   :  { %5863 = vmatpush.bf16.msrb.mxu1 %v9518_v58  ;;  %v9407_v58 = vld [vmem:[%s16337_s6 + $0x58] sm:$0xf0] }
 0x50b   :  { %v9410_v12 = vor.u32 %v10688_v15, %v9407_v58 }
 0x50e   :  { %5864 = vmatpush.bf16.msrb.mxu1 %v9502_v42 }
 0x51b   :  { %v15373_v36 = vpop.f32.mrf.mxu1 }
 0x521   :  { %v15423_v13 = vpop.f32.mrf.mxu3 }
 0x523   :  { %v5033_v14 = vpop.f32.mrf.mxu1 }
 0x529   :  { %v5059_v19 = vpop.f32.mrf.mxu3 }
 0x52a   :  { %v9469_v19 = vld [vmem:[%s16337_s6 + $0xc8] sm:$0xf] }
 0x52b   :  { %v15485_v51 = vpop.f32.mrf.mxu1  ;;  %v9470_v52 = vor.u32 %v10706_v25, %v9469_v19 }
 0x52d   :  { %5845 = vmatpush.bf16.msrb.mxu0 %v9470_v52 }
 0x52f   :  { %v5018_v54 = vpop.f32.mrf.mxu0 }
 0x530   :  { %v5019_v14 = vadd.f32 %v5018_v54, %v12397_v1 }
 0x531   :  { %v15530_v0 = vpop.f32.mrf.mxu3  ;;  %5846 = vmatpush.bf16.msrb.mxu0 %v9454_v41  ;;  %v9389_v41 = vld [vmem:[%s16337_s6 + $0x28] sm:$0xf] }
 0x532   :  { %v5032_v44 = vadd.f32 %v15373_v36, %v5019_v14  ;;  %v10704_v36 = vld [vmem:[%s16337_s6 + $0xcc] sm:$0xf] }
 0x533   :  { %v5085_v46 = vpop.f32.mrf.mxu1  ;;  %v9474_v49 = vor.u32 %v10704_v36, %v9471_v45 }
 0x534   :  { %v5113_v10 = vmul.f32 0.5, %v5032_v44  ;;  %v9421_v46 = vld [vmem:[%s16337_s6 + $0x68] sm:$0xf] }
 0x535   :  { %v5044_v32 = vpop.f32.mrf.mxu2  ;;  %5871 = vmatpush.bf16.msrb.mxu2 %v9474_v49  ;;  %5847 = vmatpush.bf16.msrb.mxu0 %v9438_v43  ;;  %v9422_v25 = vor.u32 %v10694_v8, %v9421_v46 }
 0x536   :  { %v5045_v37 = vadd.f32 %v5044_v32, %v12412_v24  ;;  %10958 = vtanh.f32 %v5113_v10  ;;  %v9423_v32 = vld [vmem:[%s16337_s6 + $0x78] sm:$0xf0] }
 0x537   :  { %v5020_v3 = vpop.f32.mrf.mxu0  ;;  %v9426_v45 = vor.u32 %v10692_v17, %v9423_v32  ;;  %v10771_v32 = vld [vmem:[%s16334_s4 + $0xe4] sm:$0xf] }
 0x538   :  { %v5058_v16 = vadd.f32 %v15423_v13, %v5045_v37  ;;  %v9455_v13 = vld [vmem:[%s16337_s6 + $0xb8] sm:$0xf0]  ;;  %v9406_v3 = vor.u32 %v10690_v27, %v9405_v5 }
 0x539   :  { %v5111_v54 = vpop.f32.mrf.mxu3  ;;  %v9458_v14 = vor.u32 %v10700_v22, %v9455_v13  ;;  %5848 = vmatpush.bf16.msrb.mxu0 %v9422_v25  ;;  %v10686_v13 = vld [vmem:[%s16337_s6 + $0x34] sm:$0xf0] }
 0x53a   :  { %v5117_v7 = vmul.f32 0.5, %v5058_v16  ;;  %v9390_v63 = vor.u32 %v10686_v13, %v9389_v41  ;;  %v10763_v13 = vld [vmem:[%s16334_s4 + $0xa4] sm:$0xf] }
 0x53b   :  { %5872 = vmatpush.bf16.msrb.mxu2 %v9458_v14 }
 0x53c   :  { %10960 = vtanh.f32 %v5117_v7  ;;  %v5351_v20 = vpop.f32.mrf.mxu1  ;;  %v10959_v19 = vpop.eup %10958  ;;  %v9391_v7 = vld [vmem:[%s16337_s6 + $0x38] sm:$0xf0] }
 0x53d   :  { %v5046_v47 = vpop.f32.mrf.mxu2  ;;  %v5382_v61 = vadd.f32 %v5351_v20, %v11937_v39  ;;  %5849 = vmatpush.bf16.msrb.mxu0 %v9406_v3  ;;  %v10684_v39 = vld [vmem:[%s16337_s6 + $0x2c] sm:$0xf]  ;;  %v10767_v3 = vld [vmem:[%s16334_s4 + $0xc4] sm:$0xf] }
 0x53e   :  { %v9394_v48 = vor.u32 %v10684_v39, %v9391_v7  ;;  %v10680_v47 = vld [vmem:[%s16337_s6 + $0xc] sm:$0xf]  ;;  %v9711_v7 = vld [vmem:[%s16334_s4 + $0xb8] sm:$0xf0] }
 0x53f   :  { %v5070_v59 = vpop.f32.mrf.mxu0  ;;  %5873 = vmatpush.bf16.msrb.mxu2 %v9442_v57  ;;  %v5389_v14 = vmul.f32 0.5, %v5382_v61  ;;  %v9378_v57 = vor.u32 %v10680_v47, %v9375_v35  ;;  %v9719_v61 = vld [vmem:[%s16334_s4 + $0xd0] sm:$0xf0]  ;;  %v10764_v39 = vld [vmem:[%s16334_s4 + $0xac] sm:$0xf] }
 0x540   :  { %v5071_v44 = vadd.f32 %v5070_v59, %v12510_v38 }
 0x541   :  { %5850 = vmatpush.bf16.msrb.mxu0 %v9390_v63 }
 0x542   :  { %v10961_v52 = vpop.eup %10960  ;;  %v5084_v36 = vadd.f32 %v15485_v51, %v5071_v44  ;;  %v5115_v51 = vmul.f32 0.5, %v10959_v19 }
 0x543   :  { %v5119_v50 = vmul.f32 0.5, %v10961_v52  ;;  %v5377_v37 = vpop.f32.mrf.mxu3  ;;  %5874 = vmatpush.bf16.msrb.mxu2 %v9426_v45  ;;  %v9735_v52 = vld [vmem:[%s16334_s4 + $0xf0] sm:$0xf0] }
 0x544   :  { %10962 = vtanh.f32 %v5084_v36  ;;  %v5353_v49 = vpop.f32.mrf.mxu1  ;;  %v5116_v62 = vadd.f32 0.5, %v5115_v51  ;;  %v5384_v25 = vadd.f32 %v5377_v37, %v11994_v29  ;;  %v9738_v51 = vor.u32 %v10771_v32, %v9735_v52  ;;  %v10773_v32 = vld [vmem:[%s16334_s4 + $0xec] sm:$0xf0]  ;;  %v9741_v52 = vld [vmem:[%s16334_s4 + $0xe8] sm:$0xf] }
 0x545   :  { %v5096_v10 = vpop.f32.mrf.mxu2  ;;  %v5120_v53 = vadd.f32 0.5, %v5119_v50  ;;  %5851 = vmatpush.bf16.msrb.mxu0 %v9374_v11  ;;  %v9743_v50 = vld [vmem:[%s16334_s4 + $0xf8] sm:$0xf0] }
 0x546   :  { %v5097_v16 = vadd.f32 %v5096_v10, %v12539_v28  ;;  %v5394_v15 = vmul.f32 0.5, %v5384_v25  ;;  %v9733_v25 = vld [vmem:[%s16334_s4 + $0xe0] sm:$0xf] }
 0x547   :  { %v5072_v22 = vpop.f32.mrf.mxu0  ;;  %5875 = vmatpush.bf16.msrb.mxu2 %v9410_v12  ;;  %v5126_v21 = vmul.f32 %v5120_v53, %v15047_v4 }
 0x548   :  { %v5110_v54 = vadd.f32 %v15530_v0, %v5097_v16  ;;  %v10768_v16 = vld [vmem:[%s16334_s4 + $0xcc] sm:$0xf] }
 0x54a   :  { %v10963_v0 = vpop.eup %10962  ;;  %v5122_v42 = vmul.f32 0.5, %v5110_v54  ;;  %v9722_v54 = vor.u32 %v10767_v3, %v9719_v61 }
 0x54b   :  { %v5127_v56 = vmul.f32 %v10963_v0, %v5116_v62  ;;  %v5379_v20 = vpop.f32.mrf.mxu3  ;;  %5876 = vmatpush.bf16.msrb.mxu2 %v9394_v48  ;;  %v9703_v62 = vld [vmem:[%s16334_s4 + $0xb0] sm:$0xf0] }
 0x54c   :  { %10964 = vtanh.f32 %v5122_v42  ;;  %v9706_v42 = vor.u32 %v10763_v13, %v9703_v62  ;;  %v10759_v20 = vld [vmem:[%s16334_s4 + $0x84] sm:$0xf]  ;;  %v9701_v62 = vld [vmem:[%s16334_s4 + $0xa0] sm:$0xf] }
 0x54d   :  { %v15664_v43 = vadd.f32 %v5127_v56, %v5126_v21  ;;  %v5098_v4 = vpop.f32.mrf.mxu2  ;;  %10966 = vtanh.f32 %v5389_v14  ;;  %v9714_v56 = vor.u32 %v10764_v39, %v9711_v7  ;;  %v9690_v11 = vor.u32 %v10759_v20, %v9687_v55 }
 0x54f   :  { %10968 = vtanh.f32 %v15664_v43  ;;  %v5338_v59 = vpop.f32.mrf.mxu0  ;;  %5877 = vmatpush.bf16.msrb.mxu2 %v9378_v57  ;;  %v10755_v57 = vld [vmem:[%s16334_s4 + $0x64] sm:$0xf] }
 0x550   :  { %v5381_v44 = vadd.f32 %v5338_v59, %v11933_v33  ;;  %v10772_v33 = vld [vmem:[%s16334_s4 + $0xec] sm:$0xf]  ;;  %v9671_v59 = vld [vmem:[%s16334_s4 + $0x70] sm:$0xf0] }
 0x551   :  { %v9746_v10 = vor.u32 %v10772_v33, %v9743_v50  ;;  %v10751_v33 = vld [vmem:[%s16334_s4 + $0x44] sm:$0xf] }
 0x552   :  { %v10965_v46 = vpop.eup %10964  ;;  %v5385_v8 = vmul.f32 0.5, %v5381_v44 }
 0x553   :  { %v5124_v17 = vmul.f32 0.5, %v10965_v46  ;;  %v10967_v19 = vpop.eup %10966  ;;  %v10756_v46 = vld [vmem:[%s16334_s4 + $0x6c] sm:$0xf] }
 0x554   :  { %10970 = vtanh.f32 %v5385_v8  ;;  %v5391_v27 = vmul.f32 0.5, %v10967_v19  ;;  %v9679_v8 = vld [vmem:[%s16334_s4 + $0x78] sm:$0xf0] }
 0x555   :  { %v10969_v36 = vpop.eup %10968  ;;  %v5125_v45 = vadd.f32 0.5, %v5124_v17  ;;  %v9674_v17 = vor.u32 %v10755_v57, %v9671_v59  ;;  %v9682_v19 = vor.u32 %v10756_v46, %v9679_v8  ;;  %v10762_v57 = vld [vmem:[%s16334_s4 + $0x94] sm:$0xf0]  ;;  %v9669_v46 = vld [vmem:[%s16334_s4 + $0x60] sm:$0xf] }
 0x556   :  { %v5364_v29 = vpop.f32.mrf.mxu2  ;;  %v5392_v22 = vadd.f32 0.5, %v5391_v27  ;;  %v9734_v27 = vor.u32 %v10773_v32, %v9733_v25  ;;  %v10757_v8 = vld [vmem:[%s16334_s4 + $0x6c] sm:$0xf0] }
 0x557   :  { %v5130_v37 = vmul.f32 %v10969_v36, %v5125_v45  ;;  %v5383_v49 = vadd.f32 %v5364_v29, %v11983_v18  ;;  %v5340_v5 = vpop.f32.mrf.mxu0  ;;  %v9727_v18 = vld [vmem:[%s16334_s4 + $0xd8] sm:$0xf0]  ;;  %v10774_v45 = vld [vmem:[%s16334_s4 + $0xf4] sm:$0xf0]  ;;  %v9655_v29 = vld [vmem:[%s16334_s4 + $0x50] sm:$0xf0]  ;;  %v9670_v25 = vor.u32 %v10757_v8, %v9669_v46 }
 0x558   :  { %v9730_v41 = vor.u32 %v10768_v16, %v9727_v18  ;;  %v5398_v48 = vmul.f32 %v5392_v22, %v15108_v31  ;;  %v9695_v31 = vld [vmem:[%s16334_s4 + $0x98] sm:$0xf0]  ;;  %v9658_v61 = vor.u32 %v10751_v33, %v9655_v29  ;;  %v10770_v18 = vld [vmem:[%s16334_s4 + $0xd4] sm:$0xf0]  ;;  %v10748_v22 = vld [vmem:[%s16334_s4 + $0x2c] sm:$0xf] }
 0x559   :  { %v5407_v58 = vpack.c.bf16 %v5130_v37, %v5130_v37  ;;  %10972 = vtanh.f32 %v5383_v49  ;;  %v9698_v35 = vor.u32 %v10760_v26, %v9695_v31  ;;  %v10752_v37 = vld [vmem:[%s16334_s4 + $0x4c] sm:$0xf]  ;;  %v9663_v49 = vld [vmem:[%s16334_s4 + $0x58] sm:$0xf0]  ;;  %v10754_v33 = vld [vmem:[%s16334_s4 + $0x54] sm:$0xf0] }
 0x55a   :  { %v10971_v12 = vpop.eup %10970  ;;  %10974 = vtanh.f32 %v5394_v15  ;;  %v9742_v15 = vor.u32 %v10774_v45, %v9741_v52  ;;  %v9666_v16 = vor.u32 %v10752_v37, %v9663_v49  ;;  %v9653_v52 = vld [vmem:[%s16334_s4 + $0x40] sm:$0xf]  ;;  %v9661_v45 = vld [vmem:[%s16334_s4 + $0x48] sm:$0xf]  ;;  %v10749_v49 = vld [vmem:[%s16334_s4 + $0x2c] sm:$0xf0] }
 0x55b   :  { %v5387_v53 = vmul.f32 0.5, %v10971_v12  ;;  %5813 = vmatmul.bf16.vlgmr.msra.gmra.mxu1 %v5407_v58  ;;  %5839 = vmatmul.bf16.vlgmr.msra.gmra.mxu3 %v5407_v58  ;;  %v10747_v12 = vld [vmem:[%s16334_s4 + $0x24] sm:$0xf]  ;;  %v9662_v29 = vor.u32 %v10754_v33, %v9661_v45  ;;  %v9637_v37 = vld [vmem:[%s16334_s4 + $0x20] sm:$0xf] }
 0x55c   :  { %6125 = vmatpush.bf16.msra.mxu1 %v9738_v51  ;;  %6151 = vmatpush.bf16.msra.mxu3 %v9746_v10  ;;  %v9717_v51 = vld [vmem:[%s16334_s4 + $0xc0] sm:$0xf]  ;;  %v10769_v10 = vld [vmem:[%s16334_s4 + $0xcc] sm:$0xf0]  ;;  %v10819_v8 = vld [vmem:[%s16337_s6 + $0x164] sm:$0xf] }
 0x55d   :  { %v5388_v63 = vadd.f32 0.5, %v5387_v53  ;;  %v9639_v53 = vld [vmem:[%s16334_s4 + $0x30] sm:$0xf0]  ;;  %v10821_v46 = vld [vmem:[%s16337_s6 + $0x16c] sm:$0xf0] }
 0x55e   :  { %v5366_v0 = vpop.f32.mrf.mxu2  ;;  %v9642_v39 = vor.u32 %v10747_v12, %v9639_v53  ;;  %v9989_v53 = vld [vmem:[%s16337_s6 + $0x1e0] sm:$0xf] }
 0x55f   :  { %v10973_v14 = vpop.eup %10972  ;;  %v9709_v0 = vld [vmem:[%s16334_s4 + $0xa8] sm:$0xf] }
 0x560   :  { %v5399_v21 = vmul.f32 %v10973_v14, %v5388_v63  ;;  %6126 = vmatpush.bf16.msra.mxu1 %v9722_v54  ;;  %6152 = vmatpush.bf16.msra.mxu3 %v9730_v41  ;;  %v10975_v47 = vpop.eup %10974  ;;  %v9647_v54 = vld [vmem:[%s16334_s4 + $0x38] sm:$0xf0]  ;;  %v9718_v41 = vor.u32 %v10769_v10, %v9717_v51  ;;  %v10765_v63 = vld [vmem:[%s16334_s4 + $0xac] sm:$0xf0]  ;;  %v10766_v14 = vld [vmem:[%s16334_s4 + $0xb4] sm:$0xf0] }
 0x561   :  { %v5396_v44 = vmul.f32 0.5, %v10975_v47  ;;  %v9650_v7 = vor.u32 %v10748_v22, %v9647_v54  ;;  %v9702_v20 = vor.u32 %v10765_v63, %v9701_v62  ;;  %v9710_v55 = vor.u32 %v10766_v14, %v9709_v0  ;;  %v9685_v47 = vld [vmem:[%s16334_s4 + $0x80] sm:$0xf]  ;;  %v10837_v22 = vld [vmem:[%s16337_s6 + $0x1ec] sm:$0xf0] }
 0x562   :  { %v15722_v4 = vadd.f32 %v5399_v21, %v5398_v48  ;;  %v9623_v48 = vld [vmem:[%s16334_s4 + $0x10] sm:$0xf0]  ;;  %v10744_v21 = vld [vmem:[%s16334_s4 + $0xc] sm:$0xf]  ;;  %v9621_v10 = vld [vmem:[%s16334_s4] sm:$0xf] }
 0x563   :  { %v5397_v36 = vadd.f32 0.5, %v5396_v44  ;;  %v10835_v54 = vld [vmem:[%s16337_s6 + $0x1e4] sm:$0xf]  ;;  %v10833_v63 = vld [vmem:[%s16337_s6 + $0x1cc] sm:$0xf0] }
 0x564   :  { %10976 = vtanh.f32 %v15722_v4  ;;  %6127 = vmatpush.bf16.msra.mxu1 %v9706_v42  ;;  %6153 = vmatpush.bf16.msra.mxu3 %v9714_v56  ;;  %v10743_v42 = vld [vmem:[%s16334_s4 + $0x4] sm:$0xf]  ;;  %v9631_v56 = vld [vmem:[%s16334_s4 + $0x18] sm:$0xf0]  ;;  %v9975_v0 = vld [vmem:[%s16337_s6 + $0x1d0] sm:$0xf0] }
 0x565   :  { %v9626_v26 = vor.u32 %v10743_v42, %v9623_v48  ;;  %v9634_v31 = vor.u32 %v10744_v21, %v9631_v56  ;;  %v9957_v42 = vld [vmem:[%s16337_s6 + $0x1a0] sm:$0xf]  ;;  %v10829_v48 = vld [vmem:[%s16337_s6 + $0x1ac] sm:$0xf0]  ;;  %v10827_v21 = vld [vmem:[%s16337_s6 + $0x1a4] sm:$0xf] }
 0x566   :  { %v9958_v56 = vor.u32 %v10829_v48, %v9957_v42  ;;  %v9831_v42 = vld [vmem:[%s16337_s6 + $0xb0] sm:$0xf0]  ;;  %v9877_v48 = vld [vmem:[%s16337_s6 + $0x100] sm:$0xf] }
 0x568   :  { %6128 = vmatpush.bf16.msra.mxu1 %v9690_v11  ;;  %6154 = vmatpush.bf16.msra.mxu3 %v9698_v35  ;;  %v10761_v11 = vld [vmem:[%s16334_s4 + $0x8c] sm:$0xf0]  ;;  %v9693_v35 = vld [vmem:[%s16334_s4 + $0x88] sm:$0xf] }
 0x569   :  { %v9686_v59 = vor.u32 %v10761_v11, %v9685_v47  ;;  %v9694_v44 = vor.u32 %v10762_v57, %v9693_v35  ;;  %v10823_v47 = vld [vmem:[%s16337_s6 + $0x184] sm:$0xf]  ;;  %v9943_v35 = vld [vmem:[%s16337_s6 + $0x190] sm:$0xf0] }
 0x56a   :  { %v10977_v50 = vpop.eup %10976 }
 0x56b   :  { %v5402_v5 = vmul.f32 %v10977_v50, %v5397_v36  ;;  %5865 = vmatmul.bf16.vlgmr.msrb.gmra.mxu1 %v5407_v58  ;;  %5891 = vmatmul.bf16.vlgmr.msrb.gmra.mxu3 %v5407_v58  ;;  %v9725_v58 = vld [vmem:[%s16334_s4 + $0xc8] sm:$0xf]  ;;  %v10753_v36 = vld [vmem:[%s16334_s4 + $0x4c] sm:$0xf0] }
 0x56c   :  { %6129 = vmatpush.bf16.msra.mxu1 %v9674_v17  ;;  %6155 = vmatpush.bf16.msra.mxu3 %v9682_v19  ;;  %v9726_v13 = vor.u32 %v10770_v18, %v9725_v58  ;;  %v9677_v17 = vld [vmem:[%s16334_s4 + $0x68] sm:$0xf]  ;;  %v10758_v19 = vld [vmem:[%s16334_s4 + $0x74] sm:$0xf0]  ;;  %v9654_v50 = vor.u32 %v10753_v36, %v9653_v52  ;;  %v10805_v52 = vld [vmem:[%s16337_s6 + $0xec] sm:$0xf0] }
 0x56d   :  { %v15767_v3 = vpack.c.bf16 %v5402_v5, %v5402_v5  ;;  %v9678_v32 = vor.u32 %v10758_v19, %v9677_v17  ;;  %v9645_v5 = vld [vmem:[%s16334_s4 + $0x28] sm:$0xf]  ;;  %v10746_v58 = vld [vmem:[%s16334_s4 + $0x14] sm:$0xf0]  ;;  %v9927_v19 = vld [vmem:[%s16337_s6 + $0x170] sm:$0xf0] }
 0x56e   :  { %v10803_v36 = vld [vmem:[%s16337_s6 + $0xe4] sm:$0xf] }
 0x56f   :  { %5800 = vmatmul.bf16.vlgmr.msra.gmra.mxu0 %v15767_v3  ;;  %5826 = vmatmul.bf16.vlgmr.msra.gmra.mxu2 %v15767_v3 }
 0x570   :  { %6112 = vmatpush.bf16.msra.mxu0 %v9734_v27  ;;  %6138 = vmatpush.bf16.msra.mxu2 %v9742_v15  ;;  %v10750_v27 = vld [vmem:[%s16334_s4 + $0x34] sm:$0xf0]  ;;  %v9638_v15 = vor.u32 %v10749_v49, %v9637_v37  ;;  %v10817_v37 = vld [vmem:[%s16337_s6 + $0x14c] sm:$0xf0] }
 0x571   :  { %6130 = vmatpush.bf16.msra.mxu1 %v9658_v61  ;;  %6156 = vmatpush.bf16.msra.mxu3 %v9666_v16  ;;  %v9646_v51 = vor.u32 %v10750_v27, %v9645_v5  ;;  %v10745_v61 = vld [vmem:[%s16334_s4 + $0xc] sm:$0xf0]  ;;  %v9629_v16 = vld [vmem:[%s16334_s4 + $0x8] sm:$0xf]  ;;  %v10815_v27 = vld [vmem:[%s16337_s6 + $0x144] sm:$0xf] }
 0x572   :  { %v9622_v18 = vor.u32 %v10745_v61, %v9621_v10  ;;  %v9630_v12 = vor.u32 %v10746_v58, %v9629_v16  ;;  %v9845_v61 = vld [vmem:[%s16337_s6 + $0xc0] sm:$0xf]  ;;  %v10801_v16 = vld [vmem:[%s16337_s6 + $0xcc] sm:$0xf0]  ;;  %v10799_v58 = vld [vmem:[%s16337_s6 + $0xc4] sm:$0xf] }
 0x574   :  { %6113 = vmatpush.bf16.msra.mxu0 %v9718_v41  ;;  %6139 = vmatpush.bf16.msra.mxu2 %v9726_v13  ;;  %v9990_v41 = vor.u32 %v10837_v22, %v9989_v53  ;;  %v9991_v13 = vld [vmem:[%s16337_s6 + $0x1f0] sm:$0xf0]  ;;  %v9893_v53 = vld [vmem:[%s16337_s6 + $0x120] sm:$0xf]  ;;  %v10813_v22 = vld [vmem:[%s16337_s6 + $0x12c] sm:$0xf0] }
 0x575   :  { %6131 = vmatpush.bf16.msra.mxu1 %v9642_v39  ;;  %6157 = vmatpush.bf16.msra.mxu3 %v9650_v7  ;;  %v9994_v62 = vor.u32 %v10835_v54, %v9991_v13  ;;  %v10831_v39 = vld [vmem:[%s16337_s6 + $0x1c4] sm:$0xf] }
 0x576   :  { %v9978_v14 = vor.u32 %v10831_v39, %v9975_v0  ;;  %v10811_v13 = vld [vmem:[%s16337_s6 + $0x124] sm:$0xf]  ;;  %v10797_v39 = vld [vmem:[%s16337_s6 + $0xac] sm:$0xf0] }
 0x578   :  { %6114 = vmatpush.bf16.msra.mxu0 %v9702_v20  ;;  %6140 = vmatpush.bf16.msra.mxu2 %v9710_v55  ;;  %v9959_v20 = vld [vmem:[%s16337_s6 + $0x1b0] sm:$0xf0] }
 0x579   :  { %6132 = vmatpush.bf16.msra.mxu1 %v9626_v26  ;;  %6158 = vmatpush.bf16.msra.mxu3 %v9634_v31  ;;  %v9962_v55 = vor.u32 %v10827_v21, %v9959_v20  ;;  %v9941_v26 = vld [vmem:[%s16337_s6 + $0x180] sm:$0xf]  ;;  %v10825_v31 = vld [vmem:[%s16337_s6 + $0x18c] sm:$0xf0] }
 0x57a   :  { %v9942_v11 = vor.u32 %v10825_v31, %v9941_v26  ;;  %v10809_v21 = vld [vmem:[%s16337_s6 + $0x10c] sm:$0xf0]  ;;  %v9879_v26 = vld [vmem:[%s16337_s6 + $0x110] sm:$0xf0]  ;;  %v9997_v31 = vld [vmem:[%s16337_s6 + $0x1e8] sm:$0xf] }
 0x57b   :  { %v9878_v20 = vor.u32 %v10809_v21, %v9877_v48 }
 0x57c   :  { %6115 = vmatpush.bf16.msra.mxu0 %v9686_v59  ;;  %6133 = vmatmul.bf16.vlgmr.msra.gmra.mxu1 %v15767_v3  ;;  %v9946_v59 = vor.u32 %v10823_v47, %v9943_v35  ;;  %v10838_v35 = vld [vmem:[%s16337_s6 + $0x1f4] sm:$0xf0] }
 0x57d   :  { %6141 = vmatpush.bf16.msra.mxu2 %v9694_v44  ;;  %6159 = vmatmul.bf16.vlgmr.msra.gmra.mxu3 %v15767_v3  ;;  %v9925_v44 = vld [vmem:[%s16337_s6 + $0x160] sm:$0xf] }
 0x57e   :  { %6588 = vmatpush.bf16.msrb.mxu1 %v9990_v41  ;;  %6614 = vmatpush.bf16.msrb.mxu3 %v9994_v62  ;;  %v9926_v17 = vor.u32 %v10821_v46, %v9925_v44  ;;  %v9894_v41 = vor.u32 %v10813_v22, %v9893_v53  ;;  %v9895_v62 = vld [vmem:[%s16337_s6 + $0x130] sm:$0xf0]  ;;  %v9999_v44 = vld [vmem:[%s16337_s6 + $0x1f8] sm:$0xf0]  ;;  %v9998_v46 = vor.u32 %v10838_v35, %v9997_v31  ;;  %v9965_v53 = vld [vmem:[%s16337_s6 + $0x1a8] sm:$0xf] }
 0x57f   :  { %5852 = vmatmul.bf16.vlgmr.msrb.gmra.mxu0 %v15767_v3  ;;  %5878 = vmatmul.bf16.vlgmr.msrb.gmra.mxu2 %v15767_v3  ;;  %v10830_v22 = vld [vmem:[%s16337_s6 + $0x1b4] sm:$0xf0]  ;;  %v9951_v35 = vld [vmem:[%s16337_s6 + $0x198] sm:$0xf0] }
 0x580   :  { %6116 = vmatpush.bf16.msra.mxu0 %v9670_v25  ;;  %v9930_v25 = vor.u32 %v10819_v8, %v9927_v19  ;;  %v10793_v19 = vld [vmem:[%s16337_s6 + $0x8c] sm:$0xf0] }
 0x581   :  { %6142 = vmatpush.bf16.msra.mxu2 %v9678_v32  ;;  %v9861_v32 = vld [vmem:[%s16337_s6 + $0xe0] sm:$0xf] }
 0x582   :  { %6615 = vmatpush.bf16.msrb.mxu3 %v9978_v14  ;;  %v9862_v33 = vor.u32 %v10805_v52, %v9861_v32  ;;  %v9815_v52 = vld [vmem:[%s16337_s6 + $0x90] sm:$0xf0] }
 0x584   :  { %6117 = vmatpush.bf16.msra.mxu0 %v9654_v50  ;;  %v9863_v50 = vld [vmem:[%s16337_s6 + $0xf0] sm:$0xf0] }
 0x585   :  { %6143 = vmatpush.bf16.msra.mxu2 %v9662_v29  ;;  %v9909_v29 = vld [vmem:[%s16337_s6 + $0x140] sm:$0xf]  ;;  %v9866_v49 = vor.u32 %v10803_v36, %v9863_v50  ;;  %v10834_v50 = vld [vmem:[%s16337_s6 + $0x1d4] sm:$0xf0] }
 0x586   :  { %6616 = vmatpush.bf16.msrb.mxu3 %v9962_v55  ;;  %v9910_v5 = vor.u32 %v10817_v37, %v9909_v29  ;;  %v10807_v55 = vld [vmem:[%s16337_s6 + $0x104] sm:$0xf]  ;;  %v10832_v29 = vld [vmem:[%s16337_s6 + $0x1cc] sm:$0xf] }
 0x588   :  { %6118 = vmatpush.bf16.msra.mxu0 %v9638_v15  ;;  %v9911_v15 = vld [vmem:[%s16337_s6 + $0x150] sm:$0xf0] }
 0x589   :  { %6144 = vmatpush.bf16.msra.mxu2 %v9646_v51  ;;  %v9914_v10 = vor.u32 %v10815_v27, %v9911_v15 }
 0x58a   :  { %6617 = vmatpush.bf16.msrb.mxu3 %v9946_v59  ;;  %v10836_v59 = vld [vmem:[%s16337_s6 + $0x1ec] sm:$0xf] }
 0x58b   :  { %v10002_v8 = vor.u32 %v10836_v59, %v9999_v44 }
 0x58c   :  { %6119 = vmatpush.bf16.msra.mxu0 %v9622_v18  ;;  %v9846_v18 = vor.u32 %v10801_v16, %v9845_v61  ;;  %v10787_v61 = vld [vmem:[%s16337_s6 + $0x64] sm:$0xf] }
 0x58d   :  { %6145 = vmatpush.bf16.msra.mxu2 %v9630_v12  ;;  %v9847_v12 = vld [vmem:[%s16337_s6 + $0xd0] sm:$0xf0] }
 0x58e   :  { %6618 = vmatpush.bf16.msrb.mxu3 %v9930_v25  ;;  %v9850_v54 = vor.u32 %v10799_v58, %v9847_v12  ;;  %v10791_v25 = vld [vmem:[%s16337_s6 + $0x84] sm:$0xf] }
 0x58f   :  { %6120 = vmatmul.bf16.vlgmr.msra.gmra.mxu0 %v15767_v3  ;;  %v9818_v36 = vor.u32 %v10791_v25, %v9815_v52 }
 0x590   :  { %6146 = vmatmul.bf16.vlgmr.msra.gmra.mxu2 %v15767_v3  ;;  %v9973_v3 = vld [vmem:[%s16337_s6 + $0x1c0] sm:$0xf]  ;;  %6575 = vmatpush.bf16.msrb.mxu0 %v9862_v33  ;;  %v9981_v33 = vld [vmem:[%s16337_s6 + $0x1c8] sm:$0xf] }
 0x591   :  { %v9974_v7 = vor.u32 %v10833_v63, %v9973_v3  ;;  %6601 = vmatpush.bf16.msrb.mxu2 %v9866_v49  ;;  %v9898_v3 = vor.u32 %v10811_v13, %v9895_v62  ;;  %v9829_v63 = vld [vmem:[%s16337_s6 + $0xa0] sm:$0xf]  ;;  %v9982_v49 = vor.u32 %v10834_v50, %v9981_v33  ;;  %v9966_v62 = vor.u32 %v10830_v22, %v9965_v53  ;;  %v10822_v33 = vld [vmem:[%s16337_s6 + $0x174] sm:$0xf0]  ;;  %v10804_v22 = vld [vmem:[%s16337_s6 + $0xec] sm:$0xf] }
 0x592   :  { %6619 = vmatpush.bf16.msrb.mxu3 %v9914_v10  ;;  %v9830_v14 = vor.u32 %v10797_v39, %v9829_v63  ;;  %v10789_v10 = vld [vmem:[%s16337_s6 + $0x6c] sm:$0xf0]  ;;  %v9781_v39 = vld [vmem:[%s16337_s6 + $0x40] sm:$0xf]  ;;  %v10806_v53 = vld [vmem:[%s16337_s6 + $0xf4] sm:$0xf0] }
 0x593   :  { %6589 = vmatpush.bf16.msrb.mxu1 %v9974_v7  ;;  %v10795_v7 = vld [vmem:[%s16337_s6 + $0xa4] sm:$0xf] }
 0x594   :  { %6576 = vmatpush.bf16.msrb.mxu0 %v9846_v18  ;;  %v9799_v18 = vld [vmem:[%s16337_s6 + $0x70] sm:$0xf0] }
 0x595   :  { %6602 = vmatpush.bf16.msrb.mxu2 %v9850_v54  ;;  %v9802_v12 = vor.u32 %v10787_v61, %v9799_v18  ;;  %v10828_v54 = vld [vmem:[%s16337_s6 + $0x1ac] sm:$0xf]  ;;  %v9869_v18 = vld [vmem:[%s16337_s6 + $0xe8] sm:$0xf] }
 0x596   :  { %6620 = vmatpush.bf16.msrb.mxu3 %v9898_v3  ;;  %v9967_v3 = vld [vmem:[%s16337_s6 + $0x1b8] sm:$0xf0] }
 0x597   :  { %6590 = vmatpush.bf16.msrb.mxu1 %v9958_v56  ;;  %v9834_v56 = vor.u32 %v10795_v7, %v9831_v42  ;;  %v9970_v63 = vor.u32 %v10828_v54, %v9967_v3  ;;  %v10785_v7 = vld [vmem:[%s16337_s6 + $0x4c] sm:$0xf0]  ;;  %v9783_v42 = vld [vmem:[%s16337_s6 + $0x50] sm:$0xf0]  ;;  %v9871_v54 = vld [vmem:[%s16337_s6 + $0xf8] sm:$0xf0] }
 0x598   :  { %6577 = vmatpush.bf16.msrb.mxu0 %v9830_v14  ;;  %v9782_v14 = vor.u32 %v10785_v7, %v9781_v39  ;;  %v9917_v3 = vld [vmem:[%s16337_s6 + $0x148] sm:$0xf] }
 0x599   :  { %6603 = vmatpush.bf16.msrb.mxu2 %v9834_v56  ;;  %v9949_v56 = vld [vmem:[%s16337_s6 + $0x188] sm:$0xf] }
 0x59b   :  { %6591 = vmatpush.bf16.msrb.mxu1 %v9942_v11  ;;  %v9882_v11 = vor.u32 %v10807_v55, %v9879_v26  ;;  %v10824_v55 = vld [vmem:[%s16337_s6 + $0x18c] sm:$0xf] }
 0x59c   :  { %v9954_v44 = vor.u32 %v10824_v55, %v9951_v35  ;;  %v10814_v35 = vld [vmem:[%s16337_s6 + $0x134] sm:$0xf0] }
 0x59d   :  { %6621 = vmatpush.bf16.msrb.mxu3 %v9882_v11  ;;  %6604 = vmatpush.bf16.msrb.mxu2 %v9818_v36  ;;  %v9933_v36 = vld [vmem:[%s16337_s6 + $0x168] sm:$0xf] }
 0x59e   :  { %v9934_v50 = vor.u32 %v10822_v33, %v9933_v36  ;;  %v10796_v36 = vld [vmem:[%s16337_s6 + $0xac] sm:$0xf] }
 0x59f   :  { %6592 = vmatpush.bf16.msrb.mxu1 %v9926_v17  ;;  %v9813_v17 = vld [vmem:[%s16337_s6 + $0x80] sm:$0xf] }
 0x5a0   :  { %v9814_v32 = vor.u32 %v10793_v19, %v9813_v17  ;;  %v10779_v17 = vld [vmem:[%s16337_s6 + $0x24] sm:$0xf] }
 0x5a1   :  { %6666 = vmatpush.bf16.msra.mxu3 %v10002_v8  ;;  %6605 = vmatpush.bf16.msrb.mxu2 %v9802_v12  ;;  %v10781_v8 = vld [vmem:[%s16337_s6 + $0x2c] sm:$0xf0] }
 0x5a2   :  { %6578 = vmatpush.bf16.msrb.mxu0 %v9814_v32 }
 0x5a3   :  { %6593 = vmatpush.bf16.msrb.mxu1 %v9910_v5  ;;  %v9983_v5 = vld [vmem:[%s16337_s6 + $0x1d8] sm:$0xf0] }
 0x5a4   :  { %v9986_v15 = vor.u32 %v10832_v29, %v9983_v5  ;;  %v10820_v29 = vld [vmem:[%s16337_s6 + $0x16c] sm:$0xf] }
 0x5a6   :  { %6667 = vmatpush.bf16.msra.mxu3 %v9986_v15  ;;  %v10777_v15 = vld [vmem:[%s16337_s6 + $0xc] sm:$0xf0] }
 0x5a7   :  { %6594 = vmatpush.bf16.msrb.mxu1 %v9894_v41 }
 0x5aa   :  { %6668 = vmatpush.bf16.msra.mxu3 %v9970_v63  ;;  %v10818_v63 = vld [vmem:[%s16337_s6 + $0x154] sm:$0xf0] }
 0x5ab   :  { %6595 = vmatpush.bf16.msrb.mxu1 %v9878_v20  ;;  %v10826_v20 = vld [vmem:[%s16337_s6 + $0x194] sm:$0xf0]  ;;  %v9918_v7 = vor.u32 %v10818_v63, %v9917_v3 }
 0x5ac   :  { %v9950_v11 = vor.u32 %v10826_v20, %v9949_v56  ;;  %v10800_v56 = vld [vmem:[%s16337_s6 + $0xcc] sm:$0xf] }
 0x5ae   :  { %6669 = vmatpush.bf16.msra.mxu3 %v9954_v44 }
 0x5af   :  { %6640 = vmatpush.bf16.msra.mxu1 %v9998_v46  ;;  %v9765_v46 = vld [vmem:[%s16337_s6 + $0x20] sm:$0xf] }
 0x5b0   :  { %v9766_v25 = vor.u32 %v10781_v8, %v9765_v46  ;;  %v10812_v8 = vld [vmem:[%s16337_s6 + $0x12c] sm:$0xf] }
 0x5b3   :  { %6641 = vmatpush.bf16.msra.mxu1 %v9982_v49 }
 0x5b7   :  { %6642 = vmatpush.bf16.msra.mxu1 %v9966_v62  ;;  %v9874_v62 = vor.u32 %v10804_v22, %v9871_v54 }
 0x5bb   :  { %6643 = vmatpush.bf16.msra.mxu1 %v9950_v11  ;;  %v9901_v11 = vld [vmem:[%s16337_s6 + $0x128] sm:$0xf] }
 0x5bf   :  { %6644 = vmatpush.bf16.msra.mxu1 %v9934_v50 }
 0x5c3   :  { %6645 = vmatpush.bf16.msra.mxu1 %v9918_v7 }
 0x5d8   :  { %v15927_v57 = vpop.f32.mrf.mxu1 }
 0x5de   :  { %v15950_v45 = vpop.f32.mrf.mxu3 }
 0x5e0   :  { %v5816_v51 = vpop.f32.mrf.mxu1 }
 0x5e1   :  { %v9797_v51 = vld [vmem:[%s16337_s6 + $0x60] sm:$0xf] }
 0x5e2   :  { %v9798_v58 = vor.u32 %v10789_v10, %v9797_v51  ;;  %v10775_v51 = vld [vmem:[%s16337_s6 + $0x4] sm:$0xf] }
 0x5e4   :  { %6579 = vmatpush.bf16.msrb.mxu0 %v9798_v58  ;;  %v9751_v58 = vld [vmem:[%s16337_s6 + $0x10] sm:$0xf0] }
 0x5e5   :  { %v9754_v12 = vor.u32 %v10775_v51, %v9751_v58  ;;  %v10810_v51 = vld [vmem:[%s16337_s6 + $0x114] sm:$0xf0] }
 0x5e6   :  { %v5842_v0 = vpop.f32.mrf.mxu3 }
 0x5e8   :  { %v16018_v47 = vpop.f32.mrf.mxu1  ;;  %6580 = vmatpush.bf16.msrb.mxu0 %v9782_v14  ;;  %v9919_v14 = vld [vmem:[%s16337_s6 + $0x158] sm:$0xf0] }
 0x5ec   :  { %v5801_v37 = vpop.f32.mrf.mxu0  ;;  %6581 = vmatpush.bf16.msrb.mxu0 %v9766_v25 }
 0x5ed   :  { %v5802_v27 = vadd.f32 %v5801_v37, %v12397_v1  ;;  %v9935_v37 = vld [vmem:[%s16337_s6 + $0x178] sm:$0xf0] }
 0x5ee   :  { %v16063_v16 = vpop.f32.mrf.mxu3  ;;  %v9938_v5 = vor.u32 %v10820_v29, %v9935_v37  ;;  %v9885_v29 = vld [vmem:[%s16337_s6 + $0x108] sm:$0xf] }
 0x5ef   :  { %v5815_v41 = vadd.f32 %v15927_v57, %v5802_v27  ;;  %v10783_v57 = vld [vmem:[%s16337_s6 + $0x44] sm:$0xf]  ;;  %v9749_v27 = vld [vmem:[%s16337_s6] sm:$0xf]  ;;  %v9886_v58 = vor.u32 %v10810_v51, %v9885_v29 }
 0x5f0   :  { %v5868_v13 = vpop.f32.mrf.mxu1  ;;  %v9786_v21 = vor.u32 %v10783_v57, %v9783_v42  ;;  %v9750_v61 = vor.u32 %v10777_v15, %v9749_v27  ;;  %6670 = vmatpush.bf16.msra.mxu3 %v9938_v5 }
 0x5f1   :  { %v5896_v26 = vmul.f32 0.5, %v5815_v41  ;;  %v9870_v13 = vor.u32 %v10806_v53, %v9869_v18  ;;  %v9887_v18 = vld [vmem:[%s16337_s6 + $0x118] sm:$0xf0] }
 0x5f2   :  { %v5827_v0 = vpop.f32.mrf.mxu2  ;;  %6606 = vmatpush.bf16.msrb.mxu2 %v9786_v21  ;;  %6582 = vmatpush.bf16.msrb.mxu0 %v9750_v61  ;;  %v10802_v21 = vld [vmem:[%s16337_s6 + $0xd4] sm:$0xf0] }
 0x5f3   :  { %v5828_v48 = vadd.f32 %v5827_v0, %v12412_v24  ;;  %10978 = vtanh.f32 %v5896_v26  ;;  %v10816_v0 = vld [vmem:[%s16337_s6 + $0x14c] sm:$0xf] }
 0x5f4   :  { %v5803_v31 = vpop.f32.mrf.mxu0  ;;  %v9922_v42 = vor.u32 %v10816_v0, %v9919_v14 }
 0x5f5   :  { %v5841_v59 = vadd.f32 %v15950_v45, %v5828_v48  ;;  %v9767_v45 = vld [vmem:[%s16337_s6 + $0x30] sm:$0xf0]  ;;  %v9853_v48 = vld [vmem:[%s16337_s6 + $0xc8] sm:$0xf]  ;;  %v9855_v31 = vld [vmem:[%s16337_s6 + $0xd8] sm:$0xf0] }
 0x5f6   :  { %v5894_v19 = vpop.f32.mrf.mxu3  ;;  %v9770_v52 = vor.u32 %v10779_v17, %v9767_v45  ;;  %6627 = vmatpush.bf16.msra.mxu0 %v9870_v13  ;;  %v9854_v26 = vor.u32 %v10802_v21, %v9853_v48  ;;  %6671 = vmatpush.bf16.msra.mxu3 %v9922_v42  ;;  %v9858_v46 = vor.u32 %v10800_v56, %v9855_v31  ;;  %v9903_v17 = vld [vmem:[%s16337_s6 + $0x138] sm:$0xf0]  ;;  %v10792_v13 = vld [vmem:[%s16337_s6 + $0x8c] sm:$0xf]  ;;  %v9805_v48 = vld [vmem:[%s16337_s6 + $0x68] sm:$0xf] }
 0x5f7   :  { %v5900_v32 = vmul.f32 0.5, %v5841_v59  ;;  %v325_v19 = vadd.f32 %v11996_v30, %v11661_v40  ;;  %v9906_v45 = vor.u32 %v10812_v8, %v9903_v17  ;;  %v9839_v30 = vld [vmem:[%s16337_s6 + $0xb8] sm:$0xf0]  ;;  %v10790_v21 = vld [vmem:[%s16337_s6 + $0x74] sm:$0xf0]  ;;  %v296_v56 = vadd.f32 %v11985_v23, %v11651_v34 }
 0x5f8   :  { %6607 = vmatpush.bf16.msrb.mxu2 %v9770_v52  ;;  %v10798_v52 = vld [vmem:[%s16337_s6 + $0xb4] sm:$0xf0]  ;;  %v9842_v15 = vor.u32 %v10796_v36, %v9839_v30  ;;  %v10784_v34 = vld [vmem:[%s16337_s6 + $0x4c] sm:$0xf]  ;;  %v9791_v23 = vld [vmem:[%s16337_s6 + $0x58] sm:$0xf0]  ;;  %v354_v30 = vadd.f32 %v12033_v2, %v11695_v60 }
 0x5f9   :  { %10980 = vtanh.f32 %v5900_v32  ;;  %v16131_v49 = vpop.f32.mrf.mxu1  ;;  %v10979_v57 = vpop.eup %10978  ;;  %v9837_v32 = vld [vmem:[%s16337_s6 + $0xa8] sm:$0xf]  ;;  %v10782_v17 = vld [vmem:[%s16337_s6 + $0x34] sm:$0xf0]  ;;  %v9759_v60 = vld [vmem:[%s16337_s6 + $0x18] sm:$0xf0] }
 0x5fa   :  { %v5829_v10 = vpop.f32.mrf.mxu2  ;;  %v5898_v33 = vmul.f32 0.5, %v10979_v57  ;;  %6628 = vmatpush.bf16.msra.mxu0 %v9854_v26  ;;  %v9838_v40 = vor.u32 %v10798_v52, %v9837_v32  ;;  %v6165_v5 = vadd.f32 %v16131_v49, %v325_v19  ;;  %6672 = vmatpush.bf16.msra.mxu3 %v9906_v45  ;;  %v9821_v49 = vld [vmem:[%s16337_s6 + $0x88] sm:$0xf]  ;;  %v10780_v32 = vld [vmem:[%s16337_s6 + $0x2c] sm:$0xf] }
 0x5fb   :  { %v10808_v10 = vld [vmem:[%s16337_s6 + $0x10c] sm:$0xf]  ;;  %v9773_v8 = vld [vmem:[%s16337_s6 + $0x28] sm:$0xf]  ;;  %v9775_v52 = vld [vmem:[%s16337_s6 + $0x38] sm:$0xf0] }
 0x5fc   :  { %v5853_v41 = vpop.f32.mrf.mxu0  ;;  %6608 = vmatpush.bf16.msrb.mxu2 %v9754_v12  ;;  %v10794_v12 = vld [vmem:[%s16337_s6 + $0x94] sm:$0xf0]  ;;  %v9890_v22 = vor.u32 %v10808_v10, %v9887_v18  ;;  %v5899_v54 = vadd.f32 0.5, %v5898_v33  ;;  %v6172_v63 = vmul.f32 0.5, %v6165_v5 }
 0x5fd   :  { %v5854_v39 = vadd.f32 %v5853_v41, %v12510_v38  ;;  %v9822_v41 = vor.u32 %v10794_v12, %v9821_v49 }
 0x5fe   :  { %6629 = vmatpush.bf16.msra.mxu0 %v9838_v40  ;;  %6673 = vmatpush.bf16.msra.mxu3 %v9890_v22 }
 0x5ff   :  { %v10981_v20 = vpop.eup %10980  ;;  %v5867_v55 = vadd.f32 %v16018_v47, %v5854_v39  ;;  %v9902_v47 = vor.u32 %v10814_v35, %v9901_v11  ;;  %v9789_v11 = vld [vmem:[%s16337_s6 + $0x48] sm:$0xf]  ;;  %v10786_v35 = vld [vmem:[%s16337_s6 + $0x54] sm:$0xf0] }
 0x600   :  { %6653 = vmatpush.bf16.msra.mxu2 %v9874_v62  ;;  %v5902_v59 = vmul.f32 0.5, %v10981_v20  ;;  %v16189_v44 = vpop.f32.mrf.mxu3  ;;  %v9823_v62 = vld [vmem:[%s16337_s6 + $0x98] sm:$0xf0]  ;;  %v9806_v20 = vor.u32 %v10790_v21, %v9805_v48  ;;  %v10845_v21 = vld [vmem:[%s16342_s8 + $0x30] sm:$0xff] }
 0x601   :  { %10982 = vtanh.f32 %v5867_v55  ;;  %v6136_v25 = vpop.f32.mrf.mxu1  ;;  %6646 = vmatpush.bf16.msra.mxu1 %v9902_v47  ;;  %v9826_v7 = vor.u32 %v10792_v13, %v9823_v62  ;;  %v9807_v55 = vld [vmem:[%s16337_s6 + $0x78] sm:$0xf0]  ;;  %v9794_v47 = vor.u32 %v10784_v34, %v9791_v23 }
 0x602   :  { %v5879_v50 = vpop.f32.mrf.mxu2  ;;  %v5903_v37 = vadd.f32 0.5, %v5902_v59  ;;  %6630 = vmatpush.bf16.msra.mxu0 %v9822_v41  ;;  %v383_v25 = vadd.f32 %v12040_v9, %v11715_v6  ;;  %v9774_v6 = vor.u32 %v10782_v17, %v9773_v8  ;;  %v9778_v9 = vor.u32 %v10780_v32, %v9775_v52  ;;  %v10846_v48 = vld [vmem:[%s16342_s8 + $0x38] sm:$0xff] }
 0x603   :  { %v5880_v27 = vadd.f32 %v5879_v50, %v12539_v28 }
 0x604   :  { %6654 = vmatpush.bf16.msra.mxu2 %v9858_v46  ;;  %v5855_v61 = vpop.f32.mrf.mxu0  ;;  %v9790_v46 = vor.u32 %v10786_v35, %v9789_v11  ;;  %v6167_v50 = vadd.f32 %v16189_v44, %v383_v25  ;;  %v10776_v44 = vld [vmem:[%s16337_s6 + $0xc] sm:$0xf]  ;;  %v10841_v35 = vld [vmem:[%s16342_s8 + $0x10] sm:$0xff]  ;;  %v10839_v25 = vld [vmem:[%s16342_s8] sm:$0xff] }
 0x605   :  { %v5893_v53 = vadd.f32 %v16063_v16, %v5880_v27  ;;  %6647 = vmatpush.bf16.msra.mxu1 %v9886_v58  ;;  %v5909_v16 = vmul.f32 %v5903_v37, %v15664_v43  ;;  %v10788_v43 = vld [vmem:[%s16337_s6 + $0x6c] sm:$0xf]  ;;  %v9757_v37 = vld [vmem:[%s16337_s6 + $0x8] sm:$0xf]  ;;  %v10778_v27 = vld [vmem:[%s16337_s6 + $0x14] sm:$0xf0]  ;;  %v9762_v49 = vor.u32 %v10776_v44, %v9759_v60 }
 0x606   :  { %v9810_v31 = vor.u32 %v10788_v43, %v9807_v55  ;;  %6631 = vmatpush.bf16.msra.mxu0 %v9806_v20  ;;  %v6177_v61 = vmul.f32 0.5, %v6167_v50  ;;  %v9758_v18 = vor.u32 %v10778_v27, %v9757_v37  ;;  %v10843_v55 = vld [vmem:[%s16342_s8 + $0x20] sm:$0xff] }
 0x607   :  { %v10983_v3 = vpop.eup %10982  ;;  %v5905_v39 = vmul.f32 0.5, %v5893_v53 }
 0x608   :  { %6655 = vmatpush.bf16.msra.mxu2 %v9842_v15  ;;  %v5910_v0 = vmul.f32 %v10983_v3, %v5899_v54  ;;  %v6162_v14 = vpop.f32.mrf.mxu3 }
 0x609   :  { %10984 = vtanh.f32 %v5905_v39 }
 0x60a   :  { %v16239_v57 = vadd.f32 %v5910_v0, %v5909_v16  ;;  %v5881_v42 = vpop.f32.mrf.mxu2  ;;  %10986 = vtanh.f32 %v6172_v63  ;;  %6632 = vmatpush.bf16.msra.mxu0 %v9790_v46  ;;  %v10840_v46 = vld [vmem:[%s16342_s8 + $0x8] sm:$0xff] }
 0x60c   :  { %6656 = vmatpush.bf16.msra.mxu2 %v9826_v7  ;;  %10988 = vtanh.f32 %v16239_v57  ;;  %v6121_v26 = vpop.f32.mrf.mxu0 }
 0x60d   :  { %v6164_v59 = vadd.f32 %v6121_v26, %v296_v56  ;;  %v10844_v56 = vld [vmem:[%s16342_s8 + $0x28] sm:$0xff] }
 0x60e   :  { %6633 = vmatpush.bf16.msra.mxu0 %v9774_v6 }
 0x60f   :  { %v10985_v19 = vpop.eup %10984  ;;  %v6168_v45 = vmul.f32 0.5, %v6164_v59 }
 0x610   :  { %6657 = vmatpush.bf16.msra.mxu2 %v9810_v31  ;;  %v5907_v36 = vmul.f32 0.5, %v10985_v19  ;;  %v10987_v33 = vpop.eup %10986  ;;  %v10842_v31 = vld [vmem:[%s16342_s8 + $0x18] sm:$0xff] }
 0x611   :  { %10990 = vtanh.f32 %v6168_v45  ;;  %v6174_v10 = vmul.f32 0.5, %v10987_v33 }
 0x612   :  { %v10989_v40 = vpop.eup %10988  ;;  %v5908_v29 = vadd.f32 0.5, %v5907_v36  ;;  %6634 = vmatpush.bf16.msra.mxu0 %v9758_v18 }
 0x613   :  { %v6147_v5 = vpop.f32.mrf.mxu2  ;;  %v6175_v22 = vadd.f32 0.5, %v6174_v10 }
 0x614   :  { %6658 = vmatpush.bf16.msra.mxu2 %v9794_v47  ;;  %v5913_v2 = vmul.f32 %v10989_v40, %v5908_v29  ;;  %v6166_v15 = vadd.f32 %v6147_v5, %v354_v30  ;;  %v6123_v51 = vpop.f32.mrf.mxu0 }
 0x615   :  { %v6181_v62 = vmul.f32 %v6175_v22, %v15722_v4 }
 0x616   :  { %v6190_v58 = vpack.c.bf16 %v5913_v2, %v5913_v2  ;;  %10992 = vtanh.f32 %v6166_v15 }
 0x617   :  { %v10991_v12 = vpop.eup %10990  ;;  %10994 = vtanh.f32 %v6177_v61 }
 0x618   :  { %6659 = vmatpush.bf16.msra.mxu2 %v9778_v9  ;;  %v6170_v53 = vmul.f32 0.5, %v10991_v12  ;;  %6596 = vmatmul.bf16.vlgmr.msrb.gmra.mxu1 %v6190_v58 }
 0x619   :  { %6622 = vmatmul.bf16.vlgmr.msrb.gmra.mxu3 %v6190_v58 }
 0x61a   :  { %v6171_v54 = vadd.f32 0.5, %v6170_v53 }
 0x61b   :  { %v6149_v41 = vpop.f32.mrf.mxu2 }
 0x61c   :  { %6660 = vmatpush.bf16.msra.mxu2 %v9762_v49  ;;  %v10993_v13 = vpop.eup %10992 }
 0x61d   :  { %v6182_v3 = vmul.f32 %v10993_v13, %v6171_v54  ;;  %v10995_v63 = vpop.eup %10994 }
 0x61e   :  { %v6179_v7 = vmul.f32 0.5, %v10995_v63 }
 0x61f   :  { %v6183_v39 = vadd.f32 %v6182_v3, %v6181_v62 }
 0x620   :  { %v6180_v16 = vadd.f32 0.5, %v6179_v7 }
 0x621   :  { %10996 = vtanh.f32 %v6183_v39 }
 0x627   :  { %v10997_v0 = vpop.eup %10996 }
 0x628   :  { %6648 = vmatmul.bf16.vlgmr.msra.gmra.mxu1 %v6190_v58  ;;  %v6185_v14 = vmul.f32 %v10997_v0, %v6180_v16 }
 0x629   :  { %6674 = vmatmul.bf16.vlgmr.msra.gmra.mxu3 %v6190_v58 }
 0x62a   :  { %v6189_v42 = vpack.c.bf16 %v6185_v14, %v6185_v14 }
 0x62c   :  { %6583 = vmatmul.bf16.vlgmr.msrb.gmra.mxu0 %v6189_v42  ;;  %6609 = vmatmul.bf16.vlgmr.msrb.gmra.mxu2 %v6189_v42 }
 0x62d   :  { %6767 = vmatpush.bf16.msrb.mxu0 %v10846_v48 }
 0x631   :  { %6768 = vmatpush.bf16.msrb.mxu0 %v10845_v21 }
 0x635   :  { %6769 = vmatpush.bf16.msrb.mxu0 %v10844_v56 }
 0x639   :  { %6770 = vmatpush.bf16.msrb.mxu0 %v10843_v55 }
 0x63c   :  { %6635 = vmatmul.bf16.vlgmr.msra.gmra.mxu0 %v6189_v42  ;;  %6661 = vmatmul.bf16.vlgmr.msra.gmra.mxu2 %v6189_v42 }
 0x63d   :  { %6771 = vmatpush.bf16.msrb.mxu0 %v10842_v31 }
 0x641   :  { %6772 = vmatpush.bf16.msrb.mxu0 %v10841_v35 }
 0x645   :  { %6773 = vmatpush.bf16.msrb.mxu0 %v10840_v46 }
 0x649   :  { %6774 = vmatpush.bf16.msrb.mxu0 %v10839_v25 }
 0x695   :  { %v6597_v4 = vpop.f32.mrf.mxu1 }
 0x69c   :  { %v6623_v43 = vpop.f32.mrf.mxu3 }
 0x69d   :  { %v6599_v20 = vpop.f32.mrf.mxu1 }
 0x6a4   :  { %v6625_v26 = vpop.f32.mrf.mxu3 }
 0x6a5   :  { %v6649_v11 = vpop.f32.mrf.mxu1 }
 0x6a9   :  { %v6584_v59 = vpop.f32.mrf.mxu0 }
 0x6aa   :  { %v6585_v34 = vadd.f32 %v6584_v59, %v12397_v1 }
 0x6ac   :  { %v6675_v23 = vpop.f32.mrf.mxu3  ;;  %v6598_v47 = vadd.f32 %v6597_v4, %v6585_v34 }
 0x6ad   :  { %v6651_v8 = vpop.f32.mrf.mxu1 }
 0x6ae   :  { %v6679_v45 = vmul.f32 0.5, %v6598_v47 }
 0x6af   :  { %v6610_v17 = vpop.f32.mrf.mxu2 }
 0x6b0   :  { %v6611_v19 = vadd.f32 %v6610_v17, %v12412_v24  ;;  %10998 = vtanh.f32 %v6679_v45 }
 0x6b1   :  { %v6586_v32 = vpop.f32.mrf.mxu0 }
 0x6b2   :  { %v6624_v52 = vadd.f32 %v6623_v43, %v6611_v19 }
 0x6b4   :  { %v6677_v1 = vpop.f32.mrf.mxu3  ;;  %v6683_v36 = vmul.f32 0.5, %v6624_v52 }
 0x6b6   :  { %11000 = vtanh.f32 %v6683_v36  ;;  %v10999_v30 = vpop.eup %10998 }
 0x6b7   :  { %v6612_v33 = vpop.f32.mrf.mxu2  ;;  %v6681_v9 = vmul.f32 0.5, %v10999_v30 }
 0x6b9   :  { %v6636_v50 = vpop.f32.mrf.mxu0  ;;  %v6682_v2 = vadd.f32 0.5, %v6681_v9 }
 0x6ba   :  { %v6637_v40 = vadd.f32 %v6636_v50, %v12510_v38 }
 0x6bc   :  { %v11001_v29 = vpop.eup %11000  ;;  %v6650_v6 = vadd.f32 %v6649_v11, %v6637_v40 }
 0x6bd   :  { %v6685_v24 = vmul.f32 0.5, %v11001_v29 }
 0x6be   :  { %11002 = vtanh.f32 %v6650_v6 }
 0x6bf   :  { %v6662_v37 = vpop.f32.mrf.mxu2  ;;  %v6686_v27 = vadd.f32 0.5, %v6685_v24 }
 0x6c0   :  { %v6663_v5 = vadd.f32 %v6662_v37, %v12539_v28  ;;  %v10847_v28 = vld [vmem:[%s16341_s9] ss:$0 sm:$0xff] }
 0x6c1   :  { %v6638_v44 = vpop.f32.mrf.mxu0  ;;  %v6692_v10 = vmul.f32 %v6686_v27, %v16239_v57 }
 0x6c2   :  { %v6676_v60 = vadd.f32 %v6675_v23, %v6663_v5 }
 0x6c4   :  { %v11003_v15 = vpop.eup %11002  ;;  %v6688_v51 = vmul.f32 0.5, %v6676_v60 }
 0x6c5   :  { %v6693_v61 = vmul.f32 %v11003_v15, %v6682_v2 }
 0x6c6   :  { %11004 = vtanh.f32 %v6688_v51 }
 0x6c7   :  { %v6694_v38 = vadd.f32 %v6693_v61, %v6692_v10  ;;  %v6664_v58 = vpop.f32.mrf.mxu2 }
 0x6c9   :  { %11006 = vtanh.f32 %v6694_v38 }
 0x6cc   :  { %v11005_v18 = vpop.eup %11004 }
 0x6cd   :  { %v6690_v49 = vmul.f32 0.5, %v11005_v18 }
 0x6cf   :  { %v11007_v12 = vpop.eup %11006  ;;  %v6691_v53 = vadd.f32 0.5, %v6690_v49 }
 0x6d1   :  { %v6696_v22 = vmul.f32 %v11007_v12, %v6691_v53 }
 0x6d3   :  { %v6698_v54 = vpack.c.bf16 %v6696_v22, %v6696_v22 }
 0x6d5   :  { %6775 = vmatmul.bf16.vlgmr.msrb.gmra.mxu0 %v6698_v54 }
 0x752   :  { %v6776_v41 = vpop.f32.mrf.mxu0 }
 0x753   :  { %v6777_v13 = vadd.f32 %v10847_v28, %v6776_v41 }
 0x755   :  { %6780 = vst [vmem:[%s16343_s10] sm:$0xff] %v6777_v13 }
 0x75a   :  { %v6778_v57 = vpop.f32.mrf.mxu0 }

</bundles_post_ra>
